<compile_context>
chip_gen: v5e
topology: v5e:2x2
jax: 0.10.0
libtpu: 0.0.40
codegen_flags: <defaults>
</compile_context>

<pallas_src>
import functools

import jax
import jax.numpy as jnp
from jax import lax
from jax.experimental import pallas as pl
from jax.experimental.pallas import tpu as pltpu

# ---------------------------------------------------------------------------
# Model geometry (a 28x28 input is implied by the 64*24*24 flatten in MyModel).
# ---------------------------------------------------------------------------
H_IN = W_IN = 28
C1_OUT, C2_OUT = 32, 64
H1, W1 = H_IN - 2, W_IN - 2          # 26, 26  true conv1 output
H2, W2 = H1 - 2, W1 - 2              # 24, 24  true conv2 output
HID = 128

# Flat-raster conv trick: both convs run on a row-major raster of width 28.
# Columns >= 26 (conv1) / >= 24 (conv2) of each raster row are junk; conv2
# never reads conv1's junk columns for its *valid* outputs, and fc1's weight
# has zero rows at conv2's junk columns, so nothing is ever sliced off.
W_RASTER = W_IN
LEN1 = 768                            # conv1 raster length (>= 26*28=728, 128-aligned)
LEN2 = H2 * W_RASTER                  # 672 = 24*28, conv2 raster length
X_FLAT_LEN = 2 * W_RASTER + 2 + LEN1  # 826: zero-padded flat input length
K_FC1 = C2_OUT * LEN2                 # 43008: fc1 fan-in incl. junk columns

assert X_FLAT_LEN >= 2 * W_RASTER + 2 + LEN1    # conv1 reads stay in-bounds
assert LEN1 >= 2 * W_RASTER + 2 + LEN2          # conv2 reads stay in-bounds
assert LEN1 >= H1 * W_RASTER                    # scratch holds all valid rows


# ---------------------------------------------------------------------------
# Fused conv kernel: Conv3x3+ReLU -> Conv3x3+ReLU, one batch element per step.
# ---------------------------------------------------------------------------
def _fused_conv_kernel(x_ref, w1_ref, b1_ref, w2_ref, b2_ref, o_ref,
                       h_ref, p1_ref, p2_ref):
    """x_ref : (1, C1p, X_FLAT_LEN) f32   zero-padded flat 28x28 input
       w1_ref: (32, 9*C1p)          f32   tap-stacked conv1 weight
       b1_ref: (32, 1)              f32
       w2_ref: (64, 9*32)           f32   tap-stacked conv2 weight
       b2_ref: (64, 1)              f32
       o_ref : (1, 64, LEN2)        bf16  conv2 raster (cols 24..27/row = junk)
       h_ref : (32, LEN1)       f32 scratch: conv1 activation (stays in VMEM)
       p1/p2 : f32 scratch: tap-stacked patch matrices for the two MXU dots"""
    c1p = x_ref.shape[1]
    c2p = h_ref.shape[0]
    offs = [di * W_RASTER + dj for di in range(3) for dj in range(3)]

    # conv1: stage the 9 shifted input views into one (9*C1p, LEN1) matrix,
    # contract with a single MXU dot, write the activation scratch once.
    for t, off in enumerate(offs):
        p1_ref[t * c1p:(t + 1) * c1p, :] = x_ref[0, :, off:off + LEN1]
    h = jnp.dot(w1_ref[...], p1_ref[...], preferred_element_type=jnp.float32)
    h_ref[...] = jnp.maximum(h + b1_ref[...], 0.0)

    # conv2: same trick, reading conv1's activation straight from VMEM; the
    # output ref is written exactly once (bias + ReLU + bf16 cast fused).
    for t, off in enumerate(offs):
        p2_ref[t * c2p:(t + 1) * c2p, :] = h_ref[:, off:off + LEN2]
    y = jnp.dot(w2_ref[...], p2_ref[...], preferred_element_type=jnp.float32)
    o_ref[0] = jnp.maximum(y + b2_ref[...], 0.0).astype(o_ref.dtype)


def fused_convs(x_nchw, w1s, b1, w2s, b2):
    """(B, C, 28, 28) f32 -> (B, 64, 672) bf16 conv2 raster output."""
    B, C, H, W = x_nchw.shape
    assert (H, W) == (H_IN, W_IN)
    c1p = w1s.shape[1] // 9
    assert C <= c1p
    x_flat = x_nchw.reshape(B, C, H * W)
    x_flat = jnp.pad(x_flat, ((0, 0), (0, c1p - C), (0, X_FLAT_LEN - H * W)))

    return pl.pallas_call(
        _fused_conv_kernel,
        out_shape=jax.ShapeDtypeStruct((B, C2_OUT, LEN2), jnp.bfloat16),
        grid_spec=pltpu.PrefetchScalarGridSpec(
            num_scalar_prefetch=0,
            grid=(B,),
            in_specs=[
                pl.BlockSpec((1, c1p, X_FLAT_LEN), lambda b: (b, 0, 0)),
                pl.BlockSpec((C1_OUT, 9 * c1p), lambda b: (0, 0)),
                pl.BlockSpec((C1_OUT, 1), lambda b: (0, 0)),
                pl.BlockSpec((C2_OUT, 9 * C1_OUT), lambda b: (0, 0)),
                pl.BlockSpec((C2_OUT, 1), lambda b: (0, 0)),
            ],
            out_specs=pl.BlockSpec((1, C2_OUT, LEN2), lambda b: (b, 0, 0)),
            scratch_shapes=[
                pltpu.VMEM((C1_OUT, LEN1), jnp.float32),
                pltpu.VMEM((9 * c1p, LEN1), jnp.float32),
                pltpu.VMEM((9 * C1_OUT, LEN2), jnp.float32),
            ],
        ),
        # v7x: the two TensorCores split the batch.
        # TODO(synk): when B == 1, add a second parallel axis over conv2
        # output-channel groups so the second TensorCore is not idle on v7x.
        compiler_params=pltpu.CompilerParams(
            dimension_semantics=("parallel",)),
    )(x_flat, w1s, b1, w2s, b2)


# ---------------------------------------------------------------------------
# Fused MLP kernel: Linear(43008->128, int8 weight) + ReLU + Linear(128->out).
# ---------------------------------------------------------------------------
def _fused_mlp_kernel(x_ref, w1q_ref, s1_ref, b1_ref, w2_ref, b2_ref, o_ref,
                      h_ref, *, n_sub):
    k = pl.program_id(0)

    @pl.when(k == 0)
    def _():
        h_ref[...] = jnp.zeros_like(h_ref)

    # Partial fc1 reduction: dequantize the int8 weight tile chunk-by-chunk to
    # bf16 (VPU work overlapped with the MXU / hidden under the weight DMA)
    # and accumulate in f32.  The per-column scale commutes with the K sum and
    # is applied once in the epilogue.
    tk = w1q_ref.shape[0]
    ck = tk // n_sub
    for c in range(n_sub):
        lo, hi = c * ck, (c + 1) * ck
        w_c = w1q_ref[lo:hi, :].astype(jnp.float32).astype(jnp.bfloat16)
        h_ref[...] += jnp.dot(x_ref[:, lo:hi], w_c,
                              preferred_element_type=jnp.float32)

    @pl.when(k == pl.num_programs(0) - 1)
    def _():
        h = jnp.maximum(h_ref[...] * s1_ref[...] + b1_ref[...], 0.0)
        y = jnp.dot(h, w2_ref[...], preferred_element_type=jnp.float32)
        o_ref[...] = (y + b2_ref[...]).astype(o_ref.dtype)


def fused_mlp(x, w1q, s1, b1, w2, b2, *, nk=4, n_sub=2):
    """y = relu(x @ (int8_w1 * col_scale) + b1) @ w2 + b2 in one pallas_call."""
    B, K = x.shape
    K2, H = w1q.shape
    _, N = w2.shape
    assert K == K2 and K % (nk * n_sub) == 0
    tk = K // nk

    return pl.pallas_call(
        functools.partial(_fused_mlp_kernel, n_sub=n_sub),
        out_shape=jax.ShapeDtypeStruct((B, N), jnp.float32),
        grid_spec=pltpu.PrefetchScalarGridSpec(
            num_scalar_prefetch=0,
            grid=(nk,),
            in_specs=[
                pl.BlockSpec((B, tk), lambda k: (0, k)),
                pl.BlockSpec((tk, H), lambda k: (k, 0)),
                pl.BlockSpec((1, H), lambda k: (0, 0)),
                pl.BlockSpec((1, H), lambda k: (0, 0)),
                pl.BlockSpec((H, N), lambda k: (0, 0)),
                pl.BlockSpec((1, N), lambda k: (0, 0)),
            ],
            out_specs=pl.BlockSpec((B, N), lambda k: (0, 0)),
            scratch_shapes=[pltpu.VMEM((B, H), jnp.float32)],
        ),
        compiler_params=pltpu.CompilerParams(
            dimension_semantics=("arbitrary",),
            vmem_limit_bytes=32 * 1024 * 1024),
    )(x, w1q, s1, b1, w2, b2)


# ---------------------------------------------------------------------------
# Parameters: torch-layout fp32 init + one-time kernel-friendly re-layout.
# ---------------------------------------------------------------------------
def init_torch_params(key, inp_ch, out_dim):
    ks = jax.random.split(key, 8)
    s = 0.02
    return {
        "conv1_w": s * jax.random.normal(ks[0], (C1_OUT, inp_ch, 3, 3), jnp.float32),
        "conv1_b": s * jax.random.normal(ks[1], (C1_OUT,), jnp.float32),
        "conv2_w": s * jax.random.normal(ks[2], (C2_OUT, C1_OUT, 3, 3), jnp.float32),
        "conv2_b": s * jax.random.normal(ks[3], (C2_OUT,), jnp.float32),
        "fc1_w": s * jax.random.normal(ks[4], (HID, C2_OUT * H2 * W2), jnp.float32),
        "fc1_b": s * jax.random.normal(ks[5], (HID,), jnp.float32),
        "fc2_w": s * jax.random.normal(ks[6], (out_dim, HID), jnp.float32),
        "fc2_b": s * jax.random.normal(ks[7], (out_dim,), jnp.float32),
    }


def prepare_params(p):
    """One-time mathematically-equivalent re-layout + fc1 int8 quantization."""
    def stack_conv_w(w_oihw):
        O, C, kh, kw = w_oihw.shape
        cp = ((max(C, 8) + 7) // 8) * 8
        w = jnp.pad(w_oihw, ((0, 0), (0, cp - C), (0, 0), (0, 0)))
        # K index = (3*di + dj)*Cp + c, matching the kernel's patch stacking.
        return w.transpose(0, 2, 3, 1).reshape(O, kh * kw * cp)

    # fc1: torch (HID, 64*24*24) -> (64,24,24,HID) -> insert zero rows at the
    # junk raster columns 24..27 -> (43008, HID); int8 per-output-column quant.
    w1t = p["fc1_w"].T.reshape(C2_OUT, H2, W2, HID)
    w1t = jnp.pad(w1t, ((0, 0), (0, 0), (0, W_RASTER - W2), (0, 0)))
    w1t = w1t.reshape(K_FC1, HID)
    s1 = jnp.max(jnp.abs(w1t), axis=0, keepdims=True) / 127.0       # (1, HID)
    s1 = jnp.where(s1 == 0, 1.0, s1).astype(jnp.float32)
    w1q = jnp.round(w1t / s1).astype(jnp.int8)

    return {
        "conv1_w": stack_conv_w(p["conv1_w"]),
        "conv1_b": p["conv1_b"].reshape(-1, 1),
        "conv2_w": stack_conv_w(p["conv2_w"]),
        "conv2_b": p["conv2_b"].reshape(-1, 1),
        "fc1_wq": w1q,                        # (43008, 128) int8
        "fc1_s": s1,                          # (1, 128) f32 per-column scales
        "fc1_b": p["fc1_b"].reshape(1, -1),
        "fc2_w": p["fc2_w"].T,                # (128, out) f32
        "fc2_b": p["fc2_b"].reshape(1, -1),
    }


# ---------------------------------------------------------------------------
# Forward pass (matches MyModel.forward: NCHW in -> (B, out) logits).
# ---------------------------------------------------------------------------
@jax.jit
def my_model_forward(params, x_nchw):
    a = fused_convs(x_nchw, params["conv1_w"], params["conv1_b"],
                    params["conv2_w"], params["conv2_b"])     # (B, 64, 672) bf16
    a = a.reshape(a.shape[0], -1)                             # free reshape
    return fused_mlp(a, params["fc1_wq"], params["fc1_s"], params["fc1_b"],
                     params["fc2_w"], params["fc2_b"])        # (B, out) f32


# ---------------------------------------------------------------------------
# Pure-JAX reference mirroring the kernel's exact quantization (bf16 conv
# activations into fc1, int8+scale fc1 weight) so the self-test can be tight.
# ---------------------------------------------------------------------------
@jax.jit
def reference_forward(torch_p, prep_p, x_nchw):
    dn = ("NCHW", "OIHW", "NCHW")
    hp = lax.Precision.HIGHEST
    a = lax.conv_general_dilated(x_nchw, torch_p["conv1_w"], (1, 1), "VALID",
                                 dimension_numbers=dn, precision=hp)
    a = jnp.maximum(a + torch_p["conv1_b"][None, :, None, None], 0.0)
    a = lax.conv_general_dilated(a, torch_p["conv2_w"], (1, 1), "VALID",
                                 dimension_numbers=dn, precision=hp)
    a = jnp.maximum(a + torch_p["conv2_b"][None, :, None, None], 0.0)
    a = a.reshape(a.shape[0], -1)                   # torch-order flatten
    a = a.astype(jnp.bfloat16).astype(jnp.float32)  # kernel stores conv out in bf16
    w1 = prep_p["fc1_wq"].astype(jnp.float32) * prep_p["fc1_s"]
    w1 = w1.reshape(C2_OUT, H2, W_RASTER, HID)[:, :, :W2, :].reshape(-1, HID)
    h = jnp.maximum(jnp.dot(a, w1, precision=hp) + torch_p["fc1_b"], 0.0)
    return jnp.dot(h, prep_p["fc2_w"], precision=hp) + torch_p["fc2_b"]


if __name__ == "__main__":
    INP_CH, OUT_DIM, BATCH = 1, 10, 2   # 28x28 input implied by 64*24*24 flatten
    key = jax.random.PRNGKey(0)
    k_param, k_data = jax.random.split(key)
    torch_params = init_torch_params(k_param, INP_CH, OUT_DIM)
    params = prepare_params(torch_params)
    x = jax.random.normal(k_data, (BATCH, INP_CH, H_IN, W_IN), jnp.float32)

    out = my_model_forward(params, x)
    jax.block_until_ready(out)
    assert out.shape == (BATCH, OUT_DIM), out.shape

    ref = reference_forward(torch_params, params, x)
    err = float(jnp.max(jnp.abs(out - ref)))
    tol = 1e-3 + 1e-2 * float(jnp.max(jnp.abs(ref)))
    assert err <= tol, f"mismatch vs reference: max abs err {err} > {tol}"

    print("KERNEL_OK")
</pallas_src>

<mosaic_0001>
module attributes {stable_mosaic.version = 11 : i64} {
  func.func @_fused_conv_kernel(%arg0: i32, %arg1: memref<1x8x826xf32, #tpu.memory_space<vmem>>, %arg2: memref<32x72xf32, #tpu.memory_space<vmem>>, %arg3: memref<32x1xf32, #tpu.memory_space<vmem>>, %arg4: memref<64x288xf32, #tpu.memory_space<vmem>>, %arg5: memref<64x1xf32, #tpu.memory_space<vmem>>, %arg6: memref<1x64x672xbf16, #tpu.memory_space<vmem>>, %arg7: memref<32x768xf32, #tpu.memory_space<vmem>>, %arg8: memref<72x768xf32, #tpu.memory_space<vmem>>, %arg9: memref<288x672xf32, #tpu.memory_space<vmem>>) attributes {dimension_semantics = [#tpu.dimension_semantics<parallel>], iteration_bounds = array<i64: 2>, scalar_prefetch = 0 : i64, scratch_operands = 3 : i64, tpu.core_type = #tpu.core_type<tc>, window_params = [{transform_indices = @transform_0, window_bounds = array<i64: 1, 8, 826>}, {pipeline_mode = #tpu.pipeline_mode<synchronous>, transform_indices = @transform_1, window_bounds = array<i64: 32, 72>}, {pipeline_mode = #tpu.pipeline_mode<synchronous>, transform_indices = @transform_2, window_bounds = array<i64: 32, 1>}, {pipeline_mode = #tpu.pipeline_mode<synchronous>, transform_indices = @transform_3, window_bounds = array<i64: 64, 288>}, {pipeline_mode = #tpu.pipeline_mode<synchronous>, transform_indices = @transform_4, window_bounds = array<i64: 64, 1>}, {transform_indices = @transform_5, window_bounds = array<i64: 1, 64, 672>}]} {
    %c0 = arith.constant 0 : index
    %c0_0 = arith.constant 0 : index
    %c0_1 = arith.constant 0 : index
    %0 = vector.load %arg1[%c0, %c0_0, %c0_1] : memref<1x8x826xf32, #tpu.memory_space<vmem>>, vector<1x8x768xf32>
    %1 = vector.shape_cast %0 : vector<1x8x768xf32> to vector<8x768xf32>
    %c0_2 = arith.constant 0 : index
    %c0_3 = arith.constant 0 : index
    %2 = vector.load %arg8[%c0_2, %c0_3] : memref<72x768xf32, #tpu.memory_space<vmem>>, vector<8x768xf32>
    tpu.vector_store %arg8[%c0_2, %c0_3], %1 {strides = array<i32>} : memref<72x768xf32, #tpu.memory_space<vmem>>, vector<8x768xf32>,
    %c0_4 = arith.constant 0 : index
    %c0_5 = arith.constant 0 : index
    %c1 = arith.constant 1 : index
    %3 = vector.load %arg1[%c0_4, %c0_5, %c1] : memref<1x8x826xf32, #tpu.memory_space<vmem>>, vector<1x8x768xf32>
    %4 = vector.shape_cast %3 : vector<1x8x768xf32> to vector<8x768xf32>
    %c8 = arith.constant 8 : index
    %c0_6 = arith.constant 0 : index
    %5 = vector.load %arg8[%c8, %c0_6] : memref<72x768xf32, #tpu.memory_space<vmem>>, vector<8x768xf32>
    tpu.vector_store %arg8[%c8, %c0_6], %4 {strides = array<i32>} : memref<72x768xf32, #tpu.memory_space<vmem>>, vector<8x768xf32>,
    %c0_7 = arith.constant 0 : index
    %c0_8 = arith.constant 0 : index
    %c2 = arith.constant 2 : index
    %6 = vector.load %arg1[%c0_7, %c0_8, %c2] : memref<1x8x826xf32, #tpu.memory_space<vmem>>, vector<1x8x768xf32>
    %7 = vector.shape_cast %6 : vector<1x8x768xf32> to vector<8x768xf32>
    %c16 = arith.constant 16 : index
    %c0_9 = arith.constant 0 : index
    %8 = vector.load %arg8[%c16, %c0_9] : memref<72x768xf32, #tpu.memory_space<vmem>>, vector<8x768xf32>
    tpu.vector_store %arg8[%c16, %c0_9], %7 {strides = array<i32>} : memref<72x768xf32, #tpu.memory_space<vmem>>, vector<8x768xf32>,
    %c0_10 = arith.constant 0 : index
    %c0_11 = arith.constant 0 : index
    %c28 = arith.constant 28 : index
    %9 = vector.load %arg1[%c0_10, %c0_11, %c28] : memref<1x8x826xf32, #tpu.memory_space<vmem>>, vector<1x8x768xf32>
    %10 = vector.shape_cast %9 : vector<1x8x768xf32> to vector<8x768xf32>
    %c24 = arith.constant 24 : index
    %c0_12 = arith.constant 0 : index
    %11 = vector.load %arg8[%c24, %c0_12] : memref<72x768xf32, #tpu.memory_space<vmem>>, vector<8x768xf32>
    tpu.vector_store %arg8[%c24, %c0_12], %10 {strides = array<i32>} : memref<72x768xf32, #tpu.memory_space<vmem>>, vector<8x768xf32>,
    %c0_13 = arith.constant 0 : index
    %c0_14 = arith.constant 0 : index
    %c29 = arith.constant 29 : index
    %12 = vector.load %arg1[%c0_13, %c0_14, %c29] : memref<1x8x826xf32, #tpu.memory_space<vmem>>, vector<1x8x768xf32>
    %13 = vector.shape_cast %12 : vector<1x8x768xf32> to vector<8x768xf32>
    %c32 = arith.constant 32 : index
    %c0_15 = arith.constant 0 : index
    %14 = vector.load %arg8[%c32, %c0_15] : memref<72x768xf32, #tpu.memory_space<vmem>>, vector<8x768xf32>
    tpu.vector_store %arg8[%c32, %c0_15], %13 {strides = array<i32>} : memref<72x768xf32, #tpu.memory_space<vmem>>, vector<8x768xf32>,
    %c0_16 = arith.constant 0 : index
    %c0_17 = arith.constant 0 : index
    %c30 = arith.constant 30 : index
    %15 = vector.load %arg1[%c0_16, %c0_17, %c30] : memref<1x8x826xf32, #tpu.memory_space<vmem>>, vector<1x8x768xf32>
    %16 = vector.shape_cast %15 : vector<1x8x768xf32> to vector<8x768xf32>
    %c40 = arith.constant 40 : index
    %c0_18 = arith.constant 0 : index
    %17 = vector.load %arg8[%c40, %c0_18] : memref<72x768xf32, #tpu.memory_space<vmem>>, vector<8x768xf32>
    tpu.vector_store %arg8[%c40, %c0_18], %16 {strides = array<i32>} : memref<72x768xf32, #tpu.memory_space<vmem>>, vector<8x768xf32>,
    %c0_19 = arith.constant 0 : index
    %c0_20 = arith.constant 0 : index
    %c56 = arith.constant 56 : index
    %18 = vector.load %arg1[%c0_19, %c0_20, %c56] : memref<1x8x826xf32, #tpu.memory_space<vmem>>, vector<1x8x768xf32>
    %19 = vector.shape_cast %18 : vector<1x8x768xf32> to vector<8x768xf32>
    %c48 = arith.constant 48 : index
    %c0_21 = arith.constant 0 : index
    %20 = vector.load %arg8[%c48, %c0_21] : memref<72x768xf32, #tpu.memory_space<vmem>>, vector<8x768xf32>
    tpu.vector_store %arg8[%c48, %c0_21], %19 {strides = array<i32>} : memref<72x768xf32, #tpu.memory_space<vmem>>, vector<8x768xf32>,
    %c0_22 = arith.constant 0 : index
    %c0_23 = arith.constant 0 : index
    %c57 = arith.constant 57 : index
    %21 = vector.load %arg1[%c0_22, %c0_23, %c57] : memref<1x8x826xf32, #tpu.memory_space<vmem>>, vector<1x8x768xf32>
    %22 = vector.shape_cast %21 : vector<1x8x768xf32> to vector<8x768xf32>
    %c56_24 = arith.constant 56 : index
    %c0_25 = arith.constant 0 : index
    %23 = vector.load %arg8[%c56_24, %c0_25] : memref<72x768xf32, #tpu.memory_space<vmem>>, vector<8x768xf32>
    tpu.vector_store %arg8[%c56_24, %c0_25], %22 {strides = array<i32>} : memref<72x768xf32, #tpu.memory_space<vmem>>, vector<8x768xf32>,
    %c0_26 = arith.constant 0 : index
    %c0_27 = arith.constant 0 : index
    %c58 = arith.constant 58 : index
    %24 = vector.load %arg1[%c0_26, %c0_27, %c58] : memref<1x8x826xf32, #tpu.memory_space<vmem>>, vector<1x8x768xf32>
    %25 = vector.shape_cast %24 : vector<1x8x768xf32> to vector<8x768xf32>
    %c64 = arith.constant 64 : index
    %c0_28 = arith.constant 0 : index
    %26 = vector.load %arg8[%c64, %c0_28] : memref<72x768xf32, #tpu.memory_space<vmem>>, vector<8x768xf32>
    tpu.vector_store %arg8[%c64, %c0_28], %25 {strides = array<i32>} : memref<72x768xf32, #tpu.memory_space<vmem>>, vector<8x768xf32>,
    %c0_29 = arith.constant 0 : index
    %c0_30 = arith.constant 0 : index
    %27 = vector.load %arg2[%c0_29, %c0_30] : memref<32x72xf32, #tpu.memory_space<vmem>>, vector<32x72xf32>
    %c0_31 = arith.constant 0 : index
    %c0_32 = arith.constant 0 : index
    %28 = vector.load %arg8[%c0_31, %c0_32] : memref<72x768xf32, #tpu.memory_space<vmem>>, vector<72x768xf32>
    %cst = arith.constant dense<0.000000e+00> : vector<32x768xf32>
    %29 = tpu.matmul %27, %28, %cst {dimension_numbers = #tpu.dot_dimension_numbers<[1], [0], [0], [1], [0, 0, 1, 1], [], []>} : vector<32x72xf32>, vector<72x768xf32>, vector<32x768xf32> -> vector<32x768xf32>
    %c0_33 = arith.constant 0 : index
    %c0_34 = arith.constant 0 : index
    %30 = vector.load %arg3[%c0_33, %c0_34] : memref<32x1xf32, #tpu.memory_space<vmem>>, vector<32x1xf32>
    %31 = vector.broadcast %30 : vector<32x1xf32> to vector<32x768xf32>
    %32 = arith.addf %29, %31 : vector<32x768xf32>
    %cst_35 = arith.constant 0.000000e+00 : f32
    %33 = vector.broadcast %cst_35 : f32 to vector<32x768xf32>
    %34 = arith.maximumf %32, %33 : vector<32x768xf32>
    %c0_36 = arith.constant 0 : index
    %c0_37 = arith.constant 0 : index
    %35 = vector.load %arg7[%c0_36, %c0_37] : memref<32x768xf32, #tpu.memory_space<vmem>>, vector<32x768xf32>
    tpu.vector_store %arg7[%c0_36, %c0_37], %34 {strides = array<i32>} : memref<32x768xf32, #tpu.memory_space<vmem>>, vector<32x768xf32>,
    %c0_38 = arith.constant 0 : index
    %c0_39 = arith.constant 0 : index
    %36 = vector.load %arg7[%c0_38, %c0_39] : memref<32x768xf32, #tpu.memory_space<vmem>>, vector<32x672xf32>
    %c0_40 = arith.constant 0 : index
    %c0_41 = arith.constant 0 : index
    %37 = vector.load %arg9[%c0_40, %c0_41] : memref<288x672xf32, #tpu.memory_space<vmem>>, vector<32x672xf32>
    tpu.vector_store %arg9[%c0_40, %c0_41], %36 {strides = array<i32>} : memref<288x672xf32, #tpu.memory_space<vmem>>, vector<32x672xf32>,
    %c0_42 = arith.constant 0 : index
    %c1_43 = arith.constant 1 : index
    %38 = vector.load %arg7[%c0_42, %c1_43] : memref<32x768xf32, #tpu.memory_space<vmem>>, vector<32x672xf32>
    %c32_44 = arith.constant 32 : index
    %c0_45 = arith.constant 0 : index
    %39 = vector.load %arg9[%c32_44, %c0_45] : memref<288x672xf32, #tpu.memory_space<vmem>>, vector<32x672xf32>
    tpu.vector_store %arg9[%c32_44, %c0_45], %38 {strides = array<i32>} : memref<288x672xf32, #tpu.memory_space<vmem>>, vector<32x672xf32>,
    %c0_46 = arith.constant 0 : index
    %c2_47 = arith.constant 2 : index
    %40 = vector.load %arg7[%c0_46, %c2_47] : memref<32x768xf32, #tpu.memory_space<vmem>>, vector<32x672xf32>
    %c64_48 = arith.constant 64 : index
    %c0_49 = arith.constant 0 : index
    %41 = vector.load %arg9[%c64_48, %c0_49] : memref<288x672xf32, #tpu.memory_space<vmem>>, vector<32x672xf32>
    tpu.vector_store %arg9[%c64_48, %c0_49], %40 {strides = array<i32>} : memref<288x672xf32, #tpu.memory_space<vmem>>, vector<32x672xf32>,
    %c0_50 = arith.constant 0 : index
    %c28_51 = arith.constant 28 : index
    %42 = vector.load %arg7[%c0_50, %c28_51] : memref<32x768xf32, #tpu.memory_space<vmem>>, vector<32x672xf32>
    %c96 = arith.constant 96 : index
    %c0_52 = arith.constant 0 : index
    %43 = vector.load %arg9[%c96, %c0_52] : memref<288x672xf32, #tpu.memory_space<vmem>>, vector<32x672xf32>
    tpu.vector_store %arg9[%c96, %c0_52], %42 {strides = array<i32>} : memref<288x672xf32, #tpu.memory_space<vmem>>, vector<32x672xf32>,
    %c0_53 = arith.constant 0 : index
    %c29_54 = arith.constant 29 : index
    %44 = vector.load %arg7[%c0_53, %c29_54] : memref<32x768xf32, #tpu.memory_space<vmem>>, vector<32x672xf32>
    %c128 = arith.constant 128 : index
    %c0_55 = arith.constant 0 : index
    %45 = vector.load %arg9[%c128, %c0_55] : memref<288x672xf32, #tpu.memory_space<vmem>>, vector<32x672xf32>
    tpu.vector_store %arg9[%c128, %c0_55], %44 {strides = array<i32>} : memref<288x672xf32, #tpu.memory_space<vmem>>, vector<32x672xf32>,
    %c0_56 = arith.constant 0 : index
    %c30_57 = arith.constant 30 : index
    %46 = vector.load %arg7[%c0_56, %c30_57] : memref<32x768xf32, #tpu.memory_space<vmem>>, vector<32x672xf32>
    %c160 = arith.constant 160 : index
    %c0_58 = arith.constant 0 : index
    %47 = vector.load %arg9[%c160, %c0_58] : memref<288x672xf32, #tpu.memory_space<vmem>>, vector<32x672xf32>
    tpu.vector_store %arg9[%c160, %c0_58], %46 {strides = array<i32>} : memref<288x672xf32, #tpu.memory_space<vmem>>, vector<32x672xf32>,
    %c0_59 = arith.constant 0 : index
    %c56_60 = arith.constant 56 : index
    %48 = vector.load %arg7[%c0_59, %c56_60] : memref<32x768xf32, #tpu.memory_space<vmem>>, vector<32x672xf32>
    %c192 = arith.constant 192 : index
    %c0_61 = arith.constant 0 : index
    %49 = vector.load %arg9[%c192, %c0_61] : memref<288x672xf32, #tpu.memory_space<vmem>>, vector<32x672xf32>
    tpu.vector_store %arg9[%c192, %c0_61], %48 {strides = array<i32>} : memref<288x672xf32, #tpu.memory_space<vmem>>, vector<32x672xf32>,
    %c0_62 = arith.constant 0 : index
    %c57_63 = arith.constant 57 : index
    %50 = vector.load %arg7[%c0_62, %c57_63] : memref<32x768xf32, #tpu.memory_space<vmem>>, vector<32x672xf32>
    %c224 = arith.constant 224 : index
    %c0_64 = arith.constant 0 : index
    %51 = vector.load %arg9[%c224, %c0_64] : memref<288x672xf32, #tpu.memory_space<vmem>>, vector<32x672xf32>
    tpu.vector_store %arg9[%c224, %c0_64], %50 {strides = array<i32>} : memref<288x672xf32, #tpu.memory_space<vmem>>, vector<32x672xf32>,
    %c0_65 = arith.constant 0 : index
    %c58_66 = arith.constant 58 : index
    %52 = vector.load %arg7[%c0_65, %c58_66] : memref<32x768xf32, #tpu.memory_space<vmem>>, vector<32x672xf32>
    %c256 = arith.constant 256 : index
    %c0_67 = arith.constant 0 : index
    %53 = vector.load %arg9[%c256, %c0_67] : memref<288x672xf32, #tpu.memory_space<vmem>>, vector<32x672xf32>
    tpu.vector_store %arg9[%c256, %c0_67], %52 {strides = array<i32>} : memref<288x672xf32, #tpu.memory_space<vmem>>, vector<32x672xf32>,
    %c0_68 = arith.constant 0 : index
    %c0_69 = arith.constant 0 : index
    %54 = vector.load %arg4[%c0_68, %c0_69] : memref<64x288xf32, #tpu.memory_space<vmem>>, vector<64x288xf32>
    %c0_70 = arith.constant 0 : index
    %c0_71 = arith.constant 0 : index
    %55 = vector.load %arg9[%c0_70, %c0_71] : memref<288x672xf32, #tpu.memory_space<vmem>>, vector<288x672xf32>
    %cst_72 = arith.constant dense<0.000000e+00> : vector<64x672xf32>
    %56 = tpu.matmul %54, %55, %cst_72 {dimension_numbers = #tpu.dot_dimension_numbers<[1], [0], [0], [1], [0, 0, 1, 1], [], []>} : vector<64x288xf32>, vector<288x672xf32>, vector<64x672xf32> -> vector<64x672xf32>
    %c0_73 = arith.constant 0 : index
    %c0_74 = arith.constant 0 : index
    %57 = vector.load %arg5[%c0_73, %c0_74] : memref<64x1xf32, #tpu.memory_space<vmem>>, vector<64x1xf32>
    %58 = vector.broadcast %57 : vector<64x1xf32> to vector<64x672xf32>
    %59 = arith.addf %56, %58 : vector<64x672xf32>
    %cst_75 = arith.constant 0.000000e+00 : f32
    %60 = vector.broadcast %cst_75 : f32 to vector<64x672xf32>
    %61 = arith.maximumf %59, %60 : vector<64x672xf32>
    %62 = arith.truncf %61 : vector<64x672xf32> to vector<64x672xbf16>
    %c0_76 = arith.constant 0 : index
    %c0_77 = arith.constant 0 : index
    %c0_78 = arith.constant 0 : index
    %63 = vector.load %arg6[%c0_76, %c0_77, %c0_78] : memref<1x64x672xbf16, #tpu.memory_space<vmem>>, vector<1x64x672xbf16>
    %64 = vector.shape_cast %63 : vector<1x64x672xbf16> to vector<64x672xbf16>
    %65 = vector.shape_cast %62 : vector<64x672xbf16> to vector<1x64x672xbf16>
    tpu.vector_store %arg6[%c0_76, %c0_77, %c0_78], %65 {strides = array<i32>} : memref<1x64x672xbf16, #tpu.memory_space<vmem>>, vector<1x64x672xbf16>,
    return
  }
  func.func @transform_0(%arg0: i32) -> (i32, i32, i32) {
    %c0_i32 = arith.constant 0 : i32
    %c0_i32_0 = arith.constant 0 : i32
    %c0_i32_1 = arith.constant 0 : i32
    return %arg0, %c0_i32, %c0_i32_0 : i32, i32, i32
  }
  func.func @transform_1(%arg0: i32) -> (i32, i32) {
    %c0_i32 = arith.constant 0 : i32
    %c0_i32_0 = arith.constant 0 : i32
    %c0_i32_1 = arith.constant 0 : i32
    return %c0_i32, %c0_i32_0 : i32, i32
  }
  func.func @transform_2(%arg0: i32) -> (i32, i32) {
    %c0_i32 = arith.constant 0 : i32
    %c0_i32_0 = arith.constant 0 : i32
    %c0_i32_1 = arith.constant 0 : i32
    return %c0_i32, %c0_i32_0 : i32, i32
  }
  func.func @transform_3(%arg0: i32) -> (i32, i32) {
    %c0_i32 = arith.constant 0 : i32
    %c0_i32_0 = arith.constant 0 : i32
    %c0_i32_1 = arith.constant 0 : i32
    return %c0_i32, %c0_i32_0 : i32, i32
  }
  func.func @transform_4(%arg0: i32) -> (i32, i32) {
    %c0_i32 = arith.constant 0 : i32
    %c0_i32_0 = arith.constant 0 : i32
    %c0_i32_1 = arith.constant 0 : i32
    return %c0_i32, %c0_i32_0 : i32, i32
  }
  func.func @transform_5(%arg0: i32) -> (i32, i32, i32) {
    %c0_i32 = arith.constant 0 : i32
    %c0_i32_0 = arith.constant 0 : i32
    %c0_i32_1 = arith.constant 0 : i32
    return %arg0, %c0_i32, %c0_i32_0 : i32, i32, i32
  }
}

module attributes {stable_mosaic.version = 11 : i64} {
  func.func @_fused_mlp_kernel(%arg0: i32, %arg1: memref<2x10752xbf16, #tpu.memory_space<vmem>>, %arg2: memref<10752x128xi8, #tpu.memory_space<vmem>>, %arg3: memref<1x128xf32, #tpu.memory_space<vmem>>, %arg4: memref<1x128xf32, #tpu.memory_space<vmem>>, %arg5: memref<128x10xf32, #tpu.memory_space<vmem>>, %arg6: memref<1x10xf32, #tpu.memory_space<vmem>>, %arg7: memref<2x10xf32, #tpu.memory_space<vmem>>, %arg8: memref<2x128xf32, #tpu.memory_space<vmem>>) attributes {dimension_semantics = [#tpu.dimension_semantics<arbitrary>], iteration_bounds = array<i64: 4>, scalar_prefetch = 0 : i64, scratch_operands = 1 : i64, tpu.core_type = #tpu.core_type<tc>, window_params = [{transform_indices = @transform_0, window_bounds = array<i64: 2, 10752>}, {transform_indices = @transform_1, window_bounds = array<i64: 10752, 128>}, {pipeline_mode = #tpu.pipeline_mode<synchronous>, transform_indices = @transform_2, window_bounds = array<i64: 1, 128>}, {pipeline_mode = #tpu.pipeline_mode<synchronous>, transform_indices = @transform_3, window_bounds = array<i64: 1, 128>}, {pipeline_mode = #tpu.pipeline_mode<synchronous>, transform_indices = @transform_4, window_bounds = array<i64: 128, 10>}, {pipeline_mode = #tpu.pipeline_mode<synchronous>, transform_indices = @transform_5, window_bounds = array<i64: 1, 10>}, {pipeline_mode = #tpu.pipeline_mode<synchronous>, transform_indices = @transform_6, window_bounds = array<i64: 2, 10>}]} {
    %c0_i32 = arith.constant 0 : i32
    %0 = arith.cmpi eq, %arg0, %c0_i32 : i32
    %1 = arith.extui %0 : i1 to i32
    %c0_i32_0 = arith.constant 0 : i32
    %2 = arith.cmpi ne, %1, %c0_i32_0 : i32
    scf.if %2 {
      %cst_17 = arith.constant 0.000000e+00 : f32
      %22 = vector.broadcast %cst_17 : f32 to vector<2x128xf32>
      %c0_18 = arith.constant 0 : index
      %c0_19 = arith.constant 0 : index
      %23 = vector.load %arg8[%c0_18, %c0_19] : memref<2x128xf32, #tpu.memory_space<vmem>>, vector<2x128xf32>
      tpu.vector_store %arg8[%c0_18, %c0_19], %22 {strides = array<i32>} : memref<2x128xf32, #tpu.memory_space<vmem>>, vector<2x128xf32>,
    } else {
    }
    %c0 = arith.constant 0 : index
    %c0_1 = arith.constant 0 : index
    %3 = vector.load %arg2[%c0, %c0_1] : memref<10752x128xi8, #tpu.memory_space<vmem>>, vector<5376x128xi8>
    %4 = arith.sitofp %3 : vector<5376x128xi8> to vector<5376x128xf32>
    %5 = arith.truncf %4 : vector<5376x128xf32> to vector<5376x128xbf16>
    %c0_2 = arith.constant 0 : index
    %c0_3 = arith.constant 0 : index
    %6 = vector.load %arg8[%c0_2, %c0_3] : memref<2x128xf32, #tpu.memory_space<vmem>>, vector<2x128xf32>
    %c0_4 = arith.constant 0 : index
    %c0_5 = arith.constant 0 : index
    %7 = vector.load %arg1[%c0_4, %c0_5] : memref<2x10752xbf16, #tpu.memory_space<vmem>>, vector<2x5376xbf16>
    %cst = arith.constant dense<0.000000e+00> : vector<2x128xf32>
    %8 = tpu.matmul %7, %5, %cst {dimension_numbers = #tpu.dot_dimension_numbers<[1], [0], [0], [1], [0, 0, 1, 1], [], []>} : vector<2x5376xbf16>, vector<5376x128xbf16>, vector<2x128xf32> -> vector<2x128xf32>
    %9 = arith.addf %6, %8 : vector<2x128xf32>
    %c0_6 = arith.constant 0 : index
    %c0_7 = arith.constant 0 : index
    %10 = vector.load %arg8[%c0_6, %c0_7] : memref<2x128xf32, #tpu.memory_space<vmem>>, vector<2x128xf32>
    tpu.vector_store %arg8[%c0_6, %c0_7], %9 {strides = array<i32>} : memref<2x128xf32, #tpu.memory_space<vmem>>, vector<2x128xf32>,
    %c5376 = arith.constant 5376 : index
    %c0_8 = arith.constant 0 : index
    %11 = vector.load %arg2[%c5376, %c0_8] : memref<10752x128xi8, #tpu.memory_space<vmem>>, vector<5376x128xi8>
    %12 = arith.sitofp %11 : vector<5376x128xi8> to vector<5376x128xf32>
    %13 = arith.truncf %12 : vector<5376x128xf32> to vector<5376x128xbf16>
    %c0_9 = arith.constant 0 : index
    %c0_10 = arith.constant 0 : index
    %14 = vector.load %arg8[%c0_9, %c0_10] : memref<2x128xf32, #tpu.memory_space<vmem>>, vector<2x128xf32>
    %c0_11 = arith.constant 0 : index
    %c5376_12 = arith.constant 5376 : index
    %15 = vector.load %arg1[%c0_11, %c5376_12] : memref<2x10752xbf16, #tpu.memory_space<vmem>>, vector<2x5376xbf16>
    %cst_13 = arith.constant dense<0.000000e+00> : vector<2x128xf32>
    %16 = tpu.matmul %15, %13, %cst_13 {dimension_numbers = #tpu.dot_dimension_numbers<[1], [0], [0], [1], [0, 0, 1, 1], [], []>} : vector<2x5376xbf16>, vector<5376x128xbf16>, vector<2x128xf32> -> vector<2x128xf32>
    %17 = arith.addf %14, %16 : vector<2x128xf32>
    %c0_14 = arith.constant 0 : index
    %c0_15 = arith.constant 0 : index
    %18 = vector.load %arg8[%c0_14, %c0_15] : memref<2x128xf32, #tpu.memory_space<vmem>>, vector<2x128xf32>
    tpu.vector_store %arg8[%c0_14, %c0_15], %17 {strides = array<i32>} : memref<2x128xf32, #tpu.memory_space<vmem>>, vector<2x128xf32>,
    %c3_i32 = arith.constant 3 : i32
    %19 = arith.cmpi eq, %arg0, %c3_i32 : i32
    %20 = arith.extui %19 : i1 to i32
    %c0_i32_16 = arith.constant 0 : i32
    %21 = arith.cmpi ne, %20, %c0_i32_16 : i32
    scf.if %21 {
      %c0_17 = arith.constant 0 : index
      %c0_18 = arith.constant 0 : index
      %22 = vector.load %arg8[%c0_17, %c0_18] : memref<2x128xf32, #tpu.memory_space<vmem>>, vector<2x128xf32>
      %c0_19 = arith.constant 0 : index
      %c0_20 = arith.constant 0 : index
      %23 = vector.load %arg3[%c0_19, %c0_20] : memref<1x128xf32, #tpu.memory_space<vmem>>, vector<1x128xf32>
      %24 = vector.broadcast %23 : vector<1x128xf32> to vector<2x128xf32>
      %25 = arith.mulf %22, %24 : vector<2x128xf32>
      %c0_21 = arith.constant 0 : index
      %c0_22 = arith.constant 0 : index
      %26 = vector.load %arg4[%c0_21, %c0_22] : memref<1x128xf32, #tpu.memory_space<vmem>>, vector<1x128xf32>
      %27 = vector.broadcast %26 : vector<1x128xf32> to vector<2x128xf32>
      %28 = arith.addf %25, %27 : vector<2x128xf32>
      %cst_23 = arith.constant 0.000000e+00 : f32
      %29 = vector.broadcast %cst_23 : f32 to vector<2x128xf32>
      %30 = arith.maximumf %28, %29 : vector<2x128xf32>
      %c0_24 = arith.constant 0 : index
      %c0_25 = arith.constant 0 : index
      %31 = vector.load %arg5[%c0_24, %c0_25] : memref<128x10xf32, #tpu.memory_space<vmem>>, vector<128x10xf32>
      %cst_26 = arith.constant dense<0.000000e+00> : vector<2x10xf32>
      %32 = tpu.matmul %30, %31, %cst_26 {dimension_numbers = #tpu.dot_dimension_numbers<[1], [0], [0], [1], [0, 0, 1, 1], [], []>} : vector<2x128xf32>, vector<128x10xf32>, vector<2x10xf32> -> vector<2x10xf32>
      %c0_27 = arith.constant 0 : index
      %c0_28 = arith.constant 0 : index
      %33 = vector.load %arg6[%c0_27, %c0_28] : memref<1x10xf32, #tpu.memory_space<vmem>>, vector<1x10xf32>
      %34 = vector.broadcast %33 : vector<1x10xf32> to vector<2x10xf32>
      %35 = arith.addf %32, %34 : vector<2x10xf32>
      %c0_29 = arith.constant 0 : index
      %c0_30 = arith.constant 0 : index
      %36 = vector.load %arg7[%c0_29, %c0_30] : memref<2x10xf32, #tpu.memory_space<vmem>>, vector<2x10xf32>
      tpu.vector_store %arg7[%c0_29, %c0_30], %35 {strides = array<i32>} : memref<2x10xf32, #tpu.memory_space<vmem>>, vector<2x10xf32>,
    } else {
    }
    return
  }
  func.func @transform_0(%arg0: i32) -> (i32, i32) {
    %c0_i32 = arith.constant 0 : i32
    %c0_i32_0 = arith.constant 0 : i32
    return %c0_i32, %arg0 : i32, i32
  }
  func.func @transform_1(%arg0: i32) -> (i32, i32) {
    %c0_i32 = arith.constant 0 : i32
    %c0_i32_0 = arith.constant 0 : i32
    return %arg0, %c0_i32 : i32, i32
  }
  func.func @transform_2(%arg0: i32) -> (i32, i32) {
    %c0_i32 = arith.constant 0 : i32
    %c0_i32_0 = arith.constant 0 : i32
    %c0_i32_1 = arith.constant 0 : i32
    return %c0_i32, %c0_i32_0 : i32, i32
  }
  func.func @transform_3(%arg0: i32) -> (i32, i32) {
    %c0_i32 = arith.constant 0 : i32
    %c0_i32_0 = arith.constant 0 : i32
    %c0_i32_1 = arith.constant 0 : i32
    return %c0_i32, %c0_i32_0 : i32, i32
  }
  func.func @transform_4(%arg0: i32) -> (i32, i32) {
    %c0_i32 = arith.constant 0 : i32
    %c0_i32_0 = arith.constant 0 : i32
    %c0_i32_1 = arith.constant 0 : i32
    return %c0_i32, %c0_i32_0 : i32, i32
  }
  func.func @transform_5(%arg0: i32) -> (i32, i32) {
    %c0_i32 = arith.constant 0 : i32
    %c0_i32_0 = arith.constant 0 : i32
    %c0_i32_1 = arith.constant 0 : i32
    return %c0_i32, %c0_i32_0 : i32, i32
  }
  func.func @transform_6(%arg0: i32) -> (i32, i32) {
    %c0_i32 = arith.constant 0 : i32
    %c0_i32_0 = arith.constant 0 : i32
    %c0_i32_1 = arith.constant 0 : i32
    return %c0_i32, %c0_i32_0 : i32, i32
  }
}

</mosaic_0001>

<bundles_post_ra>
// kernel: my_model_forward.2
= control target key start
LH: loop header
LB: loop body
LE: loop exit
PB: predicated region body
PF: predicated region fallthrough
CT: control target
= control target key end

     0   :  { %10 = vsyncpa [#allocation6], 0  ;;  %s6188_s0 = inlined_call_operand.vmem [shape: f32[2,8,826], index: 0, kind: input, shape index: {}]   ;;  %s6189_s1 = inlined_call_operand.hbm [shape: f32[32,72], index: 1, kind: input, shape index: {}]   ;;  %s6190_s2 = inlined_call_operand.vmem [shape: f32[32,1], index: 2, kind: input, shape index: {}]   ;;  %s6191_s3 = inlined_call_operand.hbm [shape: f32[64,288], index: 3, kind: input, shape index: {}]   ;;  %s6192_s4 = inlined_call_operand.vmem [shape: f32[64,1], index: 4, kind: input, shape index: {}]   ;;  %s6193_s5 = inlined_call_operand.vmem [shape: bf16[2,64,672], index: 5, kind: output, shape index: {}]  }
   0x1   :  { %11 = vsyncpa [#allocation8], 0  ;;  %s3985_s18 = smov 0  }
   0x2 LB: > { %s169_s21 = sshll.u32 %s6189_s1, 4  ;;  %s3550_s22 = sadd.s32 4294967295, %s3938_s18   ;;  %s3938_s18 = sphi %s3985_s18, %s17_s18   ;;  %s170_s21 = int_to_ptr.hbm [resolvable:$true] %s169_s21 }
   0x3   : > { %p3552_p0 = scmp.ge.s32.totalorder %s3938_s18, 1  ;;  %p158_p1 = scmp.lt.s32.totalorder %s3938_s18, 3 }
   0x4   : > { %p3684_p2 = scmp.eq.s32.totalorder %s3550_s22, 0  ;;  %s3940_s24 = smov [#allocation5]  }
   0x5   : > { %p3996_p3 = pnand %p3552_p0, %p158_p1  ;;  %s171_s25 = sshll.u32 %s3940_s24, 4  ;;  %s172_s25 = int_to_ptr.vmem [resolvable:$true] %s171_s25 }
   0x6   : > { %s186_s28 = sshll.u32 %s6191_s3, 4  ;;  %s3941_s29 = smov [#allocation7]   ;;  %s187_s28 = int_to_ptr.hbm [resolvable:$true] %s186_s28 }
   0x7   : > { %p3677_p4 = pneg %p3996_p3  ;;  %s188_s30 = sshll.u32 %s3941_s29, 4  ;;  %s189_s30 = int_to_ptr.vmem [resolvable:$true] %s188_s30 }
   0x8   : > { %s3942_s6 = smov 128   ;;  %s3943_s7 = smov 8  }
   0x9   : > { %p3678_p5 = pnand %p3684_p2, %p3677_p4  ;;  %s3944_s8 = smov 384  }
   0xa   : > { %s3945_s9 = smov 24   ;;  %215 = sbr.rel (%p3996_p3) target bundleno = 1219 (0x4c3), region = 40 }
   0xb   : > { %3680 = dma.hbm_to_vmem [thread:$0]  (!%p3678_p5), %s170_s21, 512, %s172_s25, [#allocation6], %s3942_s6, %s3942_s6, %s3943_s7  }
   0xc   : > { %3683 = dma.hbm_to_vmem [thread:$0]  (!%p3678_p5), %s187_s28, 3072, %s189_s30, [#allocation8], %s3944_s8, %s3944_s8, %s3945_s9  }
   0xf   : > { %3929 = dma.done.wait (%p3684_p2), [#allocation6], 512  }
  0x10   : > { %3931 = vsyncadd (%p3684_p2), [#allocation6], 4294966784 }
  0x11   : > { %3933 = dma.done.wait (%p3684_p2), [#allocation8], 3072  }
  0x12   : > { %3935 = vsyncadd (%p3684_p2), [#allocation8], 4294964224  ;;  %p249_p6 = scmp.lt.s32.totalorder %s3550_s22, 1  ;;  %s3946_s14 = smov 127   ;;  %vm628_vm0 = vcmask 572416   ;;  %vm581_vm1 = vcmask 580608  }
  0x13   : > { %s3947_s15 = smov 126   ;;  %s3948_s16 = smov 100   ;;  %vm534_vm2 = vcmask 588800   ;;  %vm487_vm3 = vcmask 801792   ;;  %vm440_vm4 = vcmask 809984   ;;  %vm393_vm5 = vcmask 818176  }
  0x14   : > { %s6280_s22 = smov (!%p249_p6, %s3550_s22), 1  ;;  %s3949_s17 = smov 99   ;;  %vm346_vm6 = vcmask 1031168   ;;  %vm299_vm7 = vcmask 1039360   ;;  %vm992_vm8 = vcmask 261120   ;;  %vm3448_vm9 = vcmask 1043456  }
  0x15   : > { %s3667_s10 = smul.u32 56, %s6280_s22  ;;  %s3950_s19 = smov 98   ;;  %vm3449_vm10 = vcmask 261124  }
  0x16   : > { %s3951_s20 = smov 70   ;;  %s3952_s21 = smov 71   ;;  %vm6131_vm11 = vmor %vm3449_vm10, %vm3448_vm9 }
  0x17   : > { %s253_s13 = scalar_lea.vmem %s6188_s0, %s3667_s10  ;;  %s3953_s23 = smov 72  }
  0x18   : > { %v4018_v0 = vld [vmem:[%s253_s13 + $0x20] sm:$0xff]  ;;  %v4020_v1 = vld [vmem:[%s253_s13 + $0x28] sm:$0xff]  ;;  %v4033_v6 = vld [vmem:[%s253_s13 + $0x10] sm:$0xff]  ;;  %s3668_s25 = smul.u32 192, %s6280_s22 }
  0x19   : > { %v4022_v2 = vld [vmem:[%s253_s13] sm:$0xff]  ;;  %v3721_v3 = vpack.i.bf16 %v4020_v1, %v4018_v0  ;;  %v4026_v4 = vld [vmem:[%s253_s13 + $0x8] sm:$0xff]  ;;  %v4035_v7 = vld [vmem:[%s253_s13 + $0x18] sm:$0xff] }
  0x1a   : > { %v3711_v5 = vpack.i.bf16 %v4026_v4, %v4022_v2  ;;  %v277_v8 = vld [vmem:[%s253_s13 + $0x30] sm:$0xff]  ;;  %v3716_v9 = vpack.i.bf16 %v4035_v7, %v4033_v6  ;;  %s5801_s22 = scalar_lea.vmem %s6193_s5, %s3668_s25 }
  0x1b   : > { %3722 = vrot.lane.b32.xlu1 %v3721_v3, %s3946_s14 }
  0x1c   : > { %3712 = vrot.lane.b32.xlu0 %v3711_v5, %s3946_s14  ;;  %3727 = vrot.lane.b32.xlu2 %v3711_v5, %s3947_s15 }
  0x23   : > { %297 = vrot.lane.b32.xlu1 %v277_v8, %s3946_s14 }
  0x24   : > { %3717 = vrot.lane.b32.xlu0 %v3716_v9, %s3946_s14  ;;  %3732 = vrot.lane.b32.xlu2 %v3716_v9, %s3947_s15 }
  0x2b   : > { %344 = vrot.lane.b32.xlu1 %v277_v8, %s3947_s15 }
  0x2c   : > { %3737 = vrot.lane.b32.xlu0 %v3721_v3, %s3947_s15  ;;  %3742 = vrot.lane.b32.xlu2 %v3711_v5, %s3948_s16 }
  0x33   : > { %3752 = vrot.lane.b32.xlu1 %v3721_v3, %s3948_s16 }
  0x34   : > { %3747 = vrot.lane.b32.xlu0 %v3716_v9, %s3948_s16  ;;  %391 = vrot.lane.b32.xlu2 %v277_v8, %s3948_s16 }
  0x3b   : > { %3762 = vrot.lane.b32.xlu1 %v3716_v9, %s3949_s17 }
  0x3c   : > { %3757 = vrot.lane.b32.xlu0 %v3711_v5, %s3949_s17  ;;  %3767 = vrot.lane.b32.xlu2 %v3721_v3, %s3949_s17 }
  0x43   : > { %3772 = vrot.lane.b32.xlu1 %v3711_v5, %s3950_s19 }
  0x44   : > { %438 = vrot.lane.b32.xlu0 %v277_v8, %s3949_s17  ;;  %3777 = vrot.lane.b32.xlu2 %v3711_v5, %s3951_s20 }
  0x4b   : > { %3787 = vrot.lane.b32.xlu1 %v3711_v5, %s3952_s21 }
  0x4c   : > { %3782 = vrot.lane.b32.xlu0 %v3716_v9, %s3951_s20  ;;  %3792 = vrot.lane.b32.xlu2 %v3716_v9, %s3952_s21 }
  0x53   : > { %3802 = vrot.lane.b32.xlu1 %v3716_v9, %s3953_s23 }
  0x54   : > { %3797 = vrot.lane.b32.xlu0 %v3711_v5, %s3953_s23  ;;  %3807 = vrot.lane.b32.xlu2 %v3716_v9, %s3950_s19 }
  0x5b   : > { %485 = vrot.lane.b32.xlu1 %v277_v8, %s3950_s19 }
  0x5c   : > { %3812 = vrot.lane.b32.xlu0 %v3721_v3, %s3950_s19  ;;  %3817 = vrot.lane.b32.xlu2 %v3721_v3, %s3953_s23 }
  0x63   : > { %3822 = vrot.lane.b32.xlu1 %v3721_v3, %s3952_s21 }
  0x64   : > { %532 = vrot.lane.b32.xlu0 %v277_v8, %s3953_s23  ;;  %579 = vrot.lane.b32.xlu2 %v277_v8, %s3952_s21 }
  0x6b   : > { %626 = vrot.lane.b32.xlu1 %v277_v8, %s3951_s20 }
  0x6c   : > { %3827 = vrot.lane.b32.xlu0 %v3721_v3, %s3951_s20 }
  0x76   : > { %v4068_v10 = vpop.permute.xlu2 %3727 }
  0x7e   : > { %v4070_v11 = vpop.permute.xlu2 %3732 }
  0x86   : > { %v4072_v12 = vpop.permute.xlu2 %3742 }
  0x87   : > { %v3745_v3 = vunpack.i.h.bf16 %v4072_v12  ;;  %v3744_v9 = vunpack.i.l.bf16 %v4072_v12 }
  0x8d   : > { %v4074_v13 = vpop.permute.xlu1 %3722 }
  0x8e   : > { %v4076_v14 = vpop.permute.xlu0 %3712  ;;  %v4078_v15 = vpop.permute.xlu2 %391 }
  0x95   : > { %v4080_v16 = vpop.permute.xlu1 %297 }
  0x96   : > { %v4082_v17 = vpop.permute.xlu0 %3717  ;;  %v4084_v18 = vpop.permute.xlu2 %3767 }
  0x9d   : > { %v4086_v19 = vpop.permute.xlu1 %344 }
  0x9e   : > { %v4088_v20 = vpop.permute.xlu0 %3737  ;;  %v3778_v21 = vpop.permute.xlu2 %3777 }
  0x9f   : > { %v3779_v22 = vunpack.i.l.bf16 %v3778_v21  ;;  %v3780_v23 = vunpack.i.h.bf16 %v3778_v21 }
  0xa1   : > { %v629_v24 = vsel %vm628_vm0, %v3779_v22, %v3780_v23 }
  0xa2   : > { %748 = vmatpush.msra.mxu0 %v629_v24  ;;  %v3729_v24 = vunpack.i.l.bf16 %v4068_v10 }
  0xa5   : > { %v4091_v25 = vpop.permute.xlu1 %3752 }
  0xa6   : > { %v4093_v26 = vpop.permute.xlu0 %3747  ;;  %v4101_v31 = vpop.permute.xlu2 %3792 }
  0xa7   : > { %v3795_v32 = vunpack.i.h.bf16 %v4101_v31  ;;  %v3794_v33 = vunpack.i.l.bf16 %v4101_v31  ;;  %v3750_v5 = vunpack.i.h.bf16 %v4093_v26  ;;  %v3749_v8 = vunpack.i.l.bf16 %v4093_v26 }
  0xa9   : > { %v584_v44 = vsel %vm581_vm1, %v3794_v33, %v3795_v32 }
  0xad   : > { %v4095_v27 = vpop.permute.xlu1 %3762 }
  0xae   : > { %v4097_v28 = vpop.permute.xlu0 %3757  ;;  %v4118_v45 = vpop.permute.xlu2 %3807  ;;  %v3765_v56 = vunpack.i.h.bf16 %v4095_v27  ;;  %v3764_v57 = vunpack.i.l.bf16 %v4095_v27  ;;  %v3724_v27 = vunpack.i.l.bf16 %v4074_v13 }
  0xaf   : > { %v3810_v46 = vunpack.i.h.bf16 %v4118_v45  ;;  %v3809_v48 = vunpack.i.l.bf16 %v4118_v45  ;;  %v3760_v60 = vunpack.i.h.bf16 %v4097_v28  ;;  %v3759_v61 = vunpack.i.l.bf16 %v4097_v28 }
  0xb0   : > { %v443_v28 = vsel %vm440_vm4, %v3764_v57, %v3765_v56 }
  0xb1   : > { %v490_v59 = vsel %vm487_vm3, %v3809_v48, %v3810_v46  ;;  %v441_v12 = vsel %vm440_vm4, %v3759_v61, %v3760_v60  ;;  %v708_v61 = vld [vmem:[%s6190_s2 + $0x18] sm:$0xff] }
  0xb5   : > { %v3773_v29 = vpop.permute.xlu1 %3772 }
  0xb6   : > { %v4099_v30 = vpop.permute.xlu0 %438  ;;  %v3775_v52 = vunpack.i.h.bf16 %v3773_v29  ;;  %v3774_v53 = vunpack.i.l.bf16 %v3773_v29  ;;  %v3734_v29 = vunpack.i.l.bf16 %v4070_v11 }
  0xb8   : > { %v488_v21 = vsel %vm487_vm3, %v3774_v53, %v3775_v52  ;;  %v489_v22 = vsel %vm487_vm3, %v3775_v52, %v3809_v48 }
  0xbd   : > { %v3788_v34 = vpop.permute.xlu1 %3787 }
  0xbe   : > { %v3790_v35 = vunpack.i.h.bf16 %v3788_v34  ;;  %v3789_v36 = vunpack.i.l.bf16 %v3788_v34  ;;  %v4105_v37 = vpop.permute.xlu0 %3782  ;;  %v442_v34 = vsel %vm440_vm4, %v3760_v60, %v3764_v57  ;;  %v705_v57 = vld [vmem:[%s6190_s2] sm:$0xff]  ;;  %v3818_v60 = vpop.permute.xlu2 %3817 }
  0xbf   : > { %v3785_v38 = vunpack.i.h.bf16 %v4105_v37  ;;  %v3784_v39 = vunpack.i.l.bf16 %v4105_v37 }
  0xc0   : > { %v582_v40 = vsel %vm581_vm1, %v3789_v36, %v3790_v35  ;;  %v583_v43 = vsel %vm581_vm1, %v3790_v35, %v3794_v33  ;;  %v3735_v35 = vunpack.i.h.bf16 %v4070_v11  ;;  %v3719_v36 = vunpack.i.l.bf16 %v4082_v17 }
  0xc1   : > { %v630_v41 = vsel %vm628_vm0, %v3780_v23, %v3784_v39  ;;  %v631_v42 = vsel %vm628_vm0, %v3784_v39, %v3785_v38  ;;  %749 = vmatpush.msra.mxu0 %v582_v40  ;;  %v3730_v23 = vunpack.i.h.bf16 %v4068_v10  ;;  %v3720_v10 = vunpack.i.h.bf16 %v4082_v17 }
  0xc2   : > { %777 = vmatpush.msra.mxu1 %v630_v41  ;;  %806 = vmatpush.msra.mxu2 %v631_v42  ;;  %v396_v40 = vsel %vm393_vm5, %v3749_v8, %v3750_v5  ;;  %v3715_v41 = vunpack.i.h.bf16 %v4076_v14  ;;  %v3714_v42 = vunpack.i.l.bf16 %v4076_v14  ;;  %v349_v48 = vsel %vm346_vm6, %v3734_v29, %v3735_v35 }
  0xc3   : > { %v302_v14 = vsel %vm299_vm7, %v3719_v36, %v3720_v10  ;;  %v303_v11 = vsel %vm299_vm7, %v3720_v10, %v3724_v27 }
  0xc4   : > { %778 = vmatpush.msra.mxu1 %v583_v43  ;;  %807 = vmatpush.msra.mxu2 %v584_v44  ;;  %v394_v43 = vsel %vm393_vm5, %v3744_v9, %v3745_v3  ;;  %v395_v44 = vsel %vm393_vm5, %v3745_v3, %v3749_v8  ;;  %v300_v52 = vsel %vm299_vm7, %v3714_v42, %v3715_v41 }
  0xc5   : > { %v4121_v47 = vpop.permute.xlu1 %3802  ;;  %v301_v53 = vsel %vm299_vm7, %v3715_v41, %v3719_v36  ;;  %v4217_v41 = vld [vmem:[#allocation5 + $0x10] sm:$0xff] }
  0xc6   : > { %v3805_v49 = vunpack.i.h.bf16 %v4121_v47  ;;  %v3804_v50 = vunpack.i.l.bf16 %v4121_v47  ;;  %v3798_v51 = vpop.permute.xlu0 %3797 }
  0xc7   : > { %v3800_v54 = vunpack.i.h.bf16 %v3798_v51  ;;  %v3799_v55 = vunpack.i.l.bf16 %v3798_v51  ;;  %v348_v51 = vsel %vm346_vm6, %v3730_v23, %v3734_v29 }
  0xc8   : > { %v537_v58 = vsel %vm534_vm2, %v3804_v50, %v3805_v49 }
  0xc9   : > { %v535_v62 = vsel %vm534_vm2, %v3799_v55, %v3800_v54  ;;  %v536_v63 = vsel %vm534_vm2, %v3800_v54, %v3804_v50  ;;  %808 = vmatpush.msra.mxu2 %v537_v58  ;;  %v347_v50 = vsel %vm346_vm6, %v3729_v24, %v3730_v23  ;;  %v4176_v54 = vld [vmem:[#allocation5] sm:$0xff]  ;;  %v3954_v55 = vmov 0  }
  0xca   : > { %750 = vmatpush.msra.mxu0 %v535_v62  ;;  %779 = vmatpush.msra.mxu1 %v536_v63  ;;  %v3819_v23 = vunpack.i.l.bf16 %v3818_v60 }
  0xcb   : > { %809 = vmatpush.msra.mxu2 %v490_v59  ;;  %3831 = vset.pattern.permute.xlu2 %v3954_v55 }
  0xcc   : > { %751 = vmatpush.msra.mxu0 %v488_v21  ;;  %780 = vmatpush.msra.mxu1 %v489_v22  ;;  %v580_v21 = vpop.permute.xlu2 %579  ;;  %v3820_v22 = vunpack.i.h.bf16 %v3818_v60  ;;  %v538_v42 = vsel %vm534_vm2, %v3805_v49, %v3819_v23 }
  0xcd   : > { %v4150_v33 = vpop.permute.xlu1 %485  ;;  %810 = vmatpush.msra.mxu2 %v443_v28  ;;  %711 = vperm.xlu2 %3831, %v705_v57  }
  0xce   : > { %v4157_v39 = vpop.permute.xlu0 %3812  ;;  %752 = vmatpush.msra.mxu0 %v441_v12  ;;  %781 = vmatpush.msra.mxu1 %v442_v34 }
  0xcf   : > { %811 = vmatpush.msra.mxu2 %v396_v40  ;;  %3832 = vset.pattern.permute.xlu0 %v3954_v55  ;;  %v539_v40 = vsel %vm534_vm2, %v3819_v23, %v3820_v22  ;;  %v3815_v37 = vunpack.i.h.bf16 %v4157_v39 }
  0xd0   : > { %753 = vmatpush.msra.mxu0 %v394_v43  ;;  %782 = vmatpush.msra.mxu1 %v395_v44  ;;  %v3769_v43 = vunpack.i.l.bf16 %v4084_v18  ;;  %v3754_v44 = vunpack.i.l.bf16 %v4091_v25 }
  0xd1   : > { %812 = vmatpush.msra.mxu2 %v349_v48  ;;  %3833 = vset.pattern.permute.xlu1 %v3954_v55  ;;  %v493_v49 = vsel %vm487_vm3, %v3815_v37, %v4150_v33  ;;  %v3740_v48 = vunpack.i.h.bf16 %v4088_v20 }
  0xd2   : > { %754 = vmatpush.msra.mxu0 %v347_v50  ;;  %783 = vmatpush.msra.mxu1 %v348_v51  ;;  %v444_v50 = vsel %vm440_vm4, %v3765_v56, %v3769_v43  ;;  %v397_v33 = vsel %vm393_vm5, %v3750_v5, %v3754_v44 }
  0xd3   : > { %813 = vmatpush.msra.mxu2 %v302_v14  ;;  %v650_v14 = vld [vmem:[#allocation5 + $0x18] sm:$0xff]  ;;  %v352_v5 = vsel %vm346_vm6, %v3740_v48, %v4086_v19 }
  0xd4   : > { %755 = vmatpush.msra.mxu0 %v300_v52  ;;  %784 = vmatpush.msra.mxu1 %v301_v53 }
  0xd5   : > { %814 = vmatpush.msra.mxu2 %v4033_v6  ;;  %v3823_v58 = vpop.permute.xlu1 %3822  ;;  %v706_v6 = vld [vmem:[%s6190_s2 + $0x8] sm:$0xff]  ;;  %726 = vperm.xlu2 %3831, %v708_v61  }
  0xd6   : > { %v533_v59 = vpop.permute.xlu0 %532  ;;  %756 = vmatpush.msra.mxu0 %v4022_v2  ;;  %785 = vmatpush.msra.mxu1 %v4026_v4  ;;  %v4193_v2 = vld [vmem:[#allocation5 + $0x8] sm:$0xff]  ;;  %v3825_v4 = vunpack.i.h.bf16 %v3823_v58  ;;  %v3824_v3 = vunpack.i.l.bf16 %v3823_v58 }
  0xd7   : > { %3561 = vmatmul.msk.f32.vlgmr.msra.gmra.mxu0 %vm534_vm2, %v4176_v54  ;;  %3565 = vmatmul.msk.f32.vlgmr.msra.gmra.mxu1 %vm534_vm2, %v4176_v54  ;;  %v540_v31 = vsel %vm534_vm2, %v3820_v22, %v533_v59 }
  0xd8   : > { %3569 = vmatmul.msk.f32.vlgmr.msra.gmra.mxu2 %vm534_vm2, %v4176_v54  ;;  %716 = vperm.xlu0 %3832, %v706_v6   ;;  %v586_v12 = vsel %vm581_vm1, %v3824_v3, %v3825_v4  ;;  %v587_v34 = vsel %vm581_vm1, %v3825_v4, %v580_v21  ;;  %v585_v36 = vsel %vm581_vm1, %v3795_v32, %v3824_v3  ;;  %v3770_v32 = vunpack.i.h.bf16 %v4084_v18 }
  0xda   : > { %v445_v45 = vsel %vm440_vm4, %v3769_v43, %v3770_v32 }
  0xdd   : > { %v627_v63 = vpop.permute.xlu1 %626 }
  0xde   : > { %v3828_v62 = vpop.permute.xlu0 %3827 }
  0xdf   : > { %v3830_v8 = vunpack.i.h.bf16 %v3828_v62  ;;  %v3829_v9 = vunpack.i.l.bf16 %v3828_v62  ;;  %3562 = vmatmul.msk.f32.gmra.mxu0 %vm534_vm2, %v4193_v2  ;;  %3566 = vmatmul.msk.f32.gmra.mxu1 %vm534_vm2, %v4193_v2 }
  0xe0   : > { %3570 = vmatmul.msk.f32.gmra.mxu2 %vm534_vm2, %v4193_v2 }
  0xe1   : > { %v632_v24 = vsel %vm628_vm0, %v3785_v38, %v3829_v9  ;;  %v633_v28 = vsel %vm628_vm0, %v3829_v9, %v3830_v8  ;;  %v634_v29 = vsel %vm628_vm0, %v3830_v8, %v627_v63  ;;  %v3814_v38 = vunpack.i.l.bf16 %v4157_v39 }
  0xe2   : > { %835 = vmatpush.msra.mxu3 %v632_v24  ;;  %864 = vmatpush.msrb.mxu0 %v633_v28  ;;  %v3755_v39 = vunpack.i.h.bf16 %v4091_v25  ;;  %v3739_v25 = vunpack.i.l.bf16 %v4088_v20  ;;  %v3725_v20 = vunpack.i.h.bf16 %v4074_v13 }
  0xe3   : > { %893 = vmatpush.msrb.mxu1 %v634_v29  ;;  %v491_v47 = vsel %vm487_vm3, %v3810_v46, %v3814_v38  ;;  %v492_v18 = vsel %vm487_vm3, %v3814_v38, %v3815_v37  ;;  %v446_v46 = vsel %vm440_vm4, %v3770_v32, %v4099_v30 }
  0xe4   : > { %836 = vmatpush.msra.mxu3 %v585_v36  ;;  %865 = vmatpush.msrb.mxu0 %v586_v12  ;;  %v398_v51 = vsel %vm393_vm5, %v3754_v44, %v3755_v39  ;;  %v399_v56 = vsel %vm393_vm5, %v3755_v39, %v4078_v15  ;;  %v350_v30 = vsel %vm346_vm6, %v3735_v35, %v3739_v25  ;;  %v707_v15 = vld [vmem:[%s6190_s2 + $0x10] sm:$0xff] }
  0xe5   : > { %894 = vmatpush.msrb.mxu1 %v587_v34  ;;  %v351_v26 = vsel %vm346_vm6, %v3739_v25, %v3740_v48  ;;  %v304_v13 = vsel %vm299_vm7, %v3724_v27, %v3725_v20  ;;  %v305_v19 = vsel %vm299_vm7, %v3725_v20, %v4080_v16  ;;  %721 = vperm.xlu1 %3833, %v707_v15  }
  0xe6   : > { %837 = vmatpush.msra.mxu3 %v538_v42  ;;  %866 = vmatpush.msrb.mxu0 %v539_v40 }
  0xe7   : > { %895 = vmatpush.msrb.mxu1 %v540_v31  ;;  %3563 = vmatmul.msk.f32.gmra.mxu0 %vm534_vm2, %v4217_v41 }
  0xe8   : > { %3567 = vmatmul.msk.f32.gmra.mxu1 %vm534_vm2, %v4217_v41  ;;  %3571 = vmatmul.msk.f32.gmra.mxu2 %vm534_vm2, %v4217_v41 }
  0xe9   : > { %838 = vmatpush.msra.mxu3 %v491_v47  ;;  %867 = vmatpush.msrb.mxu0 %v492_v18 }
  0xea   : > { %896 = vmatpush.msrb.mxu1 %v493_v49 }
  0xeb   : > { %839 = vmatpush.msra.mxu3 %v444_v50  ;;  %868 = vmatpush.msrb.mxu0 %v445_v45 }
  0xec   : > { %897 = vmatpush.msrb.mxu1 %v446_v46 }
  0xed   : > { %840 = vmatpush.msra.mxu3 %v397_v33  ;;  %869 = vmatpush.msrb.mxu0 %v398_v51 }
  0xee   : > { %898 = vmatpush.msrb.mxu1 %v399_v56 }
  0xef   : > { %841 = vmatpush.msra.mxu3 %v350_v30  ;;  %870 = vmatpush.msrb.mxu0 %v351_v26 }
  0xf0   : > { %899 = vmatpush.msrb.mxu1 %v352_v5  ;;  %3564 = vmatmul.msk.f32.gmra.mxu0 %vm534_vm2, %v650_v14 }
  0xf1   : > { %3568 = vmatmul.msk.f32.gmra.mxu1 %vm534_vm2, %v650_v14  ;;  %3572 = vmatmul.msk.f32.gmra.mxu2 %vm534_vm2, %v650_v14 }
  0xf2   : > { %842 = vmatpush.msra.mxu3 %v303_v11  ;;  %871 = vmatpush.msrb.mxu0 %v304_v13 }
  0xf3   : > { %900 = vmatpush.msrb.mxu1 %v305_v19 }
  0xf4   : > { %843 = vmatpush.msra.mxu3 %v4035_v7  ;;  %872 = vmatpush.msrb.mxu0 %v4018_v0 }
  0xf5   : > { %3573 = vmatmul.msk.f32.vlgmr.msra.gmra.mxu3 %vm534_vm2, %v4176_v54  ;;  %901 = vmatpush.msrb.mxu1 %v4020_v1 }
  0xf8   : > { %3577 = vmatmul.msk.f32.vlgmr.msrb.gmra.mxu0 %vm534_vm2, %v4176_v54 }
  0xf9   : > { %3581 = vmatmul.msk.f32.vlgmr.msrb.gmra.mxu1 %vm534_vm2, %v4176_v54 }
  0xfd   : > { %3574 = vmatmul.msk.f32.gmra.mxu3 %vm534_vm2, %v4193_v2 }
 0x100   : > { %3578 = vmatmul.msk.f32.gmra.mxu0 %vm534_vm2, %v4193_v2 }
 0x101   : > { %3582 = vmatmul.msk.f32.gmra.mxu1 %vm534_vm2, %v4193_v2 }
 0x105   : > { %3575 = vmatmul.msk.f32.gmra.mxu3 %vm534_vm2, %v4217_v41 }
 0x108   : > { %3579 = vmatmul.msk.f32.gmra.mxu0 %vm534_vm2, %v4217_v41 }
 0x109   : > { %3583 = vmatmul.msk.f32.gmra.mxu1 %vm534_vm2, %v4217_v41 }
 0x10d   : > { %3576 = vmatmul.msk.f32.gmra.mxu3 %vm534_vm2, %v650_v14 }
 0x110   : > { %3580 = vmatmul.msk.f32.gmra.mxu0 %vm534_vm2, %v650_v14 }
 0x111   : > { %3584 = vmatmul.msk.f32.gmra.mxu1 %vm534_vm2, %v650_v14 }
 0x127   : > { %v712_v0 = vpop.permute.xlu2 %711 }
 0x12f   : > { %v4336_v9 = vpop.permute.xlu2 %726 }
 0x14a   : > { %v4308_v52 = vpop.permute.xlu0 %716 }
 0x154   : > { %v758_v1 = vpop.f32.mrf.mxu0  ;;  %v787_v7 = vpop.f32.mrf.mxu1 }
 0x155   : > { %v759_v16 = vadd.f32 %v758_v1, %v712_v0  ;;  %v788_v17 = vadd.f32 %v787_v7, %v712_v0 }
 0x157   : > { %v4297_v35 = vmax.f32 %v759_v16, 0.0  ;;  %v4299_v10 = vmax.f32 %v788_v17, 0.0  ;;  %v722_v39 = vpop.permute.xlu1 %721 }
 0x159   : > { %1062 = vrot.lane.b32.xlu2 %v4299_v10, %s3946_s14  ;;  %1388 = vrot.lane.b32.xlu0 %v4297_v35, %s3948_s16  ;;  %988 = vst [vmem:[#allocation4 + $0x8] sm:$0xff] %v4299_v10 }
 0x15a   : > { %1060 = vrot.lane.b32.xlu1 %v4297_v35, %s3946_s14 }
 0x15b   : > { %v816_v53 = vpop.f32.mrf.mxu2 }
 0x15c   : > { %v817_v54 = vadd.f32 %v816_v53, %v712_v0  ;;  %v761_v55 = vpop.f32.mrf.mxu0  ;;  %v790_v57 = vpop.f32.mrf.mxu1 }
 0x15d   : > { %v762_v58 = vadd.f32 %v761_v55, %v4308_v52  ;;  %v791_v59 = vadd.f32 %v790_v57, %v4308_v52 }
 0x15e   : > { %v4312_v60 = vmax.f32 %v817_v54, 0.0 }
 0x15f   : > { %v4314_v6 = vmax.f32 %v762_v58, 0.0  ;;  %v4317_v2 = vmax.f32 %v791_v59, 0.0 }
 0x160   : > { %989 = vst [vmem:[#allocation4 + $0x10] sm:$0xff] %v4312_v60 }
 0x161   : > { %1226 = vrot.lane.b32.xlu2 %v4299_v10, %s3947_s15  ;;  %2044 = vrot.lane.b32.xlu0 %v4297_v35, %s3952_s21  ;;  %995 = vst [vmem:[#allocation4 + $0x38] sm:$0xff] %v4317_v2 }
 0x162   : > { %1224 = vrot.lane.b32.xlu1 %v4297_v35, %s3947_s15 }
 0x163   : > { %v819_v4 = vpop.f32.mrf.mxu2 }
 0x164   : > { %v764_v61 = vpop.f32.mrf.mxu0  ;;  %v820_v62 = vadd.f32 %v819_v4, %v4308_v52 }
 0x165   : > { %v793_v63 = vpop.f32.mrf.mxu1  ;;  %v765_v47 = vadd.f32 %v764_v61, %v722_v39 }
 0x166   : > { %v4327_v3 = vmax.f32 %v820_v62, 0.0  ;;  %v794_v18 = vadd.f32 %v793_v63, %v722_v39 }
 0x167   : > { %v4371_v25 = vmax.f32 %v765_v47, 0.0 }
 0x168   : > { %996 = vst [vmem:[#allocation4 + $0x40] sm:$0xff] %v4327_v3  ;;  %v4376_v33 = vmax.f32 %v794_v18, 0.0 }
 0x169   : > { %1716 = vrot.lane.b32.xlu2 %v4297_v35, %s3950_s19  ;;  %1880 = vrot.lane.b32.xlu0 %v4297_v35, %s3953_s23 }
 0x16a   : > { %1390 = vrot.lane.b32.xlu1 %v4299_v10, %s3948_s16 }
 0x16b   : > { %v822_v8 = vpop.f32.mrf.mxu2 }
 0x16c   : > { %v823_v49 = vadd.f32 %v822_v8, %v722_v39 }
 0x16d   : > { %v767_v21 = vpop.f32.mrf.mxu0 }
 0x16e   : > { %v768_v22 = vadd.f32 %v767_v21, %v4336_v9  ;;  %v796_v23 = vpop.f32.mrf.mxu1  ;;  %v4373_v50 = vmax.f32 %v823_v49, 0.0 }
 0x16f   : > { %v797_v24 = vadd.f32 %v796_v23, %v4336_v9 }
 0x170   : > { %v4340_v28 = vmax.f32 %v768_v22, 0.0  ;;  %1002 = vst [vmem:[#allocation4 + $0x70] sm:$0xff] %v4373_v50 }
 0x171   : > { %v4342_v29 = vmax.f32 %v797_v24, 0.0  ;;  %1074 = vrot.lane.b32.xlu2 %v4317_v2, %s3946_s14  ;;  %1718 = vrot.lane.b32.xlu0 %v4299_v10, %s3950_s19 }
 0x172   : > { %2046 = vrot.lane.b32.xlu1 %v4299_v10, %s3952_s21 }
 0x173   : > { %1007 = vst [vmem:[#allocation4 + $0x98] sm:$0xff] %v4342_v29 }
 0x174   : > { %v825_v12 = vpop.f32.mrf.mxu2 }
 0x175   : > { %v826_v34 = vadd.f32 %v825_v12, %v4336_v9  ;;  %v874_v36 = vpop.f32.mrf.mxu0 }
 0x176   : > { %v875_v40 = vadd.f32 %v874_v36, %v712_v0  ;;  %v903_v37 = vpop.f32.mrf.mxu1 }
 0x177   : > { %v4352_v38 = vmax.f32 %v826_v34, 0.0  ;;  %v904_v41 = vadd.f32 %v903_v37, %v712_v0 }
 0x178   : > { %v4354_v42 = vmax.f32 %v875_v40, 0.0  ;;  %v845_v43 = vpop.f32.mrf.mxu3 }
 0x179   : > { %1008 = vst [vmem:[#allocation4 + $0xa0] sm:$0xff] %v4352_v38  ;;  %v4357_v31 = vmax.f32 %v904_v41, 0.0  ;;  %v846_v32 = vadd.f32 %v845_v43, %v712_v0  ;;  %1238 = vrot.lane.b32.xlu2 %v4317_v2, %s3947_s15  ;;  %1064 = vrot.lane.b32.xlu0 %v4312_v60, %s3946_s14 }
 0x17a   : > { %6223 = vst [vmem:[#allocation11_spill] sm:$0xff] %v4354_v42  ;;  %1882 = vrot.lane.b32.xlu1 %v4299_v10, %s3953_s23 }
 0x17b   : > { %6224 = vst [vmem:[#allocation12_spill] sm:$0xff] %v4357_v31  ;;  %v4366_v44 = vmax.f32 %v846_v32, 0.0 }
 0x17c   : > { %991 = vst [vmem:[#allocation4 + $0x20] sm:$0xff] %v4354_v42 }
 0x17d   : > { %993 = vst.msk [vmem:[#allocation4 + $0x28] sm:$0xff] %vm992_vm8, %v4357_v31  ;;  %v877_v48 = vpop.f32.mrf.mxu0 }
 0x17e   : > { %990 = vst [vmem:[#allocation4 + $0x18] sm:$0xff] %v4366_v44  ;;  %v878_v45 = vadd.f32 %v877_v48, %v4308_v52  ;;  %v906_v46 = vpop.f32.mrf.mxu1 }
 0x17f   : > { %v907_v51 = vadd.f32 %v906_v46, %v4308_v52 }
 0x180   : > { %v4379_v20 = vmax.f32 %v878_v45, 0.0  ;;  %v848_v27 = vpop.f32.mrf.mxu3 }
 0x181   : > { %v4381_v56 = vmax.f32 %v907_v51, 0.0  ;;  %v849_v14 = vadd.f32 %v848_v27, %v4308_v52  ;;  %1400 = vrot.lane.b32.xlu2 %v4314_v6, %s3948_s16  ;;  %1228 = vrot.lane.b32.xlu0 %v4312_v60, %s3947_s15 }
 0x182   : > { %6225 = vst [vmem:[#allocation13_spill] sm:$0xff] %v4379_v20  ;;  %1066 = vrot.lane.b32.xlu1 %v4366_v44, %s3946_s14 }
 0x183   : > { %6226 = vst [vmem:[#allocation14_spill] sm:$0xff] %v4381_v56  ;;  %v4392_v30 = vmax.f32 %v849_v14, 0.0 }
 0x184   : > { %998 = vst [vmem:[#allocation4 + $0x50] sm:$0xff] %v4379_v20 }
 0x185   : > { %999 = vst.msk [vmem:[#allocation4 + $0x58] sm:$0xff] %vm992_vm8, %v4381_v56  ;;  %v880_v26 = vpop.f32.mrf.mxu0 }
 0x186   : > { %997 = vst [vmem:[#allocation4 + $0x48] sm:$0xff] %v4392_v30  ;;  %v909_v5 = vpop.f32.mrf.mxu1  ;;  %v881_v11 = vadd.f32 %v880_v26, %v722_v39 }
 0x187   : > { %v910_v13 = vadd.f32 %v909_v5, %v722_v39 }
 0x188   : > { %v851_v15 = vpop.f32.mrf.mxu3  ;;  %v4397_v19 = vmax.f32 %v881_v11, 0.0 }
 0x189   : > { %2056 = vrot.lane.b32.xlu2 %v4314_v6, %s3952_s21  ;;  %1402 = vrot.lane.b32.xlu0 %v4317_v2, %s3948_s16  ;;  %v852_v0 = vadd.f32 %v851_v15, %v722_v39  ;;  %v4403_v1 = vmax.f32 %v910_v13, 0.0 }
 0x18a   : > { %6227 = vst [vmem:[#allocation15_spill] sm:$0xff] %v4397_v19  ;;  %1230 = vrot.lane.b32.xlu1 %v4366_v44, %s3947_s15 }
 0x18b   : > { %6228 = vst [vmem:[#allocation16_spill] sm:$0xff] %v4403_v1  ;;  %v4408_v7 = vmax.f32 %v852_v0, 0.0 }
 0x18c   : > { %1004 = vst [vmem:[#allocation4 + $0x80] sm:$0xff] %v4397_v19 }
 0x18d   : > { %1005 = vst.msk [vmem:[#allocation4 + $0x88] sm:$0xff] %vm992_vm8, %v4403_v1  ;;  %v883_v16 = vpop.f32.mrf.mxu0 }
 0x18e   : > { %1003 = vst [vmem:[#allocation4 + $0x78] sm:$0xff] %v4408_v7  ;;  %v884_v17 = vadd.f32 %v883_v16, %v4336_v9  ;;  %v912_v52 = vpop.f32.mrf.mxu1 }
 0x18f   : > { %v913_v53 = vadd.f32 %v912_v52, %v4336_v9 }
 0x190   : > { %v4415_v54 = vmax.f32 %v884_v17, 0.0  ;;  %v854_v55 = vpop.f32.mrf.mxu3 }
 0x191   : > { %v4417_v57 = vmax.f32 %v913_v53, 0.0  ;;  %v855_v58 = vadd.f32 %v854_v55, %v4336_v9  ;;  %1894 = vrot.lane.b32.xlu2 %v4317_v2, %s3953_s23  ;;  %2058 = vrot.lane.b32.xlu0 %v4317_v2, %s3952_s21 }
 0x192   : > { %6229 = vst [vmem:[#allocation17_spill] sm:$0xff] %v4415_v54  ;;  %1072 = vrot.lane.b32.xlu1 %v4314_v6, %s3946_s14 }
 0x193   : > { %6230 = vst [vmem:[#allocation18_spill] sm:$0xff] %v4417_v57  ;;  %v4427_v59 = vmax.f32 %v855_v58, 0.0 }
 0x194   : > { %1010 = vst [vmem:[#allocation4 + $0xb0] sm:$0xff] %v4415_v54 }
 0x195   : > { %1011 = vst.msk [vmem:[#allocation4 + $0xb8] sm:$0xff] %vm992_vm8, %v4417_v57 }
 0x196   : > { %1009 = vst [vmem:[#allocation4 + $0xa8] sm:$0xff] %v4427_v59 }
 0x199   : > { %1564 = vrot.lane.b32.xlu2 %v4314_v6, %s3949_s17  ;;  %1728 = vrot.lane.b32.xlu0 %v4314_v6, %s3950_s19 }
 0x19a   : > { %1236 = vrot.lane.b32.xlu1 %v4314_v6, %s3947_s15 }
 0x1a1   : > { %1086 = vrot.lane.b32.xlu2 %v4376_v33, %s3946_s14  ;;  %1566 = vrot.lane.b32.xlu0 %v4317_v2, %s3949_s17 }
 0x1a2   : > { %1892 = vrot.lane.b32.xlu1 %v4314_v6, %s3953_s23 }
 0x1a9   : > { %1414 = vrot.lane.b32.xlu2 %v4376_v33, %s3948_s16  ;;  %1076 = vrot.lane.b32.xlu0 %v4327_v3, %s3946_s14 }
 0x1aa   : > { %1730 = vrot.lane.b32.xlu1 %v4317_v2, %s3950_s19 }
 0x1b1   : > { %2070 = vrot.lane.b32.xlu2 %v4376_v33, %s3952_s21  ;;  %1240 = vrot.lane.b32.xlu0 %v4327_v3, %s3947_s15 }
 0x1b2   : > { %1078 = vrot.lane.b32.xlu1 %v4392_v30, %s3946_s14 }
 0x1b3   : > { %v1063_v4 = vpop.permute.xlu2 %1062 }
 0x1b9   : > { %1250 = vrot.lane.b32.xlu2 %v4376_v33, %s3947_s15  ;;  %1906 = vrot.lane.b32.xlu0 %v4376_v33, %s3953_s23 }
 0x1ba   : > { %1242 = vrot.lane.b32.xlu1 %v4392_v30, %s3947_s15 }
 0x1bb   : > { %v1227_v61 = vpop.permute.xlu2 %1226 }
 0x1c1   : > { %1904 = vrot.lane.b32.xlu2 %v4371_v25, %s3953_s23  ;;  %1576 = vrot.lane.b32.xlu0 %v4371_v25, %s3949_s17 }
 0x1c2   : > { %1084 = vrot.lane.b32.xlu1 %v4371_v25, %s3946_s14 }
 0x1c3   : > { %v1717_v62 = vpop.permute.xlu2 %1716 }
 0x1c9   : > { %1742 = vrot.lane.b32.xlu2 %v4376_v33, %s3950_s19  ;;  %1088 = vrot.lane.b32.xlu0 %v4373_v50, %s3946_s14 }
 0x1ca   : > { %1248 = vrot.lane.b32.xlu1 %v4371_v25, %s3947_s15 }
 0x1cb   : > { %v4474_v63 = vpop.permute.xlu2 %1074  ;;  %v1389_v8 = vpop.permute.xlu0 %1388 }
 0x1cc   : > { %v1061_v9 = vpop.permute.xlu1 %1060 }
 0x1cd   : > { %v4477_v21 = vsel %vm299_vm7, %v1061_v9, %v1063_v4 }
 0x1d1   : > { %1098 = vrot.lane.b32.xlu2 %v4342_v29, %s3946_s14  ;;  %1426 = vrot.lane.b32.xlu0 %v4342_v29, %s3948_s16 }
 0x1d2   : > { %1412 = vrot.lane.b32.xlu1 %v4371_v25, %s3948_s16 }
 0x1d3   : > { %v4485_v22 = vpop.permute.xlu2 %1238  ;;  %v2045_v23 = vpop.permute.xlu0 %2044 }
 0x1d4   : > { %v1225_v24 = vpop.permute.xlu1 %1224 }
 0x1d5   : > { %v4488_v12 = vsel %vm346_vm6, %v1225_v24, %v1227_v61 }
 0x1d9   : > { %1424 = vrot.lane.b32.xlu2 %v4340_v28, %s3948_s16  ;;  %2080 = vrot.lane.b32.xlu0 %v4340_v28, %s3952_s21 }
 0x1da   : > { %2068 = vrot.lane.b32.xlu1 %v4371_v25, %s3952_s21 }
 0x1db   : > { %v1401_v34 = vpop.permute.xlu2 %1400  ;;  %v1881_v36 = vpop.permute.xlu0 %1880 }
 0x1dc   : > { %v4496_v40 = vpop.permute.xlu1 %1390 }
 0x1dd   : > { %v4500_v37 = vsel %vm393_vm5, %v1389_v8, %v4496_v40 }
 0x1e1   : > { %1262 = vrot.lane.b32.xlu2 %v4342_v29, %s3947_s15  ;;  %1916 = vrot.lane.b32.xlu0 %v4340_v28, %s3953_s23 }
 0x1e2   : > { %1740 = vrot.lane.b32.xlu1 %v4371_v25, %s3950_s19 }
 0x1e3   : > { %v2057_v41 = vpop.permute.xlu2 %2056  ;;  %v4508_v43 = vpop.permute.xlu0 %1718 }
 0x1e4   : > { %v4512_v32 = vsel %vm487_vm3, %v1717_v62, %v4508_v43  ;;  %v4514_v39 = vpop.permute.xlu1 %2046 }
 0x1e5   : > { %v4518_v47 = vsel %vm581_vm1, %v2045_v23, %v4514_v39 }
 0x1e9   : > { %1752 = vrot.lane.b32.xlu2 %v4340_v28, %s3950_s19  ;;  %1754 = vrot.lane.b32.xlu0 %v4342_v29, %s3950_s19 }
 0x1ea   : > { %1578 = vrot.lane.b32.xlu1 %v4376_v33, %s3949_s17 }
 0x1eb   : > { %v4526_v18 = vpop.permute.xlu2 %1894  ;;  %v1065_v49 = vpop.permute.xlu0 %1064 }
 0x1ec   : > { %6231 = vst [vmem:[#allocation19_spill] sm:$0xff] %v4526_v18  ;;  %v4529_v48 = vsel %vm299_vm7, %v1063_v4, %v1065_v49  ;;  %v4531_v45 = vpop.permute.xlu1 %1882 }
 0x1ed   : > { %6232 = vst [vmem:[#allocation20_spill] sm:$0xff] %v4529_v48  ;;  %v4535_v46 = vsel %vm534_vm2, %v1881_v36, %v4531_v45 }
 0x1ee   : > { %6233 = vst [vmem:[#allocation21_spill] sm:$0xff] %v4531_v45 }
 0x1f1   : > { %1590 = vrot.lane.b32.xlu2 %v4342_v29, %s3949_s17  ;;  %1100 = vrot.lane.b32.xlu0 %v4352_v38, %s3946_s14 }
 0x1f2   : > { %1090 = vrot.lane.b32.xlu1 %v4408_v7, %s3946_s14 }
 0x1f3   : > { %v1565_v51 = vpop.permute.xlu2 %1564  ;;  %v1229_v27 = vpop.permute.xlu0 %1228 }
 0x1f4   : > { %v4544_v14 = vsel %vm346_vm6, %v1227_v61, %v1229_v27  ;;  %v4546_v26 = vpop.permute.xlu1 %1066 }
 0x1f5   : > { %v1110_v5 = vsel %vm299_vm7, %v1065_v49, %v4546_v26 }
 0x1f6   : > { %1154 = vst [vmem:[#allocation4 + $0xd0] sm:$0xff] %v1110_v5 }
 0x1f9   : > { %1554 = vrot.lane.b32.xlu2 %v4299_v10, %s3949_s17  ;;  %1392 = vrot.lane.b32.xlu0 %v4312_v60, %s3948_s16 }
 0x1fa   : > { %1096 = vrot.lane.b32.xlu1 %v4340_v28, %s3946_s14 }
 0x1fb   : > { %v4556_v11 = vpop.permute.xlu2 %1086  ;;  %v4558_v13 = vpop.permute.xlu0 %1402 }
 0x1fc   : > { %v4562_v15 = vsel %vm393_vm5, %v1401_v34, %v4558_v13  ;;  %v4564_v0 = vpop.permute.xlu1 %1230 }
 0x1fd   : > { %v1274_v16 = vsel %vm346_vm6, %v1229_v27, %v4564_v0 }
 0x1fe   : > { %1318 = vst [vmem:[#allocation4 + $0x190] sm:$0xff] %v1274_v16 }
 0x201   : > { %1404 = vrot.lane.b32.xlu2 %v4327_v3, %s3948_s16  ;;  %1428 = vrot.lane.b32.xlu0 %v4352_v38, %s3948_s16 }
 0x202   : > { %2082 = vrot.lane.b32.xlu1 %v4342_v29, %s3952_s21 }
 0x203   : > { %v4574_v17 = vpop.permute.xlu2 %1414  ;;  %v4576_v52 = vpop.permute.xlu0 %2058 }
 0x204   : > { %v4580_v53 = vsel %vm581_vm1, %v2057_v41, %v4576_v52  ;;  %v1073_v55 = vpop.permute.xlu1 %1072 }
 0x205   : > { %v4584_v58 = vsel %vm299_vm7, %v1073_v55, %v4474_v63 }
 0x209   : > { %1252 = vrot.lane.b32.xlu2 %v4373_v50, %s3947_s15  ;;  %1070 = vrot.lane.b32.xlu0 %v4357_v31, %s3946_s14 }
 0x20a   : > { %1260 = vrot.lane.b32.xlu1 %v4340_v28, %s3947_s15 }
 0x20b   : > { %v4592_v4 = vpop.permute.xlu2 %2070  ;;  %v1729_v61 = vpop.permute.xlu0 %1728 }
 0x20c   : > { %6234 = vst [vmem:[#allocation22_spill] sm:$0xff] %v4592_v4  ;;  %v1237_v62 = vpop.permute.xlu1 %1236 }
 0x20d   : > { %v4596_v8 = vsel %vm346_vm6, %v1237_v62, %v4485_v22 }
 0x211   : > { %1068 = vrot.lane.b32.xlu2 %v4354_v42, %s3946_s14  ;;  %1234 = vrot.lane.b32.xlu0 %v4357_v31, %s3947_s15 }
 0x212   : > { %1918 = vrot.lane.b32.xlu1 %v4342_v29, %s3953_s23 }
 0x213   : > { %v4604_v9 = vpop.permute.xlu2 %1250  ;;  %v4606_v23 = vpop.permute.xlu0 %1566 }
 0x214   : > { %6235 = vst [vmem:[#allocation23_spill] sm:$0xff] %v4606_v23  ;;  %v4610_v24 = vsel %vm440_vm4, %v1565_v51, %v4606_v23  ;;  %v1893_v34 = vpop.permute.xlu1 %1892 }
 0x215   : > { %v4614_v36 = vsel %vm534_vm2, %v1893_v34, %v4526_v18 }
 0x219   : > { %1232 = vrot.lane.b32.xlu2 %v4354_v42, %s3947_s15  ;;  %1082 = vrot.lane.b32.xlu0 %v4381_v56, %s3946_s14 }
 0x21a   : > { %1588 = vrot.lane.b32.xlu1 %v4340_v28, %s3949_s17 }
 0x21b   : > { %v1905_v41 = vpop.permute.xlu2 %1904  ;;  %v1077_v49 = vpop.permute.xlu0 %1076 }
 0x21c   : > { %v4624_v51 = vsel %vm299_vm7, %v4474_v63, %v1077_v49  ;;  %v4626_v27 = vpop.permute.xlu1 %1730 }
 0x21d   : > { %6236 = vst [vmem:[#allocation24_spill] sm:$0xff] %v4624_v51  ;;  %v4630_v5 = vsel %vm487_vm3, %v1729_v61, %v4626_v27 }
 0x21e   : > { %6237 = vst [vmem:[#allocation25_spill] sm:$0xff] %v4626_v27 }
 0x221   : > { %1080 = vrot.lane.b32.xlu2 %v4379_v20, %s3946_s14  ;;  %1246 = vrot.lane.b32.xlu0 %v4381_v56, %s3947_s15 }
 0x222   : > { %1102 = vrot.lane.b32.xlu1 %v4427_v59, %s3946_s14 }
 0x223   : > { %v4638_v16 = vpop.permute.xlu2 %1742  ;;  %v1241_v55 = vpop.permute.xlu0 %1240 }
 0x224   : > { %6238 = vst [vmem:[#allocation26_spill] sm:$0xff] %v4638_v16  ;;  %v4642_v63 = vsel %vm346_vm6, %v4485_v22, %v1241_v55  ;;  %v4644_v62 = vpop.permute.xlu1 %1078 }
 0x225   : > { %v1115_v61 = vsel %vm299_vm7, %v1077_v49, %v4644_v62 }
 0x226   : > { %1160 = vst [vmem:[#allocation4 + $0x100] sm:$0xff] %v1115_v61 }
 0x229   : > { %1244 = vrot.lane.b32.xlu2 %v4379_v20, %s3947_s15  ;;  %1094 = vrot.lane.b32.xlu0 %v4403_v1, %s3946_s14 }
 0x22a   : > { %1552 = vrot.lane.b32.xlu1 %v4297_v35, %s3949_s17 }
 0x22b   : > { %v4654_v34 = vpop.permute.xlu2 %1098  ;;  %v4656_v31 = vpop.permute.xlu0 %1906 }
 0x22c   : > { %v4660_v22 = vsel %vm534_vm2, %v1905_v41, %v4656_v31  ;;  %v4662_v56 = vpop.permute.xlu1 %1242 }
 0x22d   : > { %v1279_v49 = vsel %vm346_vm6, %v1241_v55, %v4662_v56 }
 0x22e   : > { %1324 = vst [vmem:[#allocation4 + $0x1c0] sm:$0xff] %v1279_v49 }
 0x231   : > { %1092 = vrot.lane.b32.xlu2 %v4397_v19, %s3946_s14  ;;  %1106 = vrot.lane.b32.xlu0 %v4417_v57, %s3946_s14 }
 0x232   : > { %1416 = vrot.lane.b32.xlu1 %v4373_v50, %s3948_s16 }
 0x233   : > { %v1425_v61 = vpop.permute.xlu2 %1424  ;;  %v1577_v1 = vpop.permute.xlu0 %1576 }
 0x234   : > { %v1085_v27 = vpop.permute.xlu1 %1084 }
 0x235   : > { %v4674_v41 = vsel %vm299_vm7, %v1085_v27, %v4556_v11 }
 0x239   : > { %1104 = vrot.lane.b32.xlu2 %v4415_v54, %s3946_s14  ;;  %2084 = vrot.lane.b32.xlu0 %v4352_v38, %s3952_s21 }
 0x23a   : > { %1264 = vrot.lane.b32.xlu1 %v4352_v38, %s3947_s15 }
 0x23b   : > { %v4682_v55 = vpop.permute.xlu2 %1262  ;;  %v1089_v49 = vpop.permute.xlu0 %1088 }
 0x23c   : > { %v4686_v57 = vsel %vm299_vm7, %v4556_v11, %v1089_v49  ;;  %v1249_v20 = vpop.permute.xlu1 %1248 }
 0x23d   : > { %6239 = vst [vmem:[#allocation27_spill] sm:$0xff] %v4686_v57  ;;  %v4690_v27 = vsel %vm346_vm6, %v1249_v20, %v4604_v9 }
 0x241   : > { %2060 = vrot.lane.b32.xlu2 %v4327_v3, %s3952_s21  ;;  %2048 = vrot.lane.b32.xlu0 %v4312_v60, %s3952_s21 }
 0x242   : > { %2072 = vrot.lane.b32.xlu1 %v4373_v50, %s3952_s21 }
 0x243   : > { %v1753_v42 = vpop.permute.xlu2 %1752  ;;  %v1427_v45 = vpop.permute.xlu0 %1426 }
 0x244   : > { %v1451_v54 = vsel %vm393_vm5, %v1425_v61, %v1427_v45  ;;  %v1413_v11 = vpop.permute.xlu1 %1412 }
 0x245   : > { %v1446_v19 = vsel %vm393_vm5, %v1413_v11, %v4574_v17  ;;  %2636 = vmatpush.msra.mxu0 %v1451_v54  ;;  %3635 = vmatpush.msrb.mxu2 %v1451_v54 }
 0x247   : > { %2637 = vmatpush.msra.mxu0 %v1446_v19  ;;  %3636 = vmatpush.msrb.mxu2 %v1446_v19 }
 0x249   : > { %1908 = vrot.lane.b32.xlu2 %v4373_v50, %s3953_s23  ;;  %1896 = vrot.lane.b32.xlu0 %v4327_v3, %s3953_s23 }
 0x24a   : > { %1920 = vrot.lane.b32.xlu1 %v4352_v38, %s3953_s23  ;;  %2638 = vmatpush.msra.mxu0 %v4562_v15 }
 0x24b   : > { %v4708_v20 = vpop.permute.xlu2 %1590  ;;  %v2081_v61 = vpop.permute.xlu0 %2080  ;;  %3637 = vmatpush.msrb.mxu2 %v4562_v15 }
 0x24c   : > { %v2069_v11 = vpop.permute.xlu1 %2068  ;;  %2639 = vmatpush.msra.mxu0 %v4500_v37 }
 0x24d   : > { %v2102_v19 = vsel %vm581_vm1, %v2069_v11, %v4592_v4  ;;  %3638 = vmatpush.msrb.mxu2 %v4500_v37 }
 0x251   : > { %1756 = vrot.lane.b32.xlu2 %v4352_v38, %s3950_s19  ;;  %1744 = vrot.lane.b32.xlu0 %v4373_v50, %s3950_s19 }
 0x252   : > { %1884 = vrot.lane.b32.xlu1 %v4312_v60, %s3953_s23 }
 0x253   : > { %v4721_v54 = vpop.permute.xlu2 %1554  ;;  %v4723_v15 = vpop.permute.xlu0 %1916 }
 0x254   : > { %v1741_v48 = vpop.permute.xlu1 %1740 }
 0x255   : > { %v4727_v18 = vsel %vm487_vm3, %v1741_v48, %v4638_v16 }
 0x259   : > { %1720 = vrot.lane.b32.xlu2 %v4312_v60, %s3950_s19  ;;  %1592 = vrot.lane.b32.xlu0 %v4352_v38, %s3949_s17 }
 0x25a   : > { %1732 = vrot.lane.b32.xlu1 %v4327_v3, %s3950_s19 }
 0x25b   : > { %v4735_v37 = vpop.permute.xlu2 %1404  ;;  %v4737_v11 = vpop.permute.xlu0 %1754 }
 0x25c   : > { %6240 = vst [vmem:[#allocation28_spill] sm:$0xff] %v4735_v37  ;;  %v4742_v23 = vsel %vm393_vm5, %v4558_v13, %v4735_v37  ;;  %v4746_v48 = vsel %vm487_vm3, %v1753_v42, %v4737_v11  ;;  %v4748_v16 = vpop.permute.xlu1 %1578 }
 0x25d   : > { %6241 = vst [vmem:[#allocation29_spill] sm:$0xff] %v4748_v16  ;;  %v4752_v51 = vsel %vm440_vm4, %v1577_v1, %v4748_v16 }
 0x261   : > { %1568 = vrot.lane.b32.xlu2 %v4327_v3, %s3949_s17  ;;  %1556 = vrot.lane.b32.xlu0 %v4312_v60, %s3949_s17 }
 0x262   : > { %1580 = vrot.lane.b32.xlu1 %v4373_v50, %s3949_s17 }
 0x263   : > { %v4760_v13 = vpop.permute.xlu2 %1252  ;;  %v4762_v37 = vpop.permute.xlu0 %1100 }
 0x264   : > { %6242 = vst [vmem:[#allocation30_spill] sm:$0xff] %v4760_v13  ;;  %v4767_v42 = vsel %vm346_vm6, %v4604_v9, %v4760_v13  ;;  %v4772_v1 = vsel %vm299_vm7, %v4654_v34, %v4762_v37  ;;  %v4774_v16 = vpop.permute.xlu1 %1090 }
 0x265   : > { %6243 = vst [vmem:[#allocation31_spill] sm:$0xff] %v4772_v1  ;;  %v1120_v57 = vsel %vm299_vm7, %v1089_v49, %v4774_v16 }
 0x266   : > { %1166 = vst [vmem:[#allocation4 + $0x130] sm:$0xff] %v1120_v57 }
 0x269   : > { %2246 = vrot.lane.b32.xlu2 %v4342_v29, %s3951_s20  ;;  %2232 = vrot.lane.b32.xlu0 %v4371_v25, %s3951_s20 }
 0x26a   : > { %2244 = vrot.lane.b32.xlu1 %v4340_v28, %s3951_s20 }
 0x26b   : > { %v1069_v9 = vpop.permute.xlu2 %1068  ;;  %v4784_v13 = vpop.permute.xlu0 %1392 }
 0x26c   : > { %6244 = vst [vmem:[#allocation32_spill] sm:$0xff] %v4784_v13  ;;  %v1111_v1 = vsel %vm299_vm7, %v4546_v26, %v1069_v9  ;;  %v4791_v49 = vsel %vm393_vm5, %v4496_v40, %v4784_v13  ;;  %v1097_v57 = vpop.permute.xlu1 %1096 }
 0x26d   : > { %1155 = vst [vmem:[#allocation4 + $0xd8] sm:$0xff] %v1111_v1  ;;  %v1123_v29 = vsel %vm299_vm7, %v1097_v57, %v4654_v34 }
 0x271   : > { %2220 = vrot.lane.b32.xlu2 %v4314_v6, %s3951_s20  ;;  %2222 = vrot.lane.b32.xlu0 %v4317_v2, %s3951_s20 }
 0x272   : > { %2234 = vrot.lane.b32.xlu1 %v4376_v33, %s3951_s20 }
 0x273   : > { %v1233_v26 = vpop.permute.xlu2 %1232  ;;  %v4801_v4 = vpop.permute.xlu0 %1428 }
 0x274   : > { %v1275_v40 = vsel %vm346_vm6, %v4564_v0, %v1233_v26  ;;  %v1452_v1 = vsel %vm393_vm5, %v1427_v45, %v4801_v4  ;;  %v4807_v13 = vpop.permute.xlu1 %2082 }
 0x275   : > { %1319 = vst [vmem:[#allocation4 + $0x198] sm:$0xff] %v1275_v40  ;;  %v2107_v34 = vsel %vm581_vm1, %v2081_v61, %v4807_v13  ;;  %2759 = vmatpush.msra.mxu1 %v1452_v1  ;;  %v6246_v40 = vld [vmem:[#allocation31_spill] sm:$0xff] }
 0x276   : > { %2677 = vmatpush.msrb.mxu3 %v2107_v34  ;;  %v4982_v1 = vld [vmem:[#allocation7 + $0x20] sm:$0xff] }
 0x278   : > { %2678 = vmatpush.msrb.mxu3 %v2102_v19 }
 0x279   : > { %2210 = vrot.lane.b32.xlu2 %v4299_v10, %s3951_s20  ;;  %2248 = vrot.lane.b32.xlu0 %v4352_v38, %s3951_s20 }
 0x27a   : > { %2208 = vrot.lane.b32.xlu1 %v4297_v35, %s3951_s20  ;;  %2679 = vmatpush.msrb.mxu3 %v4580_v53 }
 0x27b   : > { %v1081_v2 = vpop.permute.xlu2 %1080  ;;  %v1071_v45 = vpop.permute.xlu0 %1070 }
 0x27c   : > { %v1116_v0 = vsel %vm299_vm7, %v4644_v62, %v1081_v2  ;;  %v1112_v61 = vsel %vm299_vm7, %v1069_v9, %v1071_v45  ;;  %1157 = vst.msk [vmem:[#allocation4 + $0xe8] sm:$0xff] %vm992_vm8, %v1071_v45  ;;  %v1261_v19 = vpop.permute.xlu1 %1260  ;;  %2680 = vmatpush.msrb.mxu3 %v4518_v47  ;;  %v6249_v45 = vld [vmem:[#allocation23_spill] sm:$0xff] }
 0x27d   : > { %1161 = vst [vmem:[#allocation4 + $0x108] sm:$0xff] %v1116_v0  ;;  %v1287_v10 = vsel %vm346_vm6, %v1261_v19, %v4682_v55 }
 0x27e   : > { %1156 = vst [vmem:[#allocation4 + $0xe0] sm:$0xff] %v1112_v61  ;;  %2640 = vmatpush.msra.mxu0 %v1287_v10  ;;  %3639 = vmatpush.msrb.mxu2 %v1287_v10  ;;  %v6251_v10 = vld [vmem:[#allocation20_spill] sm:$0xff] }
 0x280   : > { %2641 = vmatpush.msra.mxu0 %v4690_v27  ;;  %3640 = vmatpush.msrb.mxu2 %v4690_v27 }
 0x281   : > { %2224 = vrot.lane.b32.xlu2 %v4327_v3, %s3951_s20  ;;  %2212 = vrot.lane.b32.xlu0 %v4312_v60, %s3951_s20 }
 0x282   : > { %2236 = vrot.lane.b32.xlu1 %v4373_v50, %s3951_s20  ;;  %2642 = vmatpush.msra.mxu0 %v4596_v8 }
 0x283   : > { %v1245_v38 = vpop.permute.xlu2 %1244  ;;  %v1235_v47 = vpop.permute.xlu0 %1234  ;;  %3641 = vmatpush.msrb.mxu2 %v4596_v8 }
 0x284   : > { %v1280_v53 = vsel %vm346_vm6, %v4662_v56, %v1245_v38  ;;  %v1276_v62 = vsel %vm346_vm6, %v1233_v26, %v1235_v47  ;;  %1321 = vst.msk [vmem:[#allocation4 + $0x1a8] sm:$0xff] %vm992_vm8, %v1235_v47  ;;  %v4839_v3 = vpop.permute.xlu1 %1918  ;;  %2643 = vmatpush.msra.mxu0 %v4488_v12  ;;  %v6245_v26 = vld [vmem:[#allocation22_spill] sm:$0xff] }
 0x285   : > { %1325 = vst [vmem:[#allocation4 + $0x1c8] sm:$0xff] %v1280_v53  ;;  %v1943_v60 = vsel %vm534_vm2, %v4723_v15, %v4839_v3  ;;  %3642 = vmatpush.msrb.mxu2 %v4488_v12  ;;  %v2367_v47 = vld [vmem:[#allocation4 + $0x98] sm:$0xff] }
 0x286   : > { %1320 = vst [vmem:[#allocation4 + $0x1a0] sm:$0xff] %v1276_v62  ;;  %2644 = vmatpush.msra.mxu0 %v1123_v29  ;;  %2681 = vmatpush.msrb.mxu3 %v1943_v60  ;;  %v5012_v53 = vld [vmem:[#allocation7 + $0x38] sm:$0xff]  ;;  %v6252_v62 = vld [vmem:[#allocation15_spill] sm:$0xff] }
 0x287   : > { %3643 = vmatpush.msrb.mxu2 %v1123_v29  ;;  %v2355_v60 = vld [vmem:[#allocation4 + $0x38] sm:$0xff] }
 0x288   : > { %2645 = vmatpush.msra.mxu0 %v4674_v41  ;;  %2682 = vmatpush.msrb.mxu3 %v4660_v22 }
 0x289   : > { %2074 = vrot.lane.b32.xlu2 %v4408_v7, %s3952_s21  ;;  %2062 = vrot.lane.b32.xlu0 %v4392_v30, %s3952_s21 }
 0x28a   : > { %2086 = vrot.lane.b32.xlu1 %v4427_v59, %s3952_s21  ;;  %3644 = vmatpush.msrb.mxu2 %v4674_v41 }
 0x28b   : > { %v1093_v50 = vpop.permute.xlu2 %1092  ;;  %v1083_v56 = vpop.permute.xlu0 %1082  ;;  %2646 = vmatpush.msra.mxu0 %v4584_v58  ;;  %2683 = vmatpush.msrb.mxu3 %v4614_v36 }
 0x28c   : > { %v1121_v12 = vsel %vm299_vm7, %v4774_v16, %v1093_v50  ;;  %v1117_v8 = vsel %vm299_vm7, %v1081_v2, %v1083_v56  ;;  %1163 = vst.msk [vmem:[#allocation4 + $0x118] sm:$0xff] %vm992_vm8, %v1083_v56  ;;  %v1589_v22 = vpop.permute.xlu1 %1588  ;;  %3645 = vmatpush.msrb.mxu2 %v4584_v58 }
 0x28d   : > { %1167 = vst [vmem:[#allocation4 + $0x138] sm:$0xff] %v1121_v12  ;;  %v1615_v41 = vsel %vm440_vm4, %v1589_v22, %v4708_v20  ;;  %2647 = vmatpush.msra.mxu0 %v4477_v21  ;;  %2684 = vmatpush.msrb.mxu3 %v4535_v46 }
 0x28e   : > { %1162 = vst [vmem:[#allocation4 + $0x110] sm:$0xff] %v1117_v8  ;;  %3646 = vmatpush.msrb.mxu2 %v4477_v21  ;;  %v6254_v8 = vld [vmem:[#allocation26_spill] sm:$0xff] }
 0x28f   : > { %2648 = vmatpush.msra.mxu0 %v4340_v28  ;;  %2685 = vmatpush.msrb.mxu3 %v4746_v48 }
 0x290   : > { %3647 = vmatpush.msrb.mxu2 %v4340_v28 }
 0x291   : > { %1922 = vrot.lane.b32.xlu2 %v4427_v59, %s3953_s23  ;;  %1910 = vrot.lane.b32.xlu0 %v4408_v7, %s3953_s23 }
 0x292   : > { %2050 = vrot.lane.b32.xlu1 %v4366_v44, %s3952_s21  ;;  %2649 = vmatpush.msra.mxu0 %v4371_v25 }
 0x293   : > { %v1105_v46 = vpop.permute.xlu2 %1104  ;;  %v1247_v58 = vpop.permute.xlu0 %1246  ;;  %3648 = vmatpush.msrb.mxu2 %v4371_v25  ;;  %2686 = vmatpush.msrb.mxu3 %v4727_v18 }
 0x294   : > { %v1281_v21 = vsel %vm346_vm6, %v1245_v38, %v1247_v58  ;;  %1327 = vst.msk [vmem:[#allocation4 + $0x1d8] sm:$0xff] %vm992_vm8, %v1247_v58  ;;  %v1103_v28 = vpop.permute.xlu1 %1102  ;;  %2650 = vmatpush.msra.mxu0 %v4314_v6  ;;  %v5038_v58 = vld [vmem:[#allocation7 + $0x50] sm:$0xff] }
 0x295   : > { %1326 = vst [vmem:[#allocation4 + $0x1d0] sm:$0xff] %v1281_v21  ;;  %v4884_v36 = vsel %vm299_vm7, %v4762_v37, %v1103_v28  ;;  %v1126_v16 = vsel %vm299_vm7, %v1103_v28, %v1105_v46  ;;  %3649 = vmatpush.msrb.mxu2 %v4314_v6  ;;  %2687 = vmatpush.msrb.mxu3 %v4630_v5  ;;  %v6256_v21 = vld [vmem:[#allocation11_spill] sm:$0xff]  ;;  %v6257_v28 = vld [vmem:[#allocation13_spill] sm:$0xff] }
 0x296   : > { %2651 = vmatpush.msra.mxu0 %v4297_v35  ;;  %1173 = vst [vmem:[#allocation4 + $0x168] sm:$0xff] %v1126_v16  ;;  %v5046_v16 = vld [vmem:[#allocation7 + $0x60] sm:$0xff] }
 0x297   : > { %2688 = vmatpush.msrb.mxu3 %v4512_v32  ;;  %3650 = vmatpush.msrb.mxu2 %v4297_v35 }
 0x299   : > { %1886 = vrot.lane.b32.xlu2 %v4366_v44, %s3953_s23  ;;  %1758 = vrot.lane.b32.xlu0 %v4427_v59, %s3950_s19 }
 0x29a   : > { %1898 = vrot.lane.b32.xlu1 %v4392_v30, %s3953_s23  ;;  %2689 = vmatpush.msrb.mxu3 %v1615_v41  ;;  %v6255_v41 = vld [vmem:[#allocation21_spill] sm:$0xff] }
 0x29b   : > { %v4898_v6 = vpop.permute.xlu2 %2060  ;;  %v1095_v25 = vpop.permute.xlu0 %1094 }
 0x29c   : > { %v2098_v18 = vsel %vm581_vm1, %v4576_v52, %v4898_v6  ;;  %v1122_v32 = vsel %vm299_vm7, %v1093_v50, %v1095_v25  ;;  %1169 = vst.msk [vmem:[#allocation4 + $0x148] sm:$0xff] %vm992_vm8, %v1095_v25  ;;  %v1553_v35 = vpop.permute.xlu1 %1552  ;;  %2690 = vmatpush.msrb.mxu3 %v4752_v51  ;;  %v6253_v50 = vld [vmem:[#allocation17_spill] sm:$0xff] }
 0x29d   : > { %v1600_v5 = vsel %vm440_vm4, %v1553_v35, %v4721_v54  ;;  %1168 = vst [vmem:[#allocation4 + $0x140] sm:$0xff] %v1122_v32 }
 0x29e   : > { %2691 = vmatpush.msrb.mxu3 %v4610_v24 }
 0x2a0   : > { %2692 = vmatpush.msrb.mxu3 %v1600_v5 }
 0x2a1   : > { %1430 = vrot.lane.b32.xlu2 %v4427_v59, %s3948_s16  ;;  %1734 = vrot.lane.b32.xlu0 %v4392_v30, %s3950_s19 }
 0x2a2   : > { %1746 = vrot.lane.b32.xlu1 %v4408_v7, %s3950_s19 }
 0x2a3   : > { %v4915_v52 = vpop.permute.xlu2 %1908  ;;  %v1107_v27 = vpop.permute.xlu0 %1106 }
 0x2a4   : > { %v1939_v51 = vsel %vm534_vm2, %v4656_v31, %v4915_v52  ;;  %v1127_v15 = vsel %vm299_vm7, %v1105_v46, %v1107_v27  ;;  %1175 = vst.msk [vmem:[#allocation4 + $0x178] sm:$0xff] %vm992_vm8, %v1107_v27  ;;  %v4922_v24 = vpop.permute.xlu1 %1416  ;;  %v5061_v27 = vld [vmem:[#allocation7 + $0x68] sm:$0xff] }
 0x2a5   : > { %v1447_v37 = vsel %vm393_vm5, %v4574_v17, %v4922_v24  ;;  %1174 = vst [vmem:[#allocation4 + $0x170] sm:$0xff] %v1127_v15 }
 0x2a6   : > { %2760 = vmatpush.msra.mxu1 %v1447_v37 }
 0x2a8   : > { %2761 = vmatpush.msra.mxu1 %v4742_v23 }
 0x2a9   : > { %1722 = vrot.lane.b32.xlu2 %v4366_v44, %s3950_s19  ;;  %1406 = vrot.lane.b32.xlu0 %v4392_v30, %s3948_s16 }
 0x2aa   : > { %1418 = vrot.lane.b32.xlu1 %v4408_v7, %s3948_s16  ;;  %2762 = vmatpush.msra.mxu1 %v4791_v49  ;;  %v4952_v49 = vld [vmem:[#allocation7 + $0x8] sm:$0xff] }
 0x2ab   : > { %v4935_v31 = vpop.permute.xlu2 %1756  ;;  %v4937_v48 = vpop.permute.xlu0 %2084  ;;  %2693 = vmatmul.f32.vlgmr.msrb.gmra.mxu3 %v4952_v49 }
 0x2ac   : > { %v4942_v17 = vsel %vm487_vm3, %v4737_v11, %v4935_v31  ;;  %v2108_v23 = vsel %vm581_vm1, %v4807_v13, %v4937_v48  ;;  %v4947_v9 = vpop.permute.xlu1 %1264 }
 0x2ad   : > { %v1288_v57 = vsel %vm346_vm6, %v4682_v55, %v4947_v9  ;;  %2800 = vmatpush.msra.mxu2 %v2108_v23  ;;  %v6259_v23 = vld [vmem:[#allocation29_spill] sm:$0xff] }
 0x2ae   : > { %2763 = vmatpush.msra.mxu1 %v1288_v57 }
 0x2b0   : > { %2764 = vmatpush.msra.mxu1 %v4767_v42 }
 0x2b1   : > { %1394 = vrot.lane.b32.xlu2 %v4366_v44, %s3948_s16  ;;  %1582 = vrot.lane.b32.xlu0 %v4408_v7, %s3949_s17 }
 0x2b2   : > { %1594 = vrot.lane.b32.xlu1 %v4427_v59, %s3949_s17  ;;  %2765 = vmatpush.msra.mxu1 %v4642_v63 }
 0x2b3   : > { %v4963_v55 = vpop.permute.xlu2 %1720  ;;  %v4965_v11 = vpop.permute.xlu0 %2048  ;;  %2696 = vmatmul.f32.gmra.mxu3 %v4982_v1 }
 0x2b4   : > { %v4970_v13 = vsel %vm487_vm3, %v4508_v43, %v4963_v55  ;;  %v2093_v42 = vsel %vm581_vm1, %v4514_v39, %v4965_v11  ;;  %v4975_v29 = vpop.permute.xlu1 %2072  ;;  %2766 = vmatpush.msra.mxu1 %v4544_v14  ;;  %v6247_v43 = vld [vmem:[#allocation27_spill] sm:$0xff]  ;;  %v6248_v39 = vld [vmem:[#allocation24_spill] sm:$0xff]  ;;  %v4993_v14 = vld [vmem:[#allocation7 + $0x30] sm:$0xff] }
 0x2b5   : > { %v2103_v63 = vsel %vm581_vm1, %v6245_v26, %v4975_v29  ;;  %2658 = vmatmul.f32.vlgmr.msrb.gmra.mxu2 %v4993_v14  ;;  %v3834_v26 = vld [vmem:[#allocation4 + $0x18] sm:$0xff] }
 0x2b6   : > { %2767 = vmatpush.msra.mxu1 %v6246_v40  ;;  %2801 = vmatpush.msra.mxu2 %v2103_v63  ;;  %v3835_v63 = vld [vmem:[#allocation4 + $0x48] sm:$0xff]  ;;  %v5097_v40 = vld [vmem:[#allocation7 + $0x90] sm:$0xff] }
 0x2b8   : > { %2768 = vmatpush.msra.mxu1 %v6247_v43  ;;  %2802 = vmatpush.msra.mxu2 %v2098_v18 }
 0x2b9   : > { %1570 = vrot.lane.b32.xlu2 %v4392_v30, %s3949_s17  ;;  %1254 = vrot.lane.b32.xlu0 %v4408_v7, %s3947_s15  ;;  %v6250_v30 = vld [vmem:[#allocation19_spill] sm:$0xff] }
 0x2ba   : > { %1266 = vrot.lane.b32.xlu1 %v4427_v59, %s3947_s15  ;;  %2769 = vmatpush.msra.mxu1 %v6248_v39 }
 0x2bb   : > { %v4995_v34 = vpop.permute.xlu2 %1568  ;;  %v4997_v2 = vpop.permute.xlu0 %1896  ;;  %2803 = vmatpush.msra.mxu2 %v2093_v42  ;;  %2699 = vmatmul.f32.gmra.mxu3 %v5012_v53  ;;  %v5091_v42 = vld [vmem:[#allocation7 + $0x18] sm:$0xff] }
 0x2bc   : > { %v1606_v0 = vsel %vm440_vm4, %v6249_v45, %v4995_v34  ;;  %v1934_v61 = vsel %vm534_vm2, %v6250_v30, %v4997_v2  ;;  %v5005_v19 = vpop.permute.xlu1 %1920  ;;  %2770 = vmatpush.msra.mxu1 %v6251_v10  ;;  %v5107_v30 = vld [vmem:[#allocation7 + $0x98] sm:$0xff]  ;;  %v5115_v10 = vld [vmem:[#allocation7 + $0xa8] sm:$0xff] }
 0x2bd   : > { %v1944_v38 = vsel %vm534_vm2, %v4839_v3, %v5005_v19  ;;  %v5022_v3 = vld [vmem:[#allocation7 + $0x48] sm:$0xff] }
 0x2be   : > { %2771 = vmatpush.msra.mxu1 %v2367_v47  ;;  %2804 = vmatpush.msra.mxu2 %v1944_v38 }
 0x2bf   : > { %2661 = vmatmul.f32.gmra.mxu2 %v5022_v3 }
 0x2c0   : > { %2772 = vmatpush.msra.mxu1 %v4376_v33  ;;  %2805 = vmatpush.msra.mxu2 %v1939_v51  ;;  %v2349_v33 = vld [vmem:[#allocation4 + $0x8] sm:$0xff]  ;;  %v5063_v51 = vld [vmem:[#allocation7] sm:$0xff] }
 0x2c1   : > { %1558 = vrot.lane.b32.xlu2 %v4366_v44, %s3949_s17  ;;  %1420 = vrot.lane.b32.xlu0 %v6252_v62, %s3948_s16 }
 0x2c2   : > { %1432 = vrot.lane.b32.xlu1 %v6253_v50, %s3948_s16  ;;  %2773 = vmatpush.msra.mxu1 %v2355_v60 }
 0x2c3   : > { %v5024_v56 = vpop.permute.xlu2 %2246  ;;  %v5026_v12 = vpop.permute.xlu0 %1744  ;;  %2806 = vmatpush.msra.mxu2 %v1934_v61  ;;  %2702 = vmatmul.f32.gmra.mxu3 %v5038_v58  ;;  %v6261_v61 = vld [vmem:[#allocation16_spill] sm:$0xff] }
 0x2c4   : > { %v1775_v44 = vsel %vm487_vm3, %v6254_v8, %v5026_v12  ;;  %v5031_v22 = vpop.permute.xlu1 %1884  ;;  %2774 = vmatpush.msra.mxu1 %v2349_v33  ;;  %2652 = vmatmul.f32.vlgmr.msra.gmra.mxu0 %v5063_v51 }
 0x2c5   : > { %v1929_v46 = vsel %vm534_vm2, %v6255_v41, %v5031_v22  ;;  %2775 = vmatmul.f32.vlgmr.msra.gmra.mxu1 %v5063_v51  ;;  %v5131_v41 = vld [vmem:[#allocation4 + $0x80] sm:$0xff] }
 0x2c6   : > { %2807 = vmatpush.msra.mxu2 %v1929_v46 }
 0x2c7   : > { %2664 = vmatmul.f32.gmra.mxu2 %v5046_v16 }
 0x2c8   : > { %2808 = vmatpush.msra.mxu2 %v4942_v17 }
 0x2c9   : > { %1396 = vrot.lane.b32.xlu2 %v6256_v21, %s3948_s16  ;;  %2250 = vrot.lane.b32.xlu0 %v4427_v59, %s3951_s20  ;;  %v6258_v59 = vld [vmem:[#allocation25_spill] sm:$0xff] }
 0x2ca   : > { %1408 = vrot.lane.b32.xlu1 %v6257_v28, %s3948_s16  ;;  %2809 = vmatpush.msra.mxu2 %v1775_v44  ;;  %v5129_v44 = vld [vmem:[#allocation7 + $0xb0] sm:$0xff] }
 0x2cb   : > { %v2221_v25 = vpop.permute.xlu2 %2220  ;;  %v5048_v18 = vpop.permute.xlu0 %1592  ;;  %2705 = vmatmul.f32.gmra.mxu3 %v5061_v27 }
 0x2cc   : > { %v1616_v32 = vsel %vm440_vm4, %v4708_v20, %v5048_v18  ;;  %v5054_v35 = vpop.permute.xlu1 %1732  ;;  %v5071_v20 = vld [vmem:[#allocation7 + $0x78] sm:$0xff]  ;;  %2655 = vmatmul.f32.gmra.mxu0 %v5091_v42 }
 0x2cd   : > { %v1770_v5 = vsel %vm487_vm3, %v6258_v59, %v5054_v35  ;;  %2778 = vmatmul.f32.gmra.mxu1 %v5091_v42  ;;  %v5152_v59 = vld [vmem:[#allocation7 + $0x10] sm:$0xff] }
 0x2ce   : > { %2810 = vmatpush.msra.mxu2 %v1770_v5 }
 0x2cf   : > { %2667 = vmatmul.f32.gmra.mxu2 %v5071_v20 }
 0x2d0   : > { %2811 = vmatpush.msra.mxu2 %v4970_v13  ;;  %v5089_v13 = vld [vmem:[#allocation7 + $0x80] sm:$0xff] }
 0x2d1   : > { %2238 = vrot.lane.b32.xlu2 %v4408_v7, %s3951_s20  ;;  %1256 = vrot.lane.b32.xlu0 %v6252_v62, %s3947_s15 }
 0x2d2   : > { %1268 = vrot.lane.b32.xlu1 %v6253_v50, %s3947_s15  ;;  %2812 = vmatpush.msra.mxu2 %v1616_v32 }
 0x2d3   : > { %v5073_v15 = vpop.permute.xlu2 %2210  ;;  %v5075_v37 = vpop.permute.xlu0 %1556  ;;  %2708 = vmatmul.f32.gmra.mxu3 %v5089_v13 }
 0x2d4   : > { %v1601_v7 = vsel %vm440_vm4, %v4721_v54, %v5075_v37  ;;  %v5082_v17 = vpop.permute.xlu1 %1580  ;;  %v6260_v54 = vld [vmem:[#allocation18_spill] sm:$0xff] }
 0x2d5   : > { %v1611_v57 = vsel %vm440_vm4, %v6259_v23, %v5082_v17  ;;  %2781 = vmatmul.f32.gmra.mxu1 %v4993_v14 }
 0x2d6   : > { %2813 = vmatpush.msra.mxu2 %v1611_v57 }
 0x2d7   : > { %2670 = vmatmul.f32.gmra.mxu2 %v5097_v40 }
 0x2d8   : > { %2814 = vmatpush.msra.mxu2 %v1606_v0 }
 0x2d9   : > { %2214 = vrot.lane.b32.xlu2 %v3834_v26, %s3951_s20  ;;  %1434 = vrot.lane.b32.xlu0 %v6260_v54, %s3948_s16 }
 0x2da   : > { %2226 = vrot.lane.b32.xlu1 %v3835_v63, %s3951_s20  ;;  %2815 = vmatpush.msra.mxu2 %v1601_v7  ;;  %v5158_v7 = vld [vmem:[#allocation4 + $0x50] sm:$0xff] }
 0x2db   : > { %v5099_v43 = vpop.permute.xlu2 %2224  ;;  %v2233_v39 = vpop.permute.xlu0 %2232  ;;  %2711 = vmatmul.f32.gmra.mxu3 %v5107_v30 }
 0x2dc   : > { %v2245_v45 = vpop.permute.xlu1 %2244 }
 0x2dd   : > { %v2271_v0 = vsel %vm628_vm0, %v2245_v45, %v5024_v56  ;;  %2784 = vmatmul.f32.gmra.mxu1 %v5022_v3 }
 0x2de   : > { %2730 = vmatpush.msrb.mxu0 %v2271_v0  ;;  %v5186_v0 = vld [vmem:[#allocation4 + $0x20] sm:$0xff] }
 0x2df   : > { %2673 = vmatmul.f32.gmra.mxu2 %v5115_v10 }
 0x2e1   : > { %2088 = vrot.lane.b32.xlu2 %v6253_v50, %s3952_s21  ;;  %2090 = vrot.lane.b32.xlu0 %v6260_v54, %s3952_s21 }
 0x2e2   : > { %1422 = vrot.lane.b32.xlu1 %v6261_v61, %s3948_s16 }
 0x2e3   : > { %v5117_v38 = vpop.permute.xlu2 %2074  ;;  %v2223_v47 = vpop.permute.xlu0 %2222  ;;  %2714 = vmatmul.f32.gmra.mxu3 %v5129_v44 }
 0x2e4   : > { %v2104_v62 = vsel %vm581_vm1, %v4975_v29, %v5117_v38  ;;  %v2261_v60 = vsel %vm628_vm0, %v2221_v25, %v2223_v47  ;;  %v2262_v50 = vsel %vm628_vm0, %v2223_v47, %v5099_v43  ;;  %v2235_v33 = vpop.permute.xlu1 %2234  ;;  %v6262_v29 = vld [vmem:[#allocation14_spill] sm:$0xff] }
 0x2e5   : > { %v2266_v8 = vsel %vm628_vm0, %v2233_v39, %v2235_v33  ;;  %2787 = vmatmul.f32.gmra.mxu1 %v5046_v16  ;;  %v5180_v39 = vld [vmem:[#allocation7 + $0x28] sm:$0xff] }
 0x2e6   : > { %2731 = vmatpush.msrb.mxu0 %v2266_v8 }
 0x2e7   : > { %2816 = vmatmul.f32.vlgmr.msra.gmra.mxu2 %v4952_v49 }
 0x2e8   : > { %2732 = vmatpush.msrb.mxu0 %v2261_v60 }
 0x2e9   : > { %2076 = vrot.lane.b32.xlu2 %v5131_v41, %s3952_s21  ;;  %2078 = vrot.lane.b32.xlu0 %v6261_v61, %s3952_s21 }
 0x2ea   : > { %1410 = vrot.lane.b32.xlu1 %v6262_v29, %s3948_s16 }
 0x2eb   : > { %v5139_v46 = vpop.permute.xlu2 %1922  ;;  %v5141_v21 = vpop.permute.xlu0 %2248 }
 0x2ec   : > { %v1945_v28 = vsel %vm534_vm2, %v5005_v19, %v5139_v46  ;;  %v2272_v25 = vsel %vm628_vm0, %v5024_v56, %v5141_v21  ;;  %v2209_v32 = vpop.permute.xlu1 %2208  ;;  %v6263_v19 = vld [vmem:[#allocation12_spill] sm:$0xff] }
 0x2ed   : > { %v2256_v5 = vsel %vm628_vm0, %v2209_v32, %v5073_v15  ;;  %2853 = vmatpush.msra.mxu3 %v2272_v25  ;;  %2790 = vmatmul.f32.gmra.mxu1 %v5071_v20 }
 0x2ee   : > { %2733 = vmatpush.msrb.mxu0 %v2256_v5  ;;  %v5241_v5 = vld [vmem:[#allocation7 + $0x58] sm:$0xff] }
 0x2ef   : > { %3585 = vmatmul.msk.f32.vlgmr.msrb.gmra.mxu0 %vm992_vm8, %v5152_v59  ;;  %2819 = vmatmul.f32.gmra.mxu2 %v4982_v1 }
 0x2f1   : > { %2064 = vrot.lane.b32.xlu2 %v5158_v7, %s3952_s21  ;;  %2066 = vrot.lane.b32.xlu0 %v6262_v29, %s3952_s21 }
 0x2f2   : > { %1398 = vrot.lane.b32.xlu1 %v6263_v19, %s3948_s16 }
 0x2f3   : > { %v5166_v56 = vpop.permute.xlu2 %1886  ;;  %v5168_v23 = vpop.permute.xlu0 %2212 }
 0x2f4   : > { %v1930_v57 = vsel %vm534_vm2, %v5031_v22, %v5166_v56  ;;  %v2257_v26 = vsel %vm628_vm0, %v5073_v15, %v5168_v23  ;;  %v5177_v63 = vpop.permute.xlu1 %2236 }
 0x2f5   : > { %v2267_v45 = vsel %vm628_vm0, %v2235_v33, %v5177_v63  ;;  %v5210_v33 = vld [vmem:[#allocation7 + $0x40] sm:$0xff]  ;;  %2793 = vmatmul.f32.gmra.mxu1 %v5097_v40 }
 0x2f6   : > { %2854 = vmatpush.msra.mxu3 %v2267_v45 }
 0x2f7   : > { %3586 = vmatmul.msk.f32.gmra.mxu0 %vm992_vm8, %v5180_v39  ;;  %2822 = vmatmul.f32.gmra.mxu2 %v5012_v53 }
 0x2f8   : > { %2855 = vmatpush.msra.mxu3 %v2262_v50 }
 0x2f9   : > { %2052 = vrot.lane.b32.xlu2 %v5186_v0, %s3952_s21  ;;  %2054 = vrot.lane.b32.xlu0 %v6263_v19, %s3952_s21 }
 0x2fa   : > { %1270 = vrot.lane.b32.xlu1 %v6260_v54, %s3947_s15  ;;  %2856 = vmatpush.msra.mxu3 %v2257_v26 }
 0x2fb   : > { %v5194_v22 = vpop.permute.xlu2 %1430  ;;  %v5196_v15 = vpop.permute.xlu0 %2062  ;;  %3593 = vmatmul.msk.f32.vlgmr.msra.gmra.mxu3 %vm992_vm8, %v5152_v59 }
 0x2fc   : > { %v1453_v47 = vsel %vm393_vm5, %v4801_v4, %v5194_v22  ;;  %v2099_v60 = vsel %vm581_vm1, %v4898_v6, %v5196_v15  ;;  %v5207_v50 = vpop.permute.xlu1 %2086  ;;  %v5217_v4 = vld [vmem:[#allocation4 + $0xb0] sm:$0xff] }
 0x2fd   : > { %v2109_v8 = vsel %vm581_vm1, %v4937_v48, %v5207_v50  ;;  %2882 = vmatpush.msra.mxu0 %v1453_v47  ;;  %2796 = vmatmul.f32.gmra.mxu1 %v5115_v10 }
 0x2fe   : > { %2923 = vmatpush.msrb.mxu1 %v2109_v8 }
 0x2ff   : > { %3587 = vmatmul.msk.f32.gmra.mxu0 %vm992_vm8, %v5210_v33  ;;  %2825 = vmatmul.f32.gmra.mxu2 %v5038_v58 }
 0x300   : > { %2924 = vmatpush.msrb.mxu1 %v2104_v62 }
 0x301   : > { %1924 = vrot.lane.b32.xlu2 %v5217_v4, %s3953_s23  ;;  %1926 = vrot.lane.b32.xlu0 %v6260_v54, %s3953_s23 }
 0x302   : > { %1258 = vrot.lane.b32.xlu1 %v6261_v61, %s3947_s15  ;;  %2925 = vmatpush.msrb.mxu1 %v2099_v60  ;;  %v5267_v60 = vld [vmem:[#allocation7 + $0x70] sm:$0xff] }
 0x303   : > { %v5225_v6 = vpop.permute.xlu2 %1722  ;;  %v5227_v48 = vpop.permute.xlu0 %1910  ;;  %3594 = vmatmul.msk.f32.gmra.mxu3 %vm992_vm8, %v5180_v39 }
 0x304   : > { %6264 = vst [vmem:[#allocation22_spill] sm:$0xff] %v5225_v6  ;;  %v1766_v62 = vsel %vm487_vm3, %v4963_v55, %v5225_v6  ;;  %v1940_v25 = vsel %vm534_vm2, %v4915_v52, %v5227_v48  ;;  %v5238_v32 = vpop.permute.xlu1 %2050  ;;  %v5321_v6 = vld [vmem:[#allocation7 + $0xa0] sm:$0xff] }
 0x305   : > { %v2094_v26 = vsel %vm581_vm1, %v4965_v11, %v5238_v32  ;;  %v6265_v11 = vld [vmem:[#allocation32_spill] sm:$0xff] }
 0x306   : > { %2926 = vmatpush.msrb.mxu1 %v2094_v26 }
 0x307   : > { %3588 = vmatmul.msk.f32.gmra.mxu0 %vm992_vm8, %v5241_v5  ;;  %2828 = vmatmul.f32.gmra.mxu2 %v5061_v27 }
 0x308   : > { %2927 = vmatpush.msrb.mxu1 %v1945_v28 }
 0x309   : > { %1914 = vrot.lane.b32.xlu2 %v6261_v61, %s3953_s23  ;;  %1900 = vrot.lane.b32.xlu0 %v5158_v7, %s3953_s23 }
 0x30a   : > { %1912 = vrot.lane.b32.xlu1 %v5131_v41, %s3953_s23  ;;  %2928 = vmatpush.msrb.mxu1 %v1940_v25 }
 0x30b   : > { %v1395_v52 = vpop.permute.xlu2 %1394  ;;  %v5254_v55 = vpop.permute.xlu0 %1758  ;;  %3595 = vmatmul.msk.f32.gmra.mxu3 %vm992_vm8, %v5210_v33 }
 0x30c   : > { %v1438_v28 = vsel %vm393_vm5, %v6265_v11, %v1395_v52  ;;  %v1781_v45 = vsel %vm487_vm3, %v4935_v31, %v5254_v55  ;;  %v5264_v47 = vpop.permute.xlu1 %1898  ;;  %v5295_v11 = vld [vmem:[#allocation7 + $0x88] sm:$0xff] }
 0x30d   : > { %v1935_v8 = vsel %vm534_vm2, %v4997_v2, %v5264_v47 }
 0x30e   : > { %2929 = vmatpush.msrb.mxu1 %v1935_v8  ;;  %v6267_v8 = vld [vmem:[#allocation28_spill] sm:$0xff] }
 0x30f   : > { %3589 = vmatmul.msk.f32.gmra.mxu0 %vm992_vm8, %v5267_v60  ;;  %2831 = vmatmul.f32.gmra.mxu2 %v5089_v13 }
 0x310   : > { %2930 = vmatpush.msrb.mxu1 %v1930_v57 }
 0x311   : > { %1888 = vrot.lane.b32.xlu2 %v5186_v0, %s3953_s23  ;;  %1890 = vrot.lane.b32.xlu0 %v6263_v19, %s3953_s23 }
 0x312   : > { %1902 = vrot.lane.b32.xlu1 %v6262_v29, %s3953_s23  ;;  %2931 = vmatpush.msrb.mxu1 %v1781_v45 }
 0x313   : > { %v5280_v31 = vpop.permute.xlu2 %1570  ;;  %v5282_v25 = vpop.permute.xlu0 %1734  ;;  %3596 = vmatmul.msk.f32.gmra.mxu3 %vm992_vm8, %v5241_v5 }
 0x314   : > { %v1607_v2 = vsel %vm440_vm4, %v4995_v34, %v5280_v31  ;;  %v1771_v57 = vsel %vm487_vm3, %v5054_v35, %v5282_v25  ;;  %v5292_v26 = vpop.permute.xlu1 %1746 }
 0x315   : > { %v1776_v45 = vsel %vm487_vm3, %v5026_v12, %v5292_v26 }
 0x316   : > { %2932 = vmatpush.msrb.mxu1 %v1776_v45 }
 0x317   : > { %3590 = vmatmul.msk.f32.gmra.mxu0 %vm992_vm8, %v5295_v11  ;;  %2834 = vmatmul.f32.gmra.mxu2 %v5107_v30 }
 0x318   : > { %2933 = vmatpush.msrb.mxu1 %v1771_v57 }
 0x319   : > { %1762 = vrot.lane.b32.xlu2 %v6260_v54, %s3950_s19  ;;  %1748 = vrot.lane.b32.xlu0 %v5131_v41, %s3950_s19 }
 0x31a   : > { %1760 = vrot.lane.b32.xlu1 %v5217_v4, %s3950_s19  ;;  %2934 = vmatpush.msrb.mxu1 %v1766_v62 }
 0x31b   : > { %v5308_v34 = vpop.permute.xlu2 %1558  ;;  %v5310_v35 = vpop.permute.xlu0 %1406  ;;  %3597 = vmatmul.msk.f32.gmra.mxu3 %vm992_vm8, %v5267_v60 }
 0x31c   : > { %6266 = vst [vmem:[#allocation31_spill] sm:$0xff] %v5308_v34  ;;  %v1602_v12 = vsel %vm440_vm4, %v5075_v37, %v5308_v34  ;;  %v1443_v57 = vsel %vm393_vm5, %v6267_v8, %v5310_v35  ;;  %v1419_v45 = vpop.permute.xlu1 %1418 }
 0x31d   : > { %v1448_v62 = vsel %vm393_vm5, %v4922_v24, %v1419_v45 }
 0x31e   : > { %2883 = vmatpush.msra.mxu0 %v1448_v62 }
 0x31f   : > { %3591 = vmatmul.msk.f32.gmra.mxu0 %vm992_vm8, %v5321_v6  ;;  %2837 = vmatmul.f32.gmra.mxu2 %v5129_v44 }
 0x320   : > { %2884 = vmatpush.msra.mxu0 %v1443_v57 }
 0x321   : > { %1736 = vrot.lane.b32.xlu2 %v5158_v7, %s3950_s19  ;;  %1738 = vrot.lane.b32.xlu0 %v6262_v29, %s3950_s19 }
 0x322   : > { %1750 = vrot.lane.b32.xlu1 %v6261_v61, %s3950_s19  ;;  %2885 = vmatpush.msra.mxu0 %v1438_v28  ;;  %v5349_v28 = vld [vmem:[#allocation7 + $0xb8] sm:$0xff] }
 0x323   : > { %v5333_v37 = vpop.permute.xlu2 %1396  ;;  %v5335_v8 = vpop.permute.xlu0 %1582  ;;  %3598 = vmatmul.msk.f32.gmra.mxu3 %vm992_vm8, %v5295_v11 }
 0x324   : > { %v5341_v24 = vsel %vm393_vm5, %v1395_v52, %v5333_v37  ;;  %v1612_v57 = vsel %vm440_vm4, %v5082_v17, %v5335_v8  ;;  %v5346_v62 = vpop.permute.xlu1 %1594 }
 0x325   : > { %6268 = vst [vmem:[#allocation27_spill] sm:$0xff] %v5346_v62  ;;  %v1617_v34 = vsel %vm440_vm4, %v5048_v18, %v5346_v62 }
 0x326   : > { %2935 = vmatpush.msrb.mxu1 %v1617_v34  ;;  %v6270_v34 = vld [vmem:[#allocation30_spill] sm:$0xff] }
 0x327   : > { %3592 = vmatmul.msk.f32.gmra.mxu0 %vm992_vm8, %v5349_v28 }
 0x328   : > { %2936 = vmatpush.msrb.mxu1 %v1612_v57 }
 0x329   : > { %1726 = vrot.lane.b32.xlu2 %v6263_v19, %s3950_s19  ;;  %1596 = vrot.lane.b32.xlu0 %v5217_v4, %s3949_s17 }
 0x32a   : > { %1724 = vrot.lane.b32.xlu1 %v5186_v0, %s3950_s19  ;;  %2937 = vmatpush.msrb.mxu1 %v1607_v2 }
 0x32b   : > { %v5362_v17 = vpop.permute.xlu2 %2238  ;;  %v5364_v52 = vpop.permute.xlu0 %1254  ;;  %3599 = vmatmul.msk.f32.gmra.mxu3 %vm992_vm8, %v5321_v6 }
 0x32c   : > { %6269 = vst [vmem:[#allocation24_spill] sm:$0xff] %v5362_v17  ;;  %v2268_v18 = vsel %vm628_vm0, %v5177_v63, %v5362_v17  ;;  %v1284_v57 = vsel %vm346_vm6, %v6270_v34, %v5364_v52  ;;  %v5374_v62 = vpop.permute.xlu1 %1266  ;;  %2938 = vmatpush.msrb.mxu1 %v1602_v12  ;;  %v2404_v63 = vld [vmem:[#allocation4 + $0x1c0] sm:$0xff] }
 0x32d   : > { %v1289_v2 = vsel %vm346_vm6, %v4947_v9, %v5374_v62  ;;  %2939 = vmatmul.f32.vlgmr.msrb.gmra.mxu1 %v4952_v49  ;;  %v2398_v49 = vld [vmem:[#allocation4 + $0x190] sm:$0xff] }
 0x32e   : > { %2886 = vmatpush.msra.mxu0 %v1289_v2  ;;  %v5386_v12 = vpop.f32.mrf.mxu3 }
 0x32f   : > { %6271 = vst [vmem:[#allocation23_spill] sm:$0xff] %v5386_v12  ;;  %v2386_v12 = vld [vmem:[#allocation4 + $0x130] sm:$0xff] }
 0x330   : > { %2887 = vmatpush.msra.mxu0 %v1284_v57 }
 0x331   : > { %1584 = vrot.lane.b32.xlu2 %v5131_v41, %s3949_s17  ;;  %1586 = vrot.lane.b32.xlu0 %v6261_v61, %s3949_s17 }
 0x332   : > { %1598 = vrot.lane.b32.xlu1 %v6260_v54, %s3949_s17  ;;  %2888 = vmatpush.msra.mxu0 %v2404_v63 }
 0x333   : > { %v5388_v34 = vpop.permute.xlu2 %2214  ;;  %v5390_v9 = vpop.permute.xlu0 %1420  ;;  %3600 = vmatmul.msk.f32.gmra.mxu3 %vm992_vm8, %v5349_v28 }
 0x334   : > { %v5397_v57 = vsel %vm628_vm0, %v5168_v23, %v5388_v34  ;;  %v1449_v2 = vsel %vm393_vm5, %v1419_v45, %v5390_v9  ;;  %v5401_v17 = vpop.permute.xlu1 %1432  ;;  %2889 = vmatpush.msra.mxu0 %v2398_v49  ;;  %v2380_v23 = vld [vmem:[#allocation4 + $0x100] sm:$0xff] }
 0x335   : > { %v1454_v63 = vsel %vm393_vm5, %v5194_v22, %v5401_v17  ;;  %2942 = vmatmul.f32.gmra.mxu1 %v4982_v1 }
 0x336   : > { %2890 = vmatpush.msra.mxu0 %v4884_v36  ;;  %3005 = vmatpush.msra.mxu1 %v1454_v63  ;;  %v5414_v22 = vpop.f32.mrf.mxu3 }
 0x337   : > { %3651 = vmatpush.msrb.mxu3 %v1454_v63  ;;  %v2368_v63 = vld [vmem:[#allocation4 + $0xa0] sm:$0xff] }
 0x338   : > { %2891 = vmatpush.msra.mxu0 %v2386_v12  ;;  %3006 = vmatpush.msra.mxu1 %v1449_v2 }
 0x339   : > { %1572 = vrot.lane.b32.xlu2 %v5158_v7, %s3949_s17  ;;  %1574 = vrot.lane.b32.xlu0 %v6262_v29, %s3949_s17 }
 0x33a   : > { %2252 = vrot.lane.b32.xlu1 %v5217_v4, %s3951_s20  ;;  %3652 = vmatpush.msrb.mxu3 %v1449_v2  ;;  %v2374_v4 = vld [vmem:[#allocation4 + $0xd0] sm:$0xff] }
 0x33b   : > { %v5416_v1 = vpop.permute.xlu2 %2088  ;;  %v5418_v36 = vpop.permute.xlu0 %2250  ;;  %2892 = vmatpush.msra.mxu0 %v2380_v23 }
 0x33c   : > { %v2110_v45 = vsel %vm581_vm1, %v5207_v50, %v5416_v1  ;;  %v2273_v12 = vsel %vm628_vm0, %v5141_v21, %v5418_v36  ;;  %v5426_v49 = vpop.permute.xlu1 %1408  ;;  %v2362_v21 = vld [vmem:[#allocation4 + $0x70] sm:$0xff] }
 0x33d   : > { %v1444_v2 = vsel %vm393_vm5, %v5310_v35, %v5426_v49  ;;  %2893 = vmatpush.msra.mxu0 %v2374_v4  ;;  %2945 = vmatmul.f32.gmra.mxu1 %v5012_v53  ;;  %v5439_v53 = vpop.f32.mrf.mxu2 }
 0x33e   : > { %2976 = vmatpush.msrb.mxu2 %v2273_v12  ;;  %3007 = vmatpush.msra.mxu1 %v1444_v2 }
 0x33f   : > { %2894 = vmatpush.msra.mxu0 %v2368_v63  ;;  %3653 = vmatpush.msrb.mxu3 %v1444_v2  ;;  %v2350_v63 = vld [vmem:[#allocation4 + $0x10] sm:$0xff] }
 0x340   : > { %2977 = vmatpush.msrb.mxu2 %v2268_v18  ;;  %3008 = vmatpush.msra.mxu1 %v5341_v24  ;;  %v2356_v18 = vld [vmem:[#allocation4 + $0x40] sm:$0xff] }
 0x341   : > { %1560 = vrot.lane.b32.xlu2 %v5186_v0, %s3949_s17  ;;  %1562 = vrot.lane.b32.xlu0 %v6263_v19, %s3949_s17 }
 0x342   : > { %2240 = vrot.lane.b32.xlu1 %v5131_v41, %s3951_s20  ;;  %2895 = vmatpush.msra.mxu0 %v2362_v21  ;;  %v5454_v41 = vpop.f32.mrf.mxu3 }
 0x343   : > { %v5441_v50 = vpop.permute.xlu2 %2076  ;;  %v5443_v35 = vpop.permute.xlu0 %1256  ;;  %3654 = vmatpush.msrb.mxu3 %v5341_v24 }
 0x344   : > { %v2105_v23 = vsel %vm581_vm1, %v5117_v38, %v5441_v50  ;;  %v1285_v12 = vsel %vm346_vm6, %v5364_v52, %v5443_v35  ;;  %v5452_v4 = vpop.permute.xlu1 %1268  ;;  %2896 = vmatpush.msra.mxu0 %v2356_v18  ;;  %v2405_v38 = vld [vmem:[#allocation4 + $0x1c8] sm:$0xff]  ;;  %v2399_v52 = vld [vmem:[#allocation4 + $0x198] sm:$0xff] }
 0x345   : > { %v1290_v2 = vsel %vm346_vm6, %v5374_v62, %v5452_v4  ;;  %2948 = vmatmul.f32.gmra.mxu1 %v5038_v58 }
 0x346   : > { %2897 = vmatpush.msra.mxu0 %v2350_v63  ;;  %3009 = vmatpush.msra.mxu1 %v1290_v2 }
 0x347   : > { %2898 = vmatmul.f32.vlgmr.msra.gmra.mxu0 %v5063_v51  ;;  %3655 = vmatpush.msrb.mxu3 %v1290_v2  ;;  %v2369_v2 = vld [vmem:[#allocation4 + $0xa8] sm:$0xff] }
 0x348   : > { %3046 = vmatpush.msrb.mxu0 %v2110_v45  ;;  %3010 = vmatpush.msra.mxu1 %v1285_v12 }
 0x349   : > { %2216 = vrot.lane.b32.xlu2 %v5186_v0, %s3951_s20  ;;  %2254 = vrot.lane.b32.xlu0 %v6260_v54, %s3951_s20 }
 0x34a   : > { %2228 = vrot.lane.b32.xlu1 %v5158_v7, %s3951_s20  ;;  %3047 = vmatpush.msrb.mxu0 %v2105_v23  ;;  %v5477_v7 = vpop.f32.mrf.mxu2  ;;  %v2375_v23 = vld [vmem:[#allocation4 + $0xd8] sm:$0xff] }
 0x34b   : > { %v5467_v24 = vpop.permute.xlu2 %2064  ;;  %v1435_v58 = vpop.permute.xlu0 %1434  ;;  %3656 = vmatpush.msrb.mxu3 %v1285_v12  ;;  %3011 = vmatpush.msra.mxu1 %v2405_v38 }
 0x34c   : > { %v2100_v62 = vsel %vm581_vm1, %v5196_v15, %v5467_v24  ;;  %v1455_v0 = vsel %vm393_vm5, %v5401_v17, %v1435_v58  ;;  %1503 = vst.msk [vmem:[#allocation4 + $0x2f8] sm:$0xff] %vm992_vm8, %v1435_v58  ;;  %v5475_v54 = vpop.permute.xlu1 %2226  ;;  %v5483_v15 = vpop.f32.mrf.mxu3  ;;  %v2393_v17 = vld [vmem:[#allocation4 + $0x168] sm:$0xff] }
 0x34d   : > { %v2263_v45 = vsel %vm628_vm0, %v5099_v43, %v5475_v54  ;;  %3657 = vmatpush.msrb.mxu3 %v2405_v38  ;;  %3012 = vmatpush.msra.mxu1 %v2399_v52  ;;  %v2363_v38 = vld [vmem:[#allocation4 + $0x78] sm:$0xff] }
 0x34e   : > { %2951 = vmatmul.f32.gmra.mxu1 %v5061_v27  ;;  %2978 = vmatpush.msrb.mxu2 %v2263_v45  ;;  %v2387_v27 = vld [vmem:[#allocation4 + $0x138] sm:$0xff]  ;;  %v2357_v45 = vld [vmem:[#allocation4 + $0x48] sm:$0xff] }
 0x34f   : > { %3658 = vmatpush.msrb.mxu3 %v2399_v52  ;;  %2901 = vmatmul.f32.gmra.mxu0 %v5091_v42 }
 0x350   : > { %3013 = vmatpush.msra.mxu1 %v2393_v17  ;;  %3048 = vmatpush.msrb.mxu0 %v2100_v62 }
 0x351   : > { %2230 = vrot.lane.b32.xlu2 %v6262_v29, %s3951_s20  ;;  %2218 = vrot.lane.b32.xlu0 %v6263_v19, %s3951_s20 }
 0x352   : > { %2242 = vrot.lane.b32.xlu1 %v6261_v61, %s3951_s20  ;;  %3659 = vmatpush.msrb.mxu3 %v2393_v17  ;;  %v2381_v61 = vld [vmem:[#allocation4 + $0x108] sm:$0xff]  ;;  %v5514_v12 = vpop.f32.mrf.mxu2  ;;  %v2351_v17 = vld [vmem:[#allocation4 + $0x18] sm:$0xff] }
 0x353   : > { %v5492_v43 = vpop.permute.xlu2 %2052  ;;  %v2091_v21 = vpop.permute.xlu0 %2090  ;;  %2979 = vmatpush.msrb.mxu2 %v5397_v57  ;;  %3014 = vmatpush.msra.mxu1 %v2387_v27 }
 0x354   : > { %v2095_v18 = vsel %vm581_vm1, %v5238_v32, %v5492_v43  ;;  %v5500_v29 = vsel %vm581_vm1, %v5416_v1, %v2091_v21  ;;  %2159 = vst.msk [vmem:[#allocation4 + $0x5f8] sm:$0xff] %vm992_vm8, %v2091_v21  ;;  %v1423_v19 = vpop.permute.xlu1 %1422  ;;  %3660 = vmatpush.msrb.mxu3 %v2387_v27  ;;  %3601 = vmatmul.msk.f32.vlgmr.msrb.gmra.mxu2 %vm992_vm8, %v5152_v59  ;;  %v2565_v32 = vld [vmem:[%s6192_s4 + $0x8] sm:$0xff]  ;;  %v2566_v1 = vld [vmem:[%s6192_s4 + $0x10] sm:$0xff]  ;;  %v2564_v59 = vld [vmem:[%s6192_s4] sm:$0xff] }
 0x355   : > { %v1450_v57 = vsel %vm393_vm5, %v5390_v9, %v1423_v19  ;;  %3128 = vmatpush.msra.mxu2 %v1455_v0  ;;  %3015 = vmatpush.msra.mxu1 %v2381_v61  ;;  %1497 = vst.msk [vmem:[#allocation4 + $0x2c8] sm:$0xff] %vm992_vm8, %v1423_v19  ;;  %v5521_v9 = vpop.f32.mrf.mxu3 }
 0x356   : > { %3661 = vmatpush.msrb.mxu3 %v2381_v61  ;;  %2954 = vmatmul.f32.gmra.mxu1 %v5089_v13 }
 0x357   : > { %3016 = vmatpush.msra.mxu1 %v2375_v23  ;;  %2904 = vmatmul.f32.gmra.mxu0 %v4993_v14 }
 0x358   : > { %3662 = vmatpush.msrb.mxu3 %v2375_v23  ;;  %3049 = vmatpush.msrb.mxu0 %v2095_v18 }
 0x359   : > { %2579 = vperm.xlu2 %3831, %v2565_v32   ;;  %2584 = vperm.xlu0 %3832, %v2566_v1  }
 0x35a   : > { %2574 = vperm.xlu1 %3833, %v2564_v59   ;;  %3017 = vmatpush.msra.mxu1 %v2369_v2 }
 0x35b   : > { %v5523_v13 = vpop.permute.xlu2 %1924  ;;  %v2079_v63 = vpop.permute.xlu0 %2078  ;;  %3663 = vmatpush.msrb.mxu3 %v2369_v2  ;;  %3129 = vmatpush.msra.mxu2 %v1450_v57 }
 0x35c   : > { %v1946_v58 = vsel %vm534_vm2, %v5139_v46, %v5523_v13  ;;  %v2106_v62 = vsel %vm581_vm1, %v5441_v50, %v2079_v63  ;;  %2153 = vst.msk [vmem:[#allocation4 + $0x5c8] sm:$0xff] %vm992_vm8, %v2079_v63  ;;  %v1411_v0 = vpop.permute.xlu1 %1410  ;;  %3018 = vmatpush.msra.mxu1 %v2363_v38  ;;  %3602 = vmatmul.msk.f32.gmra.mxu2 %vm992_vm8, %v5180_v39  ;;  %v2568_v46 = vld [vmem:[%s6192_s4 + $0x20] sm:$0xff]  ;;  %v2569_v50 = vld [vmem:[%s6192_s4 + $0x28] sm:$0xff]  ;;  %v2567_v39 = vld [vmem:[%s6192_s4 + $0x18] sm:$0xff] }
 0x35d   : > { %v1445_v52 = vsel %vm393_vm5, %v5426_v49, %v1411_v0  ;;  %3664 = vmatpush.msrb.mxu3 %v2363_v38  ;;  %3050 = vmatpush.msrb.mxu0 %v1946_v58  ;;  %1491 = vst.msk [vmem:[#allocation4 + $0x298] sm:$0xff] %vm992_vm8, %v1411_v0  ;;  %v5546_v49 = vpop.f32.mrf.mxu2  ;;  %v5548_v27 = vpop.f32.mrf.mxu3 }
 0x35e   : > { %3019 = vmatpush.msra.mxu1 %v2357_v45  ;;  %3130 = vmatpush.msra.mxu2 %v1445_v52  ;;  %v2394_v52 = vld [vmem:[#allocation4 + $0x170] sm:$0xff] }
 0x35f   : > { %3665 = vmatpush.msrb.mxu3 %v2357_v45  ;;  %2907 = vmatmul.f32.gmra.mxu0 %v5022_v3  ;;  %v2388_v45 = vld [vmem:[#allocation4 + $0x140] sm:$0xff] }
 0x360   : > { %3020 = vmatpush.msra.mxu1 %v2351_v17 }
 0x361   : > { %2594 = vperm.xlu2 %3831, %v2568_v46   ;;  %2599 = vperm.xlu0 %3832, %v2569_v50  }
 0x362   : > { %2589 = vperm.xlu1 %3833, %v2567_v39   ;;  %3666 = vmatpush.msrb.mxu3 %v2351_v17 }
 0x363   : > { %v5550_v21 = vpop.permute.xlu2 %1914  ;;  %v2067_v18 = vpop.permute.xlu0 %2066  ;;  %2957 = vmatmul.f32.gmra.mxu1 %v5107_v30  ;;  %3027 = vmatmul.f32.vlgmr.msrb.gmra.mxu3 %v4993_v14  ;;  %v2571_v14 = vld [vmem:[%s6192_s4 + $0x38] sm:$0xff]  ;;  %v2570_v30 = vld [vmem:[%s6192_s4 + $0x30] sm:$0xff] }
 0x364   : > { %1989 = vst.msk [vmem:[#allocation4 + $0x508] sm:$0xff] %vm992_vm8, %v5550_v21  ;;  %v2101_v19 = vsel %vm581_vm1, %v5467_v24, %v2067_v18  ;;  %v1399_v61 = vpop.permute.xlu1 %1398  ;;  %3169 = vmatpush.msra.mxu3 %v5500_v29  ;;  %3603 = vmatmul.msk.f32.gmra.mxu2 %vm992_vm8, %v5210_v33  ;;  %v5572_v33 = vpop.f32.mrf.mxu0 }
 0x365   : > { %v1440_v57 = vsel %vm393_vm5, %v5333_v37, %v1399_v61  ;;  %2147 = vst.msk [vmem:[#allocation4 + $0x598] sm:$0xff] %vm992_vm8, %v2067_v18  ;;  %v5574_v37 = vpop.f32.mrf.mxu2  ;;  %v5588_v59 = vpop.f32.mrf.mxu3  ;;  %v2370_v18 = vld [vmem:[#allocation4 + $0xb0] sm:$0xff] }
 0x366   : > { %3170 = vmatpush.msra.mxu3 %v2106_v62  ;;  %3131 = vmatpush.msra.mxu2 %v1440_v57  ;;  %1485 = vst.msk [vmem:[#allocation4 + $0x268] sm:$0xff] %vm992_vm8, %v1399_v61  ;;  %v2358_v57 = vld [vmem:[#allocation4 + $0x50] sm:$0xff] }
 0x367   : > { %2910 = vmatmul.f32.gmra.mxu0 %v5046_v16 }
 0x368   : > { %3171 = vmatpush.msra.mxu3 %v2101_v19 }
 0x369   : > { %2609 = vperm.xlu2 %3831, %v2571_v14  }
 0x36a   : > { %2604 = vperm.xlu1 %3833, %v2570_v30  }
 0x36b   : > { %v5576_v24 = vpop.permute.xlu2 %1888  ;;  %v2055_v29 = vpop.permute.xlu0 %2054  ;;  %2960 = vmatmul.f32.gmra.mxu1 %v5129_v44  ;;  %3030 = vmatmul.f32.gmra.mxu3 %v5022_v3 }
 0x36c   : > { %v1931_v32 = vsel %vm534_vm2, %v5166_v56, %v5576_v24  ;;  %v2096_v1 = vsel %vm581_vm1, %v5492_v43, %v2055_v29  ;;  %2141 = vst.msk [vmem:[#allocation4 + $0x568] sm:$0xff] %vm992_vm8, %v2055_v29  ;;  %v1271_v23 = vpop.permute.xlu1 %1270  ;;  %3604 = vmatmul.msk.f32.gmra.mxu2 %vm992_vm8, %v5241_v5  ;;  %v5594_v3 = vpop.f32.mrf.mxu0 }
 0x36d   : > { %v1291_v44 = vsel %vm346_vm6, %v5452_v4, %v1271_v23  ;;  %3172 = vmatpush.msra.mxu3 %v2096_v1  ;;  %1339 = vst.msk [vmem:[#allocation4 + $0x238] sm:$0xff] %vm992_vm8, %v1271_v23  ;;  %v5606_v2 = vpop.f32.mrf.mxu2 }
 0x36e   : > { %3132 = vmatpush.msra.mxu2 %v1291_v44 }
 0x36f   : > { %2913 = vmatmul.f32.gmra.mxu0 %v5071_v20 }
 0x373   : > { %v5596_v56 = vpop.permute.xlu2 %1762  ;;  %v1927_v43 = vpop.permute.xlu0 %1926  ;;  %3021 = vmatmul.f32.vlgmr.msra.gmra.mxu1 %v5063_v51  ;;  %3033 = vmatmul.f32.gmra.mxu3 %v5046_v16  ;;  %v2406_v51 = vld [vmem:[#allocation4 + $0x1d0] sm:$0xff] }
 0x374   : > { %1831 = vst.msk [vmem:[#allocation4 + $0x478] sm:$0xff] %vm992_vm8, %v5596_v56  ;;  %v1947_v5 = vsel %vm534_vm2, %v5523_v13, %v1927_v43  ;;  %v1259_v4 = vpop.permute.xlu1 %1258  ;;  %3605 = vmatmul.msk.f32.gmra.mxu2 %vm992_vm8, %v5267_v60  ;;  %v5611_v16 = vpop.f32.mrf.mxu3  ;;  %v2400_v13 = vld [vmem:[#allocation4 + $0x1a0] sm:$0xff] }
 0x375   : > { %v1286_v63 = vsel %vm346_vm6, %v5443_v35, %v1259_v4  ;;  %3173 = vmatpush.msra.mxu3 %v1947_v5  ;;  %1995 = vst.msk [vmem:[#allocation4 + $0x538] sm:$0xff] %vm992_vm8, %v1927_v43  ;;  %v5619_v35 = vpop.f32.mrf.mxu1  ;;  %v5636_v46 = vpop.f32.mrf.mxu2  ;;  %v2539_v43 = vld [vmem:[#allocation4 + $0x5f8] sm:$0xff] }
 0x376   : > { %3133 = vmatpush.msra.mxu2 %v1286_v63  ;;  %1333 = vst.msk [vmem:[#allocation4 + $0x208] sm:$0xff] %vm992_vm8, %v1259_v4  ;;  %v2533_v4 = vld [vmem:[#allocation4 + $0x5c8] sm:$0xff]  ;;  %v2527_v63 = vld [vmem:[#allocation4 + $0x598] sm:$0xff] }
 0x377   : > { %2916 = vmatmul.f32.gmra.mxu0 %v5097_v40 }
 0x378   : > { %3134 = vmatpush.msra.mxu2 %v2406_v51 }
 0x37a   : > { %3135 = vmatpush.msra.mxu2 %v2400_v13 }
 0x37b   : > { %v5615_v60 = vpop.permute.xlu2 %1736  ;;  %v1901_v38 = vpop.permute.xlu0 %1900  ;;  %3024 = vmatmul.f32.gmra.mxu1 %v5091_v42  ;;  %3036 = vmatmul.f32.gmra.mxu3 %v5071_v20 }
 0x37c   : > { %v5624_v58 = vsel %vm487_vm3, %v5282_v25, %v5615_v60  ;;  %v1936_v62 = vsel %vm534_vm2, %v5264_v47, %v1901_v38  ;;  %v1913_v0 = vpop.permute.xlu1 %1912  ;;  %3606 = vmatmul.msk.f32.gmra.mxu2 %vm992_vm8, %v5295_v11  ;;  %v5634_v25 = vpop.f32.mrf.mxu0  ;;  %v2382_v47 = vld [vmem:[#allocation4 + $0x110] sm:$0xff] }
 0x37d   : > { %v1941_v42 = vsel %vm534_vm2, %v5227_v48, %v1913_v0  ;;  %v1942_v20 = vsel %vm534_vm2, %v1913_v0, %v5550_v21  ;;  %3136 = vmatpush.msra.mxu2 %v2394_v52  ;;  %v2376_v48 = vld [vmem:[#allocation4 + $0xe0] sm:$0xff]  ;;  %v5651_v61 = vpop.f32.mrf.mxu1  ;;  %v5657_v30 = vpop.f32.mrf.mxu2 }
 0x37e   : > { %3051 = vmatpush.msrb.mxu0 %v1941_v42  ;;  %3174 = vmatpush.msra.mxu3 %v1942_v20  ;;  %v5639_v11 = vpop.f32.mrf.mxu3  ;;  %v5692_v0 = vld [vmem:[#allocation7] sm:$0xff]  ;;  %v2509_v20 = vld [vmem:[#allocation4 + $0x508] sm:$0xff] }
 0x37f   : > { %2919 = vmatmul.f32.gmra.mxu0 %v5115_v10  ;;  %3137 = vmatpush.msra.mxu2 %v2388_v45 }
 0x380   : > { %3052 = vmatpush.msrb.mxu0 %v1936_v62 }
 0x381   : > { %3138 = vmatpush.msra.mxu2 %v2382_v47 }
 0x382   : > { %3053 = vmatpush.msrb.mxu0 %v1931_v32 }
 0x383   : > { %v5641_v50 = vpop.permute.xlu2 %1726  ;;  %v1891_v39 = vpop.permute.xlu0 %1890  ;;  %3039 = vmatmul.f32.gmra.mxu3 %v5097_v40  ;;  %3139 = vmatpush.msra.mxu2 %v2376_v48  ;;  %v2364_v40 = vld [vmem:[#allocation4 + $0x80] sm:$0xff] }
 0x384   : > { %1813 = vst.msk [vmem:[#allocation4 + $0x3e8] sm:$0xff] %vm992_vm8, %v5641_v50  ;;  %v1932_v17 = vsel %vm534_vm2, %v5576_v24, %v1891_v39  ;;  %v1903_v21 = vpop.permute.xlu1 %1902  ;;  %3607 = vmatmul.msk.f32.gmra.mxu2 %vm992_vm8, %v5321_v6  ;;  %v5655_v14 = vpop.f32.mrf.mxu0  ;;  %v2352_v6 = vld [vmem:[#allocation4 + $0x20] sm:$0xff] }
 0x385   : > { %v1937_v19 = vsel %vm534_vm2, %v1901_v38, %v1903_v21  ;;  %3140 = vmatpush.msra.mxu2 %v2370_v18  ;;  %1977 = vst.msk [vmem:[#allocation4 + $0x4a8] sm:$0xff] %vm992_vm8, %v1891_v39  ;;  %v6272_v39 = vld [vmem:[#allocation31_spill] sm:$0xff] }
 0x386   : > { %3175 = vmatpush.msra.mxu3 %v1937_v19  ;;  %1983 = vst.msk [vmem:[#allocation4 + $0x4d8] sm:$0xff] %vm992_vm8, %v1903_v21  ;;  %v5659_v24 = vpop.f32.mrf.mxu3  ;;  %v6273_v21 = vld [vmem:[#allocation27_spill] sm:$0xff] }
 0x387   : > { %3141 = vmatpush.msra.mxu2 %v2364_v40  ;;  %v5708_v40 = vld [vmem:[#allocation7 + $0x18] sm:$0xff] }
 0x388   : > { %3176 = vmatpush.msra.mxu3 %v1932_v17 }
 0x389   : > { %3142 = vmatpush.msra.mxu2 %v2358_v57  ;;  %v2491_v57 = vld [vmem:[#allocation4 + $0x478] sm:$0xff] }
 0x38b   : > { %v5661_v29 = vpop.permute.xlu2 %1584  ;;  %v1749_v32 = vpop.permute.xlu0 %1748  ;;  %3042 = vmatmul.f32.gmra.mxu3 %v5115_v10  ;;  %3143 = vmatpush.msra.mxu2 %v2352_v6 }
 0x38c   : > { %v5667_v1 = vsel %vm440_vm4, %v5335_v8, %v5661_v29  ;;  %v1777_v23 = vsel %vm487_vm3, %v5292_v26, %v1749_v32  ;;  %v1761_v44 = vpop.permute.xlu1 %1760  ;;  %3608 = vmatmul.msk.f32.gmra.mxu2 %vm992_vm8, %v5349_v28  ;;  %v5677_v8 = vpop.f32.mrf.mxu1  ;;  %v2521_v26 = vld [vmem:[#allocation4 + $0x568] sm:$0xff] }
 0x38d   : > { %v1782_v5 = vsel %vm487_vm3, %v5254_v55, %v1761_v44  ;;  %v1783_v10 = vsel %vm487_vm3, %v1761_v44, %v5596_v56  ;;  %3292 = vmatpush.msrb.mxu2 %v2539_v43  ;;  %v5679_v51 = vpop.f32.mrf.mxu0  ;;  %v5682_v28 = vpop.f32.mrf.mxu2  ;;  %v2497_v45 = vld [vmem:[#allocation4 + $0x4a8] sm:$0xff] }
 0x38e   : > { %3054 = vmatpush.msrb.mxu0 %v1782_v5  ;;  %3177 = vmatpush.msra.mxu3 %v1783_v10  ;;  %v5695_v52 = vpop.f32.mrf.mxu3 }
 0x38f   : > { %3293 = vmatpush.msrb.mxu2 %v2533_v4 }
 0x390   : > { %3055 = vmatpush.msrb.mxu0 %v1777_v23 }
 0x391   : > { %3294 = vmatpush.msrb.mxu2 %v2527_v63 }
 0x392   : > { %3056 = vmatpush.msrb.mxu0 %v5624_v58  ;;  %v2515_v58 = vld [vmem:[#allocation4 + $0x538] sm:$0xff] }
 0x393   : > { %v5684_v55 = vpop.permute.xlu2 %1572  ;;  %v1739_v56 = vpop.permute.xlu0 %1738  ;;  %3295 = vmatpush.msrb.mxu2 %v2521_v26 }
 0x394   : > { %v1608_v13 = vsel %vm440_vm4, %v5280_v31, %v5684_v55  ;;  %v1773_v38 = vsel %vm487_vm3, %v5615_v60, %v1739_v56  ;;  %1819 = vst.msk [vmem:[#allocation4 + $0x418] sm:$0xff] %vm992_vm8, %v1739_v56  ;;  %v1751_v62 = vpop.permute.xlu1 %1750  ;;  %3144 = vmatmul.f32.vlgmr.msra.gmra.mxu2 %v5692_v0  ;;  %v2503_v31 = vld [vmem:[#allocation4 + $0x4d8] sm:$0xff]  ;;  %v5699_v60 = vpop.f32.mrf.mxu1 }
 0x395   : > { %v1778_v42 = vsel %vm487_vm3, %v1749_v32, %v1751_v62  ;;  %3296 = vmatpush.msrb.mxu2 %v2515_v58  ;;  %1825 = vst.msk [vmem:[#allocation4 + $0x448] sm:$0xff] %vm992_vm8, %v1751_v62  ;;  %v5711_v6 = vpop.f32.mrf.mxu2  ;;  %v6274_v32 = vld [vmem:[#allocation22_spill] sm:$0xff]  ;;  %v5717_v43 = vpop.f32.mrf.mxu0  ;;  %v5734_v58 = vld [vmem:[#allocation7 + $0x30] sm:$0xff] }
 0x396   : > { %3178 = vmatpush.msra.mxu3 %v1778_v42  ;;  %v5719_v5 = vpop.f32.mrf.mxu3 }
 0x397   : > { %3297 = vmatpush.msrb.mxu2 %v2509_v20 }
 0x398   : > { %3179 = vmatpush.msra.mxu3 %v1773_v38 }
 0x399   : > { %3298 = vmatpush.msrb.mxu2 %v2503_v31 }
 0x39b   : > { %v5701_v47 = vpop.permute.xlu2 %1560  ;;  %v1597_v48 = vpop.permute.xlu0 %1596  ;;  %3299 = vmatpush.msrb.mxu2 %v2497_v45  ;;  %v2479_v4 = vld [vmem:[#allocation4 + $0x418] sm:$0xff] }
 0x39c   : > { %v1603_v17 = vsel %vm440_vm4, %v6272_v39, %v5701_v47  ;;  %v1618_v18 = vsel %vm440_vm4, %v6273_v21, %v1597_v48  ;;  %v1725_v19 = vpop.permute.xlu1 %1724  ;;  %3147 = vmatmul.f32.gmra.mxu2 %v5708_v40  ;;  %v2485_v10 = vld [vmem:[#allocation4 + $0x448] sm:$0xff]  ;;  %v5724_v56 = vpop.f32.mrf.mxu1 }
 0x39d   : > { %v1767_v23 = vsel %vm487_vm3, %v6274_v32, %v1725_v19  ;;  %v1768_v44 = vsel %vm487_vm3, %v1725_v19, %v5641_v50  ;;  %3300 = vmatpush.msrb.mxu2 %v2491_v57  ;;  %v5738_v20 = vpop.f32.mrf.mxu2  ;;  %v5759_v57 = vld [vmem:[#allocation7 + $0x20] sm:$0xff] }
 0x39e   : > { %3057 = vmatpush.msrb.mxu0 %v1767_v23  ;;  %3180 = vmatpush.msra.mxu3 %v1768_v44  ;;  %v5746_v31 = vpop.f32.mrf.mxu3 }
 0x39f   : > { %3301 = vmatpush.msrb.mxu2 %v2485_v10 }
 0x3a0   : > { %3058 = vmatpush.msrb.mxu0 %v1618_v18 }
 0x3a1   : > { %3302 = vmatpush.msrb.mxu2 %v2479_v4 }
 0x3a2   : > { %3059 = vmatpush.msrb.mxu0 %v5667_v1  ;;  %v2473_v1 = vld [vmem:[#allocation4 + $0x3e8] sm:$0xff] }
 0x3a3   : > { %v5722_v63 = vpop.permute.xlu2 %2216  ;;  %v1587_v26 = vpop.permute.xlu0 %1586  ;;  %3303 = vmatpush.msrb.mxu2 %v2473_v1  ;;  %v5779_v1 = vld [vmem:[#allocation7 + $0x60] sm:$0xff] }
 0x3a4   : > { %v5729_v50 = vsel %vm628_vm0, %v5388_v34, %v5722_v63  ;;  %v1614_v38 = vsel %vm440_vm4, %v5661_v29, %v1587_v26  ;;  %1661 = vst.msk [vmem:[#allocation4 + $0x388] sm:$0xff] %vm992_vm8, %v1587_v26  ;;  %v1599_v62 = vpop.permute.xlu1 %1598  ;;  %3150 = vmatmul.f32.gmra.mxu2 %v5734_v58  ;;  %3060 = vmatpush.msrb.mxu0 %v1608_v13  ;;  %v5740_v34 = vld [vmem:[#allocation7 + $0x8] sm:$0xff]  ;;  %v5744_v29 = vpop.f32.mrf.mxu0 }
 0x3a5   : > { %v1619_v42 = vsel %vm440_vm4, %v1597_v48, %v1599_v62  ;;  %1667 = vst.msk [vmem:[#allocation4 + $0x3b8] sm:$0xff] %vm992_vm8, %v1599_v62  ;;  %v5756_v18 = vpop.f32.mrf.mxu1 }
 0x3a6   : > { %3061 = vmatpush.msrb.mxu0 %v1603_v17  ;;  %3181 = vmatpush.msra.mxu3 %v1619_v42  ;;  %v5751_v17 = vld [vmem:[#allocation7 + $0x48] sm:$0xff]  ;;  %v5766_v44 = vpop.f32.mrf.mxu3 }
 0x3a7   : > { %3062 = vmatmul.f32.vlgmr.msrb.gmra.mxu0 %v5740_v34  ;;  %v6275_v42 = vld [vmem:[#allocation24_spill] sm:$0xff] }
 0x3a8   : > { %3182 = vmatpush.msra.mxu3 %v1614_v38 }
 0x3ab   : > { %v2231_v45 = vpop.permute.xlu2 %2230  ;;  %v1575_v13 = vpop.permute.xlu0 %1574  ;;  %v2461_v32 = vld [vmem:[#allocation4 + $0x388] sm:$0xff] }
 0x3ac   : > { %2311 = vst.msk [vmem:[#allocation4 + $0x658] sm:$0xff] %vm992_vm8, %v2231_v45  ;;  %v1609_v48 = vsel %vm440_vm4, %v5684_v55, %v1575_v13  ;;  %v2253_v39 = vpop.permute.xlu1 %2252  ;;  %3153 = vmatmul.f32.gmra.mxu2 %v5751_v17  ;;  %v2467_v19 = vld [vmem:[#allocation4 + $0x3b8] sm:$0xff]  ;;  %v5762_v55 = vpop.f32.mrf.mxu2 }
 0x3ad   : > { %v2274_v21 = vsel %vm628_vm0, %v5418_v36, %v2253_v39  ;;  %3183 = vmatpush.msra.mxu3 %v1609_v48  ;;  %1655 = vst.msk [vmem:[#allocation4 + $0x358] sm:$0xff] %vm992_vm8, %v1575_v13  ;;  %3304 = vmatpush.msrb.mxu2 %v2467_v19  ;;  %v5764_v23 = vpop.f32.mrf.mxu0 }
 0x3ae   : > { %3099 = vmatpush.msrb.mxu1 %v2274_v21  ;;  %v5792_v21 = vpop.f32.mrf.mxu1 }
 0x3af   : > { %3065 = vmatmul.f32.gmra.mxu0 %v5759_v57  ;;  %3305 = vmatpush.msrb.mxu2 %v2461_v32 }
 0x3b3   : > { %v5768_v36 = vpop.permute.xlu2 %2579  ;;  %v1563_v10 = vpop.permute.xlu0 %1562 }
 0x3b4   : > { %v2657_v4 = vadd.f32 %v5594_v3, %v5768_v36  ;;  %v2780_v26 = vadd.f32 %v5651_v61, %v5768_v36  ;;  %v1604_v38 = vsel %vm440_vm4, %v5701_v47, %v1563_v10  ;;  %1649 = vst.msk [vmem:[#allocation4 + $0x328] sm:$0xff] %vm992_vm8, %v1563_v10  ;;  %v5777_v62 = vpop.permute.xlu1 %2240  ;;  %3156 = vmatmul.f32.gmra.mxu2 %v5779_v1  ;;  %v2455_v48 = vld [vmem:[#allocation4 + $0x358] sm:$0xff] }
 0x3b5   : > { %v2269_v13 = vsel %vm628_vm0, %v6275_v42, %v5777_v62  ;;  %3184 = vmatpush.msra.mxu3 %v1604_v38  ;;  %3306 = vmatpush.msrb.mxu2 %v2455_v48  ;;  %v5788_v47 = vld [vmem:[#allocation7 + $0x38] sm:$0xff] }
 0x3b6   : > { %v2698_v3 = vadd.f32 %v5414_v22, %v2657_v4  ;;  %v2821_v61 = vadd.f32 %v5657_v30, %v2780_v26  ;;  %3100 = vmatpush.msrb.mxu1 %v2269_v13  ;;  %3185 = vmatmul.f32.vlgmr.msra.gmra.mxu3 %v5740_v34  ;;  %v5796_v22 = vpop.f32.mrf.mxu2 }
 0x3b7   : > { %3068 = vmatmul.f32.gmra.mxu0 %v5788_v47 }
 0x3b8   : > { %v2739_v19 = vadd.f32 %v5655_v14, %v2698_v3  ;;  %v2862_v32 = vadd.f32 %v5659_v24, %v2821_v61  ;;  %v5811_v3 = vpop.f32.mrf.mxu3  ;;  %v5813_v61 = vpop.f32.mrf.mxu0 }
 0x3ba   : > { %v3380_v10 = vmax.f32 %v2739_v19, 0.0  ;;  %v3381_v38 = vmax.f32 %v2862_v32, 0.0 }
 0x3bb   : > { %v5803_v30 = vpop.permute.xlu2 %2594  ;;  %v2255_v4 = vpop.permute.xlu0 %2254  ;;  %v2449_v26 = vld [vmem:[#allocation4 + $0x328] sm:$0xff] }
 0x3bc   : > { %v3425_v42 = vpack.c.bf16 %v3381_v38, %v3380_v10  ;;  %v2666_v14 = vadd.f32 %v5514_v12, %v5803_v30  ;;  %v2789_v24 = vadd.f32 %v5724_v56, %v5803_v30  ;;  %v2275_v13 = vsel %vm628_vm0, %v2253_v39, %v2255_v4  ;;  %2323 = vst.msk [vmem:[#allocation4 + $0x6b8] sm:$0xff] %vm992_vm8, %v2255_v4  ;;  %v2229_v48 = vpop.permute.xlu1 %2228  ;;  %v5821_v39 = vld [vmem:[#allocation7 + $0x78] sm:$0xff]  ;;  %v5824_v10 = vld [vmem:[#allocation7 + $0x50] sm:$0xff]  ;;  %v2797_v38 = vpop.f32.mrf.mxu1 }
 0x3bd   : > { %v2264_v19 = vsel %vm628_vm0, %v5475_v54, %v2229_v48  ;;  %v2265_v32 = vsel %vm628_vm0, %v2229_v48, %v2231_v45  ;;  %3307 = vmatpush.msrb.mxu2 %v2449_v26  ;;  %3222 = vmatpush.msra.mxu0 %v2275_v13 }
 0x3be   : > { %3452 = vst [vmem:[%s5801_s22 + $0x18] sm:$0xff] %v3425_v42  ;;  %v2707_v12 = vadd.f32 %v5521_v9, %v2666_v14  ;;  %v2830_v56 = vadd.f32 %v5738_v20, %v2789_v24  ;;  %3159 = vmatmul.f32.gmra.mxu2 %v5821_v39  ;;  %3101 = vmatpush.msrb.mxu1 %v2264_v19  ;;  %v5831_v9 = vld [vmem:[#allocation7 + $0x10] sm:$0xff]  ;;  %v2443_v20 = vld [vmem:[#allocation4 + $0x2f8] sm:$0xff]  ;;  %v2838_v19 = vpop.f32.mrf.mxu2 }
 0x3bf   : > { %3071 = vmatmul.f32.gmra.mxu0 %v5824_v10  ;;  %3188 = vmatmul.f32.gmra.mxu3 %v5759_v57 }
 0x3c0   : > { %v2748_v54 = vadd.f32 %v5744_v29, %v2707_v12  ;;  %v2871_v45 = vadd.f32 %v5746_v31, %v2830_v56  ;;  %3102 = vmatpush.msrb.mxu1 %v5729_v50  ;;  %v2437_v29 = vld [vmem:[#allocation4 + $0x2c8] sm:$0xff] }
 0x3c1   : > { %3609 = vmatmul.msk.f32.vlgmr.msrb.gmra.mxu1 %vm992_vm8, %v5831_v9 }
 0x3c2   : > { %v3398_v4 = vmax.f32 %v2748_v54, 0.0  ;;  %v3399_v26 = vmax.f32 %v2871_v45, 0.0  ;;  %3251 = vmatpush.msra.mxu1 %v2443_v20  ;;  %v2431_v54 = vld [vmem:[#allocation4 + $0x298] sm:$0xff]  ;;  %v2879_v20 = vpop.f32.mrf.mxu3 }
 0x3c3   : > { %v5835_v42 = vpop.permute.xlu2 %2609  ;;  %v2219_v14 = vpop.permute.xlu0 %2218  ;;  %v2563_v24 = vld [vmem:[#allocation4 + $0x6b8] sm:$0xff] }
 0x3c4   : > { %v3434_v13 = vpack.c.bf16 %v3399_v26, %v3398_v4  ;;  %v2675_v50 = vadd.f32 %v5606_v2, %v5835_v42  ;;  %v2260_v31 = vsel %vm628_vm0, %v5722_v63, %v2219_v14  ;;  %2305 = vst.msk [vmem:[#allocation4 + $0x628] sm:$0xff] %vm992_vm8, %v2219_v14  ;;  %v2243_v48 = vpop.permute.xlu1 %2242  ;;  %3345 = vmatpush.msrb.mxu3 %v2563_v24  ;;  %v5847_v2 = vld [vmem:[#allocation7 + $0x90] sm:$0xff]  ;;  %v2756_v63 = vpop.f32.mrf.mxu0  ;;  %v2425_v26 = vld [vmem:[#allocation4 + $0x268] sm:$0xff]  ;;  %v2419_v24 = vld [vmem:[#allocation4 + $0x238] sm:$0xff] }
 0x3c5   : > { %3252 = vmatpush.msra.mxu1 %v2437_v29  ;;  %v2270_v12 = vsel %vm628_vm0, %v5777_v62, %v2243_v48  ;;  %v2798_v56 = vadd.f32 %v2797_v38, %v5835_v42  ;;  %2317 = vst.msk [vmem:[#allocation4 + $0x688] sm:$0xff] %vm992_vm8, %v2243_v48  ;;  %v5852_v38 = vld [vmem:[#allocation7 + $0x68] sm:$0xff] }
 0x3c6   : > { %3461 = vst [vmem:[%s5801_s22 + $0x60] sm:$0xff] %v3434_v13  ;;  %v2716_v45 = vadd.f32 %v5611_v16, %v2675_v50  ;;  %3162 = vmatmul.f32.gmra.mxu2 %v5847_v2  ;;  %3223 = vmatpush.msra.mxu0 %v2270_v12  ;;  %v5855_v14 = vld [vmem:[#allocation7 + $0x28] sm:$0xff] }
 0x3c7   : > { %3253 = vmatpush.msra.mxu1 %v2431_v54  ;;  %v2839_v4 = vadd.f32 %v2838_v19, %v2798_v56  ;;  %3191 = vmatmul.f32.gmra.mxu3 %v5788_v47  ;;  %v2413_v48 = vld [vmem:[#allocation4 + $0x208] sm:$0xff] }
 0x3c8   : > { %v2757_v62 = vadd.f32 %v2756_v63, %v2716_v45  ;;  %3074 = vmatmul.f32.gmra.mxu0 %v5852_v38 }
 0x3c9   : > { %3254 = vmatpush.msra.mxu1 %v2425_v26  ;;  %v2880_v16 = vadd.f32 %v2879_v20, %v2839_v4  ;;  %3224 = vmatpush.msra.mxu0 %v2265_v32  ;;  %v2407_v20 = vld [vmem:[#allocation4 + $0x1d8] sm:$0xff]  ;;  %v5873_v4 = vld [vmem:[#allocation7 + $0xa8] sm:$0xff] }
 0x3ca   : > { %3610 = vmatmul.msk.f32.gmra.mxu1 %vm992_vm8, %v5855_v14  ;;  %v3416_v29 = vmax.f32 %v2757_v62, 0.0 }
 0x3cb   : > { %3255 = vmatpush.msra.mxu1 %v2419_v24  ;;  %v3417_v13 = vmax.f32 %v2880_v16, 0.0  ;;  %v5859_v50 = vpop.permute.xlu0 %2584  ;;  %3225 = vmatpush.msra.mxu0 %v2260_v31 }
 0x3cc   : > { %v2660_v19 = vadd.f32 %v5439_v53, %v5859_v50  ;;  %v2783_v32 = vadd.f32 %v5677_v8, %v5859_v50  ;;  %v5865_v12 = vpop.permute.xlu1 %2574  ;;  %v6276_v53 = vld [vmem:[#allocation23_spill] sm:$0xff]  ;;  %v2557_v62 = vld [vmem:[#allocation4 + $0x688] sm:$0xff] }
 0x3cd   : > { %3256 = vmatpush.msra.mxu1 %v2413_v48  ;;  %v3443_v56 = vpack.c.bf16 %v3417_v13, %v3416_v29  ;;  %v2654_v54 = vadd.f32 %v5572_v33, %v5865_v12  ;;  %v2777_v45 = vadd.f32 %v5619_v35, %v5865_v12  ;;  %3346 = vmatpush.msrb.mxu3 %v2557_v62  ;;  %v2551_v29 = vld [vmem:[#allocation4 + $0x658] sm:$0xff]  ;;  %v5887_v48 = vld [vmem:[#allocation7 + $0x40] sm:$0xff] }
 0x3ce   : > { %v2701_v31 = vadd.f32 %v5454_v41, %v2660_v19  ;;  %v2824_v63 = vadd.f32 %v5682_v28, %v2783_v32  ;;  %3165 = vmatmul.f32.gmra.mxu2 %v5873_v4  ;;  %v5882_v41 = vld [vmem:[#allocation7 + $0x80] sm:$0xff]  ;;  %v2401_v28 = vld [vmem:[#allocation4 + $0x1a8] sm:$0xff]  ;;  %v2383_v62 = vld [vmem:[#allocation4 + $0x118] sm:$0xff] }
 0x3cf   : > { %3257 = vmatpush.msra.mxu1 %v2407_v20  ;;  %3470 = vst [vmem:[%s5801_s22 + $0xa8] sm:$0xff] %v3443_v56  ;;  %v2695_v8 = vadd.f32 %v6276_v53, %v2654_v54  ;;  %v2818_v26 = vadd.f32 %v5636_v46, %v2777_v45  ;;  %3194 = vmatmul.f32.gmra.mxu3 %v5824_v10  ;;  %v2545_v32 = vld [vmem:[#allocation4 + $0x628] sm:$0xff] }
 0x3d0   : > { %v2742_v33 = vadd.f32 %v5679_v51, %v2701_v31  ;;  %v2865_v35 = vadd.f32 %v5695_v52, %v2824_v63  ;;  %3077 = vmatmul.f32.gmra.mxu0 %v5882_v41  ;;  %3347 = vmatpush.msrb.mxu3 %v2551_v29  ;;  %v2395_v51 = vld [vmem:[#allocation4 + $0x178] sm:$0xff]  ;;  %v2389_v20 = vld [vmem:[#allocation4 + $0x148] sm:$0xff] }
 0x3d1   : > { %v2736_v16 = vadd.f32 %v5634_v25, %v2695_v8  ;;  %v2859_v24 = vadd.f32 %v5639_v11, %v2818_v26  ;;  %3258 = vmatpush.msra.mxu1 %v2401_v28  ;;  %v5903_v8 = vpop.f32.mrf.mxu0 }
 0x3d2   : > { %v3386_v46 = vmax.f32 %v2742_v33, 0.0  ;;  %v3387_v13 = vmax.f32 %v2865_v35, 0.0  ;;  %3611 = vmatmul.msk.f32.gmra.mxu1 %vm992_vm8, %v5887_v48  ;;  %3348 = vmatpush.msrb.mxu3 %v2545_v32 }
 0x3d3   : > { %v3374_v52 = vmax.f32 %v2736_v16, 0.0  ;;  %v3375_v19 = vmax.f32 %v2859_v24, 0.0  ;;  %v5891_v56 = vpop.permute.xlu0 %2599  ;;  %3259 = vmatpush.msra.mxu1 %v2395_v51  ;;  %v5922_v16 = vld [vmem:[#allocation7 + $0x58] sm:$0xff] }
 0x3d4   : > { %v3428_v25 = vpack.c.bf16 %v3387_v13, %v3386_v46  ;;  %v2669_v11 = vadd.f32 %v5546_v49, %v5891_v56  ;;  %v2792_v54 = vadd.f32 %v5756_v18, %v5891_v56  ;;  %v5897_v45 = vpop.permute.xlu1 %2589 }
 0x3d5   : > { %v3422_v31 = vpack.c.bf16 %v3375_v19, %v3374_v52  ;;  %v2663_v63 = vadd.f32 %v5477_v7, %v5897_v45  ;;  %v2786_v53 = vadd.f32 %v5699_v60, %v5897_v45  ;;  %3260 = vmatpush.msra.mxu1 %v2389_v20  ;;  %v2359_v19 = vld [vmem:[#allocation4 + $0x58] sm:$0xff] }
 0x3d6   : > { %3455 = vst [vmem:[%s5801_s22 + $0x30] sm:$0xff] %v3428_v25  ;;  %v2710_v26 = vadd.f32 %v5548_v27, %v2669_v11  ;;  %v2833_v49 = vadd.f32 %v5762_v55, %v2792_v54  ;;  %3308 = vmatmul.f32.vlgmr.msrb.gmra.mxu2 %v5740_v34  ;;  %v5917_v27 = vld [vmem:[#allocation7 + $0x98] sm:$0xff]  ;;  %v2377_v55 = vld [vmem:[#allocation4 + $0xe8] sm:$0xff]  ;;  %v3859_v54 = vld [vmem:[#allocation7 + $0xb0] sm:$0xff] }
 0x3d7   : > { %3446 = vst [vmem:[%s5801_s22] sm:$0xff] %v3422_v31  ;;  %v2704_v18 = vadd.f32 %v5483_v15, %v2663_v63  ;;  %v2827_v33 = vadd.f32 %v5711_v6, %v2786_v53  ;;  %v5912_v7 = vpop.f32.mrf.mxu2  ;;  %3261 = vmatpush.msra.mxu1 %v2383_v62  ;;  %3197 = vmatmul.f32.gmra.mxu3 %v5852_v38  ;;  %v3860_v31 = vld [vmem:[#allocation7 + $0x70] sm:$0xff] }
 0x3d8   : > { %v2751_v60 = vadd.f32 %v5764_v23, %v2710_v26  ;;  %v2874_v35 = vadd.f32 %v5766_v44, %v2833_v49  ;;  %3080 = vmatmul.f32.gmra.mxu0 %v5917_v27  ;;  %v2371_v23 = vld [vmem:[#allocation4 + $0xb8] sm:$0xff]  ;;  %v5926_v44 = vpop.f32.mrf.mxu1 }
 0x3d9   : > { %v2745_v34 = vadd.f32 %v5717_v43, %v2704_v18  ;;  %v2868_v15 = vadd.f32 %v5719_v5, %v2827_v33  ;;  %3262 = vmatpush.msra.mxu1 %v2377_v55  ;;  %v2365_v5 = vld [vmem:[#allocation4 + $0x88] sm:$0xff] }
 0x3da   : > { %v3404_v6 = vmax.f32 %v2751_v60, 0.0  ;;  %v3405_v28 = vmax.f32 %v2874_v35, 0.0  ;;  %3612 = vmatmul.msk.f32.gmra.mxu1 %vm992_vm8, %v5922_v16  ;;  %v3863_v60 = vld [vmem:[#allocation7 + $0xb8] sm:$0xff] }
 0x3db   : > { %v3392_v24 = vmax.f32 %v2745_v34, 0.0  ;;  %v3393_v29 = vmax.f32 %v2868_v15, 0.0  ;;  %3263 = vmatpush.msra.mxu1 %v2371_v23 }
 0x3dc   : > { %v3437_v46 = vpack.c.bf16 %v3405_v28, %v3404_v6  ;;  %v5928_v43 = vpop.permute.xlu1 %2604 }
 0x3dd   : > { %v3431_v13 = vpack.c.bf16 %v3393_v29, %v3392_v24  ;;  %v2672_v51 = vadd.f32 %v5574_v37, %v5928_v43  ;;  %v2795_v52 = vadd.f32 %v5792_v21, %v5928_v43  ;;  %3264 = vmatpush.msra.mxu1 %v2365_v5  ;;  %v5942_v37 = vpop.f32.mrf.mxu0  ;;  %v2353_v21 = vld [vmem:[#allocation4 + $0x28] sm:$0xff] }
 0x3de   : > { %3464 = vst [vmem:[%s5801_s22 + $0x78] sm:$0xff] %v3437_v46  ;;  %3311 = vmatmul.f32.gmra.mxu2 %v5759_v57 }
 0x3df   : > { %3458 = vst [vmem:[%s5801_s22 + $0x48] sm:$0xff] %v3431_v13  ;;  %v2713_v32 = vadd.f32 %v5588_v59, %v2672_v51  ;;  %v2836_v25 = vadd.f32 %v5796_v22, %v2795_v52  ;;  %v5939_v11 = vpop.f32.mrf.mxu2  ;;  %3265 = vmatpush.msra.mxu1 %v2359_v19  ;;  %3200 = vmatmul.f32.gmra.mxu3 %v5882_v41 }
 0x3e0   : > { %3083 = vmatmul.f32.gmra.mxu0 %v3859_v54  ;;  %v5947_v63 = vpop.f32.mrf.mxu1  ;;  %v2900_v52 = vadd.f32 %v5903_v8, %v5865_v12 }
 0x3e1   : > { %v2754_v20 = vadd.f32 %v5813_v61, %v2713_v32  ;;  %v2877_v57 = vadd.f32 %v5811_v3, %v2836_v25  ;;  %3266 = vmatpush.msra.mxu1 %v2353_v21  ;;  %v3861_v61 = vld [vmem:[#allocation7 + $0x88] sm:$0xff]  ;;  %v2903_v21 = vadd.f32 %v5942_v37, %v5768_v36 }
 0x3e2   : > { %3613 = vmatmul.msk.f32.gmra.mxu1 %vm992_vm8, %v3860_v31  ;;  %v2941_v19 = vadd.f32 %v5926_v44, %v2900_v52 }
 0x3e3   : > { %v3410_v59 = vmax.f32 %v2754_v20, 0.0  ;;  %v3411_v22 = vmax.f32 %v2877_v57, 0.0  ;;  %v2944_v44 = vadd.f32 %v5947_v63, %v2903_v21 }
 0x3e4   : > { %v2982_v25 = vadd.f32 %v5912_v7, %v2941_v19 }
 0x3e5   : > { %v3440_v53 = vpack.c.bf16 %v3411_v22, %v3410_v59  ;;  %v5956_v3 = vpop.f32.mrf.mxu0  ;;  %v2985_v7 = vadd.f32 %v5939_v11, %v2944_v44 }
 0x3e6   : > { %3314 = vmatmul.f32.gmra.mxu2 %v5788_v47  ;;  %v3862_v47 = vld [vmem:[#allocation7 + $0xa0] sm:$0xff]  ;;  %v3376_v8 = vmax.f32 %v2982_v25, 0.0 }
 0x3e7   : > { %3467 = vst [vmem:[%s5801_s22 + $0x90] sm:$0xff] %v3440_v53  ;;  %v5951_v26 = vpop.f32.mrf.mxu2  ;;  %3203 = vmatmul.f32.gmra.mxu3 %v5917_v27 }
 0x3e8   : > { %3617 = vmatmul.msk.f32.vlgmr.msra.gmra.mxu0 %vm992_vm8, %v5831_v9  ;;  %v5960_v49 = vpop.f32.mrf.mxu1 }
 0x3ea   : > { %3614 = vmatmul.msk.f32.gmra.mxu1 %vm992_vm8, %v3861_v61 }
 0x3ed   : > { %v5967_v18 = vpop.f32.mrf.mxu0 }
 0x3ee   : > { %3317 = vmatmul.f32.gmra.mxu2 %v5824_v10 }
 0x3ef   : > { %3206 = vmatmul.f32.gmra.mxu3 %v3859_v54  ;;  %v5962_v62 = vpop.f32.mrf.mxu2 }
 0x3f0   : > { %3618 = vmatmul.msk.f32.gmra.mxu0 %vm992_vm8, %v5855_v14  ;;  %v5974_v10 = vpop.f32.mrf.mxu1 }
 0x3f2   : > { %3615 = vmatmul.msk.f32.gmra.mxu1 %vm992_vm8, %v3862_v47 }
 0x3f5   : > { %v5979_v35 = vpop.f32.mrf.mxu0 }
 0x3f6   : > { %3320 = vmatmul.f32.gmra.mxu2 %v5852_v38  ;;  %v5984_v38 = vpop.f32.mrf.mxu3 }
 0x3f7   : > { %3625 = vmatmul.msk.f32.vlgmr.msrb.gmra.mxu3 %vm992_vm8, %v5831_v9  ;;  %v5976_v33 = vpop.f32.mrf.mxu2 }
 0x3f8   : > { %3619 = vmatmul.msk.f32.gmra.mxu0 %vm992_vm8, %v5887_v48  ;;  %v5989_v9 = vpop.f32.mrf.mxu1 }
 0x3fa   : > { %3616 = vmatmul.msk.f32.gmra.mxu1 %vm992_vm8, %v3863_v60 }
 0x3fe   : > { %3323 = vmatmul.f32.gmra.mxu2 %v5882_v41  ;;  %v5996_v41 = vpop.f32.mrf.mxu0 }
 0x3ff   : > { %3626 = vmatmul.msk.f32.gmra.mxu3 %vm992_vm8, %v5855_v14  ;;  %v5991_v55 = vpop.f32.mrf.mxu2  ;;  %v5999_v14 = vpop.f32.mrf.mxu3 }
 0x400   : > { %3620 = vmatmul.msk.f32.gmra.mxu0 %vm992_vm8, %v5922_v16  ;;  %v6002_v34 = vpop.f32.mrf.mxu1 }
 0x402   : > { %3267 = vmatmul.f32.vlgmr.msra.gmra.mxu1 %v5692_v0 }
 0x406   : > { %3326 = vmatmul.f32.gmra.mxu2 %v5917_v27  ;;  %v6009_v27 = vpop.f32.mrf.mxu0 }
 0x407   : > { %3627 = vmatmul.msk.f32.gmra.mxu3 %vm992_vm8, %v5887_v48  ;;  %v6004_v0 = vpop.f32.mrf.mxu2  ;;  %v6012_v48 = vpop.f32.mrf.mxu3 }
 0x408   : > { %3621 = vmatmul.msk.f32.gmra.mxu0 %vm992_vm8, %v3860_v31  ;;  %v6014_v15 = vpop.f32.mrf.mxu1 }
 0x40a   : > { %3270 = vmatmul.f32.gmra.mxu1 %v5708_v40 }
 0x40e   : > { %3329 = vmatmul.f32.gmra.mxu2 %v3859_v54  ;;  %v6021_v6 = vpop.f32.mrf.mxu0 }
 0x40f   : > { %3628 = vmatmul.msk.f32.gmra.mxu3 %vm992_vm8, %v5922_v16  ;;  %v6017_v40 = vpop.f32.mrf.mxu2  ;;  %v6023_v28 = vpop.f32.mrf.mxu3 }
 0x410   : > { %3622 = vmatmul.msk.f32.gmra.mxu0 %vm992_vm8, %v3861_v61 }
 0x412   : > { %3273 = vmatmul.f32.gmra.mxu1 %v5734_v58  ;;  %v6027_v58 = vpop.f32.mrf.mxu1 }
 0x417   : > { %3629 = vmatmul.msk.f32.gmra.mxu3 %vm992_vm8, %v3860_v31  ;;  %v6029_v16 = vpop.f32.mrf.mxu2  ;;  %v6033_v24 = vpop.f32.mrf.mxu3 }
 0x418   : > { %3623 = vmatmul.msk.f32.gmra.mxu0 %vm992_vm8, %v3862_v47 }
 0x41a   : > { %3276 = vmatmul.f32.gmra.mxu1 %v5751_v17  ;;  %v3022_v17 = vpop.f32.mrf.mxu1 }
 0x41b   : > { %v3023_v32 = vadd.f32 %v3022_v17, %v5865_v12 }
 0x41f   : > { %3630 = vmatmul.msk.f32.gmra.mxu3 %vm992_vm8, %v3861_v61  ;;  %v6036_v29 = vpop.f32.mrf.mxu2  ;;  %v6039_v5 = vpop.f32.mrf.mxu3 }
 0x420   : > { %3624 = vmatmul.msk.f32.gmra.mxu0 %vm992_vm8, %v3863_v60 }
 0x422   : > { %3279 = vmatmul.f32.gmra.mxu1 %v5779_v1  ;;  %v3025_v51 = vpop.f32.mrf.mxu1 }
 0x423   : > { %v3026_v22 = vadd.f32 %v3025_v51, %v5768_v36  ;;  %v3029_v51 = vadd.f32 %v5984_v38, %v5859_v50  ;;  %v3032_v38 = vadd.f32 %v5999_v14, %v5897_v45 }
 0x424   : > { %v3063_v23 = vpop.f32.mrf.mxu0 }
 0x425   : > { %v3064_v54 = vadd.f32 %v3063_v23, %v3023_v32  ;;  %v3382_v23 = vmax.f32 %v2985_v7, 0.0 }
 0x427   : > { %3631 = vmatmul.msk.f32.gmra.mxu3 %vm992_vm8, %v3862_v47  ;;  %v6042_v1 = vpop.f32.mrf.mxu2 }
 0x42a   : > { %3282 = vmatmul.f32.gmra.mxu1 %v5821_v39 }
 0x42c   : > { %v3066_v46 = vpop.f32.mrf.mxu0 }
 0x42d   : > { %v3067_v61 = vadd.f32 %v3066_v46, %v3026_v22 }
 0x42f   : > { %3632 = vmatmul.msk.f32.gmra.mxu3 %vm992_vm8, %v3863_v60  ;;  %v6054_v31 = vpop.f32.mrf.mxu2  ;;  %v2906_v60 = vadd.f32 %v5956_v3, %v5859_v50  ;;  %v2909_v3 = vadd.f32 %v5967_v18, %v5897_v45 }
 0x431   : > { %v2947_v11 = vadd.f32 %v5960_v49, %v2906_v60  ;;  %v2950_v49 = vadd.f32 %v5974_v10, %v2909_v3  ;;  %v3035_v10 = vadd.f32 %v6012_v48, %v5803_v30 }
 0x432   : > { %3285 = vmatmul.f32.gmra.mxu1 %v5847_v2 }
 0x433   : > { %v2988_v46 = vadd.f32 %v5951_v26, %v2947_v11  ;;  %v2991_v26 = vadd.f32 %v5962_v62, %v2950_v49 }
 0x434   : > { %v3069_v13 = vpop.f32.mrf.mxu0 }
 0x435   : > { %v3070_v25 = vadd.f32 %v3069_v13, %v3029_v51  ;;  %v3388_v21 = vmax.f32 %v2988_v46, 0.0 }
 0x437   : > { %v6064_v19 = vpop.f32.mrf.mxu2 }
 0x439   : > { %v6047_v39 = vpop.f32.mrf.mxu3 }
 0x43a   : > { %3288 = vmatmul.f32.gmra.mxu1 %v5873_v4 }
 0x43c   : > { %v3072_v20 = vpop.f32.mrf.mxu0 }
 0x43d   : > { %v3073_v13 = vadd.f32 %v3072_v20, %v3032_v38 }
 0x43e   : > { %v3104_v2 = vpop.f32.mrf.mxu1 }
 0x43f   : > { %v3105_v57 = vadd.f32 %v3104_v2, %v3064_v54 }
 0x441   : > { %v3377_v4 = vmax.f32 %v3105_v57, 0.0  ;;  %v6080_v44 = vpop.f32.mrf.mxu2 }
 0x442   : > { %v6056_v59 = vpop.f32.mrf.mxu3 }
 0x443   : > { %v3423_v53 = vpack.c.bf16 %v3377_v4, %v3376_v8 }
 0x445   : > { %3447 = vst [vmem:[%s5801_s22 + $0x8] sm:$0xff] %v3423_v53  ;;  %v3075_v17 = vpop.f32.mrf.mxu0  ;;  %v2912_v53 = vadd.f32 %v5979_v35, %v5803_v30 }
 0x446   : > { %v3076_v20 = vadd.f32 %v3075_v17, %v3035_v10 }
 0x447   : > { %v3107_v47 = vpop.f32.mrf.mxu1  ;;  %v2953_v14 = vadd.f32 %v5989_v9, %v2912_v53  ;;  %v3038_v9 = vadd.f32 %v6023_v28, %v5891_v56 }
 0x448   : > { %v3108_v37 = vadd.f32 %v3107_v47, %v3067_v61  ;;  %v3394_v61 = vmax.f32 %v2991_v26, 0.0 }
 0x449   : > { %v2994_v62 = vadd.f32 %v5976_v33, %v2953_v14 }
 0x44a   : > { %v3383_v52 = vmax.f32 %v3108_v37, 0.0  ;;  %v6066_v32 = vpop.f32.mrf.mxu3 }
 0x44b   : > { %v3400_v11 = vmax.f32 %v2994_v62, 0.0 }
 0x44c   : > { %v3426_v63 = vpack.c.bf16 %v3383_v52, %v3382_v23  ;;  %v6092_v52 = vpop.f32.mrf.mxu2 }
 0x44d   : > { %v3078_v4 = vpop.f32.mrf.mxu0 }
 0x44e   : > { %3453 = vst [vmem:[%s5801_s22 + $0x20] sm:$0xff] %v3426_v63  ;;  %v2915_v63 = vadd.f32 %v5996_v41, %v5891_v56  ;;  %v3079_v17 = vadd.f32 %v3078_v4, %v3038_v9  ;;  %v2918_v41 = vadd.f32 %v6009_v27, %v5928_v43  ;;  %v2921_v27 = vadd.f32 %v6021_v6, %v5835_v42 }
 0x44f   : > { %v3110_v54 = vpop.f32.mrf.mxu1 }
 0x450   : > { %v3111_v2 = vadd.f32 %v3110_v54, %v3070_v25  ;;  %v2956_v48 = vadd.f32 %v6002_v34, %v2915_v63  ;;  %v3041_v34 = vadd.f32 %v6033_v24, %v5928_v43 }
 0x452   : > { %v3389_v57 = vmax.f32 %v3111_v2, 0.0  ;;  %v6075_v8 = vpop.f32.mrf.mxu3  ;;  %v2997_v33 = vadd.f32 %v5991_v55, %v2956_v48  ;;  %v2959_v55 = vadd.f32 %v6014_v15, %v2918_v41  ;;  %v3044_v15 = vadd.f32 %v6039_v5, %v5835_v42 }
 0x454   : > { %v3429_v22 = vpack.c.bf16 %v3389_v57, %v3388_v21  ;;  %v6106_v21 = vpop.f32.mrf.mxu2  ;;  %v3406_v38 = vmax.f32 %v2997_v33, 0.0  ;;  %v3000_v4 = vadd.f32 %v6004_v0, %v2959_v55  ;;  %v2962_v0 = vadd.f32 %v6027_v58, %v2921_v27 }
 0x455   : > { %v3081_v23 = vpop.f32.mrf.mxu0 }
 0x456   : > { %3456 = vst [vmem:[%s5801_s22 + $0x38] sm:$0xff] %v3429_v22  ;;  %v3082_v26 = vadd.f32 %v3081_v23, %v3041_v34  ;;  %v3003_v14 = vadd.f32 %v6017_v40, %v2962_v0 }
 0x457   : > { %v3113_v18 = vpop.f32.mrf.mxu1 }
 0x458   : > { %v3114_v7 = vadd.f32 %v3113_v18, %v3073_v13  ;;  %v3418_v62 = vmax.f32 %v3003_v14, 0.0 }
 0x45a   : > { %v3395_v47 = vmax.f32 %v3114_v7, 0.0  ;;  %v6086_v37 = vpop.f32.mrf.mxu3 }
 0x45c   : > { %v3432_v60 = vpack.c.bf16 %v3395_v47, %v3394_v61  ;;  %v3309_v53 = vpop.f32.mrf.mxu2  ;;  %v3412_v61 = vmax.f32 %v3000_v4, 0.0  ;;  %v3152_v4 = vadd.f32 %v6042_v1, %v5859_v50  ;;  %v3155_v1 = vadd.f32 %v6054_v31, %v5897_v45 }
 0x45d   : > { %v3084_v3 = vpop.f32.mrf.mxu0  ;;  %v3158_v31 = vadd.f32 %v6064_v19, %v5803_v30  ;;  %v3161_v19 = vadd.f32 %v6080_v44, %v5891_v56  ;;  %v3164_v44 = vadd.f32 %v6092_v52, %v5928_v43 }
 0x45e   : > { %3459 = vst [vmem:[%s5801_s22 + $0x50] sm:$0xff] %v3432_v60  ;;  %v3085_v60 = vadd.f32 %v3084_v3, %v3044_v15 }
 0x45f   : > { %v3116_v35 = vpop.f32.mrf.mxu1 }
 0x460   : > { %v3117_v51 = vadd.f32 %v3116_v35, %v3076_v20 }
 0x462   : > { %v3401_v46 = vmax.f32 %v3117_v51, 0.0  ;;  %v6097_v25 = vpop.f32.mrf.mxu3 }
 0x464   : > { %v3435_v54 = vpack.c.bf16 %v3401_v46, %v3400_v11  ;;  %v3312_v63 = vpop.f32.mrf.mxu2  ;;  %v3146_v46 = vadd.f32 %v6029_v16, %v5865_v12 }
 0x465   : > { %v3227_v7 = vpop.f32.mrf.mxu0 }
 0x466   : > { %3462 = vst [vmem:[%s5801_s22 + $0x68] sm:$0xff] %v3435_v54  ;;  %v3187_v58 = vadd.f32 %v6047_v39, %v3146_v46 }
 0x467   : > { %v3119_v2 = vpop.f32.mrf.mxu1 }
 0x468   : > { %v3120_v57 = vadd.f32 %v3119_v2, %v3079_v17  ;;  %v3228_v40 = vadd.f32 %v3227_v7, %v3187_v58  ;;  %v3149_v2 = vadd.f32 %v6036_v29, %v5768_v36 }
 0x46a   : > { %v3407_v49 = vmax.f32 %v3120_v57, 0.0  ;;  %v6108_v22 = vpop.f32.mrf.mxu3  ;;  %v3378_v41 = vmax.f32 %v3228_v40, 0.0 }
 0x46c   : > { %v3438_v28 = vpack.c.bf16 %v3407_v49, %v3406_v38  ;;  %v3315_v17 = vpop.f32.mrf.mxu2 }
 0x46d   : > { %v3230_v51 = vpop.f32.mrf.mxu0 }
 0x46e   : > { %3465 = vst [vmem:[%s5801_s22 + $0x80] sm:$0xff] %v3438_v28 }
 0x46f   : > { %v3122_v13 = vpop.f32.mrf.mxu1 }
 0x470   : > { %v3123_v18 = vadd.f32 %v3122_v13, %v3082_v26 }
 0x472   : > { %v3413_v47 = vmax.f32 %v3123_v18, 0.0  ;;  %v6117_v10 = vpop.f32.mrf.mxu3 }
 0x474   : > { %v3441_v24 = vpack.c.bf16 %v3413_v47, %v3412_v61  ;;  %v3318_v27 = vpop.f32.mrf.mxu2 }
 0x475   : > { %v3233_v3 = vpop.f32.mrf.mxu0 }
 0x476   : > { %3468 = vst [vmem:[%s5801_s22 + $0x98] sm:$0xff] %v3441_v24 }
 0x477   : > { %v3125_v23 = vpop.f32.mrf.mxu1 }
 0x478   : > { %v3126_v6 = vadd.f32 %v3125_v23, %v3085_v60  ;;  %v3196_v23 = vadd.f32 %v6075_v8, %v3155_v1  ;;  %v3199_v8 = vadd.f32 %v6086_v37, %v3158_v31  ;;  %v3202_v37 = vadd.f32 %v6097_v25, %v3161_v19 }
 0x479   : > { %v3205_v25 = vadd.f32 %v6108_v22, %v3164_v44 }
 0x47a   : > { %v3419_v20 = vmax.f32 %v3126_v6, 0.0  ;;  %v3350_v35 = vpop.f32.mrf.mxu3 }
 0x47c   : > { %v3444_v11 = vpack.c.bf16 %v3419_v20, %v3418_v62 }
 0x47d   : > { %v3236_v18 = vpop.f32.mrf.mxu0 }
 0x47e   : > { %3471 = vst [vmem:[%s5801_s22 + $0xb0] sm:$0xff] %v3444_v11  ;;  %v3237_v20 = vadd.f32 %v3236_v18, %v3196_v23 }
 0x47f   : > { %v3268_v5 = vpop.f32.mrf.mxu1 }
 0x480   : > { %v3269_v9 = vadd.f32 %v3268_v5, %v5865_v12  ;;  %v3190_v12 = vadd.f32 %v6056_v59, %v3149_v2  ;;  %v3193_v59 = vadd.f32 %v6066_v32, %v3152_v4  ;;  %v3396_v11 = vmax.f32 %v3237_v20, 0.0 }
 0x482   : > { %v3310_v48 = vadd.f32 %v3309_v53, %v3269_v9  ;;  %v3353_v54 = vpop.f32.mrf.mxu3  ;;  %v3231_v34 = vadd.f32 %v3230_v51, %v3190_v12  ;;  %v3234_v61 = vadd.f32 %v3233_v3, %v3193_v59 }
 0x484   : > { %v3351_v33 = vadd.f32 %v3350_v35, %v3310_v48  ;;  %v3384_v26 = vmax.f32 %v3231_v34, 0.0  ;;  %v3390_v24 = vmax.f32 %v3234_v61, 0.0 }
 0x485   : > { %v3239_v62 = vpop.f32.mrf.mxu0 }
 0x486   : > { %v3379_v16 = vmax.f32 %v3351_v33, 0.0  ;;  %v3240_v9 = vadd.f32 %v3239_v62, %v3199_v8 }
 0x487   : > { %v3271_v39 = vpop.f32.mrf.mxu1 }
 0x488   : > { %v3424_v38 = vpack.c.bf16 %v3379_v16, %v3378_v41  ;;  %v3272_v49 = vadd.f32 %v3271_v39, %v5768_v36  ;;  %v3402_v3 = vmax.f32 %v3240_v9, 0.0 }
 0x48a   : > { %3451 = vst.msk [vmem:[%s5801_s22 + $0x10] sm:$0xff] %vm6131_vm11, %v3424_v38  ;;  %v3313_v55 = vadd.f32 %v3312_v63, %v3272_v49  ;;  %v3356_v28 = vpop.f32.mrf.mxu3 }
 0x48c   : > { %v3354_v29 = vadd.f32 %v3353_v54, %v3313_v55 }
 0x48d   : > { %v3242_v54 = vpop.f32.mrf.mxu0 }
 0x48e   : > { %v3385_v13 = vmax.f32 %v3354_v29, 0.0  ;;  %v3243_v39 = vadd.f32 %v3242_v54, %v3202_v37 }
 0x48f   : > { %v3274_v53 = vpop.f32.mrf.mxu1 }
 0x490   : > { %v3427_v7 = vpack.c.bf16 %v3385_v13, %v3384_v26  ;;  %v3275_v36 = vadd.f32 %v3274_v53, %v5859_v50  ;;  %v3321_v50 = vpop.f32.mrf.mxu2  ;;  %v3408_v55 = vmax.f32 %v3243_v39, 0.0  ;;  %v3167_v53 = vadd.f32 %v6106_v21, %v5835_v42 }
 0x492   : > { %3454 = vst.msk [vmem:[%s5801_s22 + $0x28] sm:$0xff] %vm6131_vm11, %v3427_v7  ;;  %v3316_v47 = vadd.f32 %v3315_v17, %v3275_v36  ;;  %v3359_v15 = vpop.f32.mrf.mxu3  ;;  %v3208_v22 = vadd.f32 %v6117_v10, %v3167_v53 }
 0x494   : > { %v3357_v0 = vadd.f32 %v3356_v28, %v3316_v47 }
 0x495   : > { %v3245_v34 = vpop.f32.mrf.mxu0 }
 0x496   : > { %v3391_v14 = vmax.f32 %v3357_v0, 0.0  ;;  %v3246_v13 = vadd.f32 %v3245_v34, %v3205_v25 }
 0x497   : > { %v3277_v60 = vpop.f32.mrf.mxu1 }
 0x498   : > { %v3430_v32 = vpack.c.bf16 %v3391_v14, %v3390_v24  ;;  %v3278_v6 = vadd.f32 %v3277_v60, %v5897_v45  ;;  %v3324_v48 = vpop.f32.mrf.mxu2  ;;  %v3414_v52 = vmax.f32 %v3246_v13, 0.0 }
 0x49a   : > { %3457 = vst.msk [vmem:[%s5801_s22 + $0x40] sm:$0xff] %vm6131_vm11, %v3430_v32  ;;  %v3319_v35 = vadd.f32 %v3318_v27, %v3278_v6  ;;  %v3362_v63 = vpop.f32.mrf.mxu3 }
 0x49c   : > { %v3360_v51 = vadd.f32 %v3359_v15, %v3319_v35 }
 0x49d   : > { %v3248_v36 = vpop.f32.mrf.mxu0 }
 0x49e   : > { %v3397_v46 = vmax.f32 %v3360_v51, 0.0  ;;  %v3249_v0 = vadd.f32 %v3248_v36, %v3208_v22 }
 0x49f   : > { %v3280_v5 = vpop.f32.mrf.mxu1 }
 0x4a0   : > { %v3433_v58 = vpack.c.bf16 %v3397_v46, %v3396_v11  ;;  %v3281_v45 = vadd.f32 %v3280_v5, %v5803_v30  ;;  %v3327_v49 = vpop.f32.mrf.mxu2  ;;  %v3420_v14 = vmax.f32 %v3249_v0, 0.0 }
 0x4a2   : > { %3460 = vst.msk [vmem:[%s5801_s22 + $0x58] sm:$0xff] %vm6131_vm11, %v3433_v58  ;;  %v3322_v40 = vadd.f32 %v3321_v50, %v3281_v45  ;;  %v3365_v17 = vpop.f32.mrf.mxu3 }
 0x4a4   : > { %v3363_v33 = vadd.f32 %v3362_v63, %v3322_v40 }
 0x4a6   : > { %v3403_v2 = vmax.f32 %v3363_v33, 0.0 }
 0x4a7   : > { %v3283_v41 = vpop.f32.mrf.mxu1 }
 0x4a8   : > { %v3436_v16 = vpack.c.bf16 %v3403_v2, %v3402_v3  ;;  %v3284_v30 = vadd.f32 %v3283_v41, %v5891_v56  ;;  %v3330_v7 = vpop.f32.mrf.mxu2 }
 0x4aa   : > { %3463 = vst.msk [vmem:[%s5801_s22 + $0x70] sm:$0xff] %vm6131_vm11, %v3436_v16  ;;  %v3325_v12 = vadd.f32 %v3324_v48, %v3284_v30  ;;  %v3368_v4 = vpop.f32.mrf.mxu3 }
 0x4ac   : > { %v3366_v38 = vadd.f32 %v3365_v17, %v3325_v12 }
 0x4ae   : > { %v3409_v28 = vmax.f32 %v3366_v38, 0.0 }
 0x4af   : > { %v3286_v29 = vpop.f32.mrf.mxu1 }
 0x4b0   : > { %v3439_v26 = vpack.c.bf16 %v3409_v28, %v3408_v55  ;;  %v3287_v56 = vadd.f32 %v3286_v29, %v5928_v43 }
 0x4b2   : > { %3466 = vst.msk [vmem:[%s5801_s22 + $0x88] sm:$0xff] %vm6131_vm11, %v3439_v26  ;;  %v3328_v27 = vadd.f32 %v3327_v49, %v3287_v56  ;;  %v3371_v15 = vpop.f32.mrf.mxu3 }
 0x4b4   : > { %v3369_v18 = vadd.f32 %v3368_v4, %v3328_v27 }
 0x4b6   : > { %v3415_v59 = vmax.f32 %v3369_v18, 0.0 }
 0x4b7   : > { %v3289_v61 = vpop.f32.mrf.mxu1 }
 0x4b8   : > { %v3442_v47 = vpack.c.bf16 %v3415_v59, %v3414_v52  ;;  %v3290_v43 = vadd.f32 %v3289_v61, %v5835_v42 }
 0x4ba   : > { %3469 = vst.msk [vmem:[%s5801_s22 + $0xa0] sm:$0xff] %vm6131_vm11, %v3442_v47  ;;  %v3331_v1 = vadd.f32 %v3330_v7, %v3290_v43 }
 0x4bc   : > { %v3372_v24 = vadd.f32 %v3371_v15, %v3331_v1 }
 0x4be   : > { %v3421_v21 = vmax.f32 %v3372_v24, 0.0 }
 0x4c0   : > { %v3445_v60 = vpack.c.bf16 %v3421_v21, %v3420_v14 }
 0x4c2   : > { %3472 = vst.msk [vmem:[%s5801_s22 + $0xb8] sm:$0xff] %vm6131_vm11, %v3445_v60 }
 0x4c3 PF: > { %s17_s18 = sadd.s32 1, %s3938_s18  }
 0x4c4   : > { %p14_p7 = scmp.ge.s32.totalorder %s17_s18, 4  }
 0x4c6   :  { %16 = sbr.rel (!%p14_p7) target bundleno = 2 (0x2), region = 79 }
 0x4cb   :  { %3494 = vsyncpa [#allocation6], 1 }
 0x4cc   :  { %3496 = vsyncpa [#allocation6 + $0x1], 1 }
 0x4cd   :  { %3497 = vsyncpa [#allocation8], 1 }

// kernel: my_model_forward.3
= control target key start
LH: loop header
LB: loop body
LE: loop exit
PB: predicated region body
PF: predicated region fallthrough
CT: control target
= control target key end

     0   :  { %11 = vsyncpa [#allocation4], 0  ;;  %s6793_s0 = inlined_call_operand.vmem [shape: bf16[2,43008], index: 0, kind: input, shape index: {}]   ;;  %s6794_s1 = inlined_call_operand.hbm [shape: s8[43008,128], index: 1, kind: input, shape index: {}]   ;;  %s6795_s2 = inlined_call_operand.hbm [shape: f32[1,128], index: 2, kind: input, shape index: {}]   ;;  %s6796_s3 = inlined_call_operand.hbm [shape: f32[1,128], index: 3, kind: input, shape index: {}]   ;;  %s6797_s4 = inlined_call_operand.vmem [shape: f32[128,10], index: 4, kind: input, shape index: {}]   ;;  %s6798_s5 = inlined_call_operand.hbm [shape: f32[1,10], index: 5, kind: input, shape index: {}]   ;;  %s6799_s6 = inlined_call_operand.hbm [shape: f32[2,10], index: 6, kind: output, shape index: {}]  }
   0x1   :  { %13 = vsyncpa [#allocation4 + $0x1], 0 }
   0x2   :  { %14 = vsyncpa [#allocation7], 0 }
   0x3   :  { %15 = vsyncpa [#allocation10], 0 }
   0x4   :  { %16 = vsyncpa [#allocation5], 0  ;;  %s5823_s21 = smov 0   ;;  %s5825_s22 = smov 0  }
   0x5   :  { %s5827_s23 = smov 0   ;;  %s5829_s24 = smov 0  }
   0x6 LB: > { %s5842_s25 = sadd.s32 4294967295, %s5779_s24   ;;  %p68_p0 = scmp.ne.s32.totalorder %s5771_s22, %s5767_s21  ;;  %s5779_s24 = sphi %s5829_s24, %s6806_s24   ;;  %s5775_s23 = sphi %s5827_s23, %s6805_s23   ;;  %s5771_s22 = sphi %s5825_s22, %s6804_s22   ;;  %s5767_s21 = sphi %s5823_s21, %s6803_s21  }
   0x7   : > { %p69_p1 = scmp.eq.s32.totalorder %s5842_s25, 0  ;;  %p5483_p2 = scmp.ge.s32.totalorder %s5779_s24, 1 }
   0x8   : > { %p184_p3 = scmp.lt.s32.totalorder %s5779_s24, 5  ;;  %p5484_p4 = scmp.ne.s32.totalorder %s5842_s25, 0 }
   0x9   : > { %p5851_p5 = por %p69_p1, %p68_p0  ;;  %s196_s29 = sshll.u32 %s6795_s2, 4  ;;  %s197_s29 = int_to_ptr.hbm [resolvable:$true] %s196_s29 }
   0xa   : > { %p5858_p6 = pnand %p5483_p2, %p184_p3  ;;  %s5781_s7 = smov [#allocation6]  }
   0xb   : > { %s198_s8 = sshll.u32 %s5781_s7, 4  ;;  %s208_s11 = sshll.u32 %s6796_s3, 4  ;;  %s199_s8 = int_to_ptr.vmem [resolvable:$true] %s198_s8  ;;  %s209_s11 = int_to_ptr.hbm [resolvable:$true] %s208_s11 }
   0xc   : > { %p5520_p7 = pneg %p5858_p6  ;;  %s223_s14 = sshll.u32 %s6798_s5, 4  ;;  %s224_s14 = int_to_ptr.hbm [resolvable:$true] %s223_s14 }
   0xd   : > { %s5782_s15 = smov [#allocation8]   ;;  %s5783_s17 = smov [#allocation9]  }
   0xe   : > { %p5521_p8 = pnand %p5520_p7, %p69_p1  ;;  %s210_s16 = sshll.u32 %s5782_s15, 4  ;;  %s211_s16 = int_to_ptr.vmem [resolvable:$true] %s210_s16 }
   0xf   : > { %s225_s18 = sshll.u32 %s5783_s17, 4  ;;  %s5873_s19 = sadd.s32 1, %s5779_s24   ;;  %s226_s18 = int_to_ptr.vmem [resolvable:$true] %s225_s18 }
  0x10   : > { %5523 = dma.hbm_to_vmem [thread:$0]  (!%p5521_p8), %s197_s29, 16, %s199_s8, [#allocation7]  }
  0x11   : > { %5526 = dma.hbm_to_vmem [thread:$0]  (!%p5521_p8), %s209_s11, 16, %s211_s16, [#allocation7]  }
  0x12   : > { %5529 = dma.hbm_to_vmem [thread:$0]  (!%p5521_p8), %s224_s14, 16, %s226_s18, [#allocation10]  }
  0x13   : > { %s52_s20 = ssub.s32 %s5779_s24, %s5873_s19  ;;  %s55_s21 = sadd.s32 1, %s5775_s23 }
  0x14   : > { %p53_p9 = scmp.eq.s32.totalorder %s52_s20, 0  ;;  %p62_p10 = scmp.ne.s32.totalorder %s5775_s23, %s5771_s22 }
  0x15   : > { %p63_p11 = scmp.eq.s32.totalorder %s5779_s24, 0  ;;  %p5537_p12 = scmp.lt.s32.totalorder %s5779_s24, 4 }
  0x16   : > { %s5883_s27 = scalar_select %p53_p9, %s5775_s23, %s55_s21  }
  0x17   : > { %p64_p13 = por %p63_p11, %p62_p10  ;;  %s244_s28 = sand.u32 1, %s5775_s23  }
  0x18   : > { %s5500_s29 = smul.u32 2688, %s244_s28  ;;  %s245_s15 = scalar_lea.sflag [#allocation4], %s244_s28 }
  0x19   : > { %s5499_s7 = smul.u32 2688, %s5779_s24  ;;  %p5887_p0 = pnand %p5537_p12, %p64_p13 }
  0x1a   : > { %s248_s12 = scalar_lea.vmem [#allocation3], %s5500_s29  ;;  %s5682_s20 = scalar_lea.hbm %s6794_s1, 10752 }
  0x1b   : > { %s253_s11 = scalar_lea.hbm %s6794_s1, %s5499_s7  ;;  %s256_s13 = sshll.u32 %s248_s12, 4  ;;  %s257_s13 = int_to_ptr.vmem [resolvable:$true] %s256_s13 }
  0x1c   : > { %s254_s14 = sshll.u32 %s253_s11, 4  ;;  %p5679_p3 = pneg %p5887_p0  ;;  %s255_s14 = int_to_ptr.hbm [resolvable:$true] %s254_s14 }
  0x1d   : > { %s5675_s16 = sshra.s32 %s255_s14, 4  ;;  %s5676_s16 = int_to_ptr.hbm [resolvable:$true] %s5675_s16 }
  0x1e   : > { %s5677_s17 = scalar_lea.hbm %s5676_s16, 2688  ;;  %p5683_p9 = scmp.lt.s32.totalorder %s5676_s16, %s6794_s1 }
  0x1f   : > { %p5678_p2 = scmp.ne.s32.totalorder %s5676_s16, %s5677_s17  ;;  %p5684_p10 = scmp.lt.s32.totalorder %s5682_s20, %s5677_s17 }
  0x21   : > { %p5680_p7 = pnand %p5679_p3, %p5678_p2  ;;  %p5685_p11 = por %p5684_p10, %p5683_p9 }
  0x23   : > { %p5681_p8 = pneg %p5680_p7 }
  0x25   : > { %p5686_p12 = pnand %p5685_p11, %p5681_p8 }
  0x27   : > { %5689 = shalt.err (!%p5686_p12)
}
  0x28   : > { %s5784_s28 = smov 128   ;;  %s5785_s29 = smov 8  }
  0x29   : > { %5533 = dma.hbm_to_vmem [thread:$0]  (!%p5887_p0), %s255_s14, 43008, %s257_s13, %s245_s15, %s5784_s28, %s5784_s28, %s5785_s29  }
  0x2a   : > { %268 = sbr.rel (%p5858_p6) target bundleno = 1229 (0x4cd), region = 44  ;;  %s270_s9 = sand.u32 (!%p5858_p6), 1, %s5771_s22  }
  0x2b   : > { %s5501_s10 = smul.u32 (!%p5858_p6), 2688, %s270_s9  ;;  %s271_s11 = scalar_lea.sflag (!%p5858_p6), [#allocation4], %s270_s9 }
  0x2d   : > { %s5907_s12 = scalar_lea.vmem (!%p5858_p6), [#allocation3], %s5501_s10 }
  0x2f   : > { %5750 = dma.done.wait (%p5851_p5), %s271_s11, 43008  }
  0x30   : > { %5752 = vsyncadd (%p5851_p5), %s271_s11, 4294924288 }
  0x31   : > { %5754 = dma.done.wait (%p69_p1), [#allocation7], 32  }
  0x32   : > { %5756 = vsyncadd (%p69_p1), [#allocation7], 4294967264 }
  0x33   : > { %5758 = dma.done.wait (%p69_p1), [#allocation10], 16  }
  0x34   : > { %5760 = vsyncadd (%p69_p1), [#allocation10], 4294967280  ;;  %s318_s30 = smul.u32 84, %s5842_s25 }
  0x35   : > { %327 = sbr.rel (%p5484_p4) target bundleno = 60 (0x3c), region = 64 }
  0x36   : > { %p319_p6 = scmp.lt.s32.totalorder %s318_s30, 335 }
  0x38   : > { %s6808_s30 = smov (!%p319_p6, %s318_s30), 335 }
  0x39   : > { %s5925_s26 = scalar_lea.vmem %s6793_s0, %s6808_s30 }
  0x3a   : > { %v5786_v0 = vmov 0.0  }
  0x3b   : > { %328 = vst [vmem:[#allocation2] sm:$0x3] %v5786_v0 }
  0x3c PF: > { %v332_v1 = vld [vmem:[%s5907_s12 + $0x18] sm:$0xff]  ;;  %v331_v29 = vld [vmem:[%s5907_s12 + $0x10] sm:$0xff]  ;;  %p5494_p1 = scmp.ne.s32.totalorder %s5842_s25, 3 }
  0x3d   : > { %v336_v2 = vld [vmem:[%s5907_s12 + $0x38] sm:$0xff]  ;;  %v511_v4 = vunpack.c.2.s8 %v332_v1  ;;  %v512_v5 = vunpack.c.3.s8 %v332_v1  ;;  %v509_v23 = vunpack.c.0.s8 %v332_v1  ;;  %v510_v24 = vunpack.c.1.s8 %v332_v1  ;;  %v335_v38 = vld [vmem:[%s5907_s12 + $0x30] sm:$0xff] }
  0x3e   : > { %v340_v3 = vld [vmem:[%s5907_s12 + $0x58] sm:$0xff]  ;;  %v527_v6 = vunpack.c.2.s8 %v336_v2  ;;  %v528_v7 = vunpack.c.3.s8 %v336_v2  ;;  %v525_v27 = vunpack.c.0.s8 %v336_v2  ;;  %v526_v28 = vunpack.c.1.s8 %v336_v2  ;;  %v339_v43 = vld [vmem:[%s5907_s12 + $0x50] sm:$0xff] }
  0x3f   : > { %v344_v8 = vld [vmem:[%s5907_s12 + $0x78] sm:$0xff]  ;;  %v543_v9 = vunpack.c.2.s8 %v340_v3  ;;  %v544_v10 = vunpack.c.3.s8 %v340_v3  ;;  %v1183_v13 = vcvt.s32.f32 %v511_v4  ;;  %v1184_v14 = vcvt.s32.f32 %v512_v5  ;;  %v343_v48 = vld [vmem:[%s5907_s12 + $0x70] sm:$0xff] }
  0x40   : > { %v559_v11 = vunpack.c.2.s8 %v344_v8  ;;  %v560_v12 = vunpack.c.3.s8 %v344_v8  ;;  %v1199_v15 = vcvt.s32.f32 %v527_v6  ;;  %v1200_v16 = vcvt.s32.f32 %v528_v7 }
  0x41   : > { %v1215_v17 = vcvt.s32.f32 %v543_v9  ;;  %v1216_v18 = vcvt.s32.f32 %v544_v10  ;;  %v1848_v21 = vpack.c.bf16 %v1184_v14, %v1183_v13  ;;  %v1181_v30 = vcvt.s32.f32 %v509_v23  ;;  %v330_v9 = vld [vmem:[%s5907_s12 + $0x8] sm:$0xff] }
  0x42   : > { %v1231_v19 = vcvt.s32.f32 %v559_v11  ;;  %v1232_v20 = vcvt.s32.f32 %v560_v12  ;;  %v1856_v22 = vpack.c.bf16 %v1200_v16, %v1199_v15  ;;  %v1182_v31 = vcvt.s32.f32 %v510_v24  ;;  %v338_v23 = vld [vmem:[%s5907_s12 + $0x48] sm:$0xff] }
  0x43   : > { %v1864_v25 = vpack.c.bf16 %v1216_v18, %v1215_v17  ;;  %2280 = vmatpush.bf16.msra.mxu0 %v1848_v21  ;;  %v541_v32 = vunpack.c.0.s8 %v340_v3  ;;  %v542_v33 = vunpack.c.1.s8 %v340_v3  ;;  %v1197_v34 = vcvt.s32.f32 %v525_v27  ;;  %v334_v18 = vld [vmem:[%s5907_s12 + $0x28] sm:$0xff] }
  0x44   : > { %v1872_v26 = vpack.c.bf16 %v1232_v20, %v1231_v19  ;;  %2293 = vmatpush.bf16.msra.mxu1 %v1856_v22  ;;  %v1198_v35 = vcvt.s32.f32 %v526_v28  ;;  %v557_v36 = vunpack.c.0.s8 %v344_v8  ;;  %v558_v37 = vunpack.c.1.s8 %v344_v8  ;;  %v342_v28 = vld [vmem:[%s5907_s12 + $0x68] sm:$0xff] }
  0x45   : > { %2306 = vmatpush.bf16.msra.mxu2 %v1864_v25  ;;  %v1847_v39 = vpack.c.bf16 %v1182_v31, %v1181_v30  ;;  %v1213_v40 = vcvt.s32.f32 %v541_v32  ;;  %v1214_v41 = vcvt.s32.f32 %v542_v33  ;;  %v507_v42 = vunpack.c.2.s8 %v331_v29 }
  0x46   : > { %2319 = vmatpush.bf16.msra.mxu3 %v1872_v26  ;;  %v1855_v44 = vpack.c.bf16 %v1198_v35, %v1197_v34  ;;  %v1229_v45 = vcvt.s32.f32 %v557_v36  ;;  %v1230_v46 = vcvt.s32.f32 %v558_v37  ;;  %v508_v47 = vunpack.c.3.s8 %v331_v29 }
  0x47   : > { %2281 = vmatpush.bf16.msra.mxu0 %v1847_v39  ;;  %v1863_v49 = vpack.c.bf16 %v1214_v41, %v1213_v40  ;;  %v1179_v50 = vcvt.s32.f32 %v507_v42  ;;  %v523_v51 = vunpack.c.2.s8 %v335_v38  ;;  %v524_v52 = vunpack.c.3.s8 %v335_v38 }
  0x48   : > { %2294 = vmatpush.bf16.msra.mxu1 %v1855_v44  ;;  %v1871_v53 = vpack.c.bf16 %v1230_v46, %v1229_v45  ;;  %v1180_v54 = vcvt.s32.f32 %v508_v47  ;;  %v539_v55 = vunpack.c.2.s8 %v339_v43  ;;  %v540_v56 = vunpack.c.3.s8 %v339_v43 }
  0x49   : > { %2307 = vmatpush.bf16.msra.mxu2 %v1863_v49  ;;  %v1195_v57 = vcvt.s32.f32 %v523_v51  ;;  %v1196_v58 = vcvt.s32.f32 %v524_v52  ;;  %v555_v59 = vunpack.c.2.s8 %v343_v48  ;;  %v556_v60 = vunpack.c.3.s8 %v343_v48 }
  0x4a   : > { %2320 = vmatpush.bf16.msra.mxu3 %v1871_v53  ;;  %v1846_v61 = vpack.c.bf16 %v1180_v54, %v1179_v50  ;;  %v1211_v62 = vcvt.s32.f32 %v539_v55  ;;  %v1212_v63 = vcvt.s32.f32 %v540_v56  ;;  %v505_v0 = vunpack.c.0.s8 %v331_v29  ;;  %v329_v53 = vld [vmem:[%s5907_s12] sm:$0xff] }
  0x4b   : > { %v1854_v1 = vpack.c.bf16 %v1196_v58, %v1195_v57  ;;  %v1227_v2 = vcvt.s32.f32 %v555_v59  ;;  %v1228_v3 = vcvt.s32.f32 %v556_v60  ;;  %v506_v4 = vunpack.c.1.s8 %v331_v29 }
  0x4c   : > { %2282 = vmatpush.bf16.msra.mxu0 %v1846_v61  ;;  %v1862_v5 = vpack.c.bf16 %v1212_v63, %v1211_v62  ;;  %v1177_v6 = vcvt.s32.f32 %v505_v0  ;;  %v521_v7 = vunpack.c.0.s8 %v335_v38  ;;  %v522_v8 = vunpack.c.1.s8 %v335_v38  ;;  %v333_v62 = vld [vmem:[%s5907_s12 + $0x20] sm:$0xff] }
  0x4d   : > { %2295 = vmatpush.bf16.msra.mxu1 %v1854_v1  ;;  %v1870_v10 = vpack.c.bf16 %v1228_v3, %v1227_v2  ;;  %v1178_v11 = vcvt.s32.f32 %v506_v4  ;;  %v537_v12 = vunpack.c.0.s8 %v339_v43  ;;  %v538_v13 = vunpack.c.1.s8 %v339_v43  ;;  %v337_v3 = vld [vmem:[%s5907_s12 + $0x40] sm:$0xff] }
  0x4e   : > { %2308 = vmatpush.bf16.msra.mxu2 %v1862_v5  ;;  %v1193_v14 = vcvt.s32.f32 %v521_v7  ;;  %v1194_v15 = vcvt.s32.f32 %v522_v8  ;;  %v553_v16 = vunpack.c.0.s8 %v343_v48  ;;  %v554_v17 = vunpack.c.1.s8 %v343_v48  ;;  %v341_v8 = vld [vmem:[%s5907_s12 + $0x60] sm:$0xff] }
  0x4f   : > { %2321 = vmatpush.bf16.msra.mxu3 %v1870_v10  ;;  %v1845_v19 = vpack.c.bf16 %v1178_v11, %v1177_v6  ;;  %v1209_v20 = vcvt.s32.f32 %v537_v12  ;;  %v1210_v21 = vcvt.s32.f32 %v538_v13  ;;  %v503_v22 = vunpack.c.2.s8 %v330_v9  ;;  %v2178_v13 = vld [vmem:[%s5925_s26] sm:$0xff] }
  0x50   : > { %v1853_v24 = vpack.c.bf16 %v1194_v15, %v1193_v14  ;;  %v1225_v25 = vcvt.s32.f32 %v553_v16  ;;  %v1226_v26 = vcvt.s32.f32 %v554_v17  ;;  %v504_v27 = vunpack.c.3.s8 %v330_v9  ;;  %2185 = vst [vmem:[#allocation1] ss:$9 sm:$0xff] %v2178_v13 }
  0x51   : > { %2283 = vmatpush.bf16.msra.mxu0 %v1845_v19  ;;  %v1861_v29 = vpack.c.bf16 %v1210_v21, %v1209_v20  ;;  %v1175_v30 = vcvt.s32.f32 %v503_v22  ;;  %v519_v31 = vunpack.c.2.s8 %v334_v18  ;;  %v520_v32 = vunpack.c.3.s8 %v334_v18 }
  0x52   : > { %2296 = vmatpush.bf16.msra.mxu1 %v1853_v24  ;;  %v1869_v33 = vpack.c.bf16 %v1226_v26, %v1225_v25  ;;  %v1176_v34 = vcvt.s32.f32 %v504_v27  ;;  %v535_v35 = vunpack.c.2.s8 %v338_v23  ;;  %v536_v36 = vunpack.c.3.s8 %v338_v23 }
  0x53   : > { %2309 = vmatpush.bf16.msra.mxu2 %v1861_v29  ;;  %v1191_v37 = vcvt.s32.f32 %v519_v31  ;;  %v1192_v38 = vcvt.s32.f32 %v520_v32  ;;  %v551_v39 = vunpack.c.2.s8 %v342_v28  ;;  %v552_v40 = vunpack.c.3.s8 %v342_v28 }
  0x54   : > { %2322 = vmatpush.bf16.msra.mxu3 %v1869_v33  ;;  %v1844_v41 = vpack.c.bf16 %v1176_v34, %v1175_v30  ;;  %v1207_v42 = vcvt.s32.f32 %v535_v35  ;;  %v1208_v43 = vcvt.s32.f32 %v536_v36  ;;  %v501_v44 = vunpack.c.0.s8 %v330_v9  ;;  %v348_v34 = vld [vmem:[%s5907_s12 + $0x98] sm:$0xff] }
  0x55   : > { %v1852_v45 = vpack.c.bf16 %v1192_v38, %v1191_v37  ;;  %v1223_v46 = vcvt.s32.f32 %v551_v39  ;;  %v1224_v47 = vcvt.s32.f32 %v552_v40  ;;  %v502_v48 = vunpack.c.1.s8 %v330_v9 }
  0x56   : > { %2284 = vmatpush.bf16.msra.mxu0 %v1844_v41  ;;  %v1860_v49 = vpack.c.bf16 %v1208_v43, %v1207_v42  ;;  %v1173_v50 = vcvt.s32.f32 %v501_v44  ;;  %v517_v51 = vunpack.c.0.s8 %v334_v18  ;;  %v518_v52 = vunpack.c.1.s8 %v334_v18  ;;  %v352_v43 = vld [vmem:[%s5907_s12 + $0xb8] sm:$0xff] }
  0x57   : > { %2297 = vmatpush.bf16.msra.mxu1 %v1852_v45  ;;  %v1868_v54 = vpack.c.bf16 %v1224_v47, %v1223_v46  ;;  %v1174_v55 = vcvt.s32.f32 %v502_v48  ;;  %v533_v56 = vunpack.c.0.s8 %v338_v23  ;;  %v534_v57 = vunpack.c.1.s8 %v338_v23  ;;  %v356_v48 = vld [vmem:[%s5907_s12 + $0xd8] sm:$0xff] }
  0x58   : > { %2310 = vmatpush.bf16.msra.mxu2 %v1860_v49  ;;  %v1189_v58 = vcvt.s32.f32 %v517_v51  ;;  %v1190_v59 = vcvt.s32.f32 %v518_v52  ;;  %v549_v60 = vunpack.c.0.s8 %v342_v28  ;;  %v550_v61 = vunpack.c.1.s8 %v342_v28 }
  0x59   : > { %2323 = vmatpush.bf16.msra.mxu3 %v1868_v54  ;;  %v1843_v63 = vpack.c.bf16 %v1174_v55, %v1173_v50  ;;  %v1205_v0 = vcvt.s32.f32 %v533_v56  ;;  %v1206_v1 = vcvt.s32.f32 %v534_v57  ;;  %v499_v2 = vunpack.c.2.s8 %v329_v53 }
  0x5a   : > { %v1851_v4 = vpack.c.bf16 %v1190_v59, %v1189_v58  ;;  %v1221_v5 = vcvt.s32.f32 %v549_v60  ;;  %v1222_v6 = vcvt.s32.f32 %v550_v61  ;;  %v500_v7 = vunpack.c.3.s8 %v329_v53 }
  0x5b   : > { %2285 = vmatpush.bf16.msra.mxu0 %v1843_v63  ;;  %v1859_v9 = vpack.c.bf16 %v1206_v1, %v1205_v0  ;;  %v1171_v10 = vcvt.s32.f32 %v499_v2  ;;  %v515_v11 = vunpack.c.2.s8 %v333_v62  ;;  %v516_v12 = vunpack.c.3.s8 %v333_v62  ;;  %v2187_v63 = vld [vmem:[#allocation1 + $0x9] sm:$0xff] }
  0x5c   : > { %2298 = vmatpush.bf16.msra.mxu1 %v1851_v4  ;;  %v1867_v14 = vpack.c.bf16 %v1222_v6, %v1221_v5  ;;  %v1172_v15 = vcvt.s32.f32 %v500_v7  ;;  %v531_v16 = vunpack.c.2.s8 %v337_v3  ;;  %v532_v17 = vunpack.c.3.s8 %v337_v3  ;;  %v2188_v4 = vld [vmem:[#allocation1 + $0x12] sm:$0xff] }
  0x5d   : > { %2311 = vmatpush.bf16.msra.mxu2 %v1859_v9  ;;  %v1187_v18 = vcvt.s32.f32 %v515_v11  ;;  %v1188_v19 = vcvt.s32.f32 %v516_v12  ;;  %v547_v20 = vunpack.c.2.s8 %v341_v8  ;;  %v548_v21 = vunpack.c.3.s8 %v341_v8  ;;  %v2189_v9 = vld [vmem:[#allocation1 + $0x1b] sm:$0xff] }
  0x5e   : > { %2324 = vmatpush.bf16.msra.mxu3 %v1867_v14  ;;  %v1842_v22 = vpack.c.bf16 %v1172_v15, %v1171_v10  ;;  %v1203_v23 = vcvt.s32.f32 %v531_v16  ;;  %v1204_v24 = vcvt.s32.f32 %v532_v17  ;;  %v497_v25 = vunpack.c.0.s8 %v329_v53 }
  0x5f   : > { %v1850_v26 = vpack.c.bf16 %v1188_v19, %v1187_v18  ;;  %v1219_v27 = vcvt.s32.f32 %v547_v20  ;;  %v1220_v28 = vcvt.s32.f32 %v548_v21  ;;  %v498_v29 = vunpack.c.1.s8 %v329_v53  ;;  %v360_v53 = vld [vmem:[%s5907_s12 + $0xf8] sm:$0xff]  ;;  %v347_v18 = vld [vmem:[%s5907_s12 + $0x90] sm:$0xff] }
  0x60   : > { %2286 = vmatpush.bf16.msra.mxu0 %v1842_v22  ;;  %v1858_v30 = vpack.c.bf16 %v1204_v24, %v1203_v23  ;;  %v1169_v31 = vcvt.s32.f32 %v497_v25  ;;  %v513_v32 = vunpack.c.0.s8 %v333_v62  ;;  %v514_v33 = vunpack.c.1.s8 %v333_v62  ;;  %v2186_v62 = vld [vmem:[#allocation1] sm:$0xff] }
  0x61   : > { %2299 = vmatpush.bf16.msra.mxu1 %v1850_v26  ;;  %v1866_v35 = vpack.c.bf16 %v1220_v28, %v1219_v27  ;;  %v1170_v36 = vcvt.s32.f32 %v498_v29  ;;  %v529_v37 = vunpack.c.0.s8 %v337_v3  ;;  %v530_v38 = vunpack.c.1.s8 %v337_v3  ;;  %v351_v27 = vld [vmem:[%s5907_s12 + $0xb0] sm:$0xff] }
  0x62   : > { %2312 = vmatpush.bf16.msra.mxu2 %v1858_v30  ;;  %v1185_v39 = vcvt.s32.f32 %v513_v32  ;;  %v1186_v40 = vcvt.s32.f32 %v514_v33  ;;  %v545_v41 = vunpack.c.0.s8 %v341_v8  ;;  %v546_v42 = vunpack.c.1.s8 %v341_v8  ;;  %v355_v32 = vld [vmem:[%s5907_s12 + $0xd0] sm:$0xff] }
  0x63   : > { %2325 = vmatpush.bf16.msra.mxu3 %v1866_v35  ;;  %v1841_v44 = vpack.c.bf16 %v1170_v36, %v1169_v31  ;;  %v1201_v45 = vcvt.s32.f32 %v529_v37  ;;  %v1202_v46 = vcvt.s32.f32 %v530_v38  ;;  %v575_v47 = vunpack.c.2.s8 %v348_v34  ;;  %v359_v37 = vld [vmem:[%s5907_s12 + $0xf0] sm:$0xff] }
  0x64   : > { %v1849_v49 = vpack.c.bf16 %v1186_v40, %v1185_v39  ;;  %v1217_v50 = vcvt.s32.f32 %v545_v41  ;;  %v1218_v51 = vcvt.s32.f32 %v546_v42  ;;  %v576_v52 = vunpack.c.3.s8 %v348_v34 }
  0x65   : > { %2287 = vmatpush.bf16.msra.mxu0 %v1841_v44  ;;  %v1857_v54 = vpack.c.bf16 %v1202_v46, %v1201_v45  ;;  %v1247_v55 = vcvt.s32.f32 %v575_v47  ;;  %v591_v56 = vunpack.c.2.s8 %v352_v43  ;;  %v592_v57 = vunpack.c.3.s8 %v352_v43 }
  0x66   : > { %2300 = vmatpush.bf16.msra.mxu1 %v1849_v49  ;;  %v1865_v58 = vpack.c.bf16 %v1218_v51, %v1217_v50  ;;  %v1248_v59 = vcvt.s32.f32 %v576_v52  ;;  %v607_v60 = vunpack.c.2.s8 %v356_v48  ;;  %v608_v61 = vunpack.c.3.s8 %v356_v48 }
  0x67   : > { %2313 = vmatpush.bf16.msra.mxu2 %v1857_v54  ;;  %v1263_v0 = vcvt.s32.f32 %v591_v56  ;;  %v1264_v1 = vcvt.s32.f32 %v592_v57  ;;  %v623_v2 = vunpack.c.2.s8 %v360_v53  ;;  %v624_v3 = vunpack.c.3.s8 %v360_v53 }
  0x68   : > { %2326 = vmatpush.bf16.msra.mxu3 %v1865_v58  ;;  %v1880_v5 = vpack.c.bf16 %v1248_v59, %v1247_v55  ;;  %v1279_v6 = vcvt.s32.f32 %v607_v60  ;;  %v1280_v7 = vcvt.s32.f32 %v608_v61  ;;  %v573_v8 = vunpack.c.0.s8 %v348_v34  ;;  %2288 = vmatmul.bf16.vlgmr.msra.gmra.mxu0 %v2186_v62  ;;  %v346_v62 = vld [vmem:[%s5907_s12 + $0x88] sm:$0xff] }
  0x69   : > { %v1888_v10 = vpack.c.bf16 %v1264_v1, %v1263_v0  ;;  %v1295_v11 = vcvt.s32.f32 %v623_v2  ;;  %v1296_v12 = vcvt.s32.f32 %v624_v3  ;;  %v574_v13 = vunpack.c.1.s8 %v348_v34  ;;  %2301 = vmatmul.bf16.vlgmr.msra.gmra.mxu1 %v2187_v63 }
  0x6a   : > { %2332 = vmatpush.bf16.msrb.mxu0 %v1880_v5  ;;  %v1896_v14 = vpack.c.bf16 %v1280_v7, %v1279_v6  ;;  %v1245_v15 = vcvt.s32.f32 %v573_v8  ;;  %v589_v16 = vunpack.c.0.s8 %v352_v43  ;;  %v590_v17 = vunpack.c.1.s8 %v352_v43  ;;  %2314 = vmatmul.bf16.vlgmr.msra.gmra.mxu2 %v2188_v4  ;;  %v350_v7 = vld [vmem:[%s5907_s12 + $0xa8] sm:$0xff] }
  0x6b   : > { %2345 = vmatpush.bf16.msrb.mxu1 %v1888_v10  ;;  %v1904_v19 = vpack.c.bf16 %v1296_v12, %v1295_v11  ;;  %v1246_v20 = vcvt.s32.f32 %v574_v13  ;;  %v605_v21 = vunpack.c.0.s8 %v356_v48  ;;  %v606_v22 = vunpack.c.1.s8 %v356_v48  ;;  %2327 = vmatmul.bf16.vlgmr.msra.gmra.mxu3 %v2189_v9  ;;  %v354_v12 = vld [vmem:[%s5907_s12 + $0xc8] sm:$0xff] }
  0x6c   : > { %2358 = vmatpush.bf16.msrb.mxu2 %v1896_v14  ;;  %v1261_v23 = vcvt.s32.f32 %v589_v16  ;;  %v1262_v24 = vcvt.s32.f32 %v590_v17  ;;  %v621_v25 = vunpack.c.0.s8 %v360_v53  ;;  %v622_v26 = vunpack.c.1.s8 %v360_v53  ;;  %v358_v17 = vld [vmem:[%s5907_s12 + $0xe8] sm:$0xff] }
  0x6d   : > { %2371 = vmatpush.bf16.msrb.mxu3 %v1904_v19  ;;  %v1879_v28 = vpack.c.bf16 %v1246_v20, %v1245_v15  ;;  %v1277_v29 = vcvt.s32.f32 %v605_v21  ;;  %v1278_v30 = vcvt.s32.f32 %v606_v22  ;;  %v571_v31 = vunpack.c.2.s8 %v347_v18 }
  0x6e   : > { %v1887_v33 = vpack.c.bf16 %v1262_v24, %v1261_v23  ;;  %v1293_v34 = vcvt.s32.f32 %v621_v25  ;;  %v1294_v35 = vcvt.s32.f32 %v622_v26  ;;  %v572_v36 = vunpack.c.3.s8 %v347_v18 }
  0x6f   : > { %2333 = vmatpush.bf16.msrb.mxu0 %v1879_v28  ;;  %v1895_v38 = vpack.c.bf16 %v1278_v30, %v1277_v29  ;;  %v1243_v39 = vcvt.s32.f32 %v571_v31  ;;  %v587_v40 = vunpack.c.2.s8 %v351_v27  ;;  %v588_v41 = vunpack.c.3.s8 %v351_v27 }
  0x70   : > { %2346 = vmatpush.bf16.msrb.mxu1 %v1887_v33  ;;  %v1903_v42 = vpack.c.bf16 %v1294_v35, %v1293_v34  ;;  %v1244_v43 = vcvt.s32.f32 %v572_v36  ;;  %v603_v44 = vunpack.c.2.s8 %v355_v32  ;;  %v604_v45 = vunpack.c.3.s8 %v355_v32 }
  0x71   : > { %2359 = vmatpush.bf16.msrb.mxu2 %v1895_v38  ;;  %v1259_v46 = vcvt.s32.f32 %v587_v40  ;;  %v1260_v47 = vcvt.s32.f32 %v588_v41  ;;  %v619_v48 = vunpack.c.2.s8 %v359_v37  ;;  %v620_v49 = vunpack.c.3.s8 %v359_v37 }
  0x72   : > { %2372 = vmatpush.bf16.msrb.mxu3 %v1903_v42  ;;  %v1878_v50 = vpack.c.bf16 %v1244_v43, %v1243_v39  ;;  %v1275_v51 = vcvt.s32.f32 %v603_v44  ;;  %v1276_v52 = vcvt.s32.f32 %v604_v45  ;;  %v569_v53 = vunpack.c.0.s8 %v347_v18  ;;  %v345_v42 = vld [vmem:[%s5907_s12 + $0x80] sm:$0xff] }
  0x73   : > { %v1886_v54 = vpack.c.bf16 %v1260_v47, %v1259_v46  ;;  %v1291_v55 = vcvt.s32.f32 %v619_v48  ;;  %v1292_v56 = vcvt.s32.f32 %v620_v49  ;;  %v570_v57 = vunpack.c.1.s8 %v347_v18 }
  0x74   : > { %2334 = vmatpush.bf16.msrb.mxu0 %v1878_v50  ;;  %v1894_v58 = vpack.c.bf16 %v1276_v52, %v1275_v51  ;;  %v1241_v59 = vcvt.s32.f32 %v569_v53  ;;  %v585_v60 = vunpack.c.0.s8 %v351_v27  ;;  %v586_v61 = vunpack.c.1.s8 %v351_v27  ;;  %v349_v51 = vld [vmem:[%s5907_s12 + $0xa0] sm:$0xff] }
  0x75   : > { %2347 = vmatpush.bf16.msrb.mxu1 %v1886_v54  ;;  %v1902_v63 = vpack.c.bf16 %v1292_v56, %v1291_v55  ;;  %v1242_v0 = vcvt.s32.f32 %v570_v57  ;;  %v601_v1 = vunpack.c.0.s8 %v355_v32  ;;  %v602_v2 = vunpack.c.1.s8 %v355_v32  ;;  %v353_v56 = vld [vmem:[%s5907_s12 + $0xc0] sm:$0xff] }
  0x76   : > { %2360 = vmatpush.bf16.msrb.mxu2 %v1894_v58  ;;  %v1257_v3 = vcvt.s32.f32 %v585_v60  ;;  %v1258_v4 = vcvt.s32.f32 %v586_v61  ;;  %v617_v5 = vunpack.c.0.s8 %v359_v37  ;;  %v618_v6 = vunpack.c.1.s8 %v359_v37  ;;  %v357_v61 = vld [vmem:[%s5907_s12 + $0xe0] sm:$0xff] }
  0x77   : > { %2373 = vmatpush.bf16.msrb.mxu3 %v1902_v63  ;;  %v1877_v8 = vpack.c.bf16 %v1242_v0, %v1241_v59  ;;  %v1273_v9 = vcvt.s32.f32 %v601_v1  ;;  %v1274_v10 = vcvt.s32.f32 %v602_v2  ;;  %v567_v11 = vunpack.c.2.s8 %v346_v62 }
  0x78   : > { %v1885_v13 = vpack.c.bf16 %v1258_v4, %v1257_v3  ;;  %v1289_v14 = vcvt.s32.f32 %v617_v5  ;;  %v1290_v15 = vcvt.s32.f32 %v618_v6  ;;  %v568_v16 = vunpack.c.3.s8 %v346_v62 }
  0x79   : > { %2335 = vmatpush.bf16.msrb.mxu0 %v1877_v8  ;;  %v1893_v18 = vpack.c.bf16 %v1274_v10, %v1273_v9  ;;  %v1239_v19 = vcvt.s32.f32 %v567_v11  ;;  %v583_v20 = vunpack.c.2.s8 %v350_v7  ;;  %v584_v21 = vunpack.c.3.s8 %v350_v7 }
  0x7a   : > { %2348 = vmatpush.bf16.msrb.mxu1 %v1885_v13  ;;  %v1901_v22 = vpack.c.bf16 %v1290_v15, %v1289_v14  ;;  %v1240_v23 = vcvt.s32.f32 %v568_v16  ;;  %v599_v24 = vunpack.c.2.s8 %v354_v12  ;;  %v600_v25 = vunpack.c.3.s8 %v354_v12 }
  0x7b   : > { %2361 = vmatpush.bf16.msrb.mxu2 %v1893_v18  ;;  %v1255_v26 = vcvt.s32.f32 %v583_v20  ;;  %v1256_v27 = vcvt.s32.f32 %v584_v21  ;;  %v615_v28 = vunpack.c.2.s8 %v358_v17  ;;  %v616_v29 = vunpack.c.3.s8 %v358_v17 }
  0x7c   : > { %2374 = vmatpush.bf16.msrb.mxu3 %v1901_v22  ;;  %v1876_v30 = vpack.c.bf16 %v1240_v23, %v1239_v19  ;;  %v1271_v31 = vcvt.s32.f32 %v599_v24  ;;  %v1272_v32 = vcvt.s32.f32 %v600_v25  ;;  %v565_v33 = vunpack.c.0.s8 %v346_v62  ;;  %v364_v22 = vld [vmem:[%s5907_s12 + $0x118] sm:$0xff] }
  0x7d   : > { %v1884_v34 = vpack.c.bf16 %v1256_v27, %v1255_v26  ;;  %v1287_v35 = vcvt.s32.f32 %v615_v28  ;;  %v1288_v36 = vcvt.s32.f32 %v616_v29  ;;  %v566_v37 = vunpack.c.1.s8 %v346_v62 }
  0x7e   : > { %2336 = vmatpush.bf16.msrb.mxu0 %v1876_v30  ;;  %v1892_v38 = vpack.c.bf16 %v1272_v32, %v1271_v31  ;;  %v1237_v39 = vcvt.s32.f32 %v565_v33  ;;  %v581_v40 = vunpack.c.0.s8 %v350_v7  ;;  %v582_v41 = vunpack.c.1.s8 %v350_v7  ;;  %v368_v31 = vld [vmem:[%s5907_s12 + $0x138] sm:$0xff] }
  0x7f   : > { %2349 = vmatpush.bf16.msrb.mxu1 %v1884_v34  ;;  %v1900_v43 = vpack.c.bf16 %v1288_v36, %v1287_v35  ;;  %v1238_v44 = vcvt.s32.f32 %v566_v37  ;;  %v597_v45 = vunpack.c.0.s8 %v354_v12  ;;  %v598_v46 = vunpack.c.1.s8 %v354_v12  ;;  %v372_v36 = vld [vmem:[%s5907_s12 + $0x158] sm:$0xff] }
  0x80   : > { %2362 = vmatpush.bf16.msrb.mxu2 %v1892_v38  ;;  %v1253_v47 = vcvt.s32.f32 %v581_v40  ;;  %v1254_v48 = vcvt.s32.f32 %v582_v41  ;;  %v613_v49 = vunpack.c.0.s8 %v358_v17  ;;  %v614_v50 = vunpack.c.1.s8 %v358_v17  ;;  %v376_v41 = vld [vmem:[%s5907_s12 + $0x178] sm:$0xff] }
  0x81   : > { %2375 = vmatpush.bf16.msrb.mxu3 %v1900_v43  ;;  %v1875_v52 = vpack.c.bf16 %v1238_v44, %v1237_v39  ;;  %v1269_v53 = vcvt.s32.f32 %v597_v45  ;;  %v1270_v54 = vcvt.s32.f32 %v598_v46  ;;  %v563_v55 = vunpack.c.2.s8 %v345_v42  ;;  %v2190_v46 = vld [vmem:[#allocation1 + $0x24] sm:$0xff] }
  0x82   : > { %v1883_v57 = vpack.c.bf16 %v1254_v48, %v1253_v47  ;;  %v1285_v58 = vcvt.s32.f32 %v613_v49  ;;  %v1286_v59 = vcvt.s32.f32 %v614_v50  ;;  %v564_v60 = vunpack.c.3.s8 %v345_v42 }
  0x83   : > { %2337 = vmatpush.bf16.msrb.mxu0 %v1875_v52  ;;  %v1891_v62 = vpack.c.bf16 %v1270_v54, %v1269_v53  ;;  %v1235_v63 = vcvt.s32.f32 %v563_v55  ;;  %v579_v0 = vunpack.c.2.s8 %v349_v51  ;;  %v580_v1 = vunpack.c.3.s8 %v349_v51 }
  0x84   : > { %2350 = vmatpush.bf16.msrb.mxu1 %v1883_v57  ;;  %v1899_v2 = vpack.c.bf16 %v1286_v59, %v1285_v58  ;;  %v1236_v3 = vcvt.s32.f32 %v564_v60  ;;  %v595_v4 = vunpack.c.2.s8 %v353_v56  ;;  %v596_v5 = vunpack.c.3.s8 %v353_v56 }
  0x85   : > { %2363 = vmatpush.bf16.msrb.mxu2 %v1891_v62  ;;  %v1251_v6 = vcvt.s32.f32 %v579_v0  ;;  %v1252_v7 = vcvt.s32.f32 %v580_v1  ;;  %v611_v8 = vunpack.c.2.s8 %v357_v61  ;;  %v612_v9 = vunpack.c.3.s8 %v357_v61 }
  0x86   : > { %2376 = vmatpush.bf16.msrb.mxu3 %v1899_v2  ;;  %v1874_v10 = vpack.c.bf16 %v1236_v3, %v1235_v63  ;;  %v1267_v11 = vcvt.s32.f32 %v595_v4  ;;  %v1268_v12 = vcvt.s32.f32 %v596_v5  ;;  %v561_v13 = vunpack.c.0.s8 %v345_v42 }
  0x87   : > { %v1882_v14 = vpack.c.bf16 %v1252_v7, %v1251_v6  ;;  %v1283_v15 = vcvt.s32.f32 %v611_v8  ;;  %v1284_v16 = vcvt.s32.f32 %v612_v9  ;;  %v562_v17 = vunpack.c.1.s8 %v345_v42  ;;  %v363_v6 = vld [vmem:[%s5907_s12 + $0x110] sm:$0xff] }
  0x88   : > { %2338 = vmatpush.bf16.msrb.mxu0 %v1874_v10  ;;  %v1890_v18 = vpack.c.bf16 %v1268_v12, %v1267_v11  ;;  %v1233_v19 = vcvt.s32.f32 %v561_v13  ;;  %v577_v20 = vunpack.c.0.s8 %v349_v51  ;;  %v578_v21 = vunpack.c.1.s8 %v349_v51  ;;  %v2191_v51 = vld [vmem:[#allocation1 + $0x2d] sm:$0xff] }
  0x89   : > { %2351 = vmatpush.bf16.msrb.mxu1 %v1882_v14  ;;  %v1898_v23 = vpack.c.bf16 %v1284_v16, %v1283_v15  ;;  %v1234_v24 = vcvt.s32.f32 %v562_v17  ;;  %v593_v25 = vunpack.c.0.s8 %v353_v56  ;;  %v594_v26 = vunpack.c.1.s8 %v353_v56  ;;  %v2192_v56 = vld [vmem:[#allocation1 + $0x36] sm:$0xff] }
  0x8a   : > { %2364 = vmatpush.bf16.msrb.mxu2 %v1890_v18  ;;  %v1249_v27 = vcvt.s32.f32 %v577_v20  ;;  %v1250_v28 = vcvt.s32.f32 %v578_v21  ;;  %v609_v29 = vunpack.c.0.s8 %v357_v61  ;;  %v610_v30 = vunpack.c.1.s8 %v357_v61  ;;  %v2193_v61 = vld [vmem:[#allocation1 + $0x3f] sm:$0xff] }
  0x8b   : > { %2377 = vmatpush.bf16.msrb.mxu3 %v1898_v23  ;;  %v1873_v32 = vpack.c.bf16 %v1234_v24, %v1233_v19  ;;  %v1265_v33 = vcvt.s32.f32 %v593_v25  ;;  %v1266_v34 = vcvt.s32.f32 %v594_v26  ;;  %v639_v35 = vunpack.c.2.s8 %v364_v22  ;;  %v367_v15 = vld [vmem:[%s5907_s12 + $0x130] sm:$0xff]  ;;  %v2179_v26 = vld [vmem:[%s5925_s26 + $0x8] sm:$0xff] }
  0x8c   : > { %v1881_v37 = vpack.c.bf16 %v1250_v28, %v1249_v27  ;;  %v1281_v38 = vcvt.s32.f32 %v609_v29  ;;  %v1282_v39 = vcvt.s32.f32 %v610_v30  ;;  %v640_v40 = vunpack.c.3.s8 %v364_v22  ;;  %v371_v20 = vld [vmem:[%s5907_s12 + $0x150] sm:$0xff]  ;;  %2195 = vst [vmem:[#allocation1] ss:$9 sm:$0xff] %v2179_v26 }
  0x8d   : > { %2339 = vmatpush.bf16.msrb.mxu0 %v1873_v32  ;;  %v1889_v42 = vpack.c.bf16 %v1266_v34, %v1265_v33  ;;  %v1311_v43 = vcvt.s32.f32 %v639_v35  ;;  %v655_v44 = vunpack.c.2.s8 %v368_v31  ;;  %v656_v45 = vunpack.c.3.s8 %v368_v31  ;;  %v375_v25 = vld [vmem:[%s5907_s12 + $0x170] sm:$0xff] }
  0x8e   : > { %2352 = vmatpush.bf16.msrb.mxu1 %v1881_v37  ;;  %v1897_v47 = vpack.c.bf16 %v1282_v39, %v1281_v38  ;;  %v1312_v48 = vcvt.s32.f32 %v640_v40  ;;  %v671_v49 = vunpack.c.2.s8 %v372_v36  ;;  %v672_v50 = vunpack.c.3.s8 %v372_v36 }
  0x8f   : > { %2365 = vmatpush.bf16.msrb.mxu2 %v1889_v42  ;;  %v1327_v52 = vcvt.s32.f32 %v655_v44  ;;  %v1328_v53 = vcvt.s32.f32 %v656_v45  ;;  %v687_v54 = vunpack.c.2.s8 %v376_v41  ;;  %v688_v55 = vunpack.c.3.s8 %v376_v41 }
  0x90   : > { %2378 = vmatpush.bf16.msrb.mxu3 %v1897_v47  ;;  %v1912_v57 = vpack.c.bf16 %v1312_v48, %v1311_v43  ;;  %v1343_v58 = vcvt.s32.f32 %v671_v49  ;;  %v1344_v59 = vcvt.s32.f32 %v672_v50  ;;  %v637_v60 = vunpack.c.0.s8 %v364_v22  ;;  %2340 = vmatmul.bf16.vlgmr.msrb.gmra.mxu0 %v2190_v46 }
  0x91   : > { %v1920_v62 = vpack.c.bf16 %v1328_v53, %v1327_v52  ;;  %v1359_v63 = vcvt.s32.f32 %v687_v54  ;;  %v1360_v0 = vcvt.s32.f32 %v688_v55  ;;  %v638_v1 = vunpack.c.1.s8 %v364_v22  ;;  %2353 = vmatmul.bf16.vlgmr.msrb.gmra.mxu1 %v2191_v51  ;;  %v362_v51 = vld [vmem:[%s5907_s12 + $0x108] sm:$0xff] }
  0x92   : > { %2384 = vmatpush.bf16.msra.mxu0 %v1912_v57  ;;  %v1928_v2 = vpack.c.bf16 %v1344_v59, %v1343_v58  ;;  %v1309_v3 = vcvt.s32.f32 %v637_v60  ;;  %v653_v4 = vunpack.c.0.s8 %v368_v31  ;;  %v654_v5 = vunpack.c.1.s8 %v368_v31  ;;  %2366 = vmatmul.bf16.vlgmr.msrb.gmra.mxu2 %v2192_v56  ;;  %v366_v60 = vld [vmem:[%s5907_s12 + $0x128] sm:$0xff] }
  0x93   : > { %2397 = vmatpush.bf16.msra.mxu1 %v1920_v62  ;;  %v1936_v7 = vpack.c.bf16 %v1360_v0, %v1359_v63  ;;  %v1310_v8 = vcvt.s32.f32 %v638_v1  ;;  %v669_v9 = vunpack.c.0.s8 %v372_v36  ;;  %v670_v10 = vunpack.c.1.s8 %v372_v36  ;;  %2379 = vmatmul.bf16.vlgmr.msrb.gmra.mxu3 %v2193_v61  ;;  %v370_v1 = vld [vmem:[%s5907_s12 + $0x148] sm:$0xff] }
  0x94   : > { %2410 = vmatpush.bf16.msra.mxu2 %v1928_v2  ;;  %v1325_v11 = vcvt.s32.f32 %v653_v4  ;;  %v1326_v12 = vcvt.s32.f32 %v654_v5  ;;  %v685_v13 = vunpack.c.0.s8 %v376_v41  ;;  %v686_v14 = vunpack.c.1.s8 %v376_v41 }
  0x95   : > { %2423 = vmatpush.bf16.msra.mxu3 %v1936_v7  ;;  %v1911_v16 = vpack.c.bf16 %v1310_v8, %v1309_v3  ;;  %v1341_v17 = vcvt.s32.f32 %v669_v9  ;;  %v1342_v18 = vcvt.s32.f32 %v670_v10  ;;  %v635_v19 = vunpack.c.2.s8 %v363_v6 }
  0x96   : > { %v1919_v21 = vpack.c.bf16 %v1326_v12, %v1325_v11  ;;  %v1357_v22 = vcvt.s32.f32 %v685_v13  ;;  %v1358_v23 = vcvt.s32.f32 %v686_v14  ;;  %v636_v24 = vunpack.c.3.s8 %v363_v6 }
  0x97   : > { %2385 = vmatpush.bf16.msra.mxu0 %v1911_v16  ;;  %v1927_v27 = vpack.c.bf16 %v1342_v18, %v1341_v17  ;;  %v1307_v28 = vcvt.s32.f32 %v635_v19  ;;  %v651_v29 = vunpack.c.2.s8 %v367_v15  ;;  %v652_v30 = vunpack.c.3.s8 %v367_v15 }
  0x98   : > { %2398 = vmatpush.bf16.msra.mxu1 %v1919_v21  ;;  %v1935_v31 = vpack.c.bf16 %v1358_v23, %v1357_v22  ;;  %v1308_v32 = vcvt.s32.f32 %v636_v24  ;;  %v667_v33 = vunpack.c.2.s8 %v371_v20  ;;  %v668_v34 = vunpack.c.3.s8 %v371_v20 }
  0x99   : > { %2411 = vmatpush.bf16.msra.mxu2 %v1927_v27  ;;  %v1323_v35 = vcvt.s32.f32 %v651_v29  ;;  %v1324_v36 = vcvt.s32.f32 %v652_v30  ;;  %v683_v37 = vunpack.c.2.s8 %v375_v25  ;;  %v684_v38 = vunpack.c.3.s8 %v375_v25 }
  0x9a   : > { %2424 = vmatpush.bf16.msra.mxu3 %v1935_v31  ;;  %v1910_v39 = vpack.c.bf16 %v1308_v32, %v1307_v28  ;;  %v1339_v40 = vcvt.s32.f32 %v667_v33  ;;  %v1340_v41 = vcvt.s32.f32 %v668_v34  ;;  %v633_v42 = vunpack.c.0.s8 %v363_v6  ;;  %v361_v31 = vld [vmem:[%s5907_s12 + $0x100] sm:$0xff] }
  0x9b   : > { %v1918_v43 = vpack.c.bf16 %v1324_v36, %v1323_v35  ;;  %v1355_v44 = vcvt.s32.f32 %v683_v37  ;;  %v1356_v45 = vcvt.s32.f32 %v684_v38  ;;  %v634_v46 = vunpack.c.1.s8 %v363_v6  ;;  %v374_v6 = vld [vmem:[%s5907_s12 + $0x168] sm:$0xff] }
  0x9c   : > { %2386 = vmatpush.bf16.msra.mxu0 %v1910_v39  ;;  %v1926_v47 = vpack.c.bf16 %v1340_v41, %v1339_v40  ;;  %v1305_v48 = vcvt.s32.f32 %v633_v42  ;;  %v649_v49 = vunpack.c.0.s8 %v367_v15  ;;  %v650_v50 = vunpack.c.1.s8 %v367_v15  ;;  %v365_v40 = vld [vmem:[%s5907_s12 + $0x120] sm:$0xff] }
  0x9d   : > { %2399 = vmatpush.bf16.msra.mxu1 %v1918_v43  ;;  %v1934_v52 = vpack.c.bf16 %v1356_v45, %v1355_v44  ;;  %v1306_v53 = vcvt.s32.f32 %v634_v46  ;;  %v665_v54 = vunpack.c.0.s8 %v371_v20  ;;  %v666_v55 = vunpack.c.1.s8 %v371_v20  ;;  %v369_v45 = vld [vmem:[%s5907_s12 + $0x140] sm:$0xff] }
  0x9e   : > { %2412 = vmatpush.bf16.msra.mxu2 %v1926_v47  ;;  %v1321_v56 = vcvt.s32.f32 %v649_v49  ;;  %v1322_v57 = vcvt.s32.f32 %v650_v50  ;;  %v681_v58 = vunpack.c.0.s8 %v375_v25  ;;  %v682_v59 = vunpack.c.1.s8 %v375_v25  ;;  %v373_v50 = vld [vmem:[%s5907_s12 + $0x160] sm:$0xff] }
  0x9f   : > { %2425 = vmatpush.bf16.msra.mxu3 %v1934_v52  ;;  %v1909_v61 = vpack.c.bf16 %v1306_v53, %v1305_v48  ;;  %v1337_v62 = vcvt.s32.f32 %v665_v54  ;;  %v1338_v63 = vcvt.s32.f32 %v666_v55  ;;  %v631_v0 = vunpack.c.2.s8 %v362_v51 }
  0xa0   : > { %v1917_v2 = vpack.c.bf16 %v1322_v57, %v1321_v56  ;;  %v1353_v3 = vcvt.s32.f32 %v681_v58  ;;  %v1354_v4 = vcvt.s32.f32 %v682_v59  ;;  %v632_v5 = vunpack.c.3.s8 %v362_v51 }
  0xa1   : > { %2387 = vmatpush.bf16.msra.mxu0 %v1909_v61  ;;  %v1925_v7 = vpack.c.bf16 %v1338_v63, %v1337_v62  ;;  %v1303_v8 = vcvt.s32.f32 %v631_v0  ;;  %v647_v9 = vunpack.c.2.s8 %v366_v60  ;;  %v648_v10 = vunpack.c.3.s8 %v366_v60 }
  0xa2   : > { %2400 = vmatpush.bf16.msra.mxu1 %v1917_v2  ;;  %v1933_v11 = vpack.c.bf16 %v1354_v4, %v1353_v3  ;;  %v1304_v12 = vcvt.s32.f32 %v632_v5  ;;  %v663_v13 = vunpack.c.2.s8 %v370_v1  ;;  %v664_v14 = vunpack.c.3.s8 %v370_v1 }
  0xa3   : > { %2413 = vmatpush.bf16.msra.mxu2 %v1925_v7  ;;  %v1319_v15 = vcvt.s32.f32 %v647_v9  ;;  %v1320_v16 = vcvt.s32.f32 %v648_v10  ;;  %v679_v17 = vunpack.c.2.s8 %v374_v6  ;;  %v680_v18 = vunpack.c.3.s8 %v374_v6 }
  0xa4   : > { %2426 = vmatpush.bf16.msra.mxu3 %v1933_v11  ;;  %v1908_v19 = vpack.c.bf16 %v1304_v12, %v1303_v8  ;;  %v1335_v20 = vcvt.s32.f32 %v663_v13  ;;  %v1336_v21 = vcvt.s32.f32 %v664_v14  ;;  %v629_v22 = vunpack.c.0.s8 %v362_v51  ;;  %v5980_v11 = vld [vmem:[%s5907_s12 + $0x198] sm:$0xff] }
  0xa5   : > { %v1916_v23 = vpack.c.bf16 %v1320_v16, %v1319_v15  ;;  %v1351_v24 = vcvt.s32.f32 %v679_v17  ;;  %v1352_v25 = vcvt.s32.f32 %v680_v18  ;;  %v630_v26 = vunpack.c.1.s8 %v362_v51 }
  0xa6   : > { %2388 = vmatpush.bf16.msra.mxu0 %v1908_v19  ;;  %v1924_v27 = vpack.c.bf16 %v1336_v21, %v1335_v20  ;;  %v1301_v28 = vcvt.s32.f32 %v629_v22  ;;  %v645_v29 = vunpack.c.0.s8 %v366_v60  ;;  %v646_v30 = vunpack.c.1.s8 %v366_v60  ;;  %v384_v20 = vld [vmem:[%s5907_s12 + $0x1b8] sm:$0xff] }
  0xa7   : > { %2401 = vmatpush.bf16.msra.mxu1 %v1916_v23  ;;  %v1932_v32 = vpack.c.bf16 %v1352_v25, %v1351_v24  ;;  %v1302_v33 = vcvt.s32.f32 %v630_v26  ;;  %v661_v34 = vunpack.c.0.s8 %v370_v1  ;;  %v662_v35 = vunpack.c.1.s8 %v370_v1  ;;  %v388_v25 = vld [vmem:[%s5907_s12 + $0x1d8] sm:$0xff] }
  0xa8   : > { %2414 = vmatpush.bf16.msra.mxu2 %v1924_v27  ;;  %v1317_v36 = vcvt.s32.f32 %v645_v29  ;;  %v1318_v37 = vcvt.s32.f32 %v646_v30  ;;  %v677_v38 = vunpack.c.0.s8 %v374_v6  ;;  %v678_v39 = vunpack.c.1.s8 %v374_v6  ;;  %v392_v30 = vld [vmem:[%s5907_s12 + $0x1f8] sm:$0xff] }
  0xa9   : > { %2427 = vmatpush.bf16.msra.mxu3 %v1932_v32  ;;  %v1907_v41 = vpack.c.bf16 %v1302_v33, %v1301_v28  ;;  %v1333_v42 = vcvt.s32.f32 %v661_v34  ;;  %v1334_v43 = vcvt.s32.f32 %v662_v35  ;;  %v627_v44 = vunpack.c.2.s8 %v361_v31  ;;  %v2196_v35 = vld [vmem:[#allocation1] sm:$0xff] }
  0xaa   : > { %v1915_v46 = vpack.c.bf16 %v1318_v37, %v1317_v36  ;;  %v1349_v47 = vcvt.s32.f32 %v677_v38  ;;  %v1350_v48 = vcvt.s32.f32 %v678_v39  ;;  %v628_v49 = vunpack.c.3.s8 %v361_v31 }
  0xab   : > { %2389 = vmatpush.bf16.msra.mxu0 %v1907_v41  ;;  %v1923_v51 = vpack.c.bf16 %v1334_v43, %v1333_v42  ;;  %v1299_v52 = vcvt.s32.f32 %v627_v44  ;;  %v643_v53 = vunpack.c.2.s8 %v365_v40  ;;  %v644_v54 = vunpack.c.3.s8 %v365_v40 }
  0xac   : > { %2402 = vmatpush.bf16.msra.mxu1 %v1915_v46  ;;  %v1931_v55 = vpack.c.bf16 %v1350_v48, %v1349_v47  ;;  %v1300_v56 = vcvt.s32.f32 %v628_v49  ;;  %v659_v57 = vunpack.c.2.s8 %v369_v45  ;;  %v660_v58 = vunpack.c.3.s8 %v369_v45  ;;  %v2199_v49 = vld [vmem:[#allocation1 + $0x1b] sm:$0xff] }
  0xad   : > { %2415 = vmatpush.bf16.msra.mxu2 %v1923_v51  ;;  %v1315_v59 = vcvt.s32.f32 %v643_v53  ;;  %v1316_v60 = vcvt.s32.f32 %v644_v54  ;;  %v675_v61 = vunpack.c.2.s8 %v373_v50  ;;  %v676_v62 = vunpack.c.3.s8 %v373_v50 }
  0xae   : > { %2428 = vmatpush.bf16.msra.mxu3 %v1931_v55  ;;  %v1906_v63 = vpack.c.bf16 %v1300_v56, %v1299_v52  ;;  %v1331_v0 = vcvt.s32.f32 %v659_v57  ;;  %v1332_v1 = vcvt.s32.f32 %v660_v58  ;;  %v625_v2 = vunpack.c.0.s8 %v361_v31 }
  0xaf   : > { %v1914_v3 = vpack.c.bf16 %v1316_v60, %v1315_v59  ;;  %v1347_v4 = vcvt.s32.f32 %v675_v61  ;;  %v1348_v5 = vcvt.s32.f32 %v676_v62  ;;  %v626_v6 = vunpack.c.1.s8 %v361_v31  ;;  %v379_v59 = vld [vmem:[%s5907_s12 + $0x190] sm:$0xff] }
  0xb0   : > { %2390 = vmatpush.bf16.msra.mxu0 %v1906_v63  ;;  %v1922_v7 = vpack.c.bf16 %v1332_v1, %v1331_v0  ;;  %v1297_v8 = vcvt.s32.f32 %v625_v2  ;;  %v641_v9 = vunpack.c.0.s8 %v365_v40  ;;  %v642_v10 = vunpack.c.1.s8 %v365_v40  ;;  %v2197_v40 = vld [vmem:[#allocation1 + $0x9] sm:$0xff] }
  0xb1   : > { %2403 = vmatpush.bf16.msra.mxu1 %v1914_v3  ;;  %v1930_v12 = vpack.c.bf16 %v1348_v5, %v1347_v4  ;;  %v1298_v13 = vcvt.s32.f32 %v626_v6  ;;  %v657_v14 = vunpack.c.0.s8 %v369_v45  ;;  %v658_v15 = vunpack.c.1.s8 %v369_v45  ;;  %v2198_v45 = vld [vmem:[#allocation1 + $0x12] sm:$0xff]  ;;  %v383_v4 = vld [vmem:[%s5907_s12 + $0x1b0] sm:$0xff] }
  0xb2   : > { %2416 = vmatpush.bf16.msra.mxu2 %v1922_v7  ;;  %v1313_v16 = vcvt.s32.f32 %v641_v9  ;;  %v1314_v17 = vcvt.s32.f32 %v642_v10  ;;  %v673_v18 = vunpack.c.0.s8 %v373_v50  ;;  %v674_v19 = vunpack.c.1.s8 %v373_v50  ;;  %v387_v9 = vld [vmem:[%s5907_s12 + $0x1d0] sm:$0xff] }
  0xb3   : > { %2429 = vmatpush.bf16.msra.mxu3 %v1930_v12  ;;  %v1905_v21 = vpack.c.bf16 %v1298_v13, %v1297_v8  ;;  %v1329_v22 = vcvt.s32.f32 %v657_v14  ;;  %v1330_v23 = vcvt.s32.f32 %v658_v15  ;;  %v703_v24 = vunpack.c.2.s8 %v5980_v11  ;;  %v391_v14 = vld [vmem:[%s5907_s12 + $0x1f0] sm:$0xff] }
  0xb4   : > { %v1913_v26 = vpack.c.bf16 %v1314_v17, %v1313_v16  ;;  %v1345_v27 = vcvt.s32.f32 %v673_v18  ;;  %v1346_v28 = vcvt.s32.f32 %v674_v19  ;;  %v704_v29 = vunpack.c.3.s8 %v5980_v11 }
  0xb5   : > { %2391 = vmatpush.bf16.msra.mxu0 %v1905_v21  ;;  %v1921_v31 = vpack.c.bf16 %v1330_v23, %v1329_v22  ;;  %v1375_v32 = vcvt.s32.f32 %v703_v24  ;;  %v719_v33 = vunpack.c.2.s8 %v384_v20  ;;  %v720_v34 = vunpack.c.3.s8 %v384_v20 }
  0xb6   : > { %2404 = vmatpush.bf16.msra.mxu1 %v1913_v26  ;;  %v1929_v36 = vpack.c.bf16 %v1346_v28, %v1345_v27  ;;  %v1376_v37 = vcvt.s32.f32 %v704_v29  ;;  %v735_v38 = vunpack.c.2.s8 %v388_v25  ;;  %v736_v39 = vunpack.c.3.s8 %v388_v25 }
  0xb7   : > { %2417 = vmatpush.bf16.msra.mxu2 %v1921_v31  ;;  %v1391_v41 = vcvt.s32.f32 %v719_v33  ;;  %v1392_v42 = vcvt.s32.f32 %v720_v34  ;;  %v751_v43 = vunpack.c.2.s8 %v392_v30  ;;  %v752_v44 = vunpack.c.3.s8 %v392_v30 }
  0xb8   : > { %2430 = vmatpush.bf16.msra.mxu3 %v1929_v36  ;;  %v1944_v46 = vpack.c.bf16 %v1376_v37, %v1375_v32  ;;  %v1407_v47 = vcvt.s32.f32 %v735_v38  ;;  %v1408_v48 = vcvt.s32.f32 %v736_v39  ;;  %2392 = vmatmul.bf16.vlgmr.msra.gmra.mxu0 %v2196_v35  ;;  %v701_v50 = vunpack.c.0.s8 %v5980_v11  ;;  %v378_v39 = vld [vmem:[%s5907_s12 + $0x188] sm:$0xff] }
  0xb9   : > { %v1952_v51 = vpack.c.bf16 %v1392_v42, %v1391_v41  ;;  %v1423_v52 = vcvt.s32.f32 %v751_v43  ;;  %v1424_v53 = vcvt.s32.f32 %v752_v44  ;;  %2405 = vmatmul.bf16.vlgmr.msra.gmra.mxu1 %v2197_v40  ;;  %v702_v54 = vunpack.c.1.s8 %v5980_v11 }
  0xba   : > { %2436 = vmatpush.bf16.msrb.mxu0 %v1944_v46  ;;  %v1960_v55 = vpack.c.bf16 %v1408_v48, %v1407_v47  ;;  %2418 = vmatmul.bf16.vlgmr.msra.gmra.mxu2 %v2198_v45  ;;  %v1373_v56 = vcvt.s32.f32 %v701_v50  ;;  %v717_v57 = vunpack.c.0.s8 %v384_v20  ;;  %v718_v58 = vunpack.c.1.s8 %v384_v20  ;;  %v382_v48 = vld [vmem:[%s5907_s12 + $0x1a8] sm:$0xff] }
  0xbb   : > { %2449 = vmatpush.bf16.msrb.mxu1 %v1952_v51  ;;  %v1968_v60 = vpack.c.bf16 %v1424_v53, %v1423_v52  ;;  %2431 = vmatmul.bf16.vlgmr.msra.gmra.mxu3 %v2199_v49  ;;  %v1374_v61 = vcvt.s32.f32 %v702_v54  ;;  %v733_v62 = vunpack.c.0.s8 %v388_v25  ;;  %v734_v63 = vunpack.c.1.s8 %v388_v25  ;;  %v386_v53 = vld [vmem:[%s5907_s12 + $0x1c8] sm:$0xff] }
  0xbc   : > { %2462 = vmatpush.bf16.msrb.mxu2 %v1960_v55  ;;  %v1389_v0 = vcvt.s32.f32 %v717_v57  ;;  %v1390_v1 = vcvt.s32.f32 %v718_v58  ;;  %v749_v2 = vunpack.c.0.s8 %v392_v30  ;;  %v750_v3 = vunpack.c.1.s8 %v392_v30  ;;  %v390_v58 = vld [vmem:[%s5907_s12 + $0x1e8] sm:$0xff] }
  0xbd   : > { %2475 = vmatpush.bf16.msrb.mxu3 %v1968_v60  ;;  %v1943_v5 = vpack.c.bf16 %v1374_v61, %v1373_v56  ;;  %v1405_v6 = vcvt.s32.f32 %v733_v62  ;;  %v1406_v7 = vcvt.s32.f32 %v734_v63  ;;  %v699_v8 = vunpack.c.2.s8 %v379_v59 }
  0xbe   : > { %v1951_v10 = vpack.c.bf16 %v1390_v1, %v1389_v0  ;;  %v1421_v11 = vcvt.s32.f32 %v749_v2  ;;  %v1422_v12 = vcvt.s32.f32 %v750_v3  ;;  %v700_v13 = vunpack.c.3.s8 %v379_v59 }
  0xbf   : > { %2437 = vmatpush.bf16.msrb.mxu0 %v1943_v5  ;;  %v1959_v15 = vpack.c.bf16 %v1406_v7, %v1405_v6  ;;  %v1371_v16 = vcvt.s32.f32 %v699_v8  ;;  %v715_v17 = vunpack.c.2.s8 %v383_v4  ;;  %v716_v18 = vunpack.c.3.s8 %v383_v4 }
  0xc0   : > { %2450 = vmatpush.bf16.msrb.mxu1 %v1951_v10  ;;  %v1967_v19 = vpack.c.bf16 %v1422_v12, %v1421_v11  ;;  %v1372_v20 = vcvt.s32.f32 %v700_v13  ;;  %v731_v21 = vunpack.c.2.s8 %v387_v9  ;;  %v732_v22 = vunpack.c.3.s8 %v387_v9 }
  0xc1   : > { %2463 = vmatpush.bf16.msrb.mxu2 %v1959_v15  ;;  %v1387_v23 = vcvt.s32.f32 %v715_v17  ;;  %v1388_v24 = vcvt.s32.f32 %v716_v18  ;;  %v747_v25 = vunpack.c.2.s8 %v391_v14  ;;  %v748_v26 = vunpack.c.3.s8 %v391_v14 }
  0xc2   : > { %2476 = vmatpush.bf16.msrb.mxu3 %v1967_v19  ;;  %v1942_v27 = vpack.c.bf16 %v1372_v20, %v1371_v16  ;;  %v1403_v28 = vcvt.s32.f32 %v731_v21  ;;  %v1404_v29 = vcvt.s32.f32 %v732_v22  ;;  %v697_v30 = vunpack.c.0.s8 %v379_v59  ;;  %v377_v19 = vld [vmem:[%s5907_s12 + $0x180] sm:$0xff] }
  0xc3   : > { %v1950_v31 = vpack.c.bf16 %v1388_v24, %v1387_v23  ;;  %v1419_v32 = vcvt.s32.f32 %v747_v25  ;;  %v1420_v33 = vcvt.s32.f32 %v748_v26  ;;  %v698_v34 = vunpack.c.1.s8 %v379_v59 }
  0xc4   : > { %2438 = vmatpush.bf16.msrb.mxu0 %v1942_v27  ;;  %v1958_v35 = vpack.c.bf16 %v1404_v29, %v1403_v28  ;;  %v1369_v36 = vcvt.s32.f32 %v697_v30  ;;  %v713_v37 = vunpack.c.0.s8 %v383_v4  ;;  %v714_v38 = vunpack.c.1.s8 %v383_v4  ;;  %v381_v28 = vld [vmem:[%s5907_s12 + $0x1a0] sm:$0xff] }
  0xc5   : > { %2451 = vmatpush.bf16.msrb.mxu1 %v1950_v31  ;;  %v1966_v40 = vpack.c.bf16 %v1420_v33, %v1419_v32  ;;  %v1370_v41 = vcvt.s32.f32 %v698_v34  ;;  %v729_v42 = vunpack.c.0.s8 %v387_v9  ;;  %v730_v43 = vunpack.c.1.s8 %v387_v9  ;;  %v385_v33 = vld [vmem:[%s5907_s12 + $0x1c0] sm:$0xff] }
  0xc6   : > { %2464 = vmatpush.bf16.msrb.mxu2 %v1958_v35  ;;  %v1385_v44 = vcvt.s32.f32 %v713_v37  ;;  %v1386_v45 = vcvt.s32.f32 %v714_v38  ;;  %v745_v46 = vunpack.c.0.s8 %v391_v14  ;;  %v746_v47 = vunpack.c.1.s8 %v391_v14  ;;  %v389_v38 = vld [vmem:[%s5907_s12 + $0x1e0] sm:$0xff] }
  0xc7   : > { %2477 = vmatpush.bf16.msrb.mxu3 %v1966_v40  ;;  %v1941_v49 = vpack.c.bf16 %v1370_v41, %v1369_v36  ;;  %v1401_v50 = vcvt.s32.f32 %v729_v42  ;;  %v1402_v51 = vcvt.s32.f32 %v730_v43  ;;  %v695_v52 = vunpack.c.2.s8 %v378_v39 }
  0xc8   : > { %v1949_v54 = vpack.c.bf16 %v1386_v45, %v1385_v44  ;;  %v1417_v55 = vcvt.s32.f32 %v745_v46  ;;  %v1418_v56 = vcvt.s32.f32 %v746_v47  ;;  %v696_v57 = vunpack.c.3.s8 %v378_v39 }
  0xc9   : > { %2439 = vmatpush.bf16.msrb.mxu0 %v1941_v49  ;;  %v1957_v59 = vpack.c.bf16 %v1402_v51, %v1401_v50  ;;  %v1367_v60 = vcvt.s32.f32 %v695_v52  ;;  %v711_v61 = vunpack.c.2.s8 %v382_v48  ;;  %v712_v62 = vunpack.c.3.s8 %v382_v48 }
  0xca   : > { %2452 = vmatpush.bf16.msrb.mxu1 %v1949_v54  ;;  %v1965_v63 = vpack.c.bf16 %v1418_v56, %v1417_v55  ;;  %v1368_v0 = vcvt.s32.f32 %v696_v57  ;;  %v727_v1 = vunpack.c.2.s8 %v386_v53  ;;  %v728_v2 = vunpack.c.3.s8 %v386_v53 }
  0xcb   : > { %2465 = vmatpush.bf16.msrb.mxu2 %v1957_v59  ;;  %v1383_v3 = vcvt.s32.f32 %v711_v61  ;;  %v1384_v4 = vcvt.s32.f32 %v712_v62  ;;  %v743_v5 = vunpack.c.2.s8 %v390_v58  ;;  %v744_v6 = vunpack.c.3.s8 %v390_v58 }
  0xcc   : > { %2478 = vmatpush.bf16.msrb.mxu3 %v1965_v63  ;;  %v1940_v7 = vpack.c.bf16 %v1368_v0, %v1367_v60  ;;  %v1399_v8 = vcvt.s32.f32 %v727_v1  ;;  %v1400_v9 = vcvt.s32.f32 %v728_v2  ;;  %v693_v10 = vunpack.c.0.s8 %v378_v39  ;;  %v6002_v63 = vld [vmem:[%s5907_s12 + $0x218] sm:$0xff] }
  0xcd   : > { %v1948_v11 = vpack.c.bf16 %v1384_v4, %v1383_v3  ;;  %v1415_v12 = vcvt.s32.f32 %v743_v5  ;;  %v1416_v13 = vcvt.s32.f32 %v744_v6  ;;  %v694_v14 = vunpack.c.1.s8 %v378_v39 }
  0xce   : > { %2440 = vmatpush.bf16.msrb.mxu0 %v1940_v7  ;;  %v1956_v15 = vpack.c.bf16 %v1400_v9, %v1399_v8  ;;  %v1365_v16 = vcvt.s32.f32 %v693_v10  ;;  %v709_v17 = vunpack.c.0.s8 %v382_v48  ;;  %v710_v18 = vunpack.c.1.s8 %v382_v48  ;;  %v400_v8 = vld [vmem:[%s5907_s12 + $0x238] sm:$0xff] }
  0xcf   : > { %2453 = vmatpush.bf16.msrb.mxu1 %v1948_v11  ;;  %v1964_v20 = vpack.c.bf16 %v1416_v13, %v1415_v12  ;;  %v1366_v21 = vcvt.s32.f32 %v694_v14  ;;  %v725_v22 = vunpack.c.0.s8 %v386_v53  ;;  %v726_v23 = vunpack.c.1.s8 %v386_v53  ;;  %v404_v13 = vld [vmem:[%s5907_s12 + $0x258] sm:$0xff] }
  0xd0   : > { %2466 = vmatpush.bf16.msrb.mxu2 %v1956_v15  ;;  %v1381_v24 = vcvt.s32.f32 %v709_v17  ;;  %v1382_v25 = vcvt.s32.f32 %v710_v18  ;;  %v741_v26 = vunpack.c.0.s8 %v390_v58  ;;  %v742_v27 = vunpack.c.1.s8 %v390_v58  ;;  %v408_v18 = vld [vmem:[%s5907_s12 + $0x278] sm:$0xff] }
  0xd1   : > { %2479 = vmatpush.bf16.msrb.mxu3 %v1964_v20  ;;  %v1939_v29 = vpack.c.bf16 %v1366_v21, %v1365_v16  ;;  %v1397_v30 = vcvt.s32.f32 %v725_v22  ;;  %v1398_v31 = vcvt.s32.f32 %v726_v23  ;;  %v691_v32 = vunpack.c.2.s8 %v377_v19  ;;  %v2200_v23 = vld [vmem:[#allocation1 + $0x24] sm:$0xff] }
  0xd2   : > { %v1947_v34 = vpack.c.bf16 %v1382_v25, %v1381_v24  ;;  %v1413_v35 = vcvt.s32.f32 %v741_v26  ;;  %v1414_v36 = vcvt.s32.f32 %v742_v27  ;;  %v692_v37 = vunpack.c.3.s8 %v377_v19 }
  0xd3   : > { %2441 = vmatpush.bf16.msrb.mxu0 %v1939_v29  ;;  %v1955_v39 = vpack.c.bf16 %v1398_v31, %v1397_v30  ;;  %v1363_v40 = vcvt.s32.f32 %v691_v32  ;;  %v707_v41 = vunpack.c.2.s8 %v381_v28  ;;  %v708_v42 = vunpack.c.3.s8 %v381_v28 }
  0xd4   : > { %2454 = vmatpush.bf16.msrb.mxu1 %v1947_v34  ;;  %v1963_v43 = vpack.c.bf16 %v1414_v36, %v1413_v35  ;;  %v1364_v44 = vcvt.s32.f32 %v692_v37  ;;  %v723_v45 = vunpack.c.2.s8 %v385_v33  ;;  %v724_v46 = vunpack.c.3.s8 %v385_v33  ;;  %v2203_v37 = vld [vmem:[#allocation1 + $0x3f] sm:$0xff] }
  0xd5   : > { %2467 = vmatpush.bf16.msrb.mxu2 %v1955_v39  ;;  %v1379_v47 = vcvt.s32.f32 %v707_v41  ;;  %v1380_v48 = vcvt.s32.f32 %v708_v42  ;;  %v739_v49 = vunpack.c.2.s8 %v389_v38  ;;  %v740_v50 = vunpack.c.3.s8 %v389_v38 }
  0xd6   : > { %2480 = vmatpush.bf16.msrb.mxu3 %v1963_v43  ;;  %v1938_v51 = vpack.c.bf16 %v1364_v44, %v1363_v40  ;;  %v1395_v52 = vcvt.s32.f32 %v723_v45  ;;  %v1396_v53 = vcvt.s32.f32 %v724_v46  ;;  %v689_v54 = vunpack.c.0.s8 %v377_v19 }
  0xd7   : > { %v1946_v55 = vpack.c.bf16 %v1380_v48, %v1379_v47  ;;  %v1411_v56 = vcvt.s32.f32 %v739_v49  ;;  %v1412_v57 = vcvt.s32.f32 %v740_v50  ;;  %v690_v58 = vunpack.c.1.s8 %v377_v19  ;;  %v395_v47 = vld [vmem:[%s5907_s12 + $0x210] sm:$0xff] }
  0xd8   : > { %2442 = vmatpush.bf16.msrb.mxu0 %v1938_v51  ;;  %v1954_v59 = vpack.c.bf16 %v1396_v53, %v1395_v52  ;;  %v1361_v60 = vcvt.s32.f32 %v689_v54  ;;  %v705_v61 = vunpack.c.0.s8 %v381_v28  ;;  %v706_v62 = vunpack.c.1.s8 %v381_v28  ;;  %v2201_v28 = vld [vmem:[#allocation1 + $0x2d] sm:$0xff] }
  0xd9   : > { %2455 = vmatpush.bf16.msrb.mxu1 %v1946_v55  ;;  %v1962_v0 = vpack.c.bf16 %v1412_v57, %v1411_v56  ;;  %v1362_v1 = vcvt.s32.f32 %v690_v58  ;;  %v721_v2 = vunpack.c.0.s8 %v385_v33  ;;  %v722_v3 = vunpack.c.1.s8 %v385_v33  ;;  %v2202_v33 = vld [vmem:[#allocation1 + $0x36] sm:$0xff] }
  0xda   : > { %2468 = vmatpush.bf16.msrb.mxu2 %v1954_v59  ;;  %v1377_v4 = vcvt.s32.f32 %v705_v61  ;;  %v1378_v5 = vcvt.s32.f32 %v706_v62  ;;  %v737_v6 = vunpack.c.0.s8 %v389_v38  ;;  %v738_v7 = vunpack.c.1.s8 %v389_v38  ;;  %v399_v56 = vld [vmem:[%s5907_s12 + $0x230] sm:$0xff] }
  0xdb   : > { %2481 = vmatpush.bf16.msrb.mxu3 %v1962_v0  ;;  %v1937_v9 = vpack.c.bf16 %v1362_v1, %v1361_v60  ;;  %v1393_v10 = vcvt.s32.f32 %v721_v2  ;;  %v1394_v11 = vcvt.s32.f32 %v722_v3  ;;  %v767_v12 = vunpack.c.2.s8 %v6002_v63  ;;  %v403_v61 = vld [vmem:[%s5907_s12 + $0x250] sm:$0xff]  ;;  %v2180_v3 = vld [vmem:[%s5925_s26 + $0x10] sm:$0xff] }
  0xdc   : > { %v1945_v14 = vpack.c.bf16 %v1378_v5, %v1377_v4  ;;  %v1409_v15 = vcvt.s32.f32 %v737_v6  ;;  %v1410_v16 = vcvt.s32.f32 %v738_v7  ;;  %v768_v17 = vunpack.c.3.s8 %v6002_v63  ;;  %v407_v2 = vld [vmem:[%s5907_s12 + $0x270] sm:$0xff]  ;;  %2205 = vst [vmem:[#allocation1] ss:$9 sm:$0xff] %v2180_v3 }
  0xdd   : > { %2443 = vmatpush.bf16.msrb.mxu0 %v1937_v9  ;;  %v1953_v19 = vpack.c.bf16 %v1394_v11, %v1393_v10  ;;  %v1439_v20 = vcvt.s32.f32 %v767_v12  ;;  %v783_v21 = vunpack.c.2.s8 %v400_v8  ;;  %v784_v22 = vunpack.c.3.s8 %v400_v8 }
  0xde   : > { %2456 = vmatpush.bf16.msrb.mxu1 %v1945_v14  ;;  %v1961_v24 = vpack.c.bf16 %v1410_v16, %v1409_v15  ;;  %v1440_v25 = vcvt.s32.f32 %v768_v17  ;;  %v799_v26 = vunpack.c.2.s8 %v404_v13  ;;  %v800_v27 = vunpack.c.3.s8 %v404_v13 }
  0xdf   : > { %2469 = vmatpush.bf16.msrb.mxu2 %v1953_v19  ;;  %v1455_v29 = vcvt.s32.f32 %v783_v21  ;;  %v1456_v30 = vcvt.s32.f32 %v784_v22  ;;  %v815_v31 = vunpack.c.2.s8 %v408_v18  ;;  %v816_v32 = vunpack.c.3.s8 %v408_v18 }
  0xe0   : > { %2482 = vmatpush.bf16.msrb.mxu3 %v1961_v24  ;;  %v1976_v34 = vpack.c.bf16 %v1440_v25, %v1439_v20  ;;  %v1471_v35 = vcvt.s32.f32 %v799_v26  ;;  %v1472_v36 = vcvt.s32.f32 %v800_v27  ;;  %2444 = vmatmul.bf16.vlgmr.msrb.gmra.mxu0 %v2200_v23  ;;  %v765_v38 = vunpack.c.0.s8 %v6002_v63 }
  0xe1   : > { %v1984_v39 = vpack.c.bf16 %v1456_v30, %v1455_v29  ;;  %v1487_v40 = vcvt.s32.f32 %v815_v31  ;;  %v1488_v41 = vcvt.s32.f32 %v816_v32  ;;  %2457 = vmatmul.bf16.vlgmr.msrb.gmra.mxu1 %v2201_v28  ;;  %v766_v42 = vunpack.c.1.s8 %v6002_v63  ;;  %v394_v28 = vld [vmem:[%s5907_s12 + $0x208] sm:$0xff] }
  0xe2   : > { %2488 = vmatpush.bf16.msra.mxu0 %v1976_v34  ;;  %v1992_v43 = vpack.c.bf16 %v1472_v36, %v1471_v35  ;;  %2470 = vmatmul.bf16.vlgmr.msrb.gmra.mxu2 %v2202_v33  ;;  %v1437_v44 = vcvt.s32.f32 %v765_v38  ;;  %v781_v45 = vunpack.c.0.s8 %v400_v8  ;;  %v782_v46 = vunpack.c.1.s8 %v400_v8 }
  0xe3   : > { %2501 = vmatpush.bf16.msra.mxu1 %v1984_v39  ;;  %v2000_v48 = vpack.c.bf16 %v1488_v41, %v1487_v40  ;;  %2483 = vmatmul.bf16.vlgmr.msrb.gmra.mxu3 %v2203_v37  ;;  %v1438_v49 = vcvt.s32.f32 %v766_v42  ;;  %v797_v50 = vunpack.c.0.s8 %v404_v13  ;;  %v798_v51 = vunpack.c.1.s8 %v404_v13  ;;  %v398_v37 = vld [vmem:[%s5907_s12 + $0x228] sm:$0xff] }
  0xe4   : > { %2514 = vmatpush.bf16.msra.mxu2 %v1992_v43  ;;  %v1453_v52 = vcvt.s32.f32 %v781_v45  ;;  %v1454_v53 = vcvt.s32.f32 %v782_v46  ;;  %v813_v54 = vunpack.c.0.s8 %v408_v18  ;;  %v814_v55 = vunpack.c.1.s8 %v408_v18  ;;  %v402_v42 = vld [vmem:[%s5907_s12 + $0x248] sm:$0xff] }
  0xe5   : > { %2527 = vmatpush.bf16.msra.mxu3 %v2000_v48  ;;  %v1975_v57 = vpack.c.bf16 %v1438_v49, %v1437_v44  ;;  %v1469_v58 = vcvt.s32.f32 %v797_v50  ;;  %v1470_v59 = vcvt.s32.f32 %v798_v51  ;;  %v763_v60 = vunpack.c.2.s8 %v395_v47 }
  0xe6   : > { %v1983_v62 = vpack.c.bf16 %v1454_v53, %v1453_v52  ;;  %v1485_v63 = vcvt.s32.f32 %v813_v54  ;;  %v1486_v0 = vcvt.s32.f32 %v814_v55  ;;  %v764_v1 = vunpack.c.3.s8 %v395_v47 }
  0xe7   : > { %2489 = vmatpush.bf16.msra.mxu0 %v1975_v57  ;;  %v1991_v4 = vpack.c.bf16 %v1470_v59, %v1469_v58  ;;  %v1435_v5 = vcvt.s32.f32 %v763_v60  ;;  %v779_v6 = vunpack.c.2.s8 %v399_v56  ;;  %v780_v7 = vunpack.c.3.s8 %v399_v56 }
  0xe8   : > { %2502 = vmatpush.bf16.msra.mxu1 %v1983_v62  ;;  %v1999_v8 = vpack.c.bf16 %v1486_v0, %v1485_v63  ;;  %v1436_v9 = vcvt.s32.f32 %v764_v1  ;;  %v795_v10 = vunpack.c.2.s8 %v403_v61  ;;  %v796_v11 = vunpack.c.3.s8 %v403_v61 }
  0xe9   : > { %2515 = vmatpush.bf16.msra.mxu2 %v1991_v4  ;;  %v1451_v12 = vcvt.s32.f32 %v779_v6  ;;  %v1452_v13 = vcvt.s32.f32 %v780_v7  ;;  %v811_v14 = vunpack.c.2.s8 %v407_v2  ;;  %v812_v15 = vunpack.c.3.s8 %v407_v2 }
  0xea   : > { %2528 = vmatpush.bf16.msra.mxu3 %v1999_v8  ;;  %v1974_v16 = vpack.c.bf16 %v1436_v9, %v1435_v5  ;;  %v1467_v17 = vcvt.s32.f32 %v795_v10  ;;  %v1468_v18 = vcvt.s32.f32 %v796_v11  ;;  %v761_v19 = vunpack.c.0.s8 %v395_v47  ;;  %v393_v8 = vld [vmem:[%s5907_s12 + $0x200] sm:$0xff] }
  0xeb   : > { %v1982_v20 = vpack.c.bf16 %v1452_v13, %v1451_v12  ;;  %v1483_v21 = vcvt.s32.f32 %v811_v14  ;;  %v1484_v22 = vcvt.s32.f32 %v812_v15  ;;  %v762_v23 = vunpack.c.1.s8 %v395_v47  ;;  %v406_v47 = vld [vmem:[%s5907_s12 + $0x268] sm:$0xff] }
  0xec   : > { %2490 = vmatpush.bf16.msra.mxu0 %v1974_v16  ;;  %v1990_v24 = vpack.c.bf16 %v1468_v18, %v1467_v17  ;;  %v1433_v25 = vcvt.s32.f32 %v761_v19  ;;  %v777_v26 = vunpack.c.0.s8 %v399_v56  ;;  %v778_v27 = vunpack.c.1.s8 %v399_v56  ;;  %v397_v17 = vld [vmem:[%s5907_s12 + $0x220] sm:$0xff] }
  0xed   : > { %2503 = vmatpush.bf16.msra.mxu1 %v1982_v20  ;;  %v1998_v29 = vpack.c.bf16 %v1484_v22, %v1483_v21  ;;  %v1434_v30 = vcvt.s32.f32 %v762_v23  ;;  %v793_v31 = vunpack.c.0.s8 %v403_v61  ;;  %v794_v32 = vunpack.c.1.s8 %v403_v61  ;;  %v401_v22 = vld [vmem:[%s5907_s12 + $0x240] sm:$0xff] }
  0xee   : > { %2516 = vmatpush.bf16.msra.mxu2 %v1990_v24  ;;  %v1449_v33 = vcvt.s32.f32 %v777_v26  ;;  %v1450_v34 = vcvt.s32.f32 %v778_v27  ;;  %v809_v35 = vunpack.c.0.s8 %v407_v2  ;;  %v810_v36 = vunpack.c.1.s8 %v407_v2  ;;  %v405_v27 = vld [vmem:[%s5907_s12 + $0x260] sm:$0xff] }
  0xef   : > { %2529 = vmatpush.bf16.msra.mxu3 %v1998_v29  ;;  %v1973_v38 = vpack.c.bf16 %v1434_v30, %v1433_v25  ;;  %v1465_v39 = vcvt.s32.f32 %v793_v31  ;;  %v1466_v40 = vcvt.s32.f32 %v794_v32  ;;  %v759_v41 = vunpack.c.2.s8 %v394_v28 }
  0xf0   : > { %v1981_v43 = vpack.c.bf16 %v1450_v34, %v1449_v33  ;;  %v1481_v44 = vcvt.s32.f32 %v809_v35  ;;  %v1482_v45 = vcvt.s32.f32 %v810_v36  ;;  %v760_v46 = vunpack.c.3.s8 %v394_v28 }
  0xf1   : > { %2491 = vmatpush.bf16.msra.mxu0 %v1973_v38  ;;  %v1989_v48 = vpack.c.bf16 %v1466_v40, %v1465_v39  ;;  %v1431_v49 = vcvt.s32.f32 %v759_v41  ;;  %v775_v50 = vunpack.c.2.s8 %v398_v37  ;;  %v776_v51 = vunpack.c.3.s8 %v398_v37 }
  0xf2   : > { %2504 = vmatpush.bf16.msra.mxu1 %v1981_v43  ;;  %v1997_v52 = vpack.c.bf16 %v1482_v45, %v1481_v44  ;;  %v1432_v53 = vcvt.s32.f32 %v760_v46  ;;  %v791_v54 = vunpack.c.2.s8 %v402_v42  ;;  %v792_v55 = vunpack.c.3.s8 %v402_v42 }
  0xf3   : > { %2517 = vmatpush.bf16.msra.mxu2 %v1989_v48  ;;  %v1447_v56 = vcvt.s32.f32 %v775_v50  ;;  %v1448_v57 = vcvt.s32.f32 %v776_v51  ;;  %v807_v58 = vunpack.c.2.s8 %v406_v47  ;;  %v808_v59 = vunpack.c.3.s8 %v406_v47 }
  0xf4   : > { %2530 = vmatpush.bf16.msra.mxu3 %v1997_v52  ;;  %v1972_v60 = vpack.c.bf16 %v1432_v53, %v1431_v49  ;;  %v1463_v61 = vcvt.s32.f32 %v791_v54  ;;  %v1464_v62 = vcvt.s32.f32 %v792_v55  ;;  %v757_v63 = vunpack.c.0.s8 %v394_v28  ;;  %v6025_v52 = vld [vmem:[%s5907_s12 + $0x298] sm:$0xff] }
  0xf5   : > { %v1980_v0 = vpack.c.bf16 %v1448_v57, %v1447_v56  ;;  %v1479_v1 = vcvt.s32.f32 %v807_v58  ;;  %v1480_v2 = vcvt.s32.f32 %v808_v59  ;;  %v758_v3 = vunpack.c.1.s8 %v394_v28 }
  0xf6   : > { %2492 = vmatpush.bf16.msra.mxu0 %v1972_v60  ;;  %v1988_v4 = vpack.c.bf16 %v1464_v62, %v1463_v61  ;;  %v1429_v5 = vcvt.s32.f32 %v757_v63  ;;  %v773_v6 = vunpack.c.0.s8 %v398_v37  ;;  %v774_v7 = vunpack.c.1.s8 %v398_v37  ;;  %v416_v61 = vld [vmem:[%s5907_s12 + $0x2b8] sm:$0xff] }
  0xf7   : > { %2505 = vmatpush.bf16.msra.mxu1 %v1980_v0  ;;  %v1996_v9 = vpack.c.bf16 %v1480_v2, %v1479_v1  ;;  %v1430_v10 = vcvt.s32.f32 %v758_v3  ;;  %v789_v11 = vunpack.c.0.s8 %v402_v42  ;;  %v790_v12 = vunpack.c.1.s8 %v402_v42  ;;  %v420_v2 = vld [vmem:[%s5907_s12 + $0x2d8] sm:$0xff] }
  0xf8   : > { %2518 = vmatpush.bf16.msra.mxu2 %v1988_v4  ;;  %v1445_v13 = vcvt.s32.f32 %v773_v6  ;;  %v1446_v14 = vcvt.s32.f32 %v774_v7  ;;  %v805_v15 = vunpack.c.0.s8 %v406_v47  ;;  %v806_v16 = vunpack.c.1.s8 %v406_v47  ;;  %v424_v7 = vld [vmem:[%s5907_s12 + $0x2f8] sm:$0xff] }
  0xf9   : > { %2531 = vmatpush.bf16.msra.mxu3 %v1996_v9  ;;  %v1971_v18 = vpack.c.bf16 %v1430_v10, %v1429_v5  ;;  %v1461_v19 = vcvt.s32.f32 %v789_v11  ;;  %v1462_v20 = vcvt.s32.f32 %v790_v12  ;;  %v755_v21 = vunpack.c.2.s8 %v393_v8  ;;  %v2206_v12 = vld [vmem:[#allocation1] sm:$0xff] }
  0xfa   : > { %v1979_v23 = vpack.c.bf16 %v1446_v14, %v1445_v13  ;;  %v1477_v24 = vcvt.s32.f32 %v805_v15  ;;  %v1478_v25 = vcvt.s32.f32 %v806_v16  ;;  %v756_v26 = vunpack.c.3.s8 %v393_v8 }
  0xfb   : > { %2493 = vmatpush.bf16.msra.mxu0 %v1971_v18  ;;  %v1987_v28 = vpack.c.bf16 %v1462_v20, %v1461_v19  ;;  %v1427_v29 = vcvt.s32.f32 %v755_v21  ;;  %v771_v30 = vunpack.c.2.s8 %v397_v17  ;;  %v772_v31 = vunpack.c.3.s8 %v397_v17 }
  0xfc   : > { %2506 = vmatpush.bf16.msra.mxu1 %v1979_v23  ;;  %v1995_v32 = vpack.c.bf16 %v1478_v25, %v1477_v24  ;;  %v1428_v33 = vcvt.s32.f32 %v756_v26  ;;  %v787_v34 = vunpack.c.2.s8 %v401_v22  ;;  %v788_v35 = vunpack.c.3.s8 %v401_v22  ;;  %v2209_v26 = vld [vmem:[#allocation1 + $0x1b] sm:$0xff] }
  0xfd   : > { %2519 = vmatpush.bf16.msra.mxu2 %v1987_v28  ;;  %v1443_v36 = vcvt.s32.f32 %v771_v30  ;;  %v1444_v37 = vcvt.s32.f32 %v772_v31  ;;  %v803_v38 = vunpack.c.2.s8 %v405_v27  ;;  %v804_v39 = vunpack.c.3.s8 %v405_v27 }
  0xfe   : > { %2532 = vmatpush.bf16.msra.mxu3 %v1995_v32  ;;  %v1970_v40 = vpack.c.bf16 %v1428_v33, %v1427_v29  ;;  %v1459_v41 = vcvt.s32.f32 %v787_v34  ;;  %v1460_v42 = vcvt.s32.f32 %v788_v35  ;;  %v753_v43 = vunpack.c.0.s8 %v393_v8 }
  0xff   : > { %v1978_v44 = vpack.c.bf16 %v1444_v37, %v1443_v36  ;;  %v1475_v45 = vcvt.s32.f32 %v803_v38  ;;  %v1476_v46 = vcvt.s32.f32 %v804_v39  ;;  %v754_v47 = vunpack.c.1.s8 %v393_v8  ;;  %v411_v36 = vld [vmem:[%s5907_s12 + $0x290] sm:$0xff] }
 0x100   : > { %2494 = vmatpush.bf16.msra.mxu0 %v1970_v40  ;;  %v1986_v48 = vpack.c.bf16 %v1460_v42, %v1459_v41  ;;  %v1425_v49 = vcvt.s32.f32 %v753_v43  ;;  %v769_v50 = vunpack.c.0.s8 %v397_v17  ;;  %v770_v51 = vunpack.c.1.s8 %v397_v17  ;;  %v2207_v17 = vld [vmem:[#allocation1 + $0x9] sm:$0xff] }
 0x101   : > { %2507 = vmatpush.bf16.msra.mxu1 %v1978_v44  ;;  %v1994_v53 = vpack.c.bf16 %v1476_v46, %v1475_v45  ;;  %v1426_v54 = vcvt.s32.f32 %v754_v47  ;;  %v785_v55 = vunpack.c.0.s8 %v401_v22  ;;  %v786_v56 = vunpack.c.1.s8 %v401_v22  ;;  %v2208_v22 = vld [vmem:[#allocation1 + $0x12] sm:$0xff]  ;;  %v415_v45 = vld [vmem:[%s5907_s12 + $0x2b0] sm:$0xff] }
 0x102   : > { %2520 = vmatpush.bf16.msra.mxu2 %v1986_v48  ;;  %v1441_v57 = vcvt.s32.f32 %v769_v50  ;;  %v1442_v58 = vcvt.s32.f32 %v770_v51  ;;  %v801_v59 = vunpack.c.0.s8 %v405_v27  ;;  %v802_v60 = vunpack.c.1.s8 %v405_v27  ;;  %v419_v50 = vld [vmem:[%s5907_s12 + $0x2d0] sm:$0xff] }
 0x103   : > { %2533 = vmatpush.bf16.msra.mxu3 %v1994_v53  ;;  %v1969_v62 = vpack.c.bf16 %v1426_v54, %v1425_v49  ;;  %v1457_v63 = vcvt.s32.f32 %v785_v55  ;;  %v1458_v0 = vcvt.s32.f32 %v786_v56  ;;  %v831_v1 = vunpack.c.2.s8 %v6025_v52  ;;  %v423_v55 = vld [vmem:[%s5907_s12 + $0x2f0] sm:$0xff] }
 0x104   : > { %v1977_v3 = vpack.c.bf16 %v1442_v58, %v1441_v57  ;;  %v1473_v4 = vcvt.s32.f32 %v801_v59  ;;  %v1474_v5 = vcvt.s32.f32 %v802_v60  ;;  %v832_v6 = vunpack.c.3.s8 %v6025_v52 }
 0x105   : > { %2495 = vmatpush.bf16.msra.mxu0 %v1969_v62  ;;  %v1985_v8 = vpack.c.bf16 %v1458_v0, %v1457_v63  ;;  %v1503_v9 = vcvt.s32.f32 %v831_v1  ;;  %v847_v10 = vunpack.c.2.s8 %v416_v61  ;;  %v848_v11 = vunpack.c.3.s8 %v416_v61 }
 0x106   : > { %2508 = vmatpush.bf16.msra.mxu1 %v1977_v3  ;;  %v1993_v13 = vpack.c.bf16 %v1474_v5, %v1473_v4  ;;  %v1504_v14 = vcvt.s32.f32 %v832_v6  ;;  %v863_v15 = vunpack.c.2.s8 %v420_v2  ;;  %v864_v16 = vunpack.c.3.s8 %v420_v2 }
 0x107   : > { %2521 = vmatpush.bf16.msra.mxu2 %v1985_v8  ;;  %v1519_v18 = vcvt.s32.f32 %v847_v10  ;;  %v1520_v19 = vcvt.s32.f32 %v848_v11  ;;  %v879_v20 = vunpack.c.2.s8 %v424_v7  ;;  %v880_v21 = vunpack.c.3.s8 %v424_v7 }
 0x108   : > { %2534 = vmatpush.bf16.msra.mxu3 %v1993_v13  ;;  %v2008_v23 = vpack.c.bf16 %v1504_v14, %v1503_v9  ;;  %v1535_v24 = vcvt.s32.f32 %v863_v15  ;;  %v1536_v25 = vcvt.s32.f32 %v864_v16  ;;  %2496 = vmatmul.bf16.vlgmr.msra.gmra.mxu0 %v2206_v12  ;;  %v829_v27 = vunpack.c.0.s8 %v6025_v52  ;;  %v410_v16 = vld [vmem:[%s5907_s12 + $0x288] sm:$0xff] }
 0x109   : > { %v2016_v28 = vpack.c.bf16 %v1520_v19, %v1519_v18  ;;  %v1551_v29 = vcvt.s32.f32 %v879_v20  ;;  %v1552_v30 = vcvt.s32.f32 %v880_v21  ;;  %2509 = vmatmul.bf16.vlgmr.msra.gmra.mxu1 %v2207_v17  ;;  %v830_v31 = vunpack.c.1.s8 %v6025_v52  ;;  %v6039_v21 = vpop.f32.mrf.mxu0 }
 0x10a   : > { %2540 = vmatpush.bf16.msrb.mxu0 %v2008_v23  ;;  %v2024_v32 = vpack.c.bf16 %v1536_v25, %v1535_v24  ;;  %2522 = vmatmul.bf16.vlgmr.msra.gmra.mxu2 %v2208_v22  ;;  %v1501_v33 = vcvt.s32.f32 %v829_v27  ;;  %v845_v34 = vunpack.c.0.s8 %v416_v61  ;;  %v846_v35 = vunpack.c.1.s8 %v416_v61  ;;  %v6041_v22 = vpop.f32.mrf.mxu1  ;;  %v414_v27 = vld [vmem:[%s5907_s12 + $0x2a8] sm:$0xff] }
 0x10b   : > { %2553 = vmatpush.bf16.msrb.mxu1 %v2016_v28  ;;  %v2032_v37 = vpack.c.bf16 %v1552_v30, %v1551_v29  ;;  %2535 = vmatmul.bf16.vlgmr.msra.gmra.mxu3 %v2209_v26  ;;  %v1502_v38 = vcvt.s32.f32 %v830_v31  ;;  %v861_v39 = vunpack.c.0.s8 %v420_v2  ;;  %v862_v40 = vunpack.c.1.s8 %v420_v2 }
 0x10c   : > { %2566 = vmatpush.bf16.msrb.mxu2 %v2024_v32  ;;  %v1517_v41 = vcvt.s32.f32 %v845_v34  ;;  %v1518_v42 = vcvt.s32.f32 %v846_v35  ;;  %v877_v43 = vunpack.c.0.s8 %v424_v7  ;;  %v878_v44 = vunpack.c.1.s8 %v424_v7  ;;  %v418_v32 = vld [vmem:[%s5907_s12 + $0x2c8] sm:$0xff] }
 0x10d   : > { %2579 = vmatpush.bf16.msrb.mxu3 %v2032_v37  ;;  %v2007_v46 = vpack.c.bf16 %v1502_v38, %v1501_v33  ;;  %v1533_v47 = vcvt.s32.f32 %v861_v39  ;;  %v1534_v48 = vcvt.s32.f32 %v862_v40  ;;  %v827_v49 = vunpack.c.2.s8 %v411_v36  ;;  %v422_v37 = vld [vmem:[%s5907_s12 + $0x2e8] sm:$0xff] }
 0x10e   : > { %v2015_v51 = vpack.c.bf16 %v1518_v42, %v1517_v41  ;;  %v1549_v52 = vcvt.s32.f32 %v877_v43  ;;  %v1550_v53 = vcvt.s32.f32 %v878_v44  ;;  %v828_v54 = vunpack.c.3.s8 %v411_v36 }
 0x10f   : > { %2541 = vmatpush.bf16.msrb.mxu0 %v2007_v46  ;;  %v2023_v56 = vpack.c.bf16 %v1534_v48, %v1533_v47  ;;  %v1499_v57 = vcvt.s32.f32 %v827_v49  ;;  %v843_v58 = vunpack.c.2.s8 %v415_v45  ;;  %v844_v59 = vunpack.c.3.s8 %v415_v45 }
 0x110   : > { %2554 = vmatpush.bf16.msrb.mxu1 %v2015_v51  ;;  %v2031_v60 = vpack.c.bf16 %v1550_v53, %v1549_v52  ;;  %v1500_v61 = vcvt.s32.f32 %v828_v54  ;;  %v859_v62 = vunpack.c.2.s8 %v419_v50  ;;  %v860_v63 = vunpack.c.3.s8 %v419_v50  ;;  %v6048_v51 = vpop.f32.mrf.mxu3 }
 0x111   : > { %2567 = vmatpush.bf16.msrb.mxu2 %v2023_v56  ;;  %v1515_v0 = vcvt.s32.f32 %v843_v58  ;;  %v1516_v1 = vcvt.s32.f32 %v844_v59  ;;  %v875_v2 = vunpack.c.2.s8 %v423_v55  ;;  %v876_v3 = vunpack.c.3.s8 %v423_v55 }
 0x112   : > { %2580 = vmatpush.bf16.msrb.mxu3 %v2031_v60  ;;  %v2006_v4 = vpack.c.bf16 %v1500_v61, %v1499_v57  ;;  %v1531_v5 = vcvt.s32.f32 %v859_v62  ;;  %v1532_v6 = vcvt.s32.f32 %v860_v63  ;;  %v825_v7 = vunpack.c.0.s8 %v411_v36  ;;  %v2291_v60 = vpop.f32.mrf.mxu0  ;;  %v2304_v61 = vpop.f32.mrf.mxu1 }
 0x113   : > { %v2014_v8 = vpack.c.bf16 %v1516_v1, %v1515_v0  ;;  %v1547_v9 = vcvt.s32.f32 %v875_v2  ;;  %v1548_v10 = vcvt.s32.f32 %v876_v3  ;;  %v826_v11 = vunpack.c.1.s8 %v411_v36  ;;  %v409_v2 = vld [vmem:[%s5907_s12 + $0x280] sm:$0xff]  ;;  %v6058_v61 = vld [vmem:[%s5907_s12 + $0x338] sm:$0xff] }
 0x114   : > { %2542 = vmatpush.bf16.msrb.mxu0 %v2006_v4  ;;  %v2022_v12 = vpack.c.bf16 %v1532_v6, %v1531_v5  ;;  %v1497_v13 = vcvt.s32.f32 %v825_v7  ;;  %v841_v14 = vunpack.c.0.s8 %v415_v45  ;;  %v842_v15 = vunpack.c.1.s8 %v415_v45 }
 0x115   : > { %2555 = vmatpush.bf16.msrb.mxu1 %v2014_v8  ;;  %v2030_v17 = vpack.c.bf16 %v1548_v10, %v1547_v9  ;;  %v1498_v18 = vcvt.s32.f32 %v826_v11  ;;  %v857_v19 = vunpack.c.0.s8 %v419_v50  ;;  %v858_v20 = vunpack.c.1.s8 %v419_v50  ;;  %v6046_v50 = vpop.f32.mrf.mxu2  ;;  %v413_v11 = vld [vmem:[%s5907_s12 + $0x2a0] sm:$0xff] }
 0x116   : > { %2568 = vmatpush.bf16.msrb.mxu2 %v2022_v12  ;;  %v1513_v23 = vcvt.s32.f32 %v841_v14  ;;  %v1514_v24 = vcvt.s32.f32 %v842_v15  ;;  %v873_v25 = vunpack.c.0.s8 %v423_v55  ;;  %v874_v26 = vunpack.c.1.s8 %v423_v55 }
 0x117   : > { %2581 = vmatpush.bf16.msrb.mxu3 %v2030_v17  ;;  %v2005_v28 = vpack.c.bf16 %v1498_v18, %v1497_v13  ;;  %v1529_v29 = vcvt.s32.f32 %v857_v19  ;;  %v1530_v30 = vcvt.s32.f32 %v858_v20  ;;  %v823_v31 = vunpack.c.2.s8 %v410_v16 }
 0x118   : > { %v2013_v33 = vpack.c.bf16 %v1514_v24, %v1513_v23  ;;  %v1545_v34 = vcvt.s32.f32 %v873_v25  ;;  %v1546_v35 = vcvt.s32.f32 %v874_v26  ;;  %v824_v36 = vunpack.c.3.s8 %v410_v16  ;;  %v421_v23 = vld [vmem:[%s5907_s12 + $0x2e0] sm:$0xff] }
 0x119   : > { %2543 = vmatpush.bf16.msrb.mxu0 %v2005_v28  ;;  %v2021_v38 = vpack.c.bf16 %v1530_v30, %v1529_v29  ;;  %v1495_v39 = vcvt.s32.f32 %v823_v31  ;;  %v839_v40 = vunpack.c.2.s8 %v414_v27  ;;  %v840_v41 = vunpack.c.3.s8 %v414_v27  ;;  %v2330_v29 = vpop.f32.mrf.mxu3 }
 0x11a   : > { %2556 = vmatpush.bf16.msrb.mxu1 %v2013_v33  ;;  %v2029_v42 = vpack.c.bf16 %v1546_v35, %v1545_v34  ;;  %v1496_v43 = vcvt.s32.f32 %v824_v36  ;;  %v855_v44 = vunpack.c.2.s8 %v418_v32  ;;  %v856_v45 = vunpack.c.3.s8 %v418_v32 }
 0x11b   : > { %2569 = vmatpush.bf16.msrb.mxu2 %v2021_v38  ;;  %v1511_v46 = vcvt.s32.f32 %v839_v40  ;;  %v1512_v47 = vcvt.s32.f32 %v840_v41  ;;  %v871_v48 = vunpack.c.2.s8 %v422_v37  ;;  %v872_v49 = vunpack.c.3.s8 %v422_v37 }
 0x11c   : > { %2582 = vmatpush.bf16.msrb.mxu3 %v2029_v42  ;;  %v2004_v52 = vpack.c.bf16 %v1496_v43, %v1495_v39  ;;  %v1527_v53 = vcvt.s32.f32 %v855_v44  ;;  %v1528_v54 = vcvt.s32.f32 %v856_v45  ;;  %v821_v55 = vunpack.c.0.s8 %v410_v16 }
 0x11d   : > { %v2012_v56 = vpack.c.bf16 %v1512_v47, %v1511_v46  ;;  %v1543_v57 = vcvt.s32.f32 %v871_v48  ;;  %v1544_v58 = vcvt.s32.f32 %v872_v49  ;;  %v822_v59 = vunpack.c.1.s8 %v410_v16  ;;  %v417_v16 = vld [vmem:[%s5907_s12 + $0x2c0] sm:$0xff]  ;;  %v2317_v28 = vpop.f32.mrf.mxu2 }
 0x11e   : > { %2544 = vmatpush.bf16.msrb.mxu0 %v2004_v52  ;;  %v2020_v62 = vpack.c.bf16 %v1528_v54, %v1527_v53  ;;  %v1493_v63 = vcvt.s32.f32 %v821_v55  ;;  %v837_v0 = vunpack.c.0.s8 %v414_v27  ;;  %v838_v1 = vunpack.c.1.s8 %v414_v27  ;;  %v6055_v52 = vld [vmem:[%s5907_s12 + $0x318] sm:$0xff] }
 0x11f   : > { %2557 = vmatpush.bf16.msrb.mxu1 %v2012_v56  ;;  %v2028_v3 = vpack.c.bf16 %v1544_v58, %v1543_v57  ;;  %v1494_v4 = vcvt.s32.f32 %v822_v59  ;;  %v853_v5 = vunpack.c.0.s8 %v418_v32  ;;  %v854_v6 = vunpack.c.1.s8 %v418_v32 }
 0x120   : > { %2570 = vmatpush.bf16.msrb.mxu2 %v2020_v62  ;;  %v1509_v7 = vcvt.s32.f32 %v837_v0  ;;  %v1510_v8 = vcvt.s32.f32 %v838_v1  ;;  %v869_v9 = vunpack.c.0.s8 %v422_v37  ;;  %v870_v10 = vunpack.c.1.s8 %v422_v37  ;;  %v6060_v62 = vpop.f32.mrf.mxu0 }
 0x121   : > { %2583 = vmatpush.bf16.msrb.mxu3 %v2028_v3  ;;  %v2003_v12 = vpack.c.bf16 %v1494_v4, %v1493_v63  ;;  %v1525_v13 = vcvt.s32.f32 %v853_v5  ;;  %v1526_v14 = vcvt.s32.f32 %v854_v6  ;;  %v819_v15 = vunpack.c.2.s8 %v409_v2  ;;  %v6062_v63 = vpop.f32.mrf.mxu1  ;;  %v436_v4 = vld [vmem:[%s5907_s12 + $0x358] sm:$0xff]  ;;  %v6076_v28 = vpop.f32.mrf.mxu3 }
 0x122   : > { %v2011_v17 = vpack.c.bf16 %v1510_v8, %v1509_v7  ;;  %v1541_v18 = vcvt.s32.f32 %v869_v9  ;;  %v1542_v19 = vcvt.s32.f32 %v870_v10  ;;  %v820_v20 = vunpack.c.3.s8 %v409_v2  ;;  %v6068_v9 = vld [vmem:[%s5907_s12 + $0x378] sm:$0xff] }
 0x123   : > { %2545 = vmatpush.bf16.msrb.mxu0 %v2003_v12  ;;  %v2019_v24 = vpack.c.bf16 %v1526_v14, %v1525_v13  ;;  %v1491_v25 = vcvt.s32.f32 %v819_v15  ;;  %v835_v26 = vunpack.c.2.s8 %v413_v11  ;;  %v836_v27 = vunpack.c.3.s8 %v413_v11  ;;  %v2210_v14 = vld [vmem:[#allocation1 + $0x24] sm:$0xff] }
 0x124   : > { %2558 = vmatpush.bf16.msrb.mxu1 %v2011_v17  ;;  %v2027_v30 = vpack.c.bf16 %v1542_v19, %v1541_v18  ;;  %v1492_v31 = vcvt.s32.f32 %v820_v20  ;;  %v851_v32 = vunpack.c.2.s8 %v417_v16  ;;  %v852_v33 = vunpack.c.3.s8 %v417_v16  ;;  %v2211_v19 = vld [vmem:[#allocation1 + $0x2d] sm:$0xff] }
 0x125   : > { %2571 = vmatpush.bf16.msrb.mxu2 %v2019_v24  ;;  %v1507_v34 = vcvt.s32.f32 %v835_v26  ;;  %v1508_v35 = vcvt.s32.f32 %v836_v27  ;;  %v867_v36 = vunpack.c.2.s8 %v421_v23  ;;  %v868_v37 = vunpack.c.3.s8 %v421_v23  ;;  %v2212_v26 = vld [vmem:[#allocation1 + $0x36] sm:$0xff]  ;;  %v6074_v27 = vpop.f32.mrf.mxu2 }
 0x126   : > { %2584 = vmatpush.bf16.msrb.mxu3 %v2027_v30  ;;  %v2002_v38 = vpack.c.bf16 %v1492_v31, %v1491_v25  ;;  %v1523_v39 = vcvt.s32.f32 %v851_v32  ;;  %v1524_v40 = vcvt.s32.f32 %v852_v33  ;;  %v817_v41 = vunpack.c.0.s8 %v409_v2  ;;  %v2213_v33 = vld [vmem:[#allocation1 + $0x3f] sm:$0xff] }
 0x127   : > { %v2010_v42 = vpack.c.bf16 %v1508_v35, %v1507_v34  ;;  %v1539_v43 = vcvt.s32.f32 %v867_v36  ;;  %v1540_v44 = vcvt.s32.f32 %v868_v37  ;;  %v818_v45 = vunpack.c.1.s8 %v409_v2 }
 0x128   : > { %2546 = vmatpush.bf16.msrb.mxu0 %v2002_v38  ;;  %v2018_v46 = vpack.c.bf16 %v1524_v40, %v1523_v39  ;;  %v1489_v47 = vcvt.s32.f32 %v817_v41  ;;  %v833_v48 = vunpack.c.0.s8 %v413_v11  ;;  %v834_v49 = vunpack.c.1.s8 %v413_v11 }
 0x129   : > { %2559 = vmatpush.bf16.msrb.mxu1 %v2010_v42  ;;  %v2026_v53 = vpack.c.bf16 %v1540_v44, %v1539_v43  ;;  %v1490_v54 = vcvt.s32.f32 %v818_v45  ;;  %v849_v55 = vunpack.c.0.s8 %v417_v16  ;;  %v850_v56 = vunpack.c.1.s8 %v417_v16  ;;  %v2343_v42 = vpop.f32.mrf.mxu0  ;;  %v2356_v43 = vpop.f32.mrf.mxu1 }
 0x12a   : > { %2572 = vmatpush.bf16.msrb.mxu2 %v2018_v46  ;;  %v1505_v57 = vcvt.s32.f32 %v833_v48  ;;  %v1506_v58 = vcvt.s32.f32 %v834_v49  ;;  %v865_v59 = vunpack.c.0.s8 %v421_v23  ;;  %v866_v60 = vunpack.c.1.s8 %v421_v23  ;;  %v427_v46 = vld [vmem:[%s5907_s12 + $0x310] sm:$0xff] }
 0x12b   : > { %2585 = vmatpush.bf16.msrb.mxu3 %v2026_v53  ;;  %v2001_v0 = vpack.c.bf16 %v1490_v54, %v1489_v47  ;;  %v1521_v1 = vcvt.s32.f32 %v849_v55  ;;  %v1522_v2 = vcvt.s32.f32 %v850_v56  ;;  %v895_v3 = vunpack.c.2.s8 %v6055_v52 }
 0x12c   : > { %v2009_v5 = vpack.c.bf16 %v1506_v58, %v1505_v57  ;;  %v1537_v6 = vcvt.s32.f32 %v865_v59  ;;  %v1538_v7 = vcvt.s32.f32 %v866_v60  ;;  %v896_v8 = vunpack.c.3.s8 %v6055_v52  ;;  %v431_v57 = vld [vmem:[%s5907_s12 + $0x330] sm:$0xff] }
 0x12d   : > { %2547 = vmatpush.bf16.msrb.mxu0 %v2001_v0  ;;  %v2017_v10 = vpack.c.bf16 %v1522_v2, %v1521_v1  ;;  %v1567_v11 = vcvt.s32.f32 %v895_v3  ;;  %v911_v12 = vunpack.c.2.s8 %v6058_v61  ;;  %v912_v13 = vunpack.c.3.s8 %v6058_v61  ;;  %v435_v58 = vld [vmem:[%s5907_s12 + $0x350] sm:$0xff] }
 0x12e   : > { %2560 = vmatpush.bf16.msrb.mxu1 %v2009_v5  ;;  %v2025_v15 = vpack.c.bf16 %v1538_v7, %v1537_v6  ;;  %v1568_v16 = vcvt.s32.f32 %v896_v8  ;;  %v927_v17 = vunpack.c.2.s8 %v436_v4  ;;  %v928_v18 = vunpack.c.3.s8 %v436_v4  ;;  %v439_v1 = vld [vmem:[%s5907_s12 + $0x370] sm:$0xff]  ;;  %v2369_v6 = vpop.f32.mrf.mxu2  ;;  %v2382_v7 = vpop.f32.mrf.mxu3 }
 0x12f   : > { %2573 = vmatpush.bf16.msrb.mxu2 %v2017_v10  ;;  %v1583_v20 = vcvt.s32.f32 %v911_v12  ;;  %v1584_v23 = vcvt.s32.f32 %v912_v13  ;;  %v943_v24 = vunpack.c.2.s8 %v6068_v9  ;;  %v944_v25 = vunpack.c.3.s8 %v6068_v9 }
 0x130   : > { %2586 = vmatpush.bf16.msrb.mxu3 %v2025_v15  ;;  %v2040_v29 = vpack.c.bf16 %v1568_v16, %v1567_v11  ;;  %v1599_v30 = vcvt.s32.f32 %v927_v17  ;;  %v1600_v31 = vcvt.s32.f32 %v928_v18  ;;  %2548 = vmatmul.bf16.vlgmr.msrb.gmra.mxu0 %v2210_v14  ;;  %v2303_v32 = vadd.f32 %v6041_v22, %v6039_v21  ;;  %v2181_v11 = vld [vmem:[%s5925_s26 + $0x18] sm:$0xff] }
 0x131   : > { %v2048_v34 = vpack.c.bf16 %v1584_v23, %v1583_v20  ;;  %v1615_v35 = vcvt.s32.f32 %v943_v24  ;;  %v1616_v36 = vcvt.s32.f32 %v944_v25  ;;  %2561 = vmatmul.bf16.vlgmr.msrb.gmra.mxu1 %v2211_v19  ;;  %v893_v37 = vunpack.c.0.s8 %v6055_v52  ;;  %2215 = vst [vmem:[#allocation1] ss:$9 sm:$0xff] %v2181_v11 }
 0x132   : > { %2592 = vmatpush.bf16.msra.mxu0 %v2040_v29  ;;  %v2056_v38 = vpack.c.bf16 %v1600_v31, %v1599_v30  ;;  %2574 = vmatmul.bf16.vlgmr.msrb.gmra.mxu2 %v2212_v26  ;;  %v894_v39 = vunpack.c.1.s8 %v6055_v52  ;;  %v909_v40 = vunpack.c.0.s8 %v6058_v61  ;;  %v910_v41 = vunpack.c.1.s8 %v6058_v61 }
 0x133   : > { %2605 = vmatpush.bf16.msra.mxu1 %v2048_v34  ;;  %v2064_v21 = vpack.c.bf16 %v1616_v36, %v1615_v35  ;;  %2587 = vmatmul.bf16.vlgmr.msrb.gmra.mxu3 %v2213_v33  ;;  %v1565_v22 = vcvt.s32.f32 %v893_v37  ;;  %v925_v44 = vunpack.c.0.s8 %v436_v4  ;;  %v926_v45 = vunpack.c.1.s8 %v436_v4  ;;  %v426_v35 = vld [vmem:[%s5907_s12 + $0x308] sm:$0xff] }
 0x134   : > { %2618 = vmatpush.bf16.msra.mxu2 %v2056_v38  ;;  %v1566_v47 = vcvt.s32.f32 %v894_v39  ;;  %v1581_v48 = vcvt.s32.f32 %v909_v40  ;;  %v1582_v49 = vcvt.s32.f32 %v910_v41  ;;  %v941_v52 = vunpack.c.0.s8 %v6068_v9  ;;  %v430_v40 = vld [vmem:[%s5907_s12 + $0x328] sm:$0xff] }
 0x135   : > { %2631 = vmatpush.bf16.msra.mxu3 %v2064_v21  ;;  %v1597_v53 = vcvt.s32.f32 %v925_v44  ;;  %v1598_v54 = vcvt.s32.f32 %v926_v45  ;;  %v942_v55 = vunpack.c.1.s8 %v6068_v9  ;;  %v2316_v56 = vadd.f32 %v6046_v50, %v2303_v32 }
 0x136   : > { %v2039_v59 = vpack.c.bf16 %v1566_v47, %v1565_v22  ;;  %v2047_v60 = vpack.c.bf16 %v1582_v49, %v1581_v48  ;;  %v1613_v61 = vcvt.s32.f32 %v941_v52  ;;  %v891_v0 = vunpack.c.2.s8 %v427_v46  ;;  %v434_v47 = vld [vmem:[%s5907_s12 + $0x348] sm:$0xff] }
 0x137   : > { %v2055_v2 = vpack.c.bf16 %v1598_v54, %v1597_v53  ;;  %v1614_v3 = vcvt.s32.f32 %v942_v55  ;;  %v6092_v4 = vadd.f32 %v6048_v51, %v2316_v56  ;;  %v892_v5 = vunpack.c.3.s8 %v427_v46  ;;  %v438_v54 = vld [vmem:[%s5907_s12 + $0x368] sm:$0xff] }
 0x138   : > { %2593 = vmatpush.bf16.msra.mxu0 %v2039_v59  ;;  %2606 = vmatpush.bf16.msra.mxu1 %v2047_v60  ;;  %v1563_v8 = vcvt.s32.f32 %v891_v0  ;;  %v907_v50 = vunpack.c.2.s8 %v431_v57  ;;  %v908_v9 = vunpack.c.3.s8 %v431_v57  ;;  %v923_v10 = vunpack.c.2.s8 %v435_v58 }
 0x139   : > { %2619 = vmatpush.bf16.msra.mxu2 %v2055_v2  ;;  %v2063_v12 = vpack.c.bf16 %v1614_v3, %v1613_v61  ;;  %v1564_v13 = vcvt.s32.f32 %v892_v5  ;;  %v924_v14 = vunpack.c.3.s8 %v435_v58  ;;  %v939_v15 = vunpack.c.2.s8 %v439_v1 }
 0x13a   : > { %v1579_v16 = vcvt.s32.f32 %v907_v50  ;;  %v1580_v17 = vcvt.s32.f32 %v908_v9  ;;  %v1595_v51 = vcvt.s32.f32 %v923_v10  ;;  %v940_v18 = vunpack.c.3.s8 %v439_v1 }
 0x13b   : > { %2632 = vmatpush.bf16.msra.mxu3 %v2063_v12  ;;  %v2038_v19 = vpack.c.bf16 %v1564_v13, %v1563_v8  ;;  %v1596_v20 = vcvt.s32.f32 %v924_v14  ;;  %v1611_v23 = vcvt.s32.f32 %v939_v15  ;;  %v889_v24 = vunpack.c.0.s8 %v427_v46 }
 0x13c   : > { %v2046_v25 = vpack.c.bf16 %v1580_v17, %v1579_v16  ;;  %v1612_v26 = vcvt.s32.f32 %v940_v18  ;;  %v890_v29 = vunpack.c.1.s8 %v427_v46  ;;  %v905_v30 = vunpack.c.0.s8 %v431_v57 }
 0x13d   : > { %2594 = vmatpush.bf16.msra.mxu0 %v2038_v19  ;;  %v2054_v31 = vpack.c.bf16 %v1596_v20, %v1595_v51  ;;  %v1561_v32 = vcvt.s32.f32 %v889_v24  ;;  %v906_v33 = vunpack.c.1.s8 %v431_v57  ;;  %v921_v34 = vunpack.c.0.s8 %v435_v58  ;;  %v425_v20 = vld [vmem:[%s5907_s12 + $0x300] sm:$0xff] }
 0x13e   : > { %2607 = vmatpush.bf16.msra.mxu1 %v2046_v25  ;;  %v2062_v36 = vpack.c.bf16 %v1612_v26, %v1611_v23  ;;  %v1562_v37 = vcvt.s32.f32 %v890_v29  ;;  %v1577_v38 = vcvt.s32.f32 %v905_v30  ;;  %v922_v39 = vunpack.c.1.s8 %v435_v58  ;;  %v429_v25 = vld [vmem:[%s5907_s12 + $0x320] sm:$0xff]  ;;  %v6104_v26 = vpop.f32.mrf.mxu0 }
 0x13f   : > { %2620 = vmatpush.bf16.msra.mxu2 %v2054_v31  ;;  %v1578_v41 = vcvt.s32.f32 %v906_v33  ;;  %v1593_v42 = vcvt.s32.f32 %v921_v34  ;;  %v937_v43 = vunpack.c.0.s8 %v439_v1  ;;  %v938_v21 = vunpack.c.1.s8 %v439_v1 }
 0x140   : > { %2633 = vmatpush.bf16.msra.mxu3 %v2062_v36  ;;  %v2037_v22 = vpack.c.bf16 %v1562_v37, %v1561_v32  ;;  %v1594_v44 = vcvt.s32.f32 %v922_v39  ;;  %v887_v45 = vunpack.c.2.s8 %v426_v35  ;;  %v888_v46 = vunpack.c.3.s8 %v426_v35  ;;  %v433_v36 = vld [vmem:[%s5907_s12 + $0x340] sm:$0xff] }
 0x141   : > { %v2045_v48 = vpack.c.bf16 %v1578_v41, %v1577_v38  ;;  %v1609_v49 = vcvt.s32.f32 %v937_v43  ;;  %v1610_v52 = vcvt.s32.f32 %v938_v21  ;;  %v903_v53 = vunpack.c.2.s8 %v430_v40  ;;  %v437_v41 = vld [vmem:[%s5907_s12 + $0x360] sm:$0xff] }
 0x142   : > { %2595 = vmatpush.bf16.msra.mxu0 %v2037_v22  ;;  %v2053_v55 = vpack.c.bf16 %v1594_v44, %v1593_v42  ;;  %v1559_v56 = vcvt.s32.f32 %v887_v45  ;;  %v1560_v57 = vcvt.s32.f32 %v888_v46  ;;  %v904_v58 = vunpack.c.3.s8 %v430_v40 }
 0x143   : > { %2608 = vmatpush.bf16.msra.mxu1 %v2045_v48  ;;  %v2061_v59 = vpack.c.bf16 %v1610_v52, %v1609_v49  ;;  %v1575_v60 = vcvt.s32.f32 %v903_v53  ;;  %v919_v61 = vunpack.c.2.s8 %v434_v47  ;;  %v920_v0 = vunpack.c.3.s8 %v434_v47 }
 0x144   : > { %2621 = vmatpush.bf16.msra.mxu2 %v2053_v55  ;;  %v2036_v1 = vpack.c.bf16 %v1560_v57, %v1559_v56  ;;  %v1576_v2 = vcvt.s32.f32 %v904_v58  ;;  %v935_v3 = vunpack.c.2.s8 %v438_v54  ;;  %v936_v5 = vunpack.c.3.s8 %v438_v54 }
 0x145   : > { %2634 = vmatpush.bf16.msra.mxu3 %v2061_v59  ;;  %v1591_v6 = vcvt.s32.f32 %v919_v61  ;;  %v1592_v7 = vcvt.s32.f32 %v920_v0  ;;  %v2342_v8 = vadd.f32 %v6060_v62, %v6092_v4  ;;  %v885_v50 = vunpack.c.0.s8 %v426_v35 }
 0x146   : > { %2596 = vmatpush.bf16.msra.mxu0 %v2036_v1  ;;  %v2044_v9 = vpack.c.bf16 %v1576_v2, %v1575_v60  ;;  %v1607_v10 = vcvt.s32.f32 %v935_v3  ;;  %v1608_v11 = vcvt.s32.f32 %v936_v5  ;;  %v886_v12 = vunpack.c.1.s8 %v426_v35  ;;  %v2395_v61 = vpop.f32.mrf.mxu0  ;;  %v444_v5 = vld [vmem:[%s5907_s12 + $0x398] sm:$0xff] }
 0x147   : > { %v2052_v13 = vpack.c.bf16 %v1592_v7, %v1591_v6  ;;  %v2355_v14 = vadd.f32 %v6062_v63, %v2342_v8  ;;  %v1557_v15 = vcvt.s32.f32 %v885_v50  ;;  %v901_v16 = vunpack.c.0.s8 %v430_v40 }
 0x148   : > { %2609 = vmatpush.bf16.msra.mxu1 %v2044_v9  ;;  %v2060_v17 = vpack.c.bf16 %v1608_v11, %v1607_v10  ;;  %v1558_v51 = vcvt.s32.f32 %v886_v12  ;;  %v902_v18 = vunpack.c.1.s8 %v430_v40  ;;  %v917_v19 = vunpack.c.0.s8 %v434_v47  ;;  %v6116_v9 = vld [vmem:[%s5907_s12 + $0x3b8] sm:$0xff] }
 0x149   : > { %2622 = vmatpush.bf16.msra.mxu2 %v2052_v13  ;;  %v1573_v62 = vcvt.s32.f32 %v901_v16  ;;  %v918_v4 = vunpack.c.1.s8 %v434_v47  ;;  %v933_v23 = vunpack.c.0.s8 %v438_v54  ;;  %v934_v24 = vunpack.c.1.s8 %v438_v54  ;;  %v6112_v47 = vpop.f32.mrf.mxu1  ;;  %v6123_v16 = vpop.f32.mrf.mxu3 }
 0x14a   : > { %2635 = vmatpush.bf16.msra.mxu3 %v2060_v17  ;;  %v2035_v63 = vpack.c.bf16 %v1558_v51, %v1557_v15  ;;  %v1574_v29 = vcvt.s32.f32 %v902_v18  ;;  %v1589_v30 = vcvt.s32.f32 %v917_v19  ;;  %v2368_v31 = vadd.f32 %v6074_v27, %v2355_v14  ;;  %v6119_v14 = vld [vmem:[%s5907_s12 + $0x3d8] sm:$0xff]  ;;  %v6121_v15 = vpop.f32.mrf.mxu2 }
 0x14b   : > { %v1590_v32 = vcvt.s32.f32 %v918_v4  ;;  %v1605_v33 = vcvt.s32.f32 %v933_v23  ;;  %v1606_v34 = vcvt.s32.f32 %v934_v24  ;;  %v883_v35 = vunpack.c.2.s8 %v425_v20  ;;  %v456_v24 = vld [vmem:[%s5907_s12 + $0x3f8] sm:$0xff] }
 0x14c   : > { %2597 = vmatpush.bf16.msra.mxu0 %v2035_v63  ;;  %v2043_v37 = vpack.c.bf16 %v1574_v29, %v1573_v62  ;;  %v6109_v38 = vadd.f32 %v6076_v28, %v2368_v31  ;;  %v884_v39 = vunpack.c.3.s8 %v425_v20  ;;  %v899_v40 = vunpack.c.2.s8 %v429_v25 }
 0x14d   : > { %v2051_v42 = vpack.c.bf16 %v1590_v32, %v1589_v30  ;;  %v2059_v43 = vpack.c.bf16 %v1606_v34, %v1605_v33  ;;  %v1555_v21 = vcvt.s32.f32 %v883_v35  ;;  %v900_v22 = vunpack.c.3.s8 %v429_v25 }
 0x14e   : > { %2610 = vmatpush.bf16.msra.mxu1 %v2043_v37  ;;  %v1556_v44 = vcvt.s32.f32 %v884_v39  ;;  %v1571_v27 = vcvt.s32.f32 %v899_v40  ;;  %v915_v45 = vunpack.c.2.s8 %v433_v36  ;;  %v916_v46 = vunpack.c.3.s8 %v433_v36  ;;  %v2217_v37 = vld [vmem:[#allocation1 + $0x9] sm:$0xff] }
 0x14f   : > { %2623 = vmatpush.bf16.msra.mxu2 %v2051_v42  ;;  %2636 = vmatpush.bf16.msra.mxu3 %v2059_v43  ;;  %v1572_v48 = vcvt.s32.f32 %v900_v22  ;;  %v931_v49 = vunpack.c.2.s8 %v437_v41  ;;  %v932_v28 = vunpack.c.3.s8 %v437_v41  ;;  %v881_v52 = vunpack.c.0.s8 %v425_v20  ;;  %v2218_v43 = vld [vmem:[#allocation1 + $0x12] sm:$0xff] }
 0x150   : > { %v2034_v53 = vpack.c.bf16 %v1556_v44, %v1555_v21  ;;  %v1587_v54 = vcvt.s32.f32 %v915_v45  ;;  %v1588_v55 = vcvt.s32.f32 %v916_v46  ;;  %v882_v56 = vunpack.c.1.s8 %v425_v20  ;;  %v2219_v44 = vld [vmem:[#allocation1 + $0x1b] sm:$0xff] }
 0x151   : > { %v2042_v57 = vpack.c.bf16 %v1572_v48, %v1571_v27  ;;  %v1603_v58 = vcvt.s32.f32 %v931_v49  ;;  %v1604_v59 = vcvt.s32.f32 %v932_v28  ;;  %v1553_v60 = vcvt.s32.f32 %v881_v52  ;;  %v2408_v63 = vpop.f32.mrf.mxu1 }
 0x152   : > { %2598 = vmatpush.bf16.msra.mxu0 %v2034_v53  ;;  %v2050_v0 = vpack.c.bf16 %v1588_v55, %v1587_v54  ;;  %v1554_v1 = vcvt.s32.f32 %v882_v56  ;;  %v897_v2 = vunpack.c.0.s8 %v429_v25  ;;  %v898_v3 = vunpack.c.1.s8 %v429_v25  ;;  %v2216_v25 = vld [vmem:[#allocation1] sm:$0xff] }
 0x153   : > { %2611 = vmatpush.bf16.msra.mxu1 %v2042_v57  ;;  %v2058_v6 = vpack.c.bf16 %v1604_v59, %v1603_v58  ;;  %v913_v7 = vunpack.c.0.s8 %v433_v36  ;;  %v914_v8 = vunpack.c.1.s8 %v433_v36  ;;  %v929_v50 = vunpack.c.0.s8 %v437_v41  ;;  %v443_v56 = vld [vmem:[%s5907_s12 + $0x390] sm:$0xff]  ;;  %v2421_v57 = vpop.f32.mrf.mxu2  ;;  %v2434_v58 = vpop.f32.mrf.mxu3 }
 0x154   : > { %2624 = vmatpush.bf16.msra.mxu2 %v2050_v0  ;;  %v2033_v10 = vpack.c.bf16 %v1554_v1, %v1553_v60  ;;  %v1569_v11 = vcvt.s32.f32 %v897_v2  ;;  %v1570_v12 = vcvt.s32.f32 %v898_v3  ;;  %v930_v13 = vunpack.c.1.s8 %v437_v41  ;;  %v447_v1 = vld [vmem:[%s5907_s12 + $0x3b0] sm:$0xff] }
 0x155   : > { %2637 = vmatpush.bf16.msra.mxu3 %v2058_v6  ;;  %v1585_v17 = vcvt.s32.f32 %v913_v7  ;;  %v1586_v51 = vcvt.s32.f32 %v914_v8  ;;  %v1601_v18 = vcvt.s32.f32 %v929_v50  ;;  %v959_v19 = vunpack.c.2.s8 %v444_v5 }
 0x156   : > { %2599 = vmatpush.bf16.msra.mxu0 %v2033_v10  ;;  %v2041_v20 = vpack.c.bf16 %v1570_v12, %v1569_v11  ;;  %v1602_v62 = vcvt.s32.f32 %v930_v13  ;;  %v960_v4 = vunpack.c.3.s8 %v444_v5  ;;  %v975_v23 = vunpack.c.2.s8 %v6116_v9  ;;  %v451_v10 = vld [vmem:[%s5907_s12 + $0x3d0] sm:$0xff] }
 0x157   : > { %v2049_v29 = vpack.c.bf16 %v1586_v51, %v1585_v17  ;;  %v1631_v30 = vcvt.s32.f32 %v959_v19  ;;  %v976_v31 = vunpack.c.3.s8 %v6116_v9  ;;  %v991_v32 = vunpack.c.2.s8 %v6119_v14  ;;  %v455_v51 = vld [vmem:[%s5907_s12 + $0x3f0] sm:$0xff] }
 0x158   : > { %2612 = vmatpush.bf16.msra.mxu1 %v2041_v20  ;;  %v2057_v33 = vpack.c.bf16 %v1602_v62, %v1601_v18  ;;  %v1632_v34 = vcvt.s32.f32 %v960_v4  ;;  %v1647_v35 = vcvt.s32.f32 %v975_v23  ;;  %v992_v36 = vunpack.c.3.s8 %v6119_v14 }
 0x159   : > { %2625 = vmatpush.bf16.msra.mxu2 %v2049_v29  ;;  %v1648_v39 = vcvt.s32.f32 %v976_v31  ;;  %v1663_v40 = vcvt.s32.f32 %v991_v32  ;;  %v1007_v41 = vunpack.c.2.s8 %v456_v24  ;;  %v1008_v42 = vunpack.c.3.s8 %v456_v24  ;;  %2600 = vmatmul.bf16.vlgmr.msra.gmra.mxu0 %v2216_v25 }
 0x15a   : > { %2638 = vmatpush.bf16.msra.mxu3 %v2057_v33  ;;  %v2072_v21 = vpack.c.bf16 %v1632_v34, %v1631_v30  ;;  %v1664_v22 = vcvt.s32.f32 %v992_v36  ;;  %v957_v27 = vunpack.c.0.s8 %v444_v5  ;;  %v958_v45 = vunpack.c.1.s8 %v444_v5 }
 0x15b   : > { %v2080_v46 = vpack.c.bf16 %v1648_v39, %v1647_v35  ;;  %v1679_v48 = vcvt.s32.f32 %v1007_v41  ;;  %v1680_v49 = vcvt.s32.f32 %v1008_v42  ;;  %2613 = vmatmul.bf16.vlgmr.msra.gmra.mxu1 %v2217_v37  ;;  %v973_v28 = vunpack.c.0.s8 %v6116_v9 }
 0x15c   : > { %2644 = vmatpush.bf16.msrb.mxu0 %v2072_v21  ;;  %v2088_v52 = vpack.c.bf16 %v1664_v22, %v1663_v40  ;;  %2626 = vmatmul.bf16.vlgmr.msra.gmra.mxu2 %v2218_v43  ;;  %v1629_v53 = vcvt.s32.f32 %v957_v27  ;;  %v1630_v54 = vcvt.s32.f32 %v958_v45  ;;  %v974_v55 = vunpack.c.1.s8 %v6116_v9  ;;  %v442_v45 = vld [vmem:[%s5907_s12 + $0x388] sm:$0xff] }
 0x15d   : > { %2657 = vmatpush.bf16.msrb.mxu1 %v2080_v46  ;;  %v2096_v59 = vpack.c.bf16 %v1680_v49, %v1679_v48  ;;  %2639 = vmatmul.bf16.vlgmr.msra.gmra.mxu3 %v2219_v44  ;;  %v1645_v60 = vcvt.s32.f32 %v973_v28  ;;  %v989_v61 = vunpack.c.0.s8 %v6119_v14  ;;  %v990_v0 = vunpack.c.1.s8 %v6119_v14  ;;  %v446_v49 = vld [vmem:[%s5907_s12 + $0x3a8] sm:$0xff] }
 0x15e   : > { %2670 = vmatpush.bf16.msrb.mxu2 %v2088_v52  ;;  %v2071_v2 = vpack.c.bf16 %v1630_v54, %v1629_v53  ;;  %v1646_v3 = vcvt.s32.f32 %v974_v55  ;;  %v1005_v5 = vunpack.c.0.s8 %v456_v24  ;;  %v1006_v6 = vunpack.c.1.s8 %v456_v24  ;;  %v450_v55 = vld [vmem:[%s5907_s12 + $0x3c8] sm:$0xff] }
 0x15f   : > { %2683 = vmatpush.bf16.msrb.mxu3 %v2096_v59  ;;  %v1661_v7 = vcvt.s32.f32 %v989_v61  ;;  %v1662_v8 = vcvt.s32.f32 %v990_v0  ;;  %v955_v50 = vunpack.c.2.s8 %v443_v56  ;;  %v956_v9 = vunpack.c.3.s8 %v443_v56 }
 0x160   : > { %2645 = vmatpush.bf16.msrb.mxu0 %v2071_v2  ;;  %v2079_v11 = vpack.c.bf16 %v1646_v3, %v1645_v60  ;;  %v1677_v12 = vcvt.s32.f32 %v1005_v5  ;;  %v1678_v13 = vcvt.s32.f32 %v1006_v6  ;;  %v971_v17 = vunpack.c.2.s8 %v447_v1  ;;  %v454_v60 = vld [vmem:[%s5907_s12 + $0x3e8] sm:$0xff] }
 0x161   : > { %v2087_v14 = vpack.c.bf16 %v1662_v8, %v1661_v7  ;;  %v1627_v18 = vcvt.s32.f32 %v955_v50  ;;  %v1628_v19 = vcvt.s32.f32 %v956_v9  ;;  %v972_v20 = vunpack.c.3.s8 %v447_v1 }
 0x162   : > { %2658 = vmatpush.bf16.msrb.mxu1 %v2079_v11  ;;  %v2095_v62 = vpack.c.bf16 %v1678_v13, %v1677_v12  ;;  %v1643_v4 = vcvt.s32.f32 %v971_v17  ;;  %v987_v23 = vunpack.c.2.s8 %v451_v10  ;;  %v988_v24 = vunpack.c.3.s8 %v451_v10 }
 0x163   : > { %2671 = vmatpush.bf16.msrb.mxu2 %v2087_v14  ;;  %v2070_v25 = vpack.c.bf16 %v1628_v19, %v1627_v18  ;;  %v1644_v63 = vcvt.s32.f32 %v972_v20  ;;  %v1003_v29 = vunpack.c.2.s8 %v455_v51  ;;  %v1004_v30 = vunpack.c.3.s8 %v455_v51 }
 0x164   : > { %2684 = vmatpush.bf16.msrb.mxu3 %v2095_v62  ;;  %v1659_v31 = vcvt.s32.f32 %v987_v23  ;;  %v1660_v32 = vcvt.s32.f32 %v988_v24  ;;  %v2394_v33 = vadd.f32 %v6104_v26, %v6109_v38  ;;  %v953_v34 = vunpack.c.0.s8 %v443_v56 }
 0x165   : > { %2646 = vmatpush.bf16.msrb.mxu0 %v2070_v25  ;;  %v2078_v35 = vpack.c.bf16 %v1644_v63, %v1643_v4  ;;  %v1675_v36 = vcvt.s32.f32 %v1003_v29  ;;  %v1676_v37 = vcvt.s32.f32 %v1004_v30  ;;  %v954_v39 = vunpack.c.1.s8 %v443_v56  ;;  %v441_v29 = vld [vmem:[%s5907_s12 + $0x380] sm:$0xff] }
 0x166   : > { %v2086_v40 = vpack.c.bf16 %v1660_v32, %v1659_v31  ;;  %v1625_v41 = vcvt.s32.f32 %v953_v34  ;;  %v969_v42 = vunpack.c.0.s8 %v447_v1  ;;  %v970_v43 = vunpack.c.1.s8 %v447_v1  ;;  %v6151_v34 = vpop.f32.mrf.mxu0 }
 0x167   : > { %2659 = vmatpush.bf16.msrb.mxu1 %v2078_v35  ;;  %v2094_v21 = vpack.c.bf16 %v1676_v37, %v1675_v36  ;;  %v1626_v22 = vcvt.s32.f32 %v954_v39  ;;  %v985_v44 = vunpack.c.0.s8 %v451_v10  ;;  %v986_v27 = vunpack.c.1.s8 %v451_v10  ;;  %v449_v39 = vld [vmem:[%s5907_s12 + $0x3c0] sm:$0xff] }
 0x168   : > { %2672 = vmatpush.bf16.msrb.mxu2 %v2086_v40  ;;  %v1641_v26 = vcvt.s32.f32 %v969_v42  ;;  %v1642_v38 = vcvt.s32.f32 %v970_v43  ;;  %v1001_v46 = vunpack.c.0.s8 %v455_v51  ;;  %v1002_v48 = vunpack.c.1.s8 %v455_v51 }
 0x169   : > { %2685 = vmatpush.bf16.msrb.mxu3 %v2094_v21  ;;  %v2069_v28 = vpack.c.bf16 %v1626_v22, %v1625_v41  ;;  %v1657_v52 = vcvt.s32.f32 %v985_v44  ;;  %v1658_v53 = vcvt.s32.f32 %v986_v27  ;;  %v2407_v54 = vadd.f32 %v6112_v47, %v2394_v33  ;;  %v445_v33 = vld [vmem:[%s5907_s12 + $0x3a0] sm:$0xff] }
 0x16a   : > { %v2077_v56 = vpack.c.bf16 %v1642_v38, %v1641_v26  ;;  %v1673_v57 = vcvt.s32.f32 %v1001_v46  ;;  %v1674_v58 = vcvt.s32.f32 %v1002_v48  ;;  %v951_v59 = vunpack.c.2.s8 %v442_v45 }
 0x16b   : > { %2647 = vmatpush.bf16.msrb.mxu0 %v2069_v28  ;;  %v2085_v61 = vpack.c.bf16 %v1658_v53, %v1657_v52  ;;  %v952_v0 = vunpack.c.3.s8 %v442_v45  ;;  %v967_v1 = vunpack.c.2.s8 %v446_v49  ;;  %v968_v2 = vunpack.c.3.s8 %v446_v49 }
 0x16c   : > { %2660 = vmatpush.bf16.msrb.mxu1 %v2077_v56  ;;  %v2093_v3 = vpack.c.bf16 %v1674_v58, %v1673_v57  ;;  %v1623_v5 = vcvt.s32.f32 %v951_v59  ;;  %v983_v6 = vunpack.c.2.s8 %v450_v55  ;;  %v984_v7 = vunpack.c.3.s8 %v450_v55 }
 0x16d   : > { %2673 = vmatpush.bf16.msrb.mxu2 %v2085_v61  ;;  %v1624_v8 = vcvt.s32.f32 %v952_v0  ;;  %v1639_v50 = vcvt.s32.f32 %v967_v1  ;;  %v1640_v47 = vcvt.s32.f32 %v968_v2  ;;  %v999_v9 = vunpack.c.2.s8 %v454_v60 }
 0x16e   : > { %2686 = vmatpush.bf16.msrb.mxu3 %v2093_v3  ;;  %v1655_v10 = vcvt.s32.f32 %v983_v6  ;;  %v1656_v11 = vcvt.s32.f32 %v984_v7  ;;  %v1000_v12 = vunpack.c.3.s8 %v454_v60  ;;  %v2420_v13 = vadd.f32 %v6121_v15, %v2407_v54  ;;  %v6155_v54 = vpop.f32.mrf.mxu1  ;;  %v2447_v6 = vpop.f32.mrf.mxu0 }
 0x16f   : > { %v2068_v17 = vpack.c.bf16 %v1624_v8, %v1623_v5  ;;  %v2076_v51 = vpack.c.bf16 %v1640_v47, %v1639_v50  ;;  %v1671_v14 = vcvt.s32.f32 %v999_v9  ;;  %v949_v18 = vunpack.c.0.s8 %v442_v45  ;;  %v460_v9 = vld [vmem:[%s5907_s12 + $0x418] sm:$0xff] }
 0x170   : > { %v2084_v19 = vpack.c.bf16 %v1656_v11, %v1655_v10  ;;  %v1672_v20 = vcvt.s32.f32 %v1000_v12  ;;  %v6147_v62 = vadd.f32 %v6123_v16, %v2420_v13  ;;  %v950_v4 = vunpack.c.1.s8 %v442_v45  ;;  %v453_v45 = vld [vmem:[%s5907_s12 + $0x3e0] sm:$0xff] }
 0x171   : > { %2648 = vmatpush.bf16.msrb.mxu0 %v2068_v17  ;;  %2661 = vmatpush.bf16.msrb.mxu1 %v2076_v51  ;;  %v1621_v23 = vcvt.s32.f32 %v949_v18  ;;  %v965_v24 = vunpack.c.0.s8 %v446_v49  ;;  %v966_v25 = vunpack.c.1.s8 %v446_v49  ;;  %v981_v63 = vunpack.c.0.s8 %v450_v55  ;;  %v6159_v17 = vld [vmem:[%s5907_s12 + $0x438] sm:$0xff] }
 0x172   : > { %2674 = vmatpush.bf16.msrb.mxu2 %v2084_v19  ;;  %v2092_v15 = vpack.c.bf16 %v1672_v20, %v1671_v14  ;;  %v1622_v30 = vcvt.s32.f32 %v950_v4  ;;  %v982_v31 = vunpack.c.1.s8 %v450_v55  ;;  %v997_v32 = vunpack.c.0.s8 %v454_v60  ;;  %v6161_v20 = vpop.f32.mrf.mxu2  ;;  %v6163_v4 = vpop.f32.mrf.mxu3 }
 0x173   : > { %v1637_v16 = vcvt.s32.f32 %v965_v24  ;;  %v1638_v35 = vcvt.s32.f32 %v966_v25  ;;  %v1653_v36 = vcvt.s32.f32 %v981_v63  ;;  %v998_v37 = vunpack.c.1.s8 %v454_v60 }
 0x174   : > { %2687 = vmatpush.bf16.msrb.mxu3 %v2092_v15  ;;  %v2067_v40 = vpack.c.bf16 %v1622_v30, %v1621_v23  ;;  %v1654_v41 = vcvt.s32.f32 %v982_v31  ;;  %v1669_v42 = vcvt.s32.f32 %v997_v32  ;;  %v947_v43 = vunpack.c.2.s8 %v441_v29 }
 0x175   : > { %v2075_v21 = vpack.c.bf16 %v1638_v35, %v1637_v16  ;;  %v1670_v22 = vcvt.s32.f32 %v998_v37  ;;  %v948_v44 = vunpack.c.3.s8 %v441_v29  ;;  %v963_v27 = vunpack.c.2.s8 %v445_v33  ;;  %v2220_v16 = vld [vmem:[#allocation1 + $0x24] sm:$0xff] }
 0x176   : > { %2649 = vmatpush.bf16.msrb.mxu0 %v2067_v40  ;;  %v2083_v26 = vpack.c.bf16 %v1654_v41, %v1653_v36  ;;  %v1619_v38 = vcvt.s32.f32 %v947_v43  ;;  %v964_v46 = vunpack.c.3.s8 %v445_v33  ;;  %v979_v48 = vunpack.c.2.s8 %v449_v39  ;;  %v2460_v35 = vpop.f32.mrf.mxu1 }
 0x177   : > { %2662 = vmatpush.bf16.msrb.mxu1 %v2075_v21  ;;  %v2091_v49 = vpack.c.bf16 %v1670_v22, %v1669_v42  ;;  %v1620_v28 = vcvt.s32.f32 %v948_v44  ;;  %v1635_v52 = vcvt.s32.f32 %v963_v27  ;;  %v980_v53 = vunpack.c.3.s8 %v449_v39  ;;  %v2221_v22 = vld [vmem:[#allocation1 + $0x2d] sm:$0xff] }
 0x178   : > { %2675 = vmatpush.bf16.msrb.mxu2 %v2083_v26  ;;  %v1636_v55 = vcvt.s32.f32 %v964_v46  ;;  %v1651_v56 = vcvt.s32.f32 %v979_v48  ;;  %v995_v57 = vunpack.c.2.s8 %v453_v45  ;;  %v996_v58 = vunpack.c.3.s8 %v453_v45 }
 0x179   : > { %2688 = vmatpush.bf16.msrb.mxu3 %v2091_v49  ;;  %v2066_v59 = vpack.c.bf16 %v1620_v28, %v1619_v38  ;;  %v1652_v60 = vcvt.s32.f32 %v980_v53  ;;  %v945_v61 = vunpack.c.0.s8 %v441_v29  ;;  %v946_v0 = vunpack.c.1.s8 %v441_v29  ;;  %v468_v29 = vld [vmem:[%s5907_s12 + $0x458] sm:$0xff]  ;;  %v2222_v38 = vld [vmem:[#allocation1 + $0x36] sm:$0xff] }
 0x17a   : > { %v2074_v1 = vpack.c.bf16 %v1636_v55, %v1635_v52  ;;  %v1667_v2 = vcvt.s32.f32 %v995_v57  ;;  %v1668_v3 = vcvt.s32.f32 %v996_v58  ;;  %v961_v5 = vunpack.c.0.s8 %v445_v33  ;;  %v2223_v49 = vld [vmem:[#allocation1 + $0x3f] sm:$0xff] }
 0x17b   : > { %2650 = vmatpush.bf16.msrb.mxu0 %v2066_v59  ;;  %v2082_v7 = vpack.c.bf16 %v1652_v60, %v1651_v56  ;;  %v1617_v8 = vcvt.s32.f32 %v945_v61  ;;  %v1618_v50 = vcvt.s32.f32 %v946_v0  ;;  %v962_v47 = vunpack.c.1.s8 %v445_v33  ;;  %v472_v33 = vld [vmem:[%s5907_s12 + $0x478] sm:$0xff]  ;;  %v459_v0 = vld [vmem:[%s5907_s12 + $0x410] sm:$0xff] }
 0x17c   : > { %2663 = vmatpush.bf16.msrb.mxu1 %v2074_v1  ;;  %v2090_v10 = vpack.c.bf16 %v1668_v3, %v1667_v2  ;;  %v1633_v11 = vcvt.s32.f32 %v961_v5  ;;  %v977_v12 = vunpack.c.0.s8 %v449_v39  ;;  %v978_v13 = vunpack.c.1.s8 %v449_v39  ;;  %v2473_v1 = vpop.f32.mrf.mxu2  ;;  %v2486_v2 = vpop.f32.mrf.mxu3 }
 0x17d   : > { %2676 = vmatpush.bf16.msrb.mxu2 %v2082_v7  ;;  %v2065_v51 = vpack.c.bf16 %v1618_v50, %v1617_v8  ;;  %v1634_v14 = vcvt.s32.f32 %v962_v47  ;;  %v993_v18 = vunpack.c.0.s8 %v453_v45  ;;  %v994_v19 = vunpack.c.1.s8 %v453_v45  ;;  %v463_v8 = vld [vmem:[%s5907_s12 + $0x430] sm:$0xff] }
 0x17e   : > { %2689 = vmatpush.bf16.msrb.mxu3 %v2090_v10  ;;  %v1649_v23 = vcvt.s32.f32 %v977_v12  ;;  %v1650_v24 = vcvt.s32.f32 %v978_v13  ;;  %v1023_v25 = vunpack.c.2.s8 %v460_v9  ;;  %v1024_v63 = vunpack.c.3.s8 %v460_v9 }
 0x17f   : > { %2651 = vmatpush.bf16.msrb.mxu0 %v2065_v51  ;;  %v2073_v15 = vpack.c.bf16 %v1634_v14, %v1633_v11  ;;  %v1665_v30 = vcvt.s32.f32 %v993_v18  ;;  %v1666_v31 = vcvt.s32.f32 %v994_v19  ;;  %v1039_v32 = vunpack.c.2.s8 %v6159_v17  ;;  %v467_v51 = vld [vmem:[%s5907_s12 + $0x450] sm:$0xff] }
 0x180   : > { %v2081_v36 = vpack.c.bf16 %v1650_v24, %v1649_v23  ;;  %v1695_v37 = vcvt.s32.f32 %v1023_v25  ;;  %v1696_v39 = vcvt.s32.f32 %v1024_v63  ;;  %v1040_v40 = vunpack.c.3.s8 %v6159_v17  ;;  %v471_v24 = vld [vmem:[%s5907_s12 + $0x470] sm:$0xff] }
 0x181   : > { %2664 = vmatpush.bf16.msrb.mxu1 %v2073_v15  ;;  %v2089_v41 = vpack.c.bf16 %v1666_v31, %v1665_v30  ;;  %v1711_v42 = vcvt.s32.f32 %v1039_v32  ;;  %v1055_v43 = vunpack.c.2.s8 %v468_v29  ;;  %v1056_v21 = vunpack.c.3.s8 %v468_v29  ;;  %v2182_v30 = vld [vmem:[%s5925_s26 + $0x20] sm:$0xff] }
 0x182   : > { %2677 = vmatpush.bf16.msrb.mxu2 %v2081_v36  ;;  %v2104_v44 = vpack.c.bf16 %v1696_v39, %v1695_v37  ;;  %v1712_v27 = vcvt.s32.f32 %v1040_v40  ;;  %v1071_v45 = vunpack.c.2.s8 %v472_v33  ;;  %v1072_v26 = vunpack.c.3.s8 %v472_v33  ;;  %2652 = vmatmul.bf16.vlgmr.msrb.gmra.mxu0 %v2220_v16  ;;  %2225 = vst [vmem:[#allocation1] ss:$9 sm:$0xff] %v2182_v30 }
 0x183   : > { %2690 = vmatpush.bf16.msrb.mxu3 %v2089_v41  ;;  %v1727_v46 = vcvt.s32.f32 %v1055_v43  ;;  %v1728_v48 = vcvt.s32.f32 %v1056_v21  ;;  %v1021_v28 = vunpack.c.0.s8 %v460_v9  ;;  %v1022_v52 = vunpack.c.1.s8 %v460_v9 }
 0x184   : > { %2696 = vmatpush.bf16.msra.mxu0 %v2104_v44  ;;  %v2112_v53 = vpack.c.bf16 %v1712_v27, %v1711_v42  ;;  %v1743_v55 = vcvt.s32.f32 %v1071_v45  ;;  %v1744_v56 = vcvt.s32.f32 %v1072_v26  ;;  %2665 = vmatmul.bf16.vlgmr.msrb.gmra.mxu1 %v2221_v22  ;;  %v1037_v57 = vunpack.c.0.s8 %v6159_v17 }
 0x185   : > { %v2120_v58 = vpack.c.bf16 %v1728_v48, %v1727_v46  ;;  %2678 = vmatmul.bf16.vlgmr.msrb.gmra.mxu2 %v2222_v38  ;;  %v1693_v59 = vcvt.s32.f32 %v1021_v28  ;;  %v1694_v60 = vcvt.s32.f32 %v1022_v52  ;;  %v1038_v61 = vunpack.c.1.s8 %v6159_v17 }
 0x186   : > { %2709 = vmatpush.bf16.msra.mxu1 %v2112_v53  ;;  %v2128_v3 = vpack.c.bf16 %v1744_v56, %v1743_v55  ;;  %2691 = vmatmul.bf16.vlgmr.msrb.gmra.mxu3 %v2223_v49  ;;  %v1709_v5 = vcvt.s32.f32 %v1037_v57  ;;  %v1053_v6 = vunpack.c.0.s8 %v468_v29  ;;  %v1054_v7 = vunpack.c.1.s8 %v468_v29  ;;  %v458_v53 = vld [vmem:[%s5907_s12 + $0x408] sm:$0xff] }
 0x187   : > { %2722 = vmatpush.bf16.msra.mxu2 %v2120_v58  ;;  %v2103_v50 = vpack.c.bf16 %v1694_v60, %v1693_v59  ;;  %v1710_v47 = vcvt.s32.f32 %v1038_v61  ;;  %v1069_v9 = vunpack.c.0.s8 %v472_v33  ;;  %v1070_v10 = vunpack.c.1.s8 %v472_v33  ;;  %v462_v57 = vld [vmem:[%s5907_s12 + $0x428] sm:$0xff] }
 0x188   : > { %2735 = vmatpush.bf16.msra.mxu3 %v2128_v3  ;;  %v1725_v11 = vcvt.s32.f32 %v1053_v6  ;;  %v1726_v12 = vcvt.s32.f32 %v1054_v7  ;;  %v1019_v13 = vunpack.c.2.s8 %v459_v0  ;;  %v1020_v17 = vunpack.c.3.s8 %v459_v0  ;;  %v470_v6 = vld [vmem:[%s5907_s12 + $0x468] sm:$0xff] }
 0x189   : > { %2697 = vmatpush.bf16.msra.mxu0 %v2103_v50  ;;  %v2111_v14 = vpack.c.bf16 %v1710_v47, %v1709_v5  ;;  %v1741_v18 = vcvt.s32.f32 %v1069_v9  ;;  %v1742_v19 = vcvt.s32.f32 %v1070_v10  ;;  %v1035_v23 = vunpack.c.2.s8 %v463_v8 }
 0x18a   : > { %v2119_v25 = vpack.c.bf16 %v1726_v12, %v1725_v11  ;;  %v1691_v63 = vcvt.s32.f32 %v1019_v13  ;;  %v1692_v29 = vcvt.s32.f32 %v1020_v17  ;;  %v1036_v15 = vunpack.c.3.s8 %v463_v8 }
 0x18b   : > { %2710 = vmatpush.bf16.msra.mxu1 %v2111_v14  ;;  %v2127_v31 = vpack.c.bf16 %v1742_v19, %v1741_v18  ;;  %v1707_v32 = vcvt.s32.f32 %v1035_v23  ;;  %v1051_v33 = vunpack.c.2.s8 %v467_v51  ;;  %v1052_v16 = vunpack.c.3.s8 %v467_v51 }
 0x18c   : > { %2723 = vmatpush.bf16.msra.mxu2 %v2119_v25  ;;  %v2102_v35 = vpack.c.bf16 %v1692_v29, %v1691_v63  ;;  %v1708_v36 = vcvt.s32.f32 %v1036_v15  ;;  %v1067_v37 = vunpack.c.2.s8 %v471_v24  ;;  %v1068_v39 = vunpack.c.3.s8 %v471_v24 }
 0x18d   : > { %2736 = vmatpush.bf16.msra.mxu3 %v2127_v31  ;;  %v1723_v40 = vcvt.s32.f32 %v1051_v33  ;;  %v1724_v41 = vcvt.s32.f32 %v1052_v16  ;;  %v2446_v42 = vadd.f32 %v6151_v34, %v6147_v62  ;;  %v1017_v43 = vunpack.c.0.s8 %v459_v0 }
 0x18e   : > { %2698 = vmatpush.bf16.msra.mxu0 %v2102_v35  ;;  %v2110_v21 = vpack.c.bf16 %v1708_v36, %v1707_v32  ;;  %v1739_v22 = vcvt.s32.f32 %v1067_v37  ;;  %v1740_v44 = vcvt.s32.f32 %v1068_v39  ;;  %v1018_v27 = vunpack.c.1.s8 %v459_v0  ;;  %v466_v0 = vld [vmem:[%s5907_s12 + $0x448] sm:$0xff]  ;;  %v457_v37 = vld [vmem:[%s5907_s12 + $0x400] sm:$0xff] }
 0x18f   : > { %v2118_v45 = vpack.c.bf16 %v1724_v41, %v1723_v40  ;;  %v1689_v26 = vcvt.s32.f32 %v1017_v43  ;;  %v1033_v38 = vunpack.c.0.s8 %v463_v8  ;;  %v1034_v46 = vunpack.c.1.s8 %v463_v8  ;;  %v6189_v43 = vpop.f32.mrf.mxu0 }
 0x190   : > { %2711 = vmatpush.bf16.msra.mxu1 %v2110_v21  ;;  %v2126_v48 = vpack.c.bf16 %v1740_v44, %v1739_v22  ;;  %v1690_v49 = vcvt.s32.f32 %v1018_v27  ;;  %v1049_v28 = vunpack.c.0.s8 %v467_v51  ;;  %v1050_v52 = vunpack.c.1.s8 %v467_v51  ;;  %v465_v27 = vld [vmem:[%s5907_s12 + $0x440] sm:$0xff] }
 0x191   : > { %2724 = vmatpush.bf16.msra.mxu2 %v2118_v45  ;;  %v1705_v62 = vcvt.s32.f32 %v1033_v38  ;;  %v1706_v34 = vcvt.s32.f32 %v1034_v46  ;;  %v1065_v55 = vunpack.c.0.s8 %v471_v24  ;;  %v1066_v56 = vunpack.c.1.s8 %v471_v24 }
 0x192   : > { %2737 = vmatpush.bf16.msra.mxu3 %v2126_v48  ;;  %v2101_v58 = vpack.c.bf16 %v1690_v49, %v1689_v26  ;;  %v1721_v59 = vcvt.s32.f32 %v1049_v28  ;;  %v1722_v60 = vcvt.s32.f32 %v1050_v52  ;;  %v2459_v61 = vadd.f32 %v6155_v54, %v2446_v42  ;;  %v461_v42 = vld [vmem:[%s5907_s12 + $0x420] sm:$0xff] }
 0x193   : > { %v2109_v1 = vpack.c.bf16 %v1706_v34, %v1705_v62  ;;  %v1737_v2 = vcvt.s32.f32 %v1065_v55  ;;  %v1738_v3 = vcvt.s32.f32 %v1066_v56  ;;  %v1015_v5 = vunpack.c.2.s8 %v458_v53 }
 0x194   : > { %2699 = vmatpush.bf16.msra.mxu0 %v2101_v58  ;;  %v2117_v7 = vpack.c.bf16 %v1722_v60, %v1721_v59  ;;  %v1016_v8 = vunpack.c.3.s8 %v458_v53  ;;  %v1031_v50 = vunpack.c.2.s8 %v462_v57  ;;  %v1032_v47 = vunpack.c.3.s8 %v462_v57 }
 0x195   : > { %2712 = vmatpush.bf16.msra.mxu1 %v2109_v1  ;;  %v2125_v9 = vpack.c.bf16 %v1738_v3, %v1737_v2  ;;  %v1687_v10 = vcvt.s32.f32 %v1015_v5  ;;  %v1047_v11 = vunpack.c.2.s8 %v466_v0  ;;  %v1048_v12 = vunpack.c.3.s8 %v466_v0 }
 0x196   : > { %2725 = vmatpush.bf16.msra.mxu2 %v2117_v7  ;;  %v1688_v13 = vcvt.s32.f32 %v1016_v8  ;;  %v1703_v17 = vcvt.s32.f32 %v1031_v50  ;;  %v1704_v54 = vcvt.s32.f32 %v1032_v47  ;;  %v1063_v51 = vunpack.c.2.s8 %v470_v6 }
 0x197   : > { %2738 = vmatpush.bf16.msra.mxu3 %v2125_v9  ;;  %v1719_v14 = vcvt.s32.f32 %v1047_v11  ;;  %v1720_v18 = vcvt.s32.f32 %v1048_v12  ;;  %v1064_v19 = vunpack.c.3.s8 %v470_v6  ;;  %v2472_v23 = vadd.f32 %v6161_v20, %v2459_v61  ;;  %v6193_v61 = vpop.f32.mrf.mxu1  ;;  %v2499_v11 = vpop.f32.mrf.mxu0 }
 0x198   : > { %v2100_v24 = vpack.c.bf16 %v1688_v13, %v1687_v10  ;;  %v2108_v25 = vpack.c.bf16 %v1704_v54, %v1703_v17  ;;  %v1735_v63 = vcvt.s32.f32 %v1063_v51  ;;  %v1013_v29 = vunpack.c.0.s8 %v458_v53  ;;  %v476_v51 = vld [vmem:[%s5907_s12 + $0x498] sm:$0xff] }
 0x199   : > { %v2116_v15 = vpack.c.bf16 %v1720_v18, %v1719_v14  ;;  %v1736_v30 = vcvt.s32.f32 %v1064_v19  ;;  %v6185_v31 = vadd.f32 %v6163_v4, %v2472_v23  ;;  %v1014_v32 = vunpack.c.1.s8 %v458_v53  ;;  %v469_v53 = vld [vmem:[%s5907_s12 + $0x460] sm:$0xff] }
 0x19a   : > { %2700 = vmatpush.bf16.msra.mxu0 %v2100_v24  ;;  %2713 = vmatpush.bf16.msra.mxu1 %v2108_v25  ;;  %v1685_v33 = vcvt.s32.f32 %v1013_v29  ;;  %v1029_v16 = vunpack.c.0.s8 %v462_v57  ;;  %v1030_v35 = vunpack.c.1.s8 %v462_v57  ;;  %v1045_v36 = vunpack.c.0.s8 %v466_v0  ;;  %v6197_v24 = vld [vmem:[%s5907_s12 + $0x4b8] sm:$0xff] }
 0x19b   : > { %2726 = vmatpush.bf16.msra.mxu2 %v2116_v15  ;;  %v2124_v20 = vpack.c.bf16 %v1736_v30, %v1735_v63  ;;  %v1686_v39 = vcvt.s32.f32 %v1014_v32  ;;  %v1046_v40 = vunpack.c.1.s8 %v466_v0  ;;  %v1061_v41 = vunpack.c.0.s8 %v470_v6  ;;  %v6199_v30 = vpop.f32.mrf.mxu2  ;;  %v6201_v32 = vpop.f32.mrf.mxu3 }
 0x19c   : > { %v1701_v4 = vcvt.s32.f32 %v1029_v16  ;;  %v1702_v21 = vcvt.s32.f32 %v1030_v35  ;;  %v1717_v22 = vcvt.s32.f32 %v1045_v36  ;;  %v1062_v44 = vunpack.c.1.s8 %v470_v6 }
 0x19d   : > { %2739 = vmatpush.bf16.msra.mxu3 %v2124_v20  ;;  %v2099_v45 = vpack.c.bf16 %v1686_v39, %v1685_v33  ;;  %v1718_v26 = vcvt.s32.f32 %v1046_v40  ;;  %v1733_v38 = vcvt.s32.f32 %v1061_v41  ;;  %v1011_v46 = vunpack.c.2.s8 %v457_v37 }
 0x19e   : > { %v2107_v48 = vpack.c.bf16 %v1702_v21, %v1701_v4  ;;  %v1734_v49 = vcvt.s32.f32 %v1062_v44  ;;  %v1012_v28 = vunpack.c.3.s8 %v457_v37  ;;  %v1027_v52 = vunpack.c.2.s8 %v461_v42  ;;  %v2226_v4 = vld [vmem:[#allocation1] sm:$0xff] }
 0x19f   : > { %2701 = vmatpush.bf16.msra.mxu0 %v2099_v45  ;;  %v2115_v62 = vpack.c.bf16 %v1718_v26, %v1717_v22  ;;  %v1683_v34 = vcvt.s32.f32 %v1011_v46  ;;  %v1028_v55 = vunpack.c.3.s8 %v461_v42  ;;  %v1043_v56 = vunpack.c.2.s8 %v465_v27  ;;  %v2512_v21 = vpop.f32.mrf.mxu1 }
 0x1a0   : > { %2714 = vmatpush.bf16.msra.mxu1 %v2107_v48  ;;  %v2123_v57 = vpack.c.bf16 %v1734_v49, %v1733_v38  ;;  %v1684_v58 = vcvt.s32.f32 %v1012_v28  ;;  %v1699_v59 = vcvt.s32.f32 %v1027_v52  ;;  %v1044_v60 = vunpack.c.3.s8 %v465_v27  ;;  %v2227_v49 = vld [vmem:[#allocation1 + $0x9] sm:$0xff] }
 0x1a1   : > { %2727 = vmatpush.bf16.msra.mxu2 %v2115_v62  ;;  %v1700_v0 = vcvt.s32.f32 %v1028_v55  ;;  %v1715_v1 = vcvt.s32.f32 %v1043_v56  ;;  %v1059_v2 = vunpack.c.2.s8 %v469_v53  ;;  %v1060_v3 = vunpack.c.3.s8 %v469_v53 }
 0x1a2   : > { %2740 = vmatpush.bf16.msra.mxu3 %v2123_v57  ;;  %v2098_v5 = vpack.c.bf16 %v1684_v58, %v1683_v34  ;;  %v1716_v6 = vcvt.s32.f32 %v1044_v60  ;;  %v1009_v7 = vunpack.c.0.s8 %v457_v37  ;;  %v1010_v8 = vunpack.c.1.s8 %v457_v37  ;;  %v484_v37 = vld [vmem:[%s5907_s12 + $0x4d8] sm:$0xff]  ;;  %v2228_v34 = vld [vmem:[#allocation1 + $0x12] sm:$0xff] }
 0x1a3   : > { %v2106_v50 = vpack.c.bf16 %v1700_v0, %v1699_v59  ;;  %v1731_v47 = vcvt.s32.f32 %v1059_v2  ;;  %v1732_v9 = vcvt.s32.f32 %v1060_v3  ;;  %v1025_v10 = vunpack.c.0.s8 %v461_v42  ;;  %v2229_v57 = vld [vmem:[#allocation1 + $0x1b] sm:$0xff] }
 0x1a4   : > { %2702 = vmatpush.bf16.msra.mxu0 %v2098_v5  ;;  %v2114_v12 = vpack.c.bf16 %v1716_v6, %v1715_v1  ;;  %v1681_v13 = vcvt.s32.f32 %v1009_v7  ;;  %v1682_v17 = vcvt.s32.f32 %v1010_v8  ;;  %v1026_v54 = vunpack.c.1.s8 %v461_v42  ;;  %v488_v42 = vld [vmem:[%s5907_s12 + $0x4f8] sm:$0xff]  ;;  %v475_v8 = vld [vmem:[%s5907_s12 + $0x490] sm:$0xff] }
 0x1a5   : > { %2715 = vmatpush.bf16.msra.mxu1 %v2106_v50  ;;  %v2122_v14 = vpack.c.bf16 %v1732_v9, %v1731_v47  ;;  %v1697_v18 = vcvt.s32.f32 %v1025_v10  ;;  %v1041_v19 = vunpack.c.0.s8 %v465_v27  ;;  %v1042_v23 = vunpack.c.1.s8 %v465_v27  ;;  %v2525_v50 = vpop.f32.mrf.mxu2  ;;  %v2538_v47 = vpop.f32.mrf.mxu3 }
 0x1a6   : > { %2728 = vmatpush.bf16.msra.mxu2 %v2114_v12  ;;  %v2097_v25 = vpack.c.bf16 %v1682_v17, %v1681_v13  ;;  %v1698_v63 = vcvt.s32.f32 %v1026_v54  ;;  %v1057_v29 = vunpack.c.0.s8 %v469_v53  ;;  %v1058_v15 = vunpack.c.1.s8 %v469_v53  ;;  %v479_v13 = vld [vmem:[%s5907_s12 + $0x4b0] sm:$0xff] }
 0x1a7   : > { %2741 = vmatpush.bf16.msra.mxu3 %v2122_v14  ;;  %v1713_v33 = vcvt.s32.f32 %v1041_v19  ;;  %v1714_v16 = vcvt.s32.f32 %v1042_v23  ;;  %v1087_v35 = vunpack.c.2.s8 %v476_v51  ;;  %v1088_v36 = vunpack.c.3.s8 %v476_v51 }
 0x1a8   : > { %2703 = vmatpush.bf16.msra.mxu0 %v2097_v25  ;;  %v2105_v20 = vpack.c.bf16 %v1698_v63, %v1697_v18  ;;  %v1729_v39 = vcvt.s32.f32 %v1057_v29  ;;  %v1730_v40 = vcvt.s32.f32 %v1058_v15  ;;  %v1103_v41 = vunpack.c.2.s8 %v6197_v24  ;;  %v483_v25 = vld [vmem:[%s5907_s12 + $0x4d0] sm:$0xff] }
 0x1a9   : > { %v2113_v22 = vpack.c.bf16 %v1714_v16, %v1713_v33  ;;  %v1759_v44 = vcvt.s32.f32 %v1087_v35  ;;  %v1760_v27 = vcvt.s32.f32 %v1088_v36  ;;  %v1104_v45 = vunpack.c.3.s8 %v6197_v24  ;;  %v487_v16 = vld [vmem:[%s5907_s12 + $0x4f0] sm:$0xff] }
 0x1aa   : > { %2716 = vmatpush.bf16.msra.mxu1 %v2105_v20  ;;  %v2121_v26 = vpack.c.bf16 %v1730_v40, %v1729_v39  ;;  %v1775_v38 = vcvt.s32.f32 %v1103_v41  ;;  %v1119_v46 = vunpack.c.2.s8 %v484_v37  ;;  %v1120_v48 = vunpack.c.3.s8 %v484_v37 }
 0x1ab   : > { %2729 = vmatpush.bf16.msra.mxu2 %v2113_v22  ;;  %v2136_v28 = vpack.c.bf16 %v1760_v27, %v1759_v44  ;;  %v1776_v52 = vcvt.s32.f32 %v1104_v45  ;;  %v1135_v53 = vunpack.c.2.s8 %v488_v42  ;;  %v1136_v62 = vunpack.c.3.s8 %v488_v42  ;;  %2704 = vmatmul.bf16.vlgmr.msra.gmra.mxu0 %v2226_v4 }
 0x1ac   : > { %2742 = vmatpush.bf16.msra.mxu3 %v2121_v26  ;;  %v1791_v55 = vcvt.s32.f32 %v1119_v46  ;;  %v1792_v56 = vcvt.s32.f32 %v1120_v48  ;;  %v1085_v58 = vunpack.c.0.s8 %v476_v51  ;;  %v1086_v59 = vunpack.c.1.s8 %v476_v51 }
 0x1ad   : > { %2748 = vmatpush.bf16.msrb.mxu0 %v2136_v28  ;;  %v2144_v60 = vpack.c.bf16 %v1776_v52, %v1775_v38  ;;  %v1807_v0 = vcvt.s32.f32 %v1135_v53  ;;  %v1808_v1 = vcvt.s32.f32 %v1136_v62  ;;  %2717 = vmatmul.bf16.vlgmr.msra.gmra.mxu1 %v2227_v49  ;;  %v1101_v2 = vunpack.c.0.s8 %v6197_v24 }
 0x1ae   : > { %v2152_v3 = vpack.c.bf16 %v1792_v56, %v1791_v55  ;;  %2730 = vmatmul.bf16.vlgmr.msra.gmra.mxu2 %v2228_v34  ;;  %v1757_v5 = vcvt.s32.f32 %v1085_v58  ;;  %v1758_v6 = vcvt.s32.f32 %v1086_v59  ;;  %v1102_v7 = vunpack.c.1.s8 %v6197_v24  ;;  %v474_v59 = vld [vmem:[%s5907_s12 + $0x488] sm:$0xff] }
 0x1af   : > { %2761 = vmatpush.bf16.msrb.mxu1 %v2144_v60  ;;  %v2160_v9 = vpack.c.bf16 %v1808_v1, %v1807_v0  ;;  %2743 = vmatmul.bf16.vlgmr.msra.gmra.mxu3 %v2229_v57  ;;  %v1773_v10 = vcvt.s32.f32 %v1101_v2  ;;  %v1117_v11 = vunpack.c.0.s8 %v484_v37  ;;  %v1118_v12 = vunpack.c.1.s8 %v484_v37  ;;  %v478_v1 = vld [vmem:[%s5907_s12 + $0x4a8] sm:$0xff] }
 0x1b0   : > { %2774 = vmatpush.bf16.msrb.mxu2 %v2152_v3  ;;  %v2135_v17 = vpack.c.bf16 %v1758_v6, %v1757_v5  ;;  %v1774_v54 = vcvt.s32.f32 %v1102_v7  ;;  %v1133_v51 = vunpack.c.0.s8 %v488_v42  ;;  %v1134_v14 = vunpack.c.1.s8 %v488_v42  ;;  %v482_v7 = vld [vmem:[%s5907_s12 + $0x4c8] sm:$0xff] }
 0x1b1   : > { %2787 = vmatpush.bf16.msrb.mxu3 %v2160_v9  ;;  %v1789_v18 = vcvt.s32.f32 %v1117_v11  ;;  %v1790_v19 = vcvt.s32.f32 %v1118_v12  ;;  %v1083_v23 = vunpack.c.2.s8 %v475_v8  ;;  %v1084_v24 = vunpack.c.3.s8 %v475_v8 }
 0x1b2   : > { %2749 = vmatpush.bf16.msrb.mxu0 %v2135_v17  ;;  %v2143_v63 = vpack.c.bf16 %v1774_v54, %v1773_v10  ;;  %v1805_v29 = vcvt.s32.f32 %v1133_v51  ;;  %v1806_v15 = vcvt.s32.f32 %v1134_v14  ;;  %v1099_v33 = vunpack.c.2.s8 %v479_v13  ;;  %v486_v10 = vld [vmem:[%s5907_s12 + $0x4e8] sm:$0xff] }
 0x1b3   : > { %v2151_v35 = vpack.c.bf16 %v1790_v19, %v1789_v18  ;;  %v1755_v36 = vcvt.s32.f32 %v1083_v23  ;;  %v1756_v37 = vcvt.s32.f32 %v1084_v24  ;;  %v1100_v20 = vunpack.c.3.s8 %v479_v13 }
 0x1b4   : > { %2762 = vmatpush.bf16.msrb.mxu1 %v2143_v63  ;;  %v2159_v39 = vpack.c.bf16 %v1806_v15, %v1805_v29  ;;  %v1771_v40 = vcvt.s32.f32 %v1099_v33  ;;  %v1115_v41 = vunpack.c.2.s8 %v483_v25  ;;  %v1116_v42 = vunpack.c.3.s8 %v483_v25 }
 0x1b5   : > { %2775 = vmatpush.bf16.msrb.mxu2 %v2151_v35  ;;  %v2134_v4 = vpack.c.bf16 %v1756_v37, %v1755_v36  ;;  %v1772_v21 = vcvt.s32.f32 %v1100_v20  ;;  %v1131_v22 = vunpack.c.2.s8 %v487_v16  ;;  %v1132_v44 = vunpack.c.3.s8 %v487_v16 }
 0x1b6   : > { %2788 = vmatpush.bf16.msrb.mxu3 %v2159_v39  ;;  %v1787_v27 = vcvt.s32.f32 %v1115_v41  ;;  %v1788_v45 = vcvt.s32.f32 %v1116_v42  ;;  %v2498_v26 = vadd.f32 %v6189_v43, %v6185_v31  ;;  %v1081_v38 = vunpack.c.0.s8 %v475_v8 }
 0x1b7   : > { %2750 = vmatpush.bf16.msrb.mxu0 %v2134_v4  ;;  %v2142_v46 = vpack.c.bf16 %v1772_v21, %v1771_v40  ;;  %v1803_v48 = vcvt.s32.f32 %v1131_v22  ;;  %v1804_v49 = vcvt.s32.f32 %v1132_v44  ;;  %v1082_v28 = vunpack.c.1.s8 %v475_v8  ;;  %v473_v22 = vld [vmem:[%s5907_s12 + $0x480] sm:$0xff] }
 0x1b8   : > { %v2150_v52 = vpack.c.bf16 %v1788_v45, %v1787_v27  ;;  %v1753_v53 = vcvt.s32.f32 %v1081_v38  ;;  %v1097_v62 = vunpack.c.0.s8 %v479_v13  ;;  %v1098_v34 = vunpack.c.1.s8 %v479_v13  ;;  %v6226_v38 = vpop.f32.mrf.mxu0 }
 0x1b9   : > { %2763 = vmatpush.bf16.msrb.mxu1 %v2142_v46  ;;  %v2158_v55 = vpack.c.bf16 %v1804_v49, %v1803_v48  ;;  %v1754_v56 = vcvt.s32.f32 %v1082_v28  ;;  %v1113_v57 = vunpack.c.0.s8 %v483_v25  ;;  %v1114_v58 = vunpack.c.1.s8 %v483_v25  ;;  %v481_v28 = vld [vmem:[%s5907_s12 + $0x4c0] sm:$0xff] }
 0x1ba   : > { %2776 = vmatpush.bf16.msrb.mxu2 %v2150_v52  ;;  %v1769_v31 = vcvt.s32.f32 %v1097_v62  ;;  %v1770_v43 = vcvt.s32.f32 %v1098_v34  ;;  %v1129_v60 = vunpack.c.0.s8 %v487_v16  ;;  %v1130_v0 = vunpack.c.1.s8 %v487_v16 }
 0x1bb   : > { %2789 = vmatpush.bf16.msrb.mxu3 %v2158_v55  ;;  %v2133_v2 = vpack.c.bf16 %v1754_v56, %v1753_v53  ;;  %v1785_v3 = vcvt.s32.f32 %v1113_v57  ;;  %v1786_v5 = vcvt.s32.f32 %v1114_v58  ;;  %v2511_v6 = vadd.f32 %v6193_v61, %v2498_v26  ;;  %v477_v26 = vld [vmem:[%s5907_s12 + $0x4a0] sm:$0xff] }
 0x1bc   : > { %v2141_v8 = vpack.c.bf16 %v1770_v43, %v1769_v31  ;;  %v1801_v50 = vcvt.s32.f32 %v1129_v60  ;;  %v1802_v47 = vcvt.s32.f32 %v1130_v0  ;;  %v1079_v9 = vunpack.c.2.s8 %v474_v59 }
 0x1bd   : > { %2751 = vmatpush.bf16.msrb.mxu0 %v2133_v2  ;;  %v2149_v11 = vpack.c.bf16 %v1786_v5, %v1785_v3  ;;  %v1080_v12 = vunpack.c.3.s8 %v474_v59  ;;  %v1095_v13 = vunpack.c.2.s8 %v478_v1  ;;  %v1096_v17 = vunpack.c.3.s8 %v478_v1 }
 0x1be   : > { %2764 = vmatpush.bf16.msrb.mxu1 %v2141_v8  ;;  %v2157_v54 = vpack.c.bf16 %v1802_v47, %v1801_v50  ;;  %v1751_v51 = vcvt.s32.f32 %v1079_v9  ;;  %v1111_v14 = vunpack.c.2.s8 %v482_v7  ;;  %v1112_v18 = vunpack.c.3.s8 %v482_v7 }
 0x1bf   : > { %2777 = vmatpush.bf16.msrb.mxu2 %v2149_v11  ;;  %v1752_v19 = vcvt.s32.f32 %v1080_v12  ;;  %v1767_v23 = vcvt.s32.f32 %v1095_v13  ;;  %v1768_v61 = vcvt.s32.f32 %v1096_v17  ;;  %v1127_v24 = vunpack.c.2.s8 %v486_v10 }
 0x1c0   : > { %2790 = vmatpush.bf16.msrb.mxu3 %v2157_v54  ;;  %v1783_v25 = vcvt.s32.f32 %v1111_v14  ;;  %v1784_v63 = vcvt.s32.f32 %v1112_v18  ;;  %v1128_v29 = vunpack.c.3.s8 %v486_v10  ;;  %v2524_v15 = vadd.f32 %v6199_v30, %v2511_v6  ;;  %v6230_v6 = vpop.f32.mrf.mxu1  ;;  %v2551_v14 = vpop.f32.mrf.mxu0 }
 0x1c1   : > { %v2132_v33 = vpack.c.bf16 %v1752_v19, %v1751_v51  ;;  %v2140_v16 = vpack.c.bf16 %v1768_v61, %v1767_v23  ;;  %v1799_v35 = vcvt.s32.f32 %v1127_v24  ;;  %v1077_v36 = vunpack.c.0.s8 %v474_v59  ;;  %v492_v24 = vld [vmem:[%s5907_s12 + $0x518] sm:$0xff] }
 0x1c2   : > { %v2148_v37 = vpack.c.bf16 %v1784_v63, %v1783_v25  ;;  %v1800_v20 = vcvt.s32.f32 %v1128_v29  ;;  %v6222_v39 = vadd.f32 %v6201_v32, %v2524_v15  ;;  %v1078_v40 = vunpack.c.1.s8 %v474_v59  ;;  %v485_v59 = vld [vmem:[%s5907_s12 + $0x4e0] sm:$0xff] }
 0x1c3   : > { %2752 = vmatpush.bf16.msrb.mxu0 %v2132_v33  ;;  %2765 = vmatpush.bf16.msrb.mxu1 %v2140_v16  ;;  %v1749_v41 = vcvt.s32.f32 %v1077_v36  ;;  %v1093_v42 = vunpack.c.0.s8 %v478_v1  ;;  %v1094_v4 = vunpack.c.1.s8 %v478_v1  ;;  %v1109_v21 = vunpack.c.0.s8 %v482_v7  ;;  %v6234_v33 = vld [vmem:[%s5907_s12 + $0x538] sm:$0xff] }
 0x1c4   : > { %2778 = vmatpush.bf16.msrb.mxu2 %v2148_v37  ;;  %v2156_v30 = vpack.c.bf16 %v1800_v20, %v1799_v35  ;;  %v1750_v44 = vcvt.s32.f32 %v1078_v40  ;;  %v1110_v27 = vunpack.c.1.s8 %v482_v7  ;;  %v1125_v45 = vunpack.c.0.s8 %v486_v10  ;;  %v6236_v20 = vpop.f32.mrf.mxu2  ;;  %v6238_v40 = vpop.f32.mrf.mxu3 }
 0x1c5   : > { %v1765_v32 = vcvt.s32.f32 %v1093_v42  ;;  %v1766_v46 = vcvt.s32.f32 %v1094_v4  ;;  %v1781_v48 = vcvt.s32.f32 %v1109_v21  ;;  %v1126_v49 = vunpack.c.1.s8 %v486_v10 }
 0x1c6   : > { %2791 = vmatpush.bf16.msrb.mxu3 %v2156_v30  ;;  %v2131_v52 = vpack.c.bf16 %v1750_v44, %v1749_v41  ;;  %v1782_v53 = vcvt.s32.f32 %v1110_v27  ;;  %v1797_v62 = vcvt.s32.f32 %v1125_v45  ;;  %v1075_v34 = vunpack.c.2.s8 %v473_v22 }
 0x1c7   : > { %v2139_v55 = vpack.c.bf16 %v1766_v46, %v1765_v32  ;;  %v1798_v56 = vcvt.s32.f32 %v1126_v49  ;;  %v1076_v57 = vunpack.c.3.s8 %v473_v22  ;;  %v1091_v58 = vunpack.c.2.s8 %v477_v26  ;;  %v2230_v32 = vld [vmem:[#allocation1 + $0x24] sm:$0xff] }
 0x1c8   : > { %2753 = vmatpush.bf16.msrb.mxu0 %v2131_v52  ;;  %v2147_v31 = vpack.c.bf16 %v1782_v53, %v1781_v48  ;;  %v1747_v43 = vcvt.s32.f32 %v1075_v34  ;;  %v1092_v60 = vunpack.c.3.s8 %v477_v26  ;;  %v1107_v0 = vunpack.c.2.s8 %v481_v28  ;;  %v2564_v46 = vpop.f32.mrf.mxu1 }
 0x1c9   : > { %2766 = vmatpush.bf16.msrb.mxu1 %v2139_v55  ;;  %v2155_v1 = vpack.c.bf16 %v1798_v56, %v1797_v62  ;;  %v1748_v2 = vcvt.s32.f32 %v1076_v57  ;;  %v1763_v3 = vcvt.s32.f32 %v1091_v58  ;;  %v1108_v5 = vunpack.c.3.s8 %v481_v28  ;;  %v2231_v56 = vld [vmem:[#allocation1 + $0x2d] sm:$0xff] }
 0x1ca   : > { %2779 = vmatpush.bf16.msrb.mxu2 %v2147_v31  ;;  %v1764_v7 = vcvt.s32.f32 %v1092_v60  ;;  %v1779_v8 = vcvt.s32.f32 %v1107_v0  ;;  %v1123_v50 = vunpack.c.2.s8 %v485_v59  ;;  %v1124_v47 = vunpack.c.3.s8 %v485_v59 }
 0x1cb   : > { %2792 = vmatpush.bf16.msrb.mxu3 %v2155_v1  ;;  %v2130_v9 = vpack.c.bf16 %v1748_v2, %v1747_v43  ;;  %v1780_v10 = vcvt.s32.f32 %v1108_v5  ;;  %v1073_v11 = vunpack.c.0.s8 %v473_v22  ;;  %v1074_v12 = vunpack.c.1.s8 %v473_v22  ;;  %v2831_v22 = vld [vmem:[%s5907_s12 + $0x558] sm:$0xff]  ;;  %v2232_v43 = vld [vmem:[#allocation1 + $0x36] sm:$0xff] }
 0x1cc   : > { %v2138_v13 = vpack.c.bf16 %v1764_v7, %v1763_v3  ;;  %v1795_v17 = vcvt.s32.f32 %v1123_v50  ;;  %v1796_v54 = vcvt.s32.f32 %v1124_v47  ;;  %v1089_v51 = vunpack.c.0.s8 %v477_v26  ;;  %v2233_v1 = vld [vmem:[#allocation1 + $0x3f] sm:$0xff] }
 0x1cd   : > { %2754 = vmatpush.bf16.msrb.mxu0 %v2130_v9  ;;  %v2146_v18 = vpack.c.bf16 %v1780_v10, %v1779_v8  ;;  %v1745_v19 = vcvt.s32.f32 %v1073_v11  ;;  %v1746_v23 = vcvt.s32.f32 %v1074_v12  ;;  %v1090_v61 = vunpack.c.1.s8 %v477_v26  ;;  %v2835_v26 = vld [vmem:[%s5907_s12 + $0x578] sm:$0xff]  ;;  %v491_v12 = vld [vmem:[%s5907_s12 + $0x510] sm:$0xff] }
 0x1ce   : > { %2767 = vmatpush.bf16.msrb.mxu1 %v2138_v13  ;;  %v2154_v25 = vpack.c.bf16 %v1796_v54, %v1795_v17  ;;  %v1761_v63 = vcvt.s32.f32 %v1089_v51  ;;  %v1105_v29 = vunpack.c.0.s8 %v481_v28  ;;  %v1106_v15 = vunpack.c.1.s8 %v481_v28  ;;  %v2577_v13 = vpop.f32.mrf.mxu2  ;;  %v2590_v17 = vpop.f32.mrf.mxu3 }
 0x1cf   : > { %2780 = vmatpush.bf16.msrb.mxu2 %v2146_v18  ;;  %v2129_v16 = vpack.c.bf16 %v1746_v23, %v1745_v19  ;;  %v1762_v35 = vcvt.s32.f32 %v1090_v61  ;;  %v1121_v36 = vunpack.c.0.s8 %v485_v59  ;;  %v1122_v37 = vunpack.c.1.s8 %v485_v59  ;;  %v495_v19 = vld [vmem:[%s5907_s12 + $0x530] sm:$0xff]  ;;  %v2829_v13 = vld [vmem:[%s5907_s12 + $0x548] sm:$0xff] }
 0x1d0   : > { %2793 = vmatpush.bf16.msrb.mxu3 %v2154_v25  ;;  %v1777_v41 = vcvt.s32.f32 %v1105_v29  ;;  %v1778_v42 = vcvt.s32.f32 %v1106_v15  ;;  %v1151_v4 = vunpack.c.2.s8 %v492_v24  ;;  %v1152_v21 = vunpack.c.3.s8 %v492_v24 }
 0x1d1   : > { %2755 = vmatpush.bf16.msrb.mxu0 %v2129_v16  ;;  %v2137_v30 = vpack.c.bf16 %v1762_v35, %v1761_v63  ;;  %v1793_v44 = vcvt.s32.f32 %v1121_v36  ;;  %v1794_v27 = vcvt.s32.f32 %v1122_v37  ;;  %v1167_v45 = vunpack.c.2.s8 %v6234_v33  ;;  %v2830_v16 = vld [vmem:[%s5907_s12 + $0x550] sm:$0xff] }
 0x1d2   : > { %v2145_v48 = vpack.c.bf16 %v1778_v42, %v1777_v41  ;;  %v1823_v49 = vcvt.s32.f32 %v1151_v4  ;;  %v1824_v28 = vcvt.s32.f32 %v1152_v21  ;;  %v1168_v52 = vunpack.c.3.s8 %v6234_v33  ;;  %v2834_v42 = vld [vmem:[%s5907_s12 + $0x570] sm:$0xff] }
 0x1d3   : > { %2768 = vmatpush.bf16.msrb.mxu1 %v2137_v30  ;;  %v2153_v53 = vpack.c.bf16 %v1794_v27, %v1793_v44  ;;  %v1839_v62 = vcvt.s32.f32 %v1167_v45  ;;  %v3010_v34 = vunpack.c.2.s8 %v2831_v22  ;;  %v3011_v55 = vunpack.c.3.s8 %v2831_v22  ;;  %v2183_v44 = vld [vmem:[%s5925_s26 + $0x28] sm:$0x3] }
 0x1d4   : > { %2781 = vmatpush.bf16.msrb.mxu2 %v2145_v48  ;;  %v2168_v57 = vpack.c.bf16 %v1824_v28, %v1823_v49  ;;  %v1840_v58 = vcvt.s32.f32 %v1168_v52  ;;  %v3026_v59 = vunpack.c.2.s8 %v2835_v26  ;;  %v3027_v31 = vunpack.c.3.s8 %v2835_v26  ;;  %2756 = vmatmul.bf16.vlgmr.msrb.gmra.mxu0 %v2230_v32  ;;  %2235 = vst [vmem:[#allocation1] ss:$9 sm:$0xff] %v2183_v44 }
 0x1d5   : > { %2794 = vmatpush.bf16.msrb.mxu3 %v2153_v53  ;;  %v3682_v60 = vcvt.s32.f32 %v3010_v34  ;;  %v3683_v0 = vcvt.s32.f32 %v3011_v55  ;;  %v1149_v2 = vunpack.c.0.s8 %v492_v24  ;;  %v1150_v3 = vunpack.c.1.s8 %v492_v24 }
 0x1d6   : > { %2800 = vmatpush.bf16.msra.mxu0 %v2168_v57  ;;  %v2176_v5 = vpack.c.bf16 %v1840_v58, %v1839_v62  ;;  %v3698_v7 = vcvt.s32.f32 %v3026_v59  ;;  %v3699_v8 = vcvt.s32.f32 %v3027_v31  ;;  %2769 = vmatmul.bf16.vlgmr.msrb.gmra.mxu1 %v2231_v56  ;;  %v1165_v50 = vunpack.c.0.s8 %v6234_v33 }
 0x1d7   : > { %v4347_v47 = vpack.c.bf16 %v3683_v0, %v3682_v60  ;;  %2782 = vmatmul.bf16.vlgmr.msrb.gmra.mxu2 %v2232_v43  ;;  %v1821_v9 = vcvt.s32.f32 %v1149_v2  ;;  %v1822_v10 = vcvt.s32.f32 %v1150_v3  ;;  %v1166_v11 = vunpack.c.1.s8 %v6234_v33 }
 0x1d8   : > { %2813 = vmatpush.bf16.msra.mxu1 %v2176_v5  ;;  %v4355_v54 = vpack.c.bf16 %v3699_v8, %v3698_v7  ;;  %2795 = vmatmul.bf16.vlgmr.msrb.gmra.mxu3 %v2233_v1  ;;  %v1837_v51 = vcvt.s32.f32 %v1165_v50  ;;  %v3008_v14 = vunpack.c.0.s8 %v2831_v22  ;;  %v3009_v18 = vunpack.c.1.s8 %v2831_v22  ;;  %v494_v50 = vld [vmem:[%s5907_s12 + $0x528] sm:$0xff] }
 0x1d9   : > { %4779 = vmatpush.bf16.msra.mxu2 %v4347_v47  ;;  %v2167_v23 = vpack.c.bf16 %v1822_v10, %v1821_v9  ;;  %v1838_v61 = vcvt.s32.f32 %v1166_v11  ;;  %v3024_v24 = vunpack.c.0.s8 %v2835_v26  ;;  %v3025_v25 = vunpack.c.1.s8 %v2835_v26  ;;  %v4677_v47 = vld [vmem:[%s5925_s26 + $0x2a] sm:$0xff] }
 0x1da   : > { %4792 = vmatpush.bf16.msra.mxu3 %v4355_v54  ;;  %v3680_v63 = vcvt.s32.f32 %v3008_v14  ;;  %v3681_v29 = vcvt.s32.f32 %v3009_v18  ;;  %v1147_v15 = vunpack.c.2.s8 %v491_v12  ;;  %v1148_v33 = vunpack.c.3.s8 %v491_v12 }
 0x1db   : > { %2801 = vmatpush.bf16.msra.mxu0 %v2167_v23  ;;  %v2175_v35 = vpack.c.bf16 %v1838_v61, %v1837_v51  ;;  %v3696_v36 = vcvt.s32.f32 %v3024_v24  ;;  %v3697_v37 = vcvt.s32.f32 %v3025_v25  ;;  %v1163_v41 = vunpack.c.2.s8 %v495_v19  ;;  %v6258_v17 = vld [vmem:[#allocation1] sm:$0xff]  ;;  %v6260_v54 = vld [vmem:[#allocation1 + $0x9] sm:$0xff]  ;;  %v2833_v23 = vld [vmem:[%s5907_s12 + $0x568] sm:$0xff] }
 0x1dc   : > { %v4346_v4 = vpack.c.bf16 %v3681_v29, %v3680_v63  ;;  %v1819_v21 = vcvt.s32.f32 %v1147_v15  ;;  %v1820_v22 = vcvt.s32.f32 %v1148_v33  ;;  %v1164_v30 = vunpack.c.3.s8 %v495_v19  ;;  %4684 = vst [vmem:[#allocation1] ss:$9 sm:$0xff] %v4677_v47 }
 0x1dd   : > { %2814 = vmatpush.bf16.msra.mxu1 %v2175_v35  ;;  %v4354_v27 = vpack.c.bf16 %v3697_v37, %v3696_v36  ;;  %v1835_v45 = vcvt.s32.f32 %v1163_v41  ;;  %v3006_v26 = vunpack.c.2.s8 %v2830_v16  ;;  %v3007_v32 = vunpack.c.3.s8 %v2830_v16 }
 0x1de   : > { %4780 = vmatpush.bf16.msra.mxu2 %v4346_v4  ;;  %v2166_v46 = vpack.c.bf16 %v1820_v22, %v1819_v21  ;;  %v1836_v48 = vcvt.s32.f32 %v1164_v30  ;;  %v3022_v49 = vunpack.c.2.s8 %v2834_v42  ;;  %v3023_v28 = vunpack.c.3.s8 %v2834_v42 }
 0x1df   : > { %4793 = vmatpush.bf16.msra.mxu3 %v4354_v27  ;;  %v3678_v52 = vcvt.s32.f32 %v3006_v26  ;;  %v3679_v53 = vcvt.s32.f32 %v3007_v32  ;;  %v2550_v62 = vadd.f32 %v6226_v38, %v6222_v39  ;;  %v1145_v34 = vunpack.c.0.s8 %v491_v12  ;;  %v490_v39 = vld [vmem:[%s5907_s12 + $0x508] sm:$0xff] }
 0x1e0   : > { %2802 = vmatpush.bf16.msra.mxu0 %v2166_v46  ;;  %v2174_v55 = vpack.c.bf16 %v1836_v48, %v1835_v45  ;;  %v3694_v56 = vcvt.s32.f32 %v3022_v49  ;;  %v3695_v57 = vcvt.s32.f32 %v3023_v28  ;;  %v1146_v58 = vunpack.c.1.s8 %v491_v12 }
 0x1e1   : > { %v4345_v59 = vpack.c.bf16 %v3679_v53, %v3678_v52  ;;  %v1817_v31 = vcvt.s32.f32 %v1145_v34  ;;  %v1161_v43 = vunpack.c.0.s8 %v495_v19  ;;  %v1162_v60 = vunpack.c.1.s8 %v495_v19  ;;  %v489_v53 = vld [vmem:[%s5907_s12 + $0x500] sm:$0xff] }
 0x1e2   : > { %2815 = vmatpush.bf16.msra.mxu1 %v2174_v55  ;;  %v4353_v0 = vpack.c.bf16 %v3695_v57, %v3694_v56  ;;  %v1818_v1 = vcvt.s32.f32 %v1146_v58  ;;  %v3004_v2 = vunpack.c.0.s8 %v2830_v16  ;;  %v3005_v3 = vunpack.c.1.s8 %v2830_v16  ;;  %v493_v56 = vld [vmem:[%s5907_s12 + $0x520] sm:$0xff]  ;;  %v6269_v57 = vpop.f32.mrf.mxu0 }
 0x1e3   : > { %4781 = vmatpush.bf16.msra.mxu2 %v4345_v59  ;;  %v1833_v38 = vcvt.s32.f32 %v1161_v43  ;;  %v1834_v5 = vcvt.s32.f32 %v1162_v60  ;;  %v3020_v7 = vunpack.c.0.s8 %v2834_v42  ;;  %v3021_v8 = vunpack.c.1.s8 %v2834_v42  ;;  %v2828_v43 = vld [vmem:[%s5907_s12 + $0x540] sm:$0xff] }
 0x1e4   : > { %4794 = vmatpush.bf16.msra.mxu3 %v4353_v0  ;;  %v2165_v9 = vpack.c.bf16 %v1818_v1, %v1817_v31  ;;  %v3676_v10 = vcvt.s32.f32 %v3004_v2  ;;  %v3677_v11 = vcvt.s32.f32 %v3005_v3  ;;  %v2563_v12 = vadd.f32 %v6230_v6, %v2550_v62 }
 0x1e5   : > { %v2173_v51 = vpack.c.bf16 %v1834_v5, %v1833_v38  ;;  %v3692_v14 = vcvt.s32.f32 %v3020_v7  ;;  %v3693_v18 = vcvt.s32.f32 %v3021_v8  ;;  %v1143_v19 = vunpack.c.2.s8 %v490_v39  ;;  %v2832_v7 = vld [vmem:[%s5907_s12 + $0x560] sm:$0xff] }
 0x1e6   : > { %2803 = vmatpush.bf16.msra.mxu0 %v2165_v9  ;;  %v4344_v61 = vpack.c.bf16 %v3677_v11, %v3676_v10  ;;  %v1144_v24 = vunpack.c.3.s8 %v490_v39  ;;  %v1159_v25 = vunpack.c.2.s8 %v494_v50  ;;  %v1160_v63 = vunpack.c.3.s8 %v494_v50 }
 0x1e7   : > { %2816 = vmatpush.bf16.msra.mxu1 %v2173_v51  ;;  %v4352_v29 = vpack.c.bf16 %v3693_v18, %v3692_v14  ;;  %v1815_v15 = vcvt.s32.f32 %v1143_v19  ;;  %v3002_v6 = vunpack.c.2.s8 %v2829_v13  ;;  %v3003_v33 = vunpack.c.3.s8 %v2829_v13  ;;  %v6273_v51 = vpop.f32.mrf.mxu1 }
 0x1e8   : > { %4782 = vmatpush.bf16.msra.mxu2 %v4344_v61  ;;  %v1816_v16 = vcvt.s32.f32 %v1144_v24  ;;  %v1831_v35 = vcvt.s32.f32 %v1159_v25  ;;  %v1832_v36 = vcvt.s32.f32 %v1160_v63  ;;  %v3018_v37 = vunpack.c.2.s8 %v2833_v23 }
 0x1e9   : > { %4795 = vmatpush.bf16.msra.mxu3 %v4352_v29  ;;  %v3674_v41 = vcvt.s32.f32 %v3002_v6  ;;  %v3675_v42 = vcvt.s32.f32 %v3003_v33  ;;  %v3019_v4 = vunpack.c.3.s8 %v2833_v23  ;;  %v2576_v21 = vadd.f32 %v6236_v20, %v2563_v12 }
 0x1ea   : > { %v2164_v22 = vpack.c.bf16 %v1816_v16, %v1815_v15  ;;  %v2172_v30 = vpack.c.bf16 %v1832_v36, %v1831_v35  ;;  %v3690_v44 = vcvt.s32.f32 %v3018_v37  ;;  %v1141_v27 = vunpack.c.0.s8 %v490_v39  ;;  %v2603_v16 = vpop.f32.mrf.mxu0 }
 0x1eb   : > { %v4343_v45 = vpack.c.bf16 %v3675_v42, %v3674_v41  ;;  %v3691_v26 = vcvt.s32.f32 %v3019_v4  ;;  %v6265_v32 = vadd.f32 %v6238_v40, %v2576_v21  ;;  %v1142_v46 = vunpack.c.1.s8 %v490_v39  ;;  %v2839_v42 = vld [vmem:[%s5907_s12 + $0x598] sm:$0xff] }
 0x1ec   : > { %2804 = vmatpush.bf16.msra.mxu0 %v2164_v22  ;;  %2817 = vmatpush.bf16.msra.mxu1 %v2172_v30  ;;  %v1813_v48 = vcvt.s32.f32 %v1141_v27  ;;  %v1157_v49 = vunpack.c.0.s8 %v494_v50  ;;  %v1158_v28 = vunpack.c.1.s8 %v494_v50  ;;  %v3000_v52 = vunpack.c.0.s8 %v2829_v13 }
 0x1ed   : > { %4783 = vmatpush.bf16.msra.mxu2 %v4343_v45  ;;  %v4351_v20 = vpack.c.bf16 %v3691_v26, %v3690_v44  ;;  %v1814_v62 = vcvt.s32.f32 %v1142_v46  ;;  %v3001_v34 = vunpack.c.1.s8 %v2829_v13  ;;  %v3016_v55 = vunpack.c.0.s8 %v2833_v23  ;;  %v6277_v44 = vld [vmem:[%s5907_s12 + $0x5b8] sm:$0xff] }
 0x1ee   : > { %v1829_v40 = vcvt.s32.f32 %v1157_v49  ;;  %v1830_v58 = vcvt.s32.f32 %v1158_v28  ;;  %v3672_v59 = vcvt.s32.f32 %v3000_v52  ;;  %v3017_v31 = vunpack.c.1.s8 %v2833_v23  ;;  %v6281_v49 = vpop.f32.mrf.mxu3 }
 0x1ef   : > { %4796 = vmatpush.bf16.msra.mxu3 %v4351_v20  ;;  %v2163_v60 = vpack.c.bf16 %v1814_v62, %v1813_v48  ;;  %v3673_v0 = vcvt.s32.f32 %v3001_v34  ;;  %v3688_v1 = vcvt.s32.f32 %v3016_v55  ;;  %v1139_v2 = vunpack.c.2.s8 %v489_v53  ;;  %v6279_v48 = vpop.f32.mrf.mxu2  ;;  %v2847_v62 = vld [vmem:[%s5907_s12 + $0x5d8] sm:$0xff] }
 0x1f0   : > { %v2171_v3 = vpack.c.bf16 %v1830_v58, %v1829_v40  ;;  %v3689_v39 = vcvt.s32.f32 %v3017_v31  ;;  %v1140_v38 = vunpack.c.3.s8 %v489_v53  ;;  %v1155_v5 = vunpack.c.2.s8 %v493_v56  ;;  %v2851_v58 = vld [vmem:[%s5907_s12 + $0x5f8] sm:$0xff] }
 0x1f1   : > { %2805 = vmatpush.bf16.msra.mxu0 %v2163_v60  ;;  %v4342_v8 = vpack.c.bf16 %v3673_v0, %v3672_v59  ;;  %v1811_v50 = vcvt.s32.f32 %v1139_v2  ;;  %v1156_v47 = vunpack.c.3.s8 %v493_v56  ;;  %v2998_v9 = vunpack.c.2.s8 %v2828_v43  ;;  %v2616_v59 = vpop.f32.mrf.mxu1 }
 0x1f2   : > { %2818 = vmatpush.bf16.msra.mxu1 %v2171_v3  ;;  %v4350_v10 = vpack.c.bf16 %v3689_v39, %v3688_v1  ;;  %v1812_v11 = vcvt.s32.f32 %v1140_v38  ;;  %v1827_v12 = vcvt.s32.f32 %v1155_v5  ;;  %v2999_v13 = vunpack.c.3.s8 %v2828_v43 }
 0x1f3   : > { %4784 = vmatpush.bf16.msra.mxu2 %v4342_v8  ;;  %v1828_v14 = vcvt.s32.f32 %v1156_v47  ;;  %v3670_v18 = vcvt.s32.f32 %v2998_v9  ;;  %v3014_v19 = vunpack.c.2.s8 %v2832_v7  ;;  %v3015_v23 = vunpack.c.3.s8 %v2832_v7 }
 0x1f4   : > { %4797 = vmatpush.bf16.msra.mxu3 %v4350_v10  ;;  %v2162_v61 = vpack.c.bf16 %v1812_v11, %v1811_v50  ;;  %v3671_v24 = vcvt.s32.f32 %v2999_v13  ;;  %v1137_v25 = vunpack.c.0.s8 %v489_v53  ;;  %v1138_v63 = vunpack.c.1.s8 %v489_v53  ;;  %v4685_v50 = vld [vmem:[#allocation1] sm:$0xff] }
 0x1f5   : > { %v2170_v29 = vpack.c.bf16 %v1828_v14, %v1827_v12  ;;  %v3686_v15 = vcvt.s32.f32 %v3014_v19  ;;  %v3687_v6 = vcvt.s32.f32 %v3015_v23  ;;  %v1153_v33 = vunpack.c.0.s8 %v493_v56  ;;  %v4686_v12 = vld [vmem:[#allocation1 + $0x9] sm:$0xff] }
 0x1f6   : > { %2806 = vmatpush.bf16.msra.mxu0 %v2162_v61  ;;  %v4341_v35 = vpack.c.bf16 %v3671_v24, %v3670_v18  ;;  %v1809_v36 = vcvt.s32.f32 %v1137_v25  ;;  %v1810_v37 = vcvt.s32.f32 %v1138_v63  ;;  %v1154_v41 = vunpack.c.1.s8 %v493_v56  ;;  %v2838_v25 = vld [vmem:[%s5907_s12 + $0x590] sm:$0xff] }
 0x1f7   : > { %2819 = vmatpush.bf16.msra.mxu1 %v2170_v29  ;;  %v4349_v4 = vpack.c.bf16 %v3687_v6, %v3686_v15  ;;  %v1825_v21 = vcvt.s32.f32 %v1153_v33  ;;  %v2996_v22 = vunpack.c.0.s8 %v2828_v43  ;;  %v2997_v30 = vunpack.c.1.s8 %v2828_v43  ;;  %v2629_v63 = vpop.f32.mrf.mxu2  ;;  %v2642_v29 = vpop.f32.mrf.mxu3 }
 0x1f8   : > { %4785 = vmatpush.bf16.msra.mxu2 %v4341_v35  ;;  %v2161_v27 = vpack.c.bf16 %v1810_v37, %v1809_v36  ;;  %v1826_v45 = vcvt.s32.f32 %v1154_v41  ;;  %v3012_v26 = vunpack.c.0.s8 %v2832_v7  ;;  %v3013_v46 = vunpack.c.1.s8 %v2832_v7  ;;  %v2842_v35 = vld [vmem:[%s5907_s12 + $0x5b0] sm:$0xff] }
 0x1f9   : > { %4798 = vmatpush.bf16.msra.mxu3 %v4349_v4  ;;  %v3668_v28 = vcvt.s32.f32 %v2996_v22  ;;  %v3669_v52 = vcvt.s32.f32 %v2997_v30  ;;  %v3042_v53 = vunpack.c.2.s8 %v2839_v42  ;;  %v3043_v20 = vunpack.c.3.s8 %v2839_v42  ;;  %v2846_v30 = vld [vmem:[%s5907_s12 + $0x5d0] sm:$0xff] }
 0x1fa   : > { %2807 = vmatpush.bf16.msra.mxu0 %v2161_v27  ;;  %v2169_v34 = vpack.c.bf16 %v1826_v45, %v1825_v21  ;;  %v3684_v55 = vcvt.s32.f32 %v3012_v26  ;;  %v3685_v56 = vcvt.s32.f32 %v3013_v46  ;;  %v3058_v40 = vunpack.c.2.s8 %v6277_v44  ;;  %v2850_v46 = vld [vmem:[%s5907_s12 + $0x5f0] sm:$0xff] }
 0x1fb   : > { %v4340_v31 = vpack.c.bf16 %v3669_v52, %v3668_v28  ;;  %v3714_v43 = vcvt.s32.f32 %v3042_v53  ;;  %v3715_v60 = vcvt.s32.f32 %v3043_v20  ;;  %v3059_v0 = vunpack.c.3.s8 %v6277_v44 }
 0x1fc   : > { %2820 = vmatpush.bf16.msra.mxu1 %v2169_v34  ;;  %v4348_v1 = vpack.c.bf16 %v3685_v56, %v3684_v55  ;;  %v3730_v2 = vcvt.s32.f32 %v3058_v40  ;;  %v3074_v3 = vunpack.c.2.s8 %v2847_v62  ;;  %v3075_v39 = vunpack.c.3.s8 %v2847_v62 }
 0x1fd   : > { %4786 = vmatpush.bf16.msra.mxu2 %v4340_v31  ;;  %v4363_v38 = vpack.c.bf16 %v3715_v60, %v3714_v43  ;;  %v3731_v5 = vcvt.s32.f32 %v3059_v0  ;;  %v3090_v7 = vunpack.c.2.s8 %v2851_v58  ;;  %v3091_v8 = vunpack.c.3.s8 %v2851_v58  ;;  %2808 = vmatmul.bf16.vlgmr.msra.gmra.mxu0 %v6258_v17 }
 0x1fe   : > { %4799 = vmatpush.bf16.msra.mxu3 %v4348_v1  ;;  %v3746_v47 = vcvt.s32.f32 %v3074_v3  ;;  %v3747_v9 = vcvt.s32.f32 %v3075_v39  ;;  %v3040_v10 = vunpack.c.0.s8 %v2839_v42  ;;  %v3041_v11 = vunpack.c.1.s8 %v2839_v42 }
 0x1ff   : > { %4805 = vmatpush.bf16.msrb.mxu0 %v4363_v38  ;;  %v4371_v13 = vpack.c.bf16 %v3731_v5, %v3730_v2  ;;  %v3762_v14 = vcvt.s32.f32 %v3090_v7  ;;  %v3763_v18 = vcvt.s32.f32 %v3091_v8  ;;  %2821 = vmatmul.bf16.vlgmr.msra.gmra.mxu1 %v6260_v54  ;;  %v3056_v19 = vunpack.c.0.s8 %v6277_v44 }
 0x200   : > { %v4379_v23 = vpack.c.bf16 %v3747_v9, %v3746_v47  ;;  %v3712_v61 = vcvt.s32.f32 %v3040_v10  ;;  %v3713_v17 = vcvt.s32.f32 %v3041_v11  ;;  %v3057_v24 = vunpack.c.1.s8 %v6277_v44  ;;  %4787 = vmatmul.bf16.vlgmr.msra.gmra.mxu2 %v4685_v50 }
 0x201   : > { %4818 = vmatpush.bf16.msrb.mxu1 %v4371_v13  ;;  %v4387_v15 = vpack.c.bf16 %v3763_v18, %v3762_v14  ;;  %v3728_v6 = vcvt.s32.f32 %v3056_v19  ;;  %v3072_v33 = vunpack.c.0.s8 %v2847_v62  ;;  %v3073_v16 = vunpack.c.1.s8 %v2847_v62  ;;  %4800 = vmatmul.bf16.vlgmr.msra.gmra.mxu3 %v4686_v12  ;;  %v2837_v12 = vld [vmem:[%s5907_s12 + $0x588] sm:$0xff] }
 0x202   : > { %4831 = vmatpush.bf16.msrb.mxu2 %v4379_v23  ;;  %v4362_v54 = vpack.c.bf16 %v3713_v17, %v3712_v61  ;;  %v3729_v36 = vcvt.s32.f32 %v3057_v24  ;;  %v3088_v37 = vunpack.c.0.s8 %v2851_v58  ;;  %v3089_v41 = vunpack.c.1.s8 %v2851_v58  ;;  %v2841_v18 = vld [vmem:[%s5907_s12 + $0x5a8] sm:$0xff] }
 0x203   : > { %4844 = vmatpush.bf16.msrb.mxu3 %v4387_v15  ;;  %v3744_v42 = vcvt.s32.f32 %v3072_v33  ;;  %v3745_v4 = vcvt.s32.f32 %v3073_v16  ;;  %v3038_v21 = vunpack.c.2.s8 %v2838_v25  ;;  %v3039_v22 = vunpack.c.3.s8 %v2838_v25  ;;  %v2845_v24 = vld [vmem:[%s5907_s12 + $0x5c8] sm:$0xff] }
 0x204   : > { %4806 = vmatpush.bf16.msrb.mxu0 %v4362_v54  ;;  %v4370_v44 = vpack.c.bf16 %v3729_v36, %v3728_v6  ;;  %v3760_v27 = vcvt.s32.f32 %v3088_v37  ;;  %v3761_v45 = vcvt.s32.f32 %v3089_v41  ;;  %v3054_v26 = vunpack.c.2.s8 %v2842_v35  ;;  %v2849_v6 = vld [vmem:[%s5907_s12 + $0x5e8] sm:$0xff] }
 0x205   : > { %v4378_v28 = vpack.c.bf16 %v3745_v4, %v3744_v42  ;;  %v3710_v52 = vcvt.s32.f32 %v3038_v21  ;;  %v3711_v53 = vcvt.s32.f32 %v3039_v22  ;;  %v3055_v20 = vunpack.c.3.s8 %v2842_v35 }
 0x206   : > { %4819 = vmatpush.bf16.msrb.mxu1 %v4370_v44  ;;  %v4386_v62 = vpack.c.bf16 %v3761_v45, %v3760_v27  ;;  %v3726_v34 = vcvt.s32.f32 %v3054_v26  ;;  %v3070_v55 = vunpack.c.2.s8 %v2846_v30  ;;  %v3071_v56 = vunpack.c.3.s8 %v2846_v30 }
 0x207   : > { %4832 = vmatpush.bf16.msrb.mxu2 %v4378_v28  ;;  %v4361_v40 = vpack.c.bf16 %v3711_v53, %v3710_v52  ;;  %v3727_v58 = vcvt.s32.f32 %v3055_v20  ;;  %v3086_v59 = vunpack.c.2.s8 %v2850_v46  ;;  %v3087_v31 = vunpack.c.3.s8 %v2850_v46 }
 0x208   : > { %4845 = vmatpush.bf16.msrb.mxu3 %v4386_v62  ;;  %v3742_v43 = vcvt.s32.f32 %v3070_v55  ;;  %v3743_v60 = vcvt.s32.f32 %v3071_v56  ;;  %v2602_v0 = vadd.f32 %v6269_v57, %v6265_v32  ;;  %v3036_v1 = vunpack.c.0.s8 %v2838_v25 }
 0x209   : > { %4807 = vmatpush.bf16.msrb.mxu0 %v4361_v40  ;;  %v4369_v2 = vpack.c.bf16 %v3727_v58, %v3726_v34  ;;  %v3758_v3 = vcvt.s32.f32 %v3086_v59  ;;  %v3759_v39 = vcvt.s32.f32 %v3087_v31  ;;  %v3037_v38 = vunpack.c.1.s8 %v2838_v25  ;;  %v2836_v59 = vld [vmem:[%s5907_s12 + $0x580] sm:$0xff] }
 0x20a   : > { %v4377_v5 = vpack.c.bf16 %v3743_v60, %v3742_v43  ;;  %v3708_v7 = vcvt.s32.f32 %v3036_v1  ;;  %v3052_v8 = vunpack.c.0.s8 %v2842_v35  ;;  %v3053_v50 = vunpack.c.1.s8 %v2842_v35  ;;  %v6308_v1 = vpop.f32.mrf.mxu0 }
 0x20b   : > { %4820 = vmatpush.bf16.msrb.mxu1 %v4369_v2  ;;  %v4385_v47 = vpack.c.bf16 %v3759_v39, %v3758_v3  ;;  %v3709_v9 = vcvt.s32.f32 %v3037_v38  ;;  %v3068_v10 = vunpack.c.0.s8 %v2846_v30  ;;  %v3069_v11 = vunpack.c.1.s8 %v2846_v30  ;;  %v2844_v38 = vld [vmem:[%s5907_s12 + $0x5c0] sm:$0xff] }
 0x20c   : > { %4833 = vmatpush.bf16.msrb.mxu2 %v4377_v5  ;;  %v3724_v32 = vcvt.s32.f32 %v3052_v8  ;;  %v3725_v57 = vcvt.s32.f32 %v3053_v50  ;;  %v3084_v13 = vunpack.c.0.s8 %v2850_v46  ;;  %v3085_v14 = vunpack.c.1.s8 %v2850_v46 }
 0x20d   : > { %4846 = vmatpush.bf16.msrb.mxu3 %v4385_v47  ;;  %v4360_v19 = vpack.c.bf16 %v3709_v9, %v3708_v7  ;;  %v3740_v23 = vcvt.s32.f32 %v3068_v10  ;;  %v3741_v61 = vcvt.s32.f32 %v3069_v11  ;;  %v2615_v17 = vadd.f32 %v6273_v51, %v2602_v0  ;;  %v2840_v0 = vld [vmem:[%s5907_s12 + $0x5a0] sm:$0xff] }
 0x20e   : > { %v4368_v25 = vpack.c.bf16 %v3725_v57, %v3724_v32  ;;  %v3756_v63 = vcvt.s32.f32 %v3084_v13  ;;  %v3757_v29 = vcvt.s32.f32 %v3085_v14  ;;  %v3034_v15 = vunpack.c.2.s8 %v2837_v12 }
 0x20f   : > { %4808 = vmatpush.bf16.msrb.mxu0 %v4360_v19  ;;  %v4376_v33 = vpack.c.bf16 %v3741_v61, %v3740_v23  ;;  %v3035_v16 = vunpack.c.3.s8 %v2837_v12  ;;  %v3050_v35 = vunpack.c.2.s8 %v2841_v18  ;;  %v3051_v54 = vunpack.c.3.s8 %v2841_v18 }
 0x210   : > { %4821 = vmatpush.bf16.msrb.mxu1 %v4368_v25  ;;  %v4384_v36 = vpack.c.bf16 %v3757_v29, %v3756_v63  ;;  %v3706_v37 = vcvt.s32.f32 %v3034_v15  ;;  %v3066_v41 = vunpack.c.2.s8 %v2845_v24  ;;  %v3067_v42 = vunpack.c.3.s8 %v2845_v24 }
 0x211   : > { %4834 = vmatpush.bf16.msrb.mxu2 %v4376_v33  ;;  %v3707_v4 = vcvt.s32.f32 %v3035_v16  ;;  %v3722_v21 = vcvt.s32.f32 %v3050_v35  ;;  %v3723_v51 = vcvt.s32.f32 %v3051_v54  ;;  %v3082_v22 = vunpack.c.2.s8 %v2849_v6 }
 0x212   : > { %4847 = vmatpush.bf16.msrb.mxu3 %v4384_v36  ;;  %v3738_v30 = vcvt.s32.f32 %v3066_v41  ;;  %v3739_v44 = vcvt.s32.f32 %v3067_v42  ;;  %v3083_v27 = vunpack.c.3.s8 %v2849_v6  ;;  %v2628_v45 = vadd.f32 %v6279_v48, %v2615_v17  ;;  %v6312_v17 = vpop.f32.mrf.mxu1  ;;  %v2655_v41 = vpop.f32.mrf.mxu0 }
 0x213   : > { %v4359_v26 = vpack.c.bf16 %v3707_v4, %v3706_v37  ;;  %v4367_v46 = vpack.c.bf16 %v3723_v51, %v3722_v21  ;;  %v3754_v28 = vcvt.s32.f32 %v3082_v22  ;;  %v3032_v52 = vunpack.c.0.s8 %v2837_v12  ;;  %v2855_v22 = vld [vmem:[%s5907_s12 + $0x618] sm:$0xff] }
 0x214   : > { %v4375_v53 = vpack.c.bf16 %v3739_v44, %v3738_v30  ;;  %v3755_v20 = vcvt.s32.f32 %v3083_v27  ;;  %v6304_v62 = vadd.f32 %v6281_v49, %v2628_v45  ;;  %v3033_v34 = vunpack.c.1.s8 %v2837_v12  ;;  %v2848_v12 = vld [vmem:[%s5907_s12 + $0x5e0] sm:$0xff] }
 0x215   : > { %4809 = vmatpush.bf16.msrb.mxu0 %v4359_v26  ;;  %4822 = vmatpush.bf16.msrb.mxu1 %v4367_v46  ;;  %v3704_v55 = vcvt.s32.f32 %v3032_v52  ;;  %v3048_v56 = vunpack.c.0.s8 %v2841_v18  ;;  %v3049_v40 = vunpack.c.1.s8 %v2841_v18  ;;  %v3064_v58 = vunpack.c.0.s8 %v2845_v24  ;;  %v6316_v26 = vld [vmem:[%s5907_s12 + $0x638] sm:$0xff] }
 0x216   : > { %4835 = vmatpush.bf16.msrb.mxu2 %v4375_v53  ;;  %v4383_v48 = vpack.c.bf16 %v3755_v20, %v3754_v28  ;;  %v3705_v31 = vcvt.s32.f32 %v3033_v34  ;;  %v3065_v43 = vunpack.c.1.s8 %v2845_v24  ;;  %v3080_v60 = vunpack.c.0.s8 %v2849_v6  ;;  %v6318_v20 = vpop.f32.mrf.mxu2  ;;  %v6320_v34 = vpop.f32.mrf.mxu3 }
 0x217   : > { %v3720_v49 = vcvt.s32.f32 %v3048_v56  ;;  %v3721_v2 = vcvt.s32.f32 %v3049_v40  ;;  %v3736_v3 = vcvt.s32.f32 %v3064_v58  ;;  %v3081_v39 = vunpack.c.1.s8 %v2849_v6 }
 0x218   : > { %4848 = vmatpush.bf16.msrb.mxu3 %v4383_v48  ;;  %v4358_v5 = vpack.c.bf16 %v3705_v31, %v3704_v55  ;;  %v3737_v7 = vcvt.s32.f32 %v3065_v43  ;;  %v3752_v8 = vcvt.s32.f32 %v3080_v60  ;;  %v3030_v50 = vunpack.c.2.s8 %v2836_v59 }
 0x219   : > { %v4366_v47 = vpack.c.bf16 %v3721_v2, %v3720_v49  ;;  %v3753_v9 = vcvt.s32.f32 %v3081_v39  ;;  %v3031_v10 = vunpack.c.3.s8 %v2836_v59  ;;  %v3046_v11 = vunpack.c.2.s8 %v2840_v0  ;;  %v4687_v49 = vld [vmem:[#allocation1 + $0x12] sm:$0xff] }
 0x21a   : > { %4810 = vmatpush.bf16.msrb.mxu0 %v4358_v5  ;;  %v4374_v32 = vpack.c.bf16 %v3737_v7, %v3736_v3  ;;  %v3702_v57 = vcvt.s32.f32 %v3030_v50  ;;  %v3047_v13 = vunpack.c.3.s8 %v2840_v0  ;;  %v3062_v14 = vunpack.c.2.s8 %v2844_v38  ;;  %v2668_v2 = vpop.f32.mrf.mxu1 }
 0x21b   : > { %4823 = vmatpush.bf16.msrb.mxu1 %v4366_v47  ;;  %v4382_v18 = vpack.c.bf16 %v3753_v9, %v3752_v8  ;;  %v3703_v19 = vcvt.s32.f32 %v3031_v10  ;;  %v3718_v23 = vcvt.s32.f32 %v3046_v11  ;;  %v3063_v61 = vunpack.c.3.s8 %v2844_v38  ;;  %v4688_v9 = vld [vmem:[#allocation1 + $0x1b] sm:$0xff] }
 0x21c   : > { %4836 = vmatpush.bf16.msrb.mxu2 %v4374_v32  ;;  %v3719_v24 = vcvt.s32.f32 %v3047_v13  ;;  %v3734_v25 = vcvt.s32.f32 %v3062_v14  ;;  %v3078_v63 = vunpack.c.2.s8 %v2848_v12  ;;  %v3079_v29 = vunpack.c.3.s8 %v2848_v12 }
 0x21d   : > { %4849 = vmatpush.bf16.msrb.mxu3 %v4382_v18  ;;  %v4357_v15 = vpack.c.bf16 %v3703_v19, %v3702_v57  ;;  %v3735_v6 = vcvt.s32.f32 %v3063_v61  ;;  %v3028_v33 = vunpack.c.0.s8 %v2836_v59  ;;  %v3029_v16 = vunpack.c.1.s8 %v2836_v59  ;;  %v2863_v59 = vld [vmem:[%s5907_s12 + $0x658] sm:$0xff] }
 0x21e   : > { %v4365_v35 = vpack.c.bf16 %v3719_v24, %v3718_v23  ;;  %v3750_v54 = vcvt.s32.f32 %v3078_v63  ;;  %v3751_v36 = vcvt.s32.f32 %v3079_v29  ;;  %v3044_v37 = vunpack.c.0.s8 %v2840_v0  ;;  %v4689_v57 = vld [vmem:[#allocation1 + $0x24] sm:$0xff]  ;;  %v4690_v23 = vld [vmem:[#allocation1 + $0x2d] sm:$0xff] }
 0x21f   : > { %4811 = vmatpush.bf16.msrb.mxu0 %v4357_v15  ;;  %v4373_v42 = vpack.c.bf16 %v3735_v6, %v3734_v25  ;;  %v3700_v4 = vcvt.s32.f32 %v3028_v33  ;;  %v3701_v21 = vcvt.s32.f32 %v3029_v16  ;;  %v3045_v51 = vunpack.c.1.s8 %v2840_v0  ;;  %v2867_v0 = vld [vmem:[%s5907_s12 + $0x678] sm:$0xff]  ;;  %v2854_v16 = vld [vmem:[%s5907_s12 + $0x610] sm:$0xff] }
 0x220   : > { %4824 = vmatpush.bf16.msrb.mxu1 %v4365_v35  ;;  %v4381_v30 = vpack.c.bf16 %v3751_v36, %v3750_v54  ;;  %v3716_v44 = vcvt.s32.f32 %v3044_v37  ;;  %v3060_v27 = vunpack.c.0.s8 %v2844_v38  ;;  %v3061_v45 = vunpack.c.1.s8 %v2844_v38  ;;  %v2681_v35 = vpop.f32.mrf.mxu2  ;;  %v2694_v54 = vpop.f32.mrf.mxu3 }
 0x221   : > { %4837 = vmatpush.bf16.msrb.mxu2 %v4373_v42  ;;  %v4356_v46 = vpack.c.bf16 %v3701_v21, %v3700_v4  ;;  %v3717_v28 = vcvt.s32.f32 %v3045_v51  ;;  %v3076_v52 = vunpack.c.0.s8 %v2848_v12  ;;  %v3077_v53 = vunpack.c.1.s8 %v2848_v12  ;;  %v2858_v4 = vld [vmem:[%s5907_s12 + $0x630] sm:$0xff]  ;;  %v2861_v54 = vld [vmem:[%s5907_s12 + $0x648] sm:$0xff] }
 0x222   : > { %4850 = vmatpush.bf16.msrb.mxu3 %v4381_v30  ;;  %v3732_v55 = vcvt.s32.f32 %v3060_v27  ;;  %v3733_v56 = vcvt.s32.f32 %v3061_v45  ;;  %v3106_v40 = vunpack.c.2.s8 %v2855_v22  ;;  %v3107_v58 = vunpack.c.3.s8 %v2855_v22 }
 0x223   : > { %4812 = vmatpush.bf16.msrb.mxu0 %v4356_v46  ;;  %v4364_v48 = vpack.c.bf16 %v3717_v28, %v3716_v44  ;;  %v3748_v31 = vcvt.s32.f32 %v3076_v52  ;;  %v3749_v43 = vcvt.s32.f32 %v3077_v53  ;;  %v3122_v60 = vunpack.c.2.s8 %v6316_v26  ;;  %v6330_v44 = vld [vmem:[#allocation1 + $0x3f] sm:$0xff] }
 0x224   : > { %v4372_v3 = vpack.c.bf16 %v3733_v56, %v3732_v55  ;;  %v3778_v39 = vcvt.s32.f32 %v3106_v40  ;;  %v3779_v38 = vcvt.s32.f32 %v3107_v58  ;;  %v3123_v5 = vunpack.c.3.s8 %v6316_v26  ;;  %v2862_v28 = vld [vmem:[%s5907_s12 + $0x650] sm:$0xff] }
 0x225   : > { %4825 = vmatpush.bf16.msrb.mxu1 %v4364_v48  ;;  %v4380_v7 = vpack.c.bf16 %v3749_v43, %v3748_v31  ;;  %v3794_v8 = vcvt.s32.f32 %v3122_v60  ;;  %v3138_v50 = vunpack.c.2.s8 %v2863_v59  ;;  %v3139_v47 = vunpack.c.3.s8 %v2863_v59  ;;  %v2866_v40 = vld [vmem:[%s5907_s12 + $0x670] sm:$0xff]  ;;  %v4678_v43 = vld [vmem:[%s5925_s26 + $0x32] sm:$0xff] }
 0x226   : > { %4838 = vmatpush.bf16.msrb.mxu2 %v4372_v3  ;;  %v4395_v10 = vpack.c.bf16 %v3779_v38, %v3778_v39  ;;  %v3795_v11 = vcvt.s32.f32 %v3123_v5  ;;  %v3154_v12 = vunpack.c.2.s8 %v2867_v0  ;;  %v3155_v32 = vunpack.c.3.s8 %v2867_v0  ;;  %4813 = vmatmul.bf16.vlgmr.msrb.gmra.mxu0 %v4687_v49  ;;  %v6335_v60 = vld [vmem:[#allocation1 + $0x36] sm:$0xff] }
 0x227   : > { %4851 = vmatpush.bf16.msrb.mxu3 %v4380_v7  ;;  %v3810_v13 = vcvt.s32.f32 %v3138_v50  ;;  %v3811_v14 = vcvt.s32.f32 %v3139_v47  ;;  %v3104_v18 = vunpack.c.0.s8 %v2855_v22  ;;  %v3105_v19 = vunpack.c.1.s8 %v2855_v22  ;;  %4694 = vst [vmem:[#allocation1] ss:$9 sm:$0xff] %v4678_v43 }
 0x228   : > { %4857 = vmatpush.bf16.msra.mxu0 %v4395_v10  ;;  %v4403_v61 = vpack.c.bf16 %v3795_v11, %v3794_v8  ;;  %v3826_v24 = vcvt.s32.f32 %v3154_v12  ;;  %v3827_v25 = vcvt.s32.f32 %v3155_v32  ;;  %v3120_v63 = vunpack.c.0.s8 %v6316_v26  ;;  %4826 = vmatmul.bf16.vlgmr.msrb.gmra.mxu1 %v4688_v9 }
 0x229   : > { %v4411_v29 = vpack.c.bf16 %v3811_v14, %v3810_v13  ;;  %v3776_v15 = vcvt.s32.f32 %v3104_v18  ;;  %v3777_v6 = vcvt.s32.f32 %v3105_v19  ;;  %v3121_v33 = vunpack.c.1.s8 %v6316_v26  ;;  %4839 = vmatmul.bf16.vlgmr.msrb.gmra.mxu2 %v4689_v57 }
 0x22a   : > { %4870 = vmatpush.bf16.msra.mxu1 %v4403_v61  ;;  %v4419_v36 = vpack.c.bf16 %v3827_v25, %v3826_v24  ;;  %v3792_v37 = vcvt.s32.f32 %v3120_v63  ;;  %v3136_v41 = vunpack.c.0.s8 %v2863_v59  ;;  %v3137_v42 = vunpack.c.1.s8 %v2863_v59  ;;  %4852 = vmatmul.bf16.vlgmr.msrb.gmra.mxu3 %v4690_v23  ;;  %v2853_v25 = vld [vmem:[%s5907_s12 + $0x608] sm:$0xff] }
 0x22b   : > { %4883 = vmatpush.bf16.msra.mxu2 %v4411_v29  ;;  %v4394_v21 = vpack.c.bf16 %v3777_v6, %v3776_v15  ;;  %v3793_v51 = vcvt.s32.f32 %v3121_v33  ;;  %v3152_v22 = vunpack.c.0.s8 %v2867_v0  ;;  %v3153_v30 = vunpack.c.1.s8 %v2867_v0  ;;  %v2857_v15 = vld [vmem:[%s5907_s12 + $0x628] sm:$0xff] }
 0x22c   : > { %4896 = vmatpush.bf16.msra.mxu3 %v4419_v36  ;;  %v3808_v27 = vcvt.s32.f32 %v3136_v41  ;;  %v3809_v45 = vcvt.s32.f32 %v3137_v42  ;;  %v3102_v26 = vunpack.c.2.s8 %v2854_v16  ;;  %v3103_v46 = vunpack.c.3.s8 %v2854_v16 }
 0x22d   : > { %4858 = vmatpush.bf16.msra.mxu0 %v4394_v21  ;;  %v4402_v52 = vpack.c.bf16 %v3793_v51, %v3792_v37  ;;  %v3824_v53 = vcvt.s32.f32 %v3152_v22  ;;  %v3825_v55 = vcvt.s32.f32 %v3153_v30  ;;  %v3118_v56 = vunpack.c.2.s8 %v2858_v4 }
 0x22e   : > { %v4410_v58 = vpack.c.bf16 %v3809_v45, %v3808_v27  ;;  %v3774_v59 = vcvt.s32.f32 %v3102_v26  ;;  %v3775_v48 = vcvt.s32.f32 %v3103_v46  ;;  %v3119_v31 = vunpack.c.3.s8 %v2858_v4 }
 0x22f   : > { %4871 = vmatpush.bf16.msra.mxu1 %v4402_v52  ;;  %v4418_v0 = vpack.c.bf16 %v3825_v55, %v3824_v53  ;;  %v3790_v49 = vcvt.s32.f32 %v3118_v56  ;;  %v3134_v2 = vunpack.c.2.s8 %v2862_v28  ;;  %v3135_v3 = vunpack.c.3.s8 %v2862_v28 }
 0x230   : > { %4884 = vmatpush.bf16.msra.mxu2 %v4410_v58  ;;  %v4393_v39 = vpack.c.bf16 %v3775_v48, %v3774_v59  ;;  %v3791_v38 = vcvt.s32.f32 %v3119_v31  ;;  %v3150_v5 = vunpack.c.2.s8 %v2866_v40  ;;  %v3151_v7 = vunpack.c.3.s8 %v2866_v40 }
 0x231   : > { %4897 = vmatpush.bf16.msra.mxu3 %v4418_v0  ;;  %v3806_v8 = vcvt.s32.f32 %v3134_v2  ;;  %v3807_v50 = vcvt.s32.f32 %v3135_v3  ;;  %v2654_v47 = vadd.f32 %v6308_v1, %v6304_v62  ;;  %v3100_v9 = vunpack.c.0.s8 %v2854_v16 }
 0x232   : > { %4859 = vmatpush.bf16.msra.mxu0 %v4393_v39  ;;  %v4401_v10 = vpack.c.bf16 %v3791_v38, %v3790_v49  ;;  %v3822_v11 = vcvt.s32.f32 %v3150_v5  ;;  %v3823_v12 = vcvt.s32.f32 %v3151_v7  ;;  %v3101_v32 = vunpack.c.1.s8 %v2854_v16 }
 0x233   : > { %v4409_v57 = vpack.c.bf16 %v3807_v50, %v3806_v8  ;;  %v3772_v13 = vcvt.s32.f32 %v3100_v9  ;;  %v3116_v14 = vunpack.c.0.s8 %v2858_v4  ;;  %v3117_v18 = vunpack.c.1.s8 %v2858_v4  ;;  %v2865_v4 = vld [vmem:[%s5907_s12 + $0x668] sm:$0xff]  ;;  %v2852_v8 = vld [vmem:[%s5907_s12 + $0x600] sm:$0xff] }
 0x234   : > { %4872 = vmatpush.bf16.msra.mxu1 %v4401_v10  ;;  %v4417_v19 = vpack.c.bf16 %v3823_v12, %v3822_v11  ;;  %v3773_v23 = vcvt.s32.f32 %v3101_v32  ;;  %v3132_v61 = vunpack.c.0.s8 %v2862_v28  ;;  %v3133_v24 = vunpack.c.1.s8 %v2862_v28  ;;  %v2856_v10 = vld [vmem:[%s5907_s12 + $0x620] sm:$0xff]  ;;  %v6350_v11 = vpop.f32.mrf.mxu0 }
 0x235   : > { %4885 = vmatpush.bf16.msra.mxu2 %v4409_v57  ;;  %v3788_v62 = vcvt.s32.f32 %v3116_v14  ;;  %v3789_v1 = vcvt.s32.f32 %v3117_v18  ;;  %v3148_v63 = vunpack.c.0.s8 %v2866_v40  ;;  %v3149_v29 = vunpack.c.1.s8 %v2866_v40 }
 0x236   : > { %4898 = vmatpush.bf16.msra.mxu3 %v4417_v19  ;;  %v4392_v6 = vpack.c.bf16 %v3773_v23, %v3772_v13  ;;  %v3804_v33 = vcvt.s32.f32 %v3132_v61  ;;  %v3805_v16 = vcvt.s32.f32 %v3133_v24  ;;  %v2667_v35 = vadd.f32 %v6312_v17, %v2654_v47  ;;  %v2860_v13 = vld [vmem:[%s5907_s12 + $0x640] sm:$0xff] }
 0x237   : > { %v4400_v36 = vpack.c.bf16 %v3789_v1, %v3788_v62  ;;  %v3820_v37 = vcvt.s32.f32 %v3148_v63  ;;  %v3821_v41 = vcvt.s32.f32 %v3149_v29  ;;  %v3098_v42 = vunpack.c.2.s8 %v2853_v25  ;;  %v2864_v1 = vld [vmem:[%s5907_s12 + $0x660] sm:$0xff] }
 0x238   : > { %4860 = vmatpush.bf16.msra.mxu0 %v4392_v6  ;;  %v4408_v21 = vpack.c.bf16 %v3805_v16, %v3804_v33  ;;  %v3099_v51 = vunpack.c.3.s8 %v2853_v25  ;;  %v3114_v22 = vunpack.c.2.s8 %v2857_v15  ;;  %v3115_v30 = vunpack.c.3.s8 %v2857_v15 }
 0x239   : > { %4873 = vmatpush.bf16.msra.mxu1 %v4400_v36  ;;  %v4416_v27 = vpack.c.bf16 %v3821_v41, %v3820_v37  ;;  %v3770_v45 = vcvt.s32.f32 %v3098_v42  ;;  %v3130_v26 = vunpack.c.2.s8 %v2861_v54  ;;  %v3131_v46 = vunpack.c.3.s8 %v2861_v54  ;;  %v6354_v36 = vpop.f32.mrf.mxu1 }
 0x23a   : > { %4886 = vmatpush.bf16.msra.mxu2 %v4408_v21  ;;  %v3771_v28 = vcvt.s32.f32 %v3099_v51  ;;  %v3786_v52 = vcvt.s32.f32 %v3114_v22  ;;  %v3787_v17 = vcvt.s32.f32 %v3115_v30  ;;  %v3146_v53 = vunpack.c.2.s8 %v2865_v4 }
 0x23b   : > { %4899 = vmatpush.bf16.msra.mxu3 %v4416_v27  ;;  %v3802_v55 = vcvt.s32.f32 %v3130_v26  ;;  %v3803_v56 = vcvt.s32.f32 %v3131_v46  ;;  %v3147_v40 = vunpack.c.3.s8 %v2865_v4  ;;  %v2680_v58 = vadd.f32 %v6318_v20, %v2667_v35 }
 0x23c   : > { %v4391_v59 = vpack.c.bf16 %v3771_v28, %v3770_v45  ;;  %v4399_v48 = vpack.c.bf16 %v3787_v17, %v3786_v52  ;;  %v3818_v31 = vcvt.s32.f32 %v3146_v53  ;;  %v3096_v43 = vunpack.c.0.s8 %v2853_v25  ;;  %v2707_v28 = vpop.f32.mrf.mxu0 }
 0x23d   : > { %v4407_v0 = vpack.c.bf16 %v3803_v56, %v3802_v55  ;;  %v3819_v49 = vcvt.s32.f32 %v3147_v40  ;;  %v6346_v2 = vadd.f32 %v6320_v34, %v2680_v58  ;;  %v3097_v3 = vunpack.c.1.s8 %v2853_v25  ;;  %v2871_v56 = vld [vmem:[%s5907_s12 + $0x698] sm:$0xff] }
 0x23e   : > { %4861 = vmatpush.bf16.msra.mxu0 %v4391_v59  ;;  %4874 = vmatpush.bf16.msra.mxu1 %v4399_v48  ;;  %v3768_v39 = vcvt.s32.f32 %v3096_v43  ;;  %v3112_v38 = vunpack.c.0.s8 %v2857_v15  ;;  %v3113_v5 = vunpack.c.1.s8 %v2857_v15  ;;  %v3128_v7 = vunpack.c.0.s8 %v2861_v54 }
 0x23f   : > { %4887 = vmatpush.bf16.msra.mxu2 %v4407_v0  ;;  %v4415_v20 = vpack.c.bf16 %v3819_v49, %v3818_v31  ;;  %v3769_v50 = vcvt.s32.f32 %v3097_v3  ;;  %v3129_v47 = vunpack.c.1.s8 %v2861_v54  ;;  %v3144_v9 = vunpack.c.0.s8 %v2865_v4  ;;  %v6358_v31 = vld [vmem:[%s5907_s12 + $0x6b8] sm:$0xff] }
 0x240   : > { %v3784_v34 = vcvt.s32.f32 %v3112_v38  ;;  %v3785_v12 = vcvt.s32.f32 %v3113_v5  ;;  %v3800_v32 = vcvt.s32.f32 %v3128_v7  ;;  %v3145_v57 = vunpack.c.1.s8 %v2865_v4  ;;  %v6362_v38 = vpop.f32.mrf.mxu3 }
 0x241   : > { %4900 = vmatpush.bf16.msra.mxu3 %v4415_v20  ;;  %v4390_v14 = vpack.c.bf16 %v3769_v50, %v3768_v39  ;;  %v3801_v18 = vcvt.s32.f32 %v3129_v47  ;;  %v3816_v19 = vcvt.s32.f32 %v3144_v9  ;;  %v3094_v23 = vunpack.c.2.s8 %v2852_v8  ;;  %v6360_v39 = vpop.f32.mrf.mxu2  ;;  %v2879_v50 = vld [vmem:[%s5907_s12 + $0x6d8] sm:$0xff] }
 0x242   : > { %v4398_v61 = vpack.c.bf16 %v3785_v12, %v3784_v34  ;;  %v3817_v24 = vcvt.s32.f32 %v3145_v57  ;;  %v3095_v25 = vunpack.c.3.s8 %v2852_v8  ;;  %v3110_v62 = vunpack.c.2.s8 %v2856_v10  ;;  %v2883_v12 = vld [vmem:[%s5907_s12 + $0x6f8] sm:$0xff] }
 0x243   : > { %4862 = vmatpush.bf16.msra.mxu0 %v4390_v14  ;;  %v4406_v63 = vpack.c.bf16 %v3801_v18, %v3800_v32  ;;  %v3766_v29 = vcvt.s32.f32 %v3094_v23  ;;  %v3111_v15 = vunpack.c.3.s8 %v2856_v10  ;;  %v3126_v6 = vunpack.c.2.s8 %v2860_v13  ;;  %v2720_v32 = vpop.f32.mrf.mxu1 }
 0x244   : > { %4875 = vmatpush.bf16.msra.mxu1 %v4398_v61  ;;  %v4414_v33 = vpack.c.bf16 %v3817_v24, %v3816_v19  ;;  %v3767_v16 = vcvt.s32.f32 %v3095_v25  ;;  %v3782_v35 = vcvt.s32.f32 %v3110_v62  ;;  %v3127_v54 = vunpack.c.3.s8 %v2860_v13 }
 0x245   : > { %4888 = vmatpush.bf16.msra.mxu2 %v4406_v63  ;;  %v3783_v37 = vcvt.s32.f32 %v3111_v15  ;;  %v3798_v41 = vcvt.s32.f32 %v3126_v6  ;;  %v3142_v42 = vunpack.c.2.s8 %v2864_v1  ;;  %v3143_v4 = vunpack.c.3.s8 %v2864_v1 }
 0x246   : > { %4901 = vmatpush.bf16.msra.mxu3 %v4414_v33  ;;  %v4389_v21 = vpack.c.bf16 %v3767_v16, %v3766_v29  ;;  %v3799_v51 = vcvt.s32.f32 %v3127_v54  ;;  %v3092_v22 = vunpack.c.0.s8 %v2852_v8  ;;  %v3093_v30 = vunpack.c.1.s8 %v2852_v8  ;;  %v4695_v29 = vld [vmem:[#allocation1] sm:$0xff]  ;;  %v4696_v33 = vld [vmem:[#allocation1 + $0x9] sm:$0xff] }
 0x247   : > { %v4397_v27 = vpack.c.bf16 %v3783_v37, %v3782_v35  ;;  %v3814_v45 = vcvt.s32.f32 %v3142_v42  ;;  %v3815_v26 = vcvt.s32.f32 %v3143_v4  ;;  %v3108_v46 = vunpack.c.0.s8 %v2856_v10 }
 0x248   : > { %4863 = vmatpush.bf16.msra.mxu0 %v4389_v21  ;;  %v4405_v52 = vpack.c.bf16 %v3799_v51, %v3798_v41  ;;  %v3764_v17 = vcvt.s32.f32 %v3092_v22  ;;  %v3765_v53 = vcvt.s32.f32 %v3093_v30  ;;  %v3109_v55 = vunpack.c.1.s8 %v2856_v10  ;;  %v2870_v22 = vld [vmem:[%s5907_s12 + $0x690] sm:$0xff] }
 0x249   : > { %4876 = vmatpush.bf16.msra.mxu1 %v4397_v27  ;;  %v4413_v40 = vpack.c.bf16 %v3815_v26, %v3814_v45  ;;  %v3780_v58 = vcvt.s32.f32 %v3108_v46  ;;  %v3124_v59 = vunpack.c.0.s8 %v2860_v13  ;;  %v3125_v48 = vunpack.c.1.s8 %v2860_v13  ;;  %v2733_v30 = vpop.f32.mrf.mxu2  ;;  %v2746_v27 = vpop.f32.mrf.mxu3 }
 0x24a   : > { %4889 = vmatpush.bf16.msra.mxu2 %v4405_v52  ;;  %v4388_v43 = vpack.c.bf16 %v3765_v53, %v3764_v17  ;;  %v3781_v0 = vcvt.s32.f32 %v3109_v55  ;;  %v3140_v49 = vunpack.c.0.s8 %v2864_v1  ;;  %v3141_v3 = vunpack.c.1.s8 %v2864_v1 }
 0x24b   : > { %4902 = vmatpush.bf16.msra.mxu3 %v4413_v40  ;;  %v3796_v5 = vcvt.s32.f32 %v3124_v59  ;;  %v3797_v7 = vcvt.s32.f32 %v3125_v48  ;;  %v3170_v8 = vunpack.c.2.s8 %v2871_v56  ;;  %v3171_v20 = vunpack.c.3.s8 %v2871_v56  ;;  %v2878_v48 = vld [vmem:[%s5907_s12 + $0x6d0] sm:$0xff] }
 0x24c   : > { %4864 = vmatpush.bf16.msra.mxu0 %v4388_v43  ;;  %v4396_v47 = vpack.c.bf16 %v3781_v0, %v3780_v58  ;;  %v3812_v9 = vcvt.s32.f32 %v3140_v49  ;;  %v3813_v10 = vcvt.s32.f32 %v3141_v3  ;;  %v3186_v34 = vunpack.c.2.s8 %v6358_v31  ;;  %v2882_v3 = vld [vmem:[%s5907_s12 + $0x6f0] sm:$0xff] }
 0x24d   : > { %v4404_v57 = vpack.c.bf16 %v3797_v7, %v3796_v5  ;;  %v3842_v13 = vcvt.s32.f32 %v3170_v8  ;;  %v3843_v14 = vcvt.s32.f32 %v3171_v20  ;;  %v3187_v18 = vunpack.c.3.s8 %v6358_v31 }
 0x24e   : > { %4877 = vmatpush.bf16.msra.mxu1 %v4396_v47  ;;  %v4412_v19 = vpack.c.bf16 %v3813_v10, %v3812_v9  ;;  %v3858_v23 = vcvt.s32.f32 %v3186_v34  ;;  %v3202_v61 = vunpack.c.2.s8 %v2879_v50  ;;  %v3203_v24 = vunpack.c.3.s8 %v2879_v50 }
 0x24f   : > { %4890 = vmatpush.bf16.msra.mxu2 %v4404_v57  ;;  %v4427_v25 = vpack.c.bf16 %v3843_v14, %v3842_v13  ;;  %v3859_v62 = vcvt.s32.f32 %v3187_v18  ;;  %v3218_v1 = vunpack.c.2.s8 %v2883_v12  ;;  %v3219_v63 = vunpack.c.3.s8 %v2883_v12  ;;  %4865 = vmatmul.bf16.vlgmr.msra.gmra.mxu0 %v6335_v60 }
 0x250   : > { %4903 = vmatpush.bf16.msra.mxu3 %v4412_v19  ;;  %v3874_v15 = vcvt.s32.f32 %v3202_v61  ;;  %v3875_v6 = vcvt.s32.f32 %v3203_v24  ;;  %v3168_v16 = vunpack.c.0.s8 %v2871_v56  ;;  %v3169_v35 = vunpack.c.1.s8 %v2871_v56 }
 0x251   : > { %4909 = vmatpush.bf16.msrb.mxu0 %v4427_v25  ;;  %v4435_v54 = vpack.c.bf16 %v3859_v62, %v3858_v23  ;;  %v3890_v37 = vcvt.s32.f32 %v3218_v1  ;;  %v3891_v41 = vcvt.s32.f32 %v3219_v63  ;;  %4878 = vmatmul.bf16.vlgmr.msra.gmra.mxu1 %v6330_v44  ;;  %v3184_v42 = vunpack.c.0.s8 %v6358_v31  ;;  %v2874_v44 = vld [vmem:[%s5907_s12 + $0x6b0] sm:$0xff] }
 0x252   : > { %v4443_v4 = vpack.c.bf16 %v3875_v6, %v3874_v15  ;;  %4891 = vmatmul.bf16.vlgmr.msra.gmra.mxu2 %v4695_v29  ;;  %v3840_v60 = vcvt.s32.f32 %v3168_v16  ;;  %v3841_v21 = vcvt.s32.f32 %v3169_v35  ;;  %v3185_v51 = vunpack.c.1.s8 %v6358_v31  ;;  %v2869_v35 = vld [vmem:[%s5907_s12 + $0x688] sm:$0xff] }
 0x253   : > { %4922 = vmatpush.bf16.msrb.mxu1 %v4435_v54  ;;  %v4451_v45 = vpack.c.bf16 %v3891_v41, %v3890_v37  ;;  %4904 = vmatmul.bf16.vlgmr.msra.gmra.mxu3 %v4696_v33  ;;  %v3856_v26 = vcvt.s32.f32 %v3184_v42  ;;  %v3200_v46 = vunpack.c.0.s8 %v2879_v50  ;;  %v3201_v28 = vunpack.c.1.s8 %v2879_v50  ;;  %v2873_v41 = vld [vmem:[%s5907_s12 + $0x6a8] sm:$0xff] }
 0x254   : > { %4935 = vmatpush.bf16.msrb.mxu2 %v4443_v4  ;;  %v4426_v52 = vpack.c.bf16 %v3841_v21, %v3840_v60  ;;  %v3857_v17 = vcvt.s32.f32 %v3185_v51  ;;  %v3216_v53 = vunpack.c.0.s8 %v2883_v12  ;;  %v3217_v55 = vunpack.c.1.s8 %v2883_v12  ;;  %v2877_v51 = vld [vmem:[%s5907_s12 + $0x6c8] sm:$0xff] }
 0x255   : > { %4948 = vmatpush.bf16.msrb.mxu3 %v4451_v45  ;;  %v3872_v56 = vcvt.s32.f32 %v3200_v46  ;;  %v3873_v40 = vcvt.s32.f32 %v3201_v28  ;;  %v3166_v58 = vunpack.c.2.s8 %v2870_v22  ;;  %v3167_v59 = vunpack.c.3.s8 %v2870_v22 }
 0x256   : > { %4910 = vmatpush.bf16.msrb.mxu0 %v4426_v52  ;;  %v4434_v31 = vpack.c.bf16 %v3857_v17, %v3856_v26  ;;  %v3888_v43 = vcvt.s32.f32 %v3216_v53  ;;  %v3889_v0 = vcvt.s32.f32 %v3217_v55  ;;  %v3182_v49 = vunpack.c.2.s8 %v2874_v44  ;;  %v2881_v26 = vld [vmem:[%s5907_s12 + $0x6e8] sm:$0xff] }
 0x257   : > { %v4442_v5 = vpack.c.bf16 %v3873_v40, %v3872_v56  ;;  %v3838_v7 = vcvt.s32.f32 %v3166_v58  ;;  %v3839_v8 = vcvt.s32.f32 %v3167_v59  ;;  %v3183_v20 = vunpack.c.3.s8 %v2874_v44 }
 0x258   : > { %4923 = vmatpush.bf16.msrb.mxu1 %v4434_v31  ;;  %v4450_v50 = vpack.c.bf16 %v3889_v0, %v3888_v43  ;;  %v3854_v47 = vcvt.s32.f32 %v3182_v49  ;;  %v3198_v9 = vunpack.c.2.s8 %v2878_v48  ;;  %v3199_v10 = vunpack.c.3.s8 %v2878_v48 }
 0x259   : > { %4936 = vmatpush.bf16.msrb.mxu2 %v4442_v5  ;;  %v4425_v34 = vpack.c.bf16 %v3839_v8, %v3838_v7  ;;  %v3855_v12 = vcvt.s32.f32 %v3183_v20  ;;  %v3214_v32 = vunpack.c.2.s8 %v2882_v3  ;;  %v3215_v57 = vunpack.c.3.s8 %v2882_v3 }
 0x25a   : > { %4949 = vmatpush.bf16.msrb.mxu3 %v4450_v50  ;;  %v3870_v13 = vcvt.s32.f32 %v3198_v9  ;;  %v3871_v14 = vcvt.s32.f32 %v3199_v10  ;;  %v2706_v18 = vadd.f32 %v6350_v11, %v6346_v2  ;;  %v3164_v19 = vunpack.c.0.s8 %v2870_v22 }
 0x25b   : > { %4911 = vmatpush.bf16.msrb.mxu0 %v4425_v34  ;;  %v4433_v23 = vpack.c.bf16 %v3855_v12, %v3854_v47  ;;  %v3886_v61 = vcvt.s32.f32 %v3214_v32  ;;  %v3887_v24 = vcvt.s32.f32 %v3215_v57  ;;  %v3165_v25 = vunpack.c.1.s8 %v2870_v22  ;;  %v2868_v32 = vld [vmem:[%s5907_s12 + $0x680] sm:$0xff] }
 0x25c   : > { %v4441_v62 = vpack.c.bf16 %v3871_v14, %v3870_v13  ;;  %v3836_v1 = vcvt.s32.f32 %v3164_v19  ;;  %v3180_v63 = vunpack.c.0.s8 %v2874_v44  ;;  %v3181_v29 = vunpack.c.1.s8 %v2874_v44  ;;  %v6389_v19 = vpop.f32.mrf.mxu0 }
 0x25d   : > { %4924 = vmatpush.bf16.msrb.mxu1 %v4433_v23  ;;  %v4449_v15 = vpack.c.bf16 %v3887_v24, %v3886_v61  ;;  %v3837_v6 = vcvt.s32.f32 %v3165_v25  ;;  %v3196_v33 = vunpack.c.0.s8 %v2878_v48  ;;  %v3197_v16 = vunpack.c.1.s8 %v2878_v48  ;;  %v2876_v25 = vld [vmem:[%s5907_s12 + $0x6c0] sm:$0xff] }
 0x25e   : > { %4937 = vmatpush.bf16.msrb.mxu2 %v4441_v62  ;;  %v3852_v2 = vcvt.s32.f32 %v3180_v63  ;;  %v3853_v11 = vcvt.s32.f32 %v3181_v29  ;;  %v3212_v54 = vunpack.c.0.s8 %v2882_v3  ;;  %v3213_v37 = vunpack.c.1.s8 %v2882_v3 }
 0x25f   : > { %4950 = vmatpush.bf16.msrb.mxu3 %v4449_v15  ;;  %v4424_v42 = vpack.c.bf16 %v3837_v6, %v3836_v1  ;;  %v3868_v4 = vcvt.s32.f32 %v3196_v33  ;;  %v3869_v60 = vcvt.s32.f32 %v3197_v16  ;;  %v2719_v21 = vadd.f32 %v6354_v36, %v2706_v18  ;;  %v2872_v18 = vld [vmem:[%s5907_s12 + $0x6a0] sm:$0xff] }
 0x260   : > { %v4432_v22 = vpack.c.bf16 %v3853_v11, %v3852_v2  ;;  %v3884_v30 = vcvt.s32.f32 %v3212_v54  ;;  %v3885_v27 = vcvt.s32.f32 %v3213_v37  ;;  %v3162_v45 = vunpack.c.2.s8 %v2869_v35 }
 0x261   : > { %4912 = vmatpush.bf16.msrb.mxu0 %v4424_v42  ;;  %v4440_v46 = vpack.c.bf16 %v3869_v60, %v3868_v4  ;;  %v3163_v28 = vunpack.c.3.s8 %v2869_v35  ;;  %v3178_v44 = vunpack.c.2.s8 %v2873_v41  ;;  %v3179_v52 = vunpack.c.3.s8 %v2873_v41 }
 0x262   : > { %4925 = vmatpush.bf16.msrb.mxu1 %v4432_v22  ;;  %v4448_v17 = vpack.c.bf16 %v3885_v27, %v3884_v30  ;;  %v3834_v53 = vcvt.s32.f32 %v3162_v45  ;;  %v3194_v55 = vunpack.c.2.s8 %v2877_v51  ;;  %v3195_v56 = vunpack.c.3.s8 %v2877_v51 }
 0x263   : > { %4938 = vmatpush.bf16.msrb.mxu2 %v4440_v46  ;;  %v3835_v40 = vcvt.s32.f32 %v3163_v28  ;;  %v3850_v58 = vcvt.s32.f32 %v3178_v44  ;;  %v3851_v36 = vcvt.s32.f32 %v3179_v52  ;;  %v3210_v59 = vunpack.c.2.s8 %v2881_v26 }
 0x264   : > { %4951 = vmatpush.bf16.msrb.mxu3 %v4448_v17  ;;  %v3866_v48 = vcvt.s32.f32 %v3194_v55  ;;  %v3867_v31 = vcvt.s32.f32 %v3195_v56  ;;  %v3211_v43 = vunpack.c.3.s8 %v2881_v26  ;;  %v2732_v0 = vadd.f32 %v6360_v39, %v2719_v21  ;;  %v6393_v21 = vpop.f32.mrf.mxu1  ;;  %v2759_v55 = vpop.f32.mrf.mxu0 }
 0x265   : > { %v4423_v49 = vpack.c.bf16 %v3835_v40, %v3834_v53  ;;  %v4431_v3 = vpack.c.bf16 %v3851_v36, %v3850_v58  ;;  %v3882_v5 = vcvt.s32.f32 %v3210_v59  ;;  %v3160_v7 = vunpack.c.0.s8 %v2869_v35  ;;  %v2887_v59 = vld [vmem:[%s5907_s12 + $0x718] sm:$0xff] }
 0x266   : > { %v4439_v8 = vpack.c.bf16 %v3867_v31, %v3866_v48  ;;  %v3883_v20 = vcvt.s32.f32 %v3211_v43  ;;  %v6385_v50 = vadd.f32 %v6362_v38, %v2732_v0  ;;  %v3161_v47 = vunpack.c.1.s8 %v2869_v35  ;;  %v2880_v35 = vld [vmem:[%s5907_s12 + $0x6e0] sm:$0xff] }
 0x267   : > { %4913 = vmatpush.bf16.msrb.mxu0 %v4423_v49  ;;  %4926 = vmatpush.bf16.msrb.mxu1 %v4431_v3  ;;  %v3832_v9 = vcvt.s32.f32 %v3160_v7  ;;  %v3176_v10 = vunpack.c.0.s8 %v2873_v41  ;;  %v3177_v34 = vunpack.c.1.s8 %v2873_v41  ;;  %v3192_v12 = vunpack.c.0.s8 %v2877_v51  ;;  %v6397_v49 = vld [vmem:[%s5907_s12 + $0x738] sm:$0xff] }
 0x268   : > { %4939 = vmatpush.bf16.msrb.mxu2 %v4439_v8  ;;  %v4447_v39 = vpack.c.bf16 %v3883_v20, %v3882_v5  ;;  %v3833_v57 = vcvt.s32.f32 %v3161_v47  ;;  %v3193_v13 = vunpack.c.1.s8 %v2877_v51  ;;  %v3208_v14 = vunpack.c.0.s8 %v2881_v26  ;;  %v6399_v20 = vpop.f32.mrf.mxu2  ;;  %v6401_v47 = vpop.f32.mrf.mxu3 }
 0x269   : > { %v3848_v38 = vcvt.s32.f32 %v3176_v10  ;;  %v3849_v23 = vcvt.s32.f32 %v3177_v34  ;;  %v3864_v61 = vcvt.s32.f32 %v3192_v12  ;;  %v3209_v24 = vunpack.c.1.s8 %v2881_v26 }
 0x26a   : > { %4952 = vmatpush.bf16.msrb.mxu3 %v4447_v39  ;;  %v4422_v62 = vpack.c.bf16 %v3833_v57, %v3832_v9  ;;  %v3865_v1 = vcvt.s32.f32 %v3193_v13  ;;  %v3880_v63 = vcvt.s32.f32 %v3208_v14  ;;  %v3158_v29 = vunpack.c.2.s8 %v2868_v32 }
 0x26b   : > { %v4430_v15 = vpack.c.bf16 %v3849_v23, %v3848_v38  ;;  %v3881_v6 = vcvt.s32.f32 %v3209_v24  ;;  %v3159_v33 = vunpack.c.3.s8 %v2868_v32  ;;  %v3174_v16 = vunpack.c.2.s8 %v2872_v18  ;;  %v4697_v38 = vld [vmem:[#allocation1 + $0x12] sm:$0xff] }
 0x26c   : > { %4914 = vmatpush.bf16.msrb.mxu0 %v4422_v62  ;;  %v4438_v2 = vpack.c.bf16 %v3865_v1, %v3864_v61  ;;  %v3830_v11 = vcvt.s32.f32 %v3158_v29  ;;  %v3175_v54 = vunpack.c.3.s8 %v2872_v18  ;;  %v3190_v37 = vunpack.c.2.s8 %v2876_v25  ;;  %v2772_v23 = vpop.f32.mrf.mxu1 }
 0x26d   : > { %4927 = vmatpush.bf16.msrb.mxu1 %v4430_v15  ;;  %v4446_v41 = vpack.c.bf16 %v3881_v6, %v3880_v63  ;;  %v3831_v42 = vcvt.s32.f32 %v3159_v33  ;;  %v3846_v4 = vcvt.s32.f32 %v3174_v16  ;;  %v3191_v60 = vunpack.c.3.s8 %v2876_v25  ;;  %v4698_v6 = vld [vmem:[#allocation1 + $0x1b] sm:$0xff] }
 0x26e   : > { %4940 = vmatpush.bf16.msrb.mxu2 %v4438_v2  ;;  %v3847_v51 = vcvt.s32.f32 %v3175_v54  ;;  %v3862_v22 = vcvt.s32.f32 %v3190_v37  ;;  %v3206_v30 = vunpack.c.2.s8 %v2880_v35  ;;  %v3207_v27 = vunpack.c.3.s8 %v2880_v35 }
 0x26f   : > { %4953 = vmatpush.bf16.msrb.mxu3 %v4446_v41  ;;  %v4421_v45 = vpack.c.bf16 %v3831_v42, %v3830_v11  ;;  %v3863_v26 = vcvt.s32.f32 %v3191_v60  ;;  %v3156_v46 = vunpack.c.0.s8 %v2868_v32  ;;  %v3157_v28 = vunpack.c.1.s8 %v2868_v32  ;;  %v2895_v32 = vld [vmem:[%s5907_s12 + $0x758] sm:$0xff]  ;;  %v4700_v41 = vld [vmem:[#allocation1 + $0x2d] sm:$0xff] }
 0x270   : > { %v4429_v44 = vpack.c.bf16 %v3847_v51, %v3846_v4  ;;  %v3878_v52 = vcvt.s32.f32 %v3206_v30  ;;  %v3879_v17 = vcvt.s32.f32 %v3207_v27  ;;  %v3172_v53 = vunpack.c.0.s8 %v2872_v18  ;;  %v4699_v11 = vld [vmem:[#allocation1 + $0x24] sm:$0xff] }
 0x271   : > { %4915 = vmatpush.bf16.msrb.mxu0 %v4421_v45  ;;  %v4437_v56 = vpack.c.bf16 %v3863_v26, %v3862_v22  ;;  %v3828_v40 = vcvt.s32.f32 %v3156_v46  ;;  %v3829_v58 = vcvt.s32.f32 %v3157_v28  ;;  %v3173_v36 = vunpack.c.1.s8 %v2872_v18  ;;  %v2899_v18 = vld [vmem:[%s5907_s12 + $0x778] sm:$0xff]  ;;  %v2886_v28 = vld [vmem:[%s5907_s12 + $0x710] sm:$0xff] }
 0x272   : > { %4928 = vmatpush.bf16.msrb.mxu1 %v4429_v44  ;;  %v4445_v48 = vpack.c.bf16 %v3879_v17, %v3878_v52  ;;  %v3844_v31 = vcvt.s32.f32 %v3172_v53  ;;  %v3188_v43 = vunpack.c.0.s8 %v2876_v25  ;;  %v3189_v0 = vunpack.c.1.s8 %v2876_v25  ;;  %v2785_v44 = vpop.f32.mrf.mxu2  ;;  %v2798_v52 = vpop.f32.mrf.mxu3 }
 0x273   : > { %4941 = vmatpush.bf16.msrb.mxu2 %v4437_v56  ;;  %v4420_v3 = vpack.c.bf16 %v3829_v58, %v3828_v40  ;;  %v3845_v5 = vcvt.s32.f32 %v3173_v36  ;;  %v3204_v7 = vunpack.c.0.s8 %v2880_v35  ;;  %v3205_v8 = vunpack.c.1.s8 %v2880_v35  ;;  %v2890_v40 = vld [vmem:[%s5907_s12 + $0x730] sm:$0xff]  ;;  %v2893_v52 = vld [vmem:[%s5907_s12 + $0x748] sm:$0xff] }
 0x274   : > { %4954 = vmatpush.bf16.msrb.mxu3 %v4445_v48  ;;  %v3860_v9 = vcvt.s32.f32 %v3188_v43  ;;  %v3861_v10 = vcvt.s32.f32 %v3189_v0  ;;  %v3234_v34 = vunpack.c.2.s8 %v2887_v59  ;;  %v3235_v12 = vunpack.c.3.s8 %v2887_v59 }
 0x275   : > { %4916 = vmatpush.bf16.msrb.mxu0 %v4420_v3  ;;  %v4428_v39 = vpack.c.bf16 %v3845_v5, %v3844_v31  ;;  %v3876_v57 = vcvt.s32.f32 %v3204_v7  ;;  %v3877_v13 = vcvt.s32.f32 %v3205_v8  ;;  %v3250_v14 = vunpack.c.2.s8 %v6397_v49  ;;  %v6411_v31 = vld [vmem:[#allocation1 + $0x3f] sm:$0xff] }
 0x276   : > { %v4436_v61 = vpack.c.bf16 %v3861_v10, %v3860_v9  ;;  %v3906_v24 = vcvt.s32.f32 %v3234_v34  ;;  %v3907_v25 = vcvt.s32.f32 %v3235_v12  ;;  %v3251_v62 = vunpack.c.3.s8 %v6397_v49  ;;  %v2894_v5 = vld [vmem:[%s5907_s12 + $0x750] sm:$0xff] }
 0x277   : > { %4929 = vmatpush.bf16.msrb.mxu1 %v4428_v39  ;;  %v4444_v1 = vpack.c.bf16 %v3877_v13, %v3876_v57  ;;  %v3922_v63 = vcvt.s32.f32 %v3250_v14  ;;  %v3266_v29 = vunpack.c.2.s8 %v2895_v32  ;;  %v3267_v15 = vunpack.c.3.s8 %v2895_v32  ;;  %v2898_v34 = vld [vmem:[%s5907_s12 + $0x770] sm:$0xff] }
 0x278   : > { %4942 = vmatpush.bf16.msrb.mxu2 %v4436_v61  ;;  %v4459_v33 = vpack.c.bf16 %v3907_v25, %v3906_v24  ;;  %v3923_v16 = vcvt.s32.f32 %v3251_v62  ;;  %v3282_v35 = vunpack.c.2.s8 %v2899_v18  ;;  %v3283_v2 = vunpack.c.3.s8 %v2899_v18  ;;  %4917 = vmatmul.bf16.vlgmr.msrb.gmra.mxu0 %v4697_v38  ;;  %v4679_v13 = vld [vmem:[%s5925_s26 + $0x3a] sm:$0xff] }
 0x279   : > { %4955 = vmatpush.bf16.msrb.mxu3 %v4444_v1  ;;  %v3938_v54 = vcvt.s32.f32 %v3266_v29  ;;  %v3939_v37 = vcvt.s32.f32 %v3267_v15  ;;  %v3232_v42 = vunpack.c.0.s8 %v2887_v59  ;;  %v3233_v4 = vunpack.c.1.s8 %v2887_v59  ;;  %v6416_v14 = vld [vmem:[#allocation1 + $0x36] sm:$0xff] }
 0x27a   : > { %4961 = vmatpush.bf16.msra.mxu0 %v4459_v33  ;;  %v4467_v60 = vpack.c.bf16 %v3923_v16, %v3922_v63  ;;  %v3954_v51 = vcvt.s32.f32 %v3282_v35  ;;  %v3955_v22 = vcvt.s32.f32 %v3283_v2  ;;  %4930 = vmatmul.bf16.vlgmr.msrb.gmra.mxu1 %v4698_v6  ;;  %v3248_v30 = vunpack.c.0.s8 %v6397_v49  ;;  %4704 = vst [vmem:[#allocation1] ss:$9 sm:$0xff] %v4679_v13 }
 0x27b   : > { %v4475_v27 = vpack.c.bf16 %v3939_v37, %v3938_v54  ;;  %4943 = vmatmul.bf16.vlgmr.msrb.gmra.mxu2 %v4699_v11  ;;  %v3904_v45 = vcvt.s32.f32 %v3232_v42  ;;  %v3905_v26 = vcvt.s32.f32 %v3233_v4  ;;  %v3249_v46 = vunpack.c.1.s8 %v6397_v49 }
 0x27c   : > { %4974 = vmatpush.bf16.msra.mxu1 %v4467_v60  ;;  %v4483_v17 = vpack.c.bf16 %v3955_v22, %v3954_v51  ;;  %4956 = vmatmul.bf16.vlgmr.msrb.gmra.mxu3 %v4700_v41  ;;  %v3920_v53 = vcvt.s32.f32 %v3248_v30  ;;  %v3264_v55 = vunpack.c.0.s8 %v2895_v32  ;;  %v3265_v56 = vunpack.c.1.s8 %v2895_v32  ;;  %v2885_v22 = vld [vmem:[%s5907_s12 + $0x708] sm:$0xff] }
 0x27d   : > { %4987 = vmatpush.bf16.msra.mxu2 %v4475_v27  ;;  %v4458_v58 = vpack.c.bf16 %v3905_v26, %v3904_v45  ;;  %v3921_v36 = vcvt.s32.f32 %v3249_v46  ;;  %v3280_v59 = vunpack.c.0.s8 %v2899_v18  ;;  %v3281_v48 = vunpack.c.1.s8 %v2899_v18  ;;  %v2889_v45 = vld [vmem:[%s5907_s12 + $0x728] sm:$0xff] }
 0x27e   : > { %5000 = vmatpush.bf16.msra.mxu3 %v4483_v17  ;;  %v3936_v43 = vcvt.s32.f32 %v3264_v55  ;;  %v3937_v0 = vcvt.s32.f32 %v3265_v56  ;;  %v3230_v49 = vunpack.c.2.s8 %v2886_v28  ;;  %v3231_v3 = vunpack.c.3.s8 %v2886_v28 }
 0x27f   : > { %4962 = vmatpush.bf16.msra.mxu0 %v4458_v58  ;;  %v4466_v7 = vpack.c.bf16 %v3921_v36, %v3920_v53  ;;  %v3952_v8 = vcvt.s32.f32 %v3280_v59  ;;  %v3953_v9 = vcvt.s32.f32 %v3281_v48  ;;  %v3246_v10 = vunpack.c.2.s8 %v2890_v40 }
 0x280   : > { %v4474_v12 = vpack.c.bf16 %v3937_v0, %v3936_v43  ;;  %v3902_v32 = vcvt.s32.f32 %v3230_v49  ;;  %v3903_v39 = vcvt.s32.f32 %v3231_v3  ;;  %v3247_v57 = vunpack.c.3.s8 %v2890_v40 }
 0x281   : > { %4975 = vmatpush.bf16.msra.mxu1 %v4466_v7  ;;  %v4482_v18 = vpack.c.bf16 %v3953_v9, %v3952_v8  ;;  %v3918_v38 = vcvt.s32.f32 %v3246_v10  ;;  %v3262_v23 = vunpack.c.2.s8 %v2894_v5  ;;  %v3263_v61 = vunpack.c.3.s8 %v2894_v5 }
 0x282   : > { %4988 = vmatpush.bf16.msra.mxu2 %v4474_v12  ;;  %v4457_v24 = vpack.c.bf16 %v3903_v39, %v3902_v32  ;;  %v3919_v25 = vcvt.s32.f32 %v3247_v57  ;;  %v3278_v62 = vunpack.c.2.s8 %v2898_v34  ;;  %v3279_v1 = vunpack.c.3.s8 %v2898_v34 }
 0x283   : > { %5001 = vmatpush.bf16.msra.mxu3 %v4482_v18  ;;  %v3934_v63 = vcvt.s32.f32 %v3262_v23  ;;  %v3935_v29 = vcvt.s32.f32 %v3263_v61  ;;  %v2758_v15 = vadd.f32 %v6389_v19, %v6385_v50  ;;  %v3228_v6 = vunpack.c.0.s8 %v2886_v28 }
 0x284   : > { %4963 = vmatpush.bf16.msra.mxu0 %v4457_v24  ;;  %v4465_v33 = vpack.c.bf16 %v3919_v25, %v3918_v38  ;;  %v3950_v16 = vcvt.s32.f32 %v3278_v62  ;;  %v3951_v35 = vcvt.s32.f32 %v3279_v1  ;;  %v3229_v2 = vunpack.c.1.s8 %v2886_v28 }
 0x285   : > { %v4473_v11 = vpack.c.bf16 %v3935_v29, %v3934_v63  ;;  %v3900_v54 = vcvt.s32.f32 %v3228_v6  ;;  %v3244_v37 = vunpack.c.0.s8 %v2890_v40  ;;  %v3245_v41 = vunpack.c.1.s8 %v2890_v40  ;;  %v2897_v40 = vld [vmem:[%s5907_s12 + $0x768] sm:$0xff]  ;;  %v2884_v63 = vld [vmem:[%s5907_s12 + $0x700] sm:$0xff] }
 0x286   : > { %4976 = vmatpush.bf16.msra.mxu1 %v4465_v33  ;;  %v4481_v42 = vpack.c.bf16 %v3951_v35, %v3950_v16  ;;  %v3901_v4 = vcvt.s32.f32 %v3229_v2  ;;  %v3260_v60 = vunpack.c.0.s8 %v2894_v5  ;;  %v3261_v51 = vunpack.c.1.s8 %v2894_v5  ;;  %v2888_v33 = vld [vmem:[%s5907_s12 + $0x720] sm:$0xff]  ;;  %v6431_v16 = vpop.f32.mrf.mxu0 }
 0x287   : > { %4989 = vmatpush.bf16.msra.mxu2 %v4473_v11  ;;  %v3916_v50 = vcvt.s32.f32 %v3244_v37  ;;  %v3917_v19 = vcvt.s32.f32 %v3245_v41  ;;  %v3276_v30 = vunpack.c.0.s8 %v2898_v34  ;;  %v3277_v27 = vunpack.c.1.s8 %v2898_v34 }
 0x288   : > { %5002 = vmatpush.bf16.msra.mxu3 %v4481_v42  ;;  %v4456_v26 = vpack.c.bf16 %v3901_v4, %v3900_v54  ;;  %v3932_v46 = vcvt.s32.f32 %v3260_v60  ;;  %v3933_v28 = vcvt.s32.f32 %v3261_v51  ;;  %v2771_v44 = vadd.f32 %v6393_v21, %v2758_v15  ;;  %v2892_v54 = vld [vmem:[%s5907_s12 + $0x740] sm:$0xff] }
 0x289   : > { %v4464_v17 = vpack.c.bf16 %v3917_v19, %v3916_v50  ;;  %v3948_v53 = vcvt.s32.f32 %v3276_v30  ;;  %v3949_v55 = vcvt.s32.f32 %v3277_v27  ;;  %v3226_v56 = vunpack.c.2.s8 %v2885_v22  ;;  %v2896_v19 = vld [vmem:[%s5907_s12 + $0x760] sm:$0xff] }
 0x28a   : > { %4964 = vmatpush.bf16.msra.mxu0 %v4456_v26  ;;  %v4472_v58 = vpack.c.bf16 %v3933_v28, %v3932_v46  ;;  %v3227_v36 = vunpack.c.3.s8 %v2885_v22  ;;  %v3242_v59 = vunpack.c.2.s8 %v2889_v45  ;;  %v3243_v48 = vunpack.c.3.s8 %v2889_v45 }
 0x28b   : > { %4977 = vmatpush.bf16.msra.mxu1 %v4464_v17  ;;  %v4480_v43 = vpack.c.bf16 %v3949_v55, %v3948_v53  ;;  %v3898_v0 = vcvt.s32.f32 %v3226_v56  ;;  %v3258_v49 = vunpack.c.2.s8 %v2893_v52  ;;  %v3259_v3 = vunpack.c.3.s8 %v2893_v52  ;;  %v6435_v17 = vpop.f32.mrf.mxu1 }
 0x28c   : > { %4990 = vmatpush.bf16.msra.mxu2 %v4472_v58  ;;  %v3899_v5 = vcvt.s32.f32 %v3227_v36  ;;  %v3914_v7 = vcvt.s32.f32 %v3242_v59  ;;  %v3915_v21 = vcvt.s32.f32 %v3243_v48  ;;  %v3274_v8 = vunpack.c.2.s8 %v2897_v40 }
 0x28d   : > { %5003 = vmatpush.bf16.msra.mxu3 %v4480_v43  ;;  %v3930_v9 = vcvt.s32.f32 %v3258_v49  ;;  %v3931_v10 = vcvt.s32.f32 %v3259_v3  ;;  %v3275_v34 = vunpack.c.3.s8 %v2897_v40  ;;  %v2784_v12 = vadd.f32 %v6399_v20, %v2771_v44 }
 0x28e   : > { %v4455_v32 = vpack.c.bf16 %v3899_v5, %v3898_v0  ;;  %v4463_v39 = vpack.c.bf16 %v3915_v21, %v3914_v7  ;;  %v3946_v57 = vcvt.s32.f32 %v3274_v8  ;;  %v3224_v13 = vunpack.c.0.s8 %v2885_v22  ;;  %v2811_v5 = vpop.f32.mrf.mxu0 }
 0x28f   : > { %v4471_v18 = vpack.c.bf16 %v3931_v10, %v3930_v9  ;;  %v3947_v38 = vcvt.s32.f32 %v3275_v34  ;;  %v6427_v23 = vadd.f32 %v6401_v47, %v2784_v12  ;;  %v3225_v61 = vunpack.c.1.s8 %v2885_v22  ;;  %v2903_v10 = vld [vmem:[%s5907_s12 + $0x798] sm:$0xff] }
 0x290   : > { %4965 = vmatpush.bf16.msra.mxu0 %v4455_v32  ;;  %4978 = vmatpush.bf16.msra.mxu1 %v4463_v39  ;;  %v3896_v24 = vcvt.s32.f32 %v3224_v13  ;;  %v3240_v25 = vunpack.c.0.s8 %v2889_v45  ;;  %v3241_v62 = vunpack.c.1.s8 %v2889_v45  ;;  %v3256_v1 = vunpack.c.0.s8 %v2893_v52 }
 0x291   : > { %4991 = vmatpush.bf16.msra.mxu2 %v4471_v18  ;;  %v4479_v20 = vpack.c.bf16 %v3947_v38, %v3946_v57  ;;  %v3897_v29 = vcvt.s32.f32 %v3225_v61  ;;  %v3257_v15 = vunpack.c.1.s8 %v2893_v52  ;;  %v3272_v6 = vunpack.c.0.s8 %v2897_v40  ;;  %v2907_v57 = vld [vmem:[%s5907_s12 + $0x7b8] sm:$0xff] }
 0x292   : > { %v3912_v47 = vcvt.s32.f32 %v3240_v25  ;;  %v3913_v35 = vcvt.s32.f32 %v3241_v62  ;;  %v3928_v2 = vcvt.s32.f32 %v3256_v1  ;;  %v3273_v11 = vunpack.c.1.s8 %v2897_v40 }
 0x293   : > { %5004 = vmatpush.bf16.msra.mxu3 %v4479_v20  ;;  %v4454_v37 = vpack.c.bf16 %v3897_v29, %v3896_v24  ;;  %v3929_v41 = vcvt.s32.f32 %v3257_v15  ;;  %v3944_v42 = vcvt.s32.f32 %v3272_v6  ;;  %v3222_v4 = vunpack.c.2.s8 %v2884_v63 }
 0x294   : > { %v4462_v60 = vpack.c.bf16 %v3913_v35, %v3912_v47  ;;  %v3945_v51 = vcvt.s32.f32 %v3273_v11  ;;  %v3223_v22 = vunpack.c.3.s8 %v2884_v63  ;;  %v3238_v50 = vunpack.c.2.s8 %v2888_v33  ;;  %v2824_v47 = vpop.f32.mrf.mxu1 }
 0x295   : > { %4966 = vmatpush.bf16.msra.mxu0 %v4454_v37  ;;  %v4470_v30 = vpack.c.bf16 %v3929_v41, %v3928_v2  ;;  %v3894_v27 = vcvt.s32.f32 %v3222_v4  ;;  %v3239_v45 = vunpack.c.3.s8 %v2888_v33  ;;  %v3254_v26 = vunpack.c.2.s8 %v2892_v54 }
 0x296   : > { %4979 = vmatpush.bf16.msra.mxu1 %v4462_v60  ;;  %v4478_v46 = vpack.c.bf16 %v3945_v51, %v3944_v42  ;;  %v3895_v28 = vcvt.s32.f32 %v3223_v22  ;;  %v3910_v44 = vcvt.s32.f32 %v3238_v50  ;;  %v3255_v52 = vunpack.c.3.s8 %v2892_v54 }
 0x297   : > { %4992 = vmatpush.bf16.msra.mxu2 %v4470_v30  ;;  %v3911_v53 = vcvt.s32.f32 %v3239_v45  ;;  %v3926_v55 = vcvt.s32.f32 %v3254_v26  ;;  %v3270_v56 = vunpack.c.2.s8 %v2896_v19  ;;  %v3271_v40 = vunpack.c.3.s8 %v2896_v19  ;;  %v4706_v45 = vld [vmem:[#allocation1 + $0x9] sm:$0xff] }
 0x298   : > { %5005 = vmatpush.bf16.msra.mxu3 %v4478_v46  ;;  %v4453_v58 = vpack.c.bf16 %v3895_v28, %v3894_v27  ;;  %v3927_v36 = vcvt.s32.f32 %v3255_v52  ;;  %v3220_v59 = vunpack.c.0.s8 %v2884_v63  ;;  %v3221_v48 = vunpack.c.1.s8 %v2884_v63  ;;  %v2911_v63 = vld [vmem:[%s5907_s12 + $0x7d8] sm:$0xff] }
 0x299   : > { %v4461_v43 = vpack.c.bf16 %v3911_v53, %v3910_v44  ;;  %v3942_v0 = vcvt.s32.f32 %v3270_v56  ;;  %v3943_v49 = vcvt.s32.f32 %v3271_v40  ;;  %v3236_v3 = vunpack.c.0.s8 %v2888_v33 }
 0x29a   : > { %4967 = vmatpush.bf16.msra.mxu0 %v4453_v58  ;;  %v4469_v7 = vpack.c.bf16 %v3927_v36, %v3926_v55  ;;  %v3892_v21 = vcvt.s32.f32 %v3220_v59  ;;  %v3893_v8 = vcvt.s32.f32 %v3221_v48  ;;  %v3237_v9 = vunpack.c.1.s8 %v2888_v33  ;;  %v2915_v33 = vld [vmem:[%s5907_s12 + $0x7f8] sm:$0xff]  ;;  %v2902_v58 = vld [vmem:[%s5907_s12 + $0x790] sm:$0xff] }
 0x29b   : > { %4980 = vmatpush.bf16.msra.mxu1 %v4461_v43  ;;  %v4477_v34 = vpack.c.bf16 %v3943_v49, %v3942_v0  ;;  %v3908_v12 = vcvt.s32.f32 %v3236_v3  ;;  %v3252_v32 = vunpack.c.0.s8 %v2892_v54  ;;  %v3253_v39 = vunpack.c.1.s8 %v2892_v54  ;;  %v2906_v0 = vld [vmem:[%s5907_s12 + $0x7b0] sm:$0xff] }
 0x29c   : > { %4993 = vmatpush.bf16.msra.mxu2 %v4469_v7  ;;  %v4452_v13 = vpack.c.bf16 %v3893_v8, %v3892_v21  ;;  %v3909_v18 = vcvt.s32.f32 %v3237_v9  ;;  %v3268_v38 = vunpack.c.0.s8 %v2896_v19  ;;  %v3269_v61 = vunpack.c.1.s8 %v2896_v19  ;;  %v4705_v19 = vld [vmem:[#allocation1] sm:$0xff] }
 0x29d   : > { %5006 = vmatpush.bf16.msra.mxu3 %v4477_v34  ;;  %v3924_v24 = vcvt.s32.f32 %v3252_v32  ;;  %v3925_v25 = vcvt.s32.f32 %v3253_v39  ;;  %v3298_v62 = vunpack.c.2.s8 %v2903_v10  ;;  %v3299_v1 = vunpack.c.3.s8 %v2903_v10 }
 0x29e   : > { %4968 = vmatpush.bf16.msra.mxu0 %v4452_v13  ;;  %v4460_v20 = vpack.c.bf16 %v3909_v18, %v3908_v12  ;;  %v3940_v29 = vcvt.s32.f32 %v3268_v38  ;;  %v3941_v15 = vcvt.s32.f32 %v3269_v61  ;;  %v3314_v6 = vunpack.c.2.s8 %v2907_v57 }
 0x29f   : > { %v4468_v35 = vpack.c.bf16 %v3925_v25, %v3924_v24  ;;  %v3970_v2 = vcvt.s32.f32 %v3298_v62  ;;  %v3971_v11 = vcvt.s32.f32 %v3299_v1  ;;  %v3315_v54 = vunpack.c.3.s8 %v2907_v57 }
 0x2a0   : > { %4981 = vmatpush.bf16.msra.mxu1 %v4460_v20  ;;  %v4476_v37 = vpack.c.bf16 %v3941_v15, %v3940_v29  ;;  %v3986_v41 = vcvt.s32.f32 %v3314_v6  ;;  %v3330_v42 = vunpack.c.2.s8 %v2911_v63  ;;  %v3331_v4 = vunpack.c.3.s8 %v2911_v63 }
 0x2a1   : > { %4994 = vmatpush.bf16.msra.mxu2 %v4468_v35  ;;  %v4491_v60 = vpack.c.bf16 %v3971_v11, %v3970_v2  ;;  %v3987_v51 = vcvt.s32.f32 %v3315_v54  ;;  %v3346_v22 = vunpack.c.2.s8 %v2915_v33  ;;  %v3347_v50 = vunpack.c.3.s8 %v2915_v33  ;;  %4969 = vmatmul.bf16.vlgmr.msra.gmra.mxu0 %v6416_v14 }
 0x2a2   : > { %5007 = vmatpush.bf16.msra.mxu3 %v4476_v37  ;;  %v4002_v30 = vcvt.s32.f32 %v3330_v42  ;;  %v4003_v27 = vcvt.s32.f32 %v3331_v4  ;;  %v3296_v26 = vunpack.c.0.s8 %v2903_v10  ;;  %v3297_v46 = vunpack.c.1.s8 %v2903_v10  ;;  %v2910_v10 = vld [vmem:[%s5907_s12 + $0x7d0] sm:$0xff] }
 0x2a3   : > { %5013 = vmatpush.bf16.msrb.mxu0 %v4491_v60  ;;  %v4499_v28 = vpack.c.bf16 %v3987_v51, %v3986_v41  ;;  %v4018_v44 = vcvt.s32.f32 %v3346_v22  ;;  %v4019_v52 = vcvt.s32.f32 %v3347_v50  ;;  %4982 = vmatmul.bf16.vlgmr.msra.gmra.mxu1 %v6411_v31  ;;  %v3312_v53 = vunpack.c.0.s8 %v2907_v57 }
 0x2a4   : > { %v4507_v55 = vpack.c.bf16 %v4003_v27, %v4002_v30  ;;  %4995 = vmatmul.bf16.vlgmr.msra.gmra.mxu2 %v4705_v19  ;;  %v3968_v56 = vcvt.s32.f32 %v3296_v26  ;;  %v3969_v14 = vcvt.s32.f32 %v3297_v46  ;;  %v3313_v40 = vunpack.c.1.s8 %v2907_v57  ;;  %v2914_v57 = vld [vmem:[%s5907_s12 + $0x7f0] sm:$0xff]  ;;  %v2901_v30 = vld [vmem:[%s5907_s12 + $0x788] sm:$0xff]  ;;  %v2177_v26 = vld [vmem:[#allocation2] sm:$0x3] }
 0x2a5   : > { %5026 = vmatpush.bf16.msrb.mxu1 %v4499_v28  ;;  %v4515_v36 = vpack.c.bf16 %v4019_v52, %v4018_v44  ;;  %5008 = vmatmul.bf16.vlgmr.msra.gmra.mxu3 %v4706_v45  ;;  %v3984_v59 = vcvt.s32.f32 %v3312_v53  ;;  %v3328_v48 = vunpack.c.0.s8 %v2911_v63  ;;  %v3329_v43 = vunpack.c.1.s8 %v2911_v63  ;;  %v2905_v46 = vld [vmem:[%s5907_s12 + $0x7a8] sm:$0xff] }
 0x2a6   : > { %5039 = vmatpush.bf16.msrb.mxu2 %v4507_v55  ;;  %v4490_v49 = vpack.c.bf16 %v3969_v14, %v3968_v56  ;;  %v3985_v3 = vcvt.s32.f32 %v3313_v40  ;;  %v3344_v31 = vunpack.c.0.s8 %v2915_v33  ;;  %v3345_v5 = vunpack.c.1.s8 %v2915_v33  ;;  %v2909_v55 = vld [vmem:[%s5907_s12 + $0x7c8] sm:$0xff] }
 0x2a7   : > { %5052 = vmatpush.bf16.msrb.mxu3 %v4515_v36  ;;  %v4000_v7 = vcvt.s32.f32 %v3328_v48  ;;  %v4001_v21 = vcvt.s32.f32 %v3329_v43  ;;  %v3294_v8 = vunpack.c.2.s8 %v2902_v58  ;;  %v3295_v9 = vunpack.c.3.s8 %v2902_v58  ;;  %v2913_v36 = vld [vmem:[%s5907_s12 + $0x7e8] sm:$0xff] }
 0x2a8   : > { %5014 = vmatpush.bf16.msrb.mxu0 %v4490_v49  ;;  %v4498_v34 = vpack.c.bf16 %v3985_v3, %v3984_v59  ;;  %v4016_v12 = vcvt.s32.f32 %v3344_v31  ;;  %v4017_v32 = vcvt.s32.f32 %v3345_v5  ;;  %v3310_v39 = vunpack.c.2.s8 %v2906_v0 }
 0x2a9   : > { %v4506_v13 = vpack.c.bf16 %v4001_v21, %v4000_v7  ;;  %v3966_v18 = vcvt.s32.f32 %v3294_v8  ;;  %v3967_v38 = vcvt.s32.f32 %v3295_v9  ;;  %v3311_v61 = vunpack.c.3.s8 %v2906_v0  ;;  %v6454_v9 = vpop.f32.mrf.mxu2 }
 0x2aa   : > { %5027 = vmatpush.bf16.msrb.mxu1 %v4498_v34  ;;  %v4514_v24 = vpack.c.bf16 %v4017_v32, %v4016_v12  ;;  %v3982_v25 = vcvt.s32.f32 %v3310_v39  ;;  %v3326_v62 = vunpack.c.2.s8 %v2910_v10  ;;  %v3327_v1 = vunpack.c.3.s8 %v2910_v10 }
 0x2ab   : > { %5040 = vmatpush.bf16.msrb.mxu2 %v4506_v13  ;;  %v4489_v63 = vpack.c.bf16 %v3967_v38, %v3966_v18  ;;  %v3983_v20 = vcvt.s32.f32 %v3311_v61  ;;  %v3342_v29 = vunpack.c.2.s8 %v2914_v57  ;;  %v3343_v15 = vunpack.c.3.s8 %v2914_v57 }
 0x2ac   : > { %5053 = vmatpush.bf16.msrb.mxu3 %v4514_v24  ;;  %v3998_v6 = vcvt.s32.f32 %v3326_v62  ;;  %v3999_v33 = vcvt.s32.f32 %v3327_v1  ;;  %v2810_v47 = vadd.f32 %v6431_v16, %v6427_v23  ;;  %v3292_v35 = vunpack.c.0.s8 %v2902_v58 }
 0x2ad   : > { %5015 = vmatpush.bf16.msrb.mxu0 %v4489_v63  ;;  %v4497_v2 = vpack.c.bf16 %v3983_v20, %v3982_v25  ;;  %v4014_v11 = vcvt.s32.f32 %v3342_v29  ;;  %v4015_v54 = vcvt.s32.f32 %v3343_v15  ;;  %v3293_v37 = vunpack.c.1.s8 %v2902_v58  ;;  %v2900_v15 = vld [vmem:[%s5907_s12 + $0x780] sm:$0xff] }
 0x2ae   : > { %v4505_v41 = vpack.c.bf16 %v3999_v33, %v3998_v6  ;;  %v3964_v42 = vcvt.s32.f32 %v3292_v35  ;;  %v3308_v4 = vunpack.c.0.s8 %v2906_v0  ;;  %v3309_v60 = vunpack.c.1.s8 %v2906_v0 }
 0x2af   : > { %5028 = vmatpush.bf16.msrb.mxu1 %v4497_v2  ;;  %v4513_v51 = vpack.c.bf16 %v4015_v54, %v4014_v11  ;;  %v3965_v22 = vcvt.s32.f32 %v3293_v37  ;;  %v3324_v50 = vunpack.c.0.s8 %v2910_v10  ;;  %v3325_v19 = vunpack.c.1.s8 %v2910_v10  ;;  %v6456_v10 = vpop.f32.mrf.mxu3  ;;  %v2904_v2 = vld [vmem:[%s5907_s12 + $0x7a0] sm:$0xff] }
 0x2b0   : > { %5041 = vmatpush.bf16.msrb.mxu2 %v4505_v41  ;;  %v3980_v23 = vcvt.s32.f32 %v3308_v4  ;;  %v3981_v16 = vcvt.s32.f32 %v3309_v60  ;;  %v3340_v27 = vunpack.c.0.s8 %v2914_v57  ;;  %v3341_v45 = vunpack.c.1.s8 %v2914_v57 }
 0x2b1   : > { %5054 = vmatpush.bf16.msrb.mxu3 %v4513_v51  ;;  %v4488_v28 = vpack.c.bf16 %v3965_v22, %v3964_v42  ;;  %v3996_v44 = vcvt.s32.f32 %v3324_v50  ;;  %v3997_v52 = vcvt.s32.f32 %v3325_v19  ;;  %v2823_v53 = vadd.f32 %v6435_v17, %v2810_v47  ;;  %v2908_v42 = vld [vmem:[%s5907_s12 + $0x7c0] sm:$0xff] }
 0x2b2   : > { %v4496_v56 = vpack.c.bf16 %v3981_v16, %v3980_v23  ;;  %v4012_v14 = vcvt.s32.f32 %v3340_v27  ;;  %v4013_v40 = vcvt.s32.f32 %v3341_v45  ;;  %v3290_v58 = vunpack.c.2.s8 %v2901_v30  ;;  %v2912_v16 = vld [vmem:[%s5907_s12 + $0x7e0] sm:$0xff]  ;;  %v4790_v27 = vpop.f32.mrf.mxu2 }
 0x2b3   : > { %5016 = vmatpush.bf16.msrb.mxu0 %v4488_v28  ;;  %v4504_v59 = vpack.c.bf16 %v3997_v52, %v3996_v44  ;;  %v2826_v48 = vadd.f32 %v2823_v53, %v2177_v26  ;;  %v3291_v43 = vunpack.c.3.s8 %v2901_v30  ;;  %v3306_v0 = vunpack.c.2.s8 %v2905_v46 }
 0x2b4   : > { %5029 = vmatpush.bf16.msrb.mxu1 %v4496_v56  ;;  %v4512_v49 = vpack.c.bf16 %v4013_v40, %v4012_v14  ;;  %v3962_v3 = vcvt.s32.f32 %v3290_v58  ;;  %v3307_v31 = vunpack.c.3.s8 %v2905_v46  ;;  %v3322_v5 = vunpack.c.2.s8 %v2909_v55 }
 0x2b5   : > { %5042 = vmatpush.bf16.msrb.mxu2 %v4504_v59  ;;  %2827 = vst [vmem:[#allocation2] sm:$0x3] %v2826_v48  ;;  %v3963_v7 = vcvt.s32.f32 %v3291_v43  ;;  %v3978_v17 = vcvt.s32.f32 %v3306_v0  ;;  %v3323_v21 = vunpack.c.3.s8 %v2909_v55  ;;  %v3338_v8 = vunpack.c.2.s8 %v2913_v36 }
 0x2b6   : > { %5055 = vmatpush.bf16.msrb.mxu3 %v4512_v49  ;;  %v3979_v34 = vcvt.s32.f32 %v3307_v31  ;;  %v3994_v12 = vcvt.s32.f32 %v3322_v5  ;;  %v3339_v32 = vunpack.c.3.s8 %v2913_v36  ;;  %v3288_v39 = vunpack.c.0.s8 %v2901_v30 }
 0x2b7   : > { %v4487_v57 = vpack.c.bf16 %v3963_v7, %v3962_v3  ;;  %v3995_v13 = vcvt.s32.f32 %v3323_v21  ;;  %v4010_v18 = vcvt.s32.f32 %v3338_v8  ;;  %v3289_v38 = vunpack.c.1.s8 %v2901_v30  ;;  %v4803_v45 = vpop.f32.mrf.mxu3 }
 0x2b8   : > { %v4495_v61 = vpack.c.bf16 %v3979_v34, %v3978_v17  ;;  %v4011_v24 = vcvt.s32.f32 %v3339_v32  ;;  %v3960_v25 = vcvt.s32.f32 %v3288_v39  ;;  %v3304_v62 = vunpack.c.0.s8 %v2905_v46  ;;  %v6463_v34 = vld [vmem:[%s5907_s12 + $0x818] sm:$0xff] }
 0x2b9   : > { %5017 = vmatpush.bf16.msrb.mxu0 %v4487_v57  ;;  %v4503_v1 = vpack.c.bf16 %v3995_v13, %v3994_v12  ;;  %v3961_v63 = vcvt.s32.f32 %v3289_v38  ;;  %v3305_v20 = vunpack.c.1.s8 %v2905_v46  ;;  %v3320_v29 = vunpack.c.0.s8 %v2909_v55  ;;  %v6466_v13 = vld [vmem:[%s5907_s12 + $0x838] sm:$0xff]  ;;  %v6470_v38 = vpop.f32.mrf.mxu1 }
 0x2ba   : > { %5030 = vmatpush.bf16.msrb.mxu1 %v4495_v61  ;;  %v4511_v6 = vpack.c.bf16 %v4011_v24, %v4010_v18  ;;  %v3976_v33 = vcvt.s32.f32 %v3304_v62  ;;  %v3321_v47 = vunpack.c.1.s8 %v2909_v55  ;;  %v3336_v35 = vunpack.c.0.s8 %v2913_v36  ;;  %v6468_v18 = vpop.f32.mrf.mxu0 }
 0x2bb   : > { %5043 = vmatpush.bf16.msrb.mxu2 %v4503_v1  ;;  %v4486_v11 = vpack.c.bf16 %v3961_v63, %v3960_v25  ;;  %v3977_v54 = vcvt.s32.f32 %v3305_v20  ;;  %v3992_v37 = vcvt.s32.f32 %v3320_v29  ;;  %v3337_v41 = vunpack.c.1.s8 %v2913_v36  ;;  %v6473_v1 = vld [vmem:[%s5907_s12 + $0x858] sm:$0xff] }
 0x2bc   : > { %5056 = vmatpush.bf16.msrb.mxu3 %v4511_v6  ;;  %v3993_v4 = vcvt.s32.f32 %v3321_v47  ;;  %v4008_v60 = vcvt.s32.f32 %v3336_v35  ;;  %v3286_v51 = vunpack.c.2.s8 %v2900_v15  ;;  %v3287_v22 = vunpack.c.3.s8 %v2900_v15 }
 0x2bd   : > { %5018 = vmatpush.bf16.msrb.mxu0 %v4486_v11  ;;  %v4494_v50 = vpack.c.bf16 %v3977_v54, %v3976_v33  ;;  %v4009_v19 = vcvt.s32.f32 %v3337_v41  ;;  %v3302_v30 = vunpack.c.2.s8 %v2904_v2  ;;  %v3303_v23 = vunpack.c.3.s8 %v2904_v2  ;;  %v4707_v11 = vld [vmem:[#allocation1 + $0x12] sm:$0xff] }
 0x2be   : > { %v4502_v26 = vpack.c.bf16 %v3993_v4, %v3992_v37  ;;  %v3958_v46 = vcvt.s32.f32 %v3286_v51  ;;  %v3959_v28 = vcvt.s32.f32 %v3287_v22  ;;  %v3318_v44 = vunpack.c.2.s8 %v2908_v42  ;;  %v4708_v4 = vld [vmem:[#allocation1 + $0x1b] sm:$0xff] }
 0x2bf   : > { %5031 = vmatpush.bf16.msrb.mxu1 %v4494_v50  ;;  %v4510_v52 = vpack.c.bf16 %v4009_v19, %v4008_v60  ;;  %v3974_v53 = vcvt.s32.f32 %v3302_v30  ;;  %v3975_v55 = vcvt.s32.f32 %v3303_v23  ;;  %v3319_v56 = vunpack.c.3.s8 %v2908_v42  ;;  %v6482_v19 = vpop.f32.mrf.mxu2  ;;  %v6484_v30 = vpop.f32.mrf.mxu3 }
 0x2c0   : > { %5044 = vmatpush.bf16.msrb.mxu2 %v4502_v26  ;;  %v4485_v14 = vpack.c.bf16 %v3959_v28, %v3958_v46  ;;  %v3990_v40 = vcvt.s32.f32 %v3318_v44  ;;  %v3334_v58 = vunpack.c.2.s8 %v2912_v16  ;;  %v3335_v36 = vunpack.c.3.s8 %v2912_v16  ;;  %v4709_v26 = vld [vmem:[#allocation1 + $0x24] sm:$0xff]  ;;  %v4710_v44 = vld [vmem:[#allocation1 + $0x2d] sm:$0xff] }
 0x2c1   : > { %5057 = vmatpush.bf16.msrb.mxu3 %v4510_v52  ;;  %v4493_v59 = vpack.c.bf16 %v3975_v55, %v3974_v53  ;;  %v3991_v48 = vcvt.s32.f32 %v3319_v56  ;;  %v3284_v43 = vunpack.c.0.s8 %v2900_v15  ;;  %v3285_v0 = vunpack.c.1.s8 %v2900_v15 }
 0x2c2   : > { %5019 = vmatpush.bf16.msrb.mxu0 %v4485_v14  ;;  %v4006_v49 = vcvt.s32.f32 %v3334_v58  ;;  %v4007_v3 = vcvt.s32.f32 %v3335_v36  ;;  %v3300_v31 = vunpack.c.0.s8 %v2904_v2  ;;  %v3301_v5 = vunpack.c.1.s8 %v2904_v2  ;;  %v2931_v2 = vld [vmem:[%s5907_s12 + $0x878] sm:$0xff]  ;;  %v4816_v58 = vpop.f32.mrf.mxu0  ;;  %v4829_v36 = vpop.f32.mrf.mxu1 }
 0x2c3   : > { %5032 = vmatpush.bf16.msrb.mxu1 %v4493_v59  ;;  %v4501_v7 = vpack.c.bf16 %v3991_v48, %v3990_v40  ;;  %v3956_v17 = vcvt.s32.f32 %v3284_v43  ;;  %v3957_v21 = vcvt.s32.f32 %v3285_v0  ;;  %v3316_v8 = vunpack.c.0.s8 %v2908_v42  ;;  %v2921_v58 = vld [vmem:[%s5907_s12 + $0x828] sm:$0xff] }
 0x2c4   : > { %v4509_v12 = vpack.c.bf16 %v4007_v3, %v4006_v49  ;;  %v3972_v32 = vcvt.s32.f32 %v3300_v31  ;;  %v3973_v39 = vcvt.s32.f32 %v3301_v5  ;;  %v3317_v57 = vunpack.c.1.s8 %v2908_v42  ;;  %v2918_v49 = vld [vmem:[%s5907_s12 + $0x810] sm:$0xff] }
 0x2c5   : > { %5045 = vmatpush.bf16.msrb.mxu2 %v4501_v7  ;;  %v4484_v61 = vpack.c.bf16 %v3957_v21, %v3956_v17  ;;  %v3988_v24 = vcvt.s32.f32 %v3316_v8  ;;  %v3332_v25 = vunpack.c.0.s8 %v2912_v16  ;;  %v3333_v62 = vunpack.c.1.s8 %v2912_v16  ;;  %v2922_v17 = vld [vmem:[%s5907_s12 + $0x830] sm:$0xff] }
 0x2c6   : > { %5058 = vmatpush.bf16.msrb.mxu3 %v4509_v12  ;;  %v4492_v63 = vpack.c.bf16 %v3973_v39, %v3972_v32  ;;  %v3989_v20 = vcvt.s32.f32 %v3317_v57  ;;  %v3362_v29 = vunpack.c.2.s8 %v6463_v34  ;;  %v3363_v15 = vunpack.c.3.s8 %v6463_v34  ;;  %v2926_v32 = vld [vmem:[%s5907_s12 + $0x850] sm:$0xff] }
 0x2c7   : > { %5020 = vmatpush.bf16.msrb.mxu0 %v4484_v61  ;;  %v4004_v6 = vcvt.s32.f32 %v3332_v25  ;;  %v4005_v33 = vcvt.s32.f32 %v3333_v62  ;;  %v3378_v47 = vunpack.c.2.s8 %v6466_v13  ;;  %v3379_v35 = vunpack.c.3.s8 %v6466_v13  ;;  %v6495_v39 = vld [vmem:[#allocation1 + $0x3f] sm:$0xff] }
 0x2c8   : > { %5033 = vmatpush.bf16.msrb.mxu1 %v4492_v63  ;;  %v4500_v54 = vpack.c.bf16 %v3989_v20, %v3988_v24  ;;  %v4034_v37 = vcvt.s32.f32 %v3362_v29  ;;  %v4035_v41 = vcvt.s32.f32 %v3363_v15  ;;  %v3394_v42 = vunpack.c.2.s8 %v6473_v1  ;;  %v2930_v20 = vld [vmem:[%s5907_s12 + $0x870] sm:$0xff]  ;;  %v4842_v29 = vpop.f32.mrf.mxu2  ;;  %v4855_v15 = vpop.f32.mrf.mxu3 }
 0x2c9   : > { %v4508_v60 = vpack.c.bf16 %v4005_v33, %v4004_v6  ;;  %v4050_v51 = vcvt.s32.f32 %v3378_v47  ;;  %v4051_v22 = vcvt.s32.f32 %v3379_v35  ;;  %v3395_v50 = vunpack.c.3.s8 %v6473_v1 }
 0x2ca   : > { %5046 = vmatpush.bf16.msrb.mxu2 %v4500_v54  ;;  %v4523_v23 = vpack.c.bf16 %v4035_v41, %v4034_v37  ;;  %v4066_v16 = vcvt.s32.f32 %v3394_v42  ;;  %v3410_v27 = vunpack.c.2.s8 %v2931_v2  ;;  %v3411_v45 = vunpack.c.3.s8 %v2931_v2  ;;  %5021 = vmatmul.bf16.vlgmr.msrb.gmra.mxu0 %v4707_v11  ;;  %v6503_v11 = vld [vmem:[#allocation1 + $0x36] sm:$0xff] }
 0x2cb   : > { %5059 = vmatpush.bf16.msrb.mxu3 %v4508_v60  ;;  %v4531_v46 = vpack.c.bf16 %v4051_v22, %v4050_v51  ;;  %v4067_v28 = vcvt.s32.f32 %v3395_v50  ;;  %5034 = vmatmul.bf16.vlgmr.msrb.gmra.mxu1 %v4708_v4  ;;  %v3360_v52 = vunpack.c.0.s8 %v6463_v34  ;;  %v3361_v53 = vunpack.c.1.s8 %v6463_v34 }
 0x2cc   : > { %5065 = vmatpush.bf16.msra.mxu0 %v4523_v23  ;;  %v4082_v55 = vcvt.s32.f32 %v3410_v27  ;;  %v4083_v56 = vcvt.s32.f32 %v3411_v45  ;;  %v3376_v14 = vunpack.c.0.s8 %v6466_v13  ;;  %v3377_v40 = vunpack.c.1.s8 %v6466_v13 }
 0x2cd   : > { %5078 = vmatpush.bf16.msra.mxu1 %v4531_v46  ;;  %v4539_v59 = vpack.c.bf16 %v4067_v28, %v4066_v16  ;;  %5047 = vmatmul.bf16.vlgmr.msrb.gmra.mxu2 %v4709_v26  ;;  %v4032_v48 = vcvt.s32.f32 %v3360_v52  ;;  %v4033_v43 = vcvt.s32.f32 %v3361_v53  ;;  %v3392_v0 = vunpack.c.0.s8 %v6473_v1  ;;  %v2917_v53 = vld [vmem:[%s5907_s12 + $0x808] sm:$0xff] }
 0x2ce   : > { %v4547_v3 = vpack.c.bf16 %v4083_v56, %v4082_v55  ;;  %5060 = vmatmul.bf16.vlgmr.msrb.gmra.mxu3 %v4710_v44  ;;  %v4048_v31 = vcvt.s32.f32 %v3376_v14  ;;  %v4049_v5 = vcvt.s32.f32 %v3377_v40  ;;  %v3393_v7 = vunpack.c.1.s8 %v6473_v1 }
 0x2cf   : > { %5091 = vmatpush.bf16.msra.mxu2 %v4539_v59  ;;  %v4522_v21 = vpack.c.bf16 %v4033_v43, %v4032_v48  ;;  %v4064_v8 = vcvt.s32.f32 %v3392_v0  ;;  %v3408_v34 = vunpack.c.0.s8 %v2931_v2  ;;  %v3409_v12 = vunpack.c.1.s8 %v2931_v2  ;;  %v4680_v2 = vld [vmem:[%s5925_s26 + $0x42] sm:$0xff] }
 0x2d0   : > { %5104 = vmatpush.bf16.msra.mxu3 %v4547_v3  ;;  %v4530_v57 = vpack.c.bf16 %v4049_v5, %v4048_v31  ;;  %v4065_v13 = vcvt.s32.f32 %v3393_v7  ;;  %v6499_v61 = vadd.f32 %v6456_v10, %v6454_v9  ;;  %v3358_v24 = vunpack.c.2.s8 %v2918_v49  ;;  %4714 = vst [vmem:[#allocation1] ss:$9 sm:$0xff] %v4680_v2  ;;  %v2925_v5 = vld [vmem:[%s5907_s12 + $0x848] sm:$0xff] }
 0x2d1   : > { %5066 = vmatpush.bf16.msra.mxu0 %v4522_v21  ;;  %v4080_v25 = vcvt.s32.f32 %v3408_v34  ;;  %v4081_v62 = vcvt.s32.f32 %v3409_v12  ;;  %v3359_v1 = vunpack.c.3.s8 %v2918_v49  ;;  %v3374_v63 = vunpack.c.2.s8 %v2922_v17  ;;  %v2929_v34 = vld [vmem:[%s5907_s12 + $0x868] sm:$0xff] }
 0x2d2   : > { %5079 = vmatpush.bf16.msra.mxu1 %v4530_v57  ;;  %v4538_v6 = vpack.c.bf16 %v4065_v13, %v4064_v8  ;;  %v4030_v33 = vcvt.s32.f32 %v3358_v24  ;;  %v3375_v47 = vunpack.c.3.s8 %v2922_v17  ;;  %v3390_v35 = vunpack.c.2.s8 %v2926_v32 }
 0x2d3   : > { %v4546_v54 = vpack.c.bf16 %v4081_v62, %v4080_v25  ;;  %v4031_v9 = vcvt.s32.f32 %v3359_v1  ;;  %v4046_v10 = vcvt.s32.f32 %v3374_v63  ;;  %v3391_v37 = vunpack.c.3.s8 %v2926_v32 }
 0x2d4   : > { %5092 = vmatpush.bf16.msra.mxu2 %v4538_v6  ;;  %v4047_v41 = vcvt.s32.f32 %v3375_v47  ;;  %v4062_v42 = vcvt.s32.f32 %v3390_v35  ;;  %v3406_v4 = vunpack.c.2.s8 %v2930_v20  ;;  %v3407_v60 = vunpack.c.3.s8 %v2930_v20 }
 0x2d5   : > { %5105 = vmatpush.bf16.msra.mxu3 %v4546_v54  ;;  %v4521_v51 = vpack.c.bf16 %v4031_v9, %v4030_v33  ;;  %v4063_v22 = vcvt.s32.f32 %v3391_v37  ;;  %v3356_v50 = vunpack.c.0.s8 %v2918_v49  ;;  %v3357_v23 = vunpack.c.1.s8 %v2918_v49 }
 0x2d6   : > { %v4529_v16 = vpack.c.bf16 %v4047_v41, %v4046_v10  ;;  %v4078_v27 = vcvt.s32.f32 %v3406_v4  ;;  %v4079_v45 = vcvt.s32.f32 %v3407_v60  ;;  %v3372_v26 = vunpack.c.0.s8 %v2922_v17 }
 0x2d7   : > { %5067 = vmatpush.bf16.msra.mxu0 %v4521_v51  ;;  %v4537_v46 = vpack.c.bf16 %v4063_v22, %v4062_v42  ;;  %v4028_v28 = vcvt.s32.f32 %v3356_v50  ;;  %v4029_v44 = vcvt.s32.f32 %v3357_v23  ;;  %v3373_v52 = vunpack.c.1.s8 %v2922_v17  ;;  %v2916_v23 = vld [vmem:[%s5907_s12 + $0x800] sm:$0xff] }
 0x2d8   : > { %5080 = vmatpush.bf16.msra.mxu1 %v4529_v16  ;;  %v4545_v55 = vpack.c.bf16 %v4079_v45, %v4078_v27  ;;  %v4044_v56 = vcvt.s32.f32 %v3372_v26  ;;  %v3388_v14 = vunpack.c.0.s8 %v2926_v32  ;;  %v3389_v40 = vunpack.c.1.s8 %v2926_v32  ;;  %v2920_v45 = vld [vmem:[%s5907_s12 + $0x820] sm:$0xff]  ;;  %v6514_v26 = vpop.f32.mrf.mxu0 }
 0x2d9   : > { %5093 = vmatpush.bf16.msra.mxu2 %v4537_v46  ;;  %v4520_v36 = vpack.c.bf16 %v4029_v44, %v4028_v28  ;;  %v4045_v59 = vcvt.s32.f32 %v3373_v52  ;;  %v3404_v48 = vunpack.c.0.s8 %v2930_v20  ;;  %v3405_v43 = vunpack.c.1.s8 %v2930_v20 }
 0x2da   : > { %5106 = vmatpush.bf16.msra.mxu3 %v4545_v55  ;;  %v4060_v0 = vcvt.s32.f32 %v3388_v14  ;;  %v4061_v49 = vcvt.s32.f32 %v3389_v40  ;;  %v3354_v3 = vunpack.c.2.s8 %v2917_v53  ;;  %v3355_v31 = vunpack.c.3.s8 %v2917_v53  ;;  %v2924_v14 = vld [vmem:[%s5907_s12 + $0x840] sm:$0xff] }
 0x2db   : > { %5068 = vmatpush.bf16.msra.mxu0 %v4520_v36  ;;  %v4528_v7 = vpack.c.bf16 %v4045_v59, %v4044_v56  ;;  %v4076_v17 = vcvt.s32.f32 %v3404_v48  ;;  %v4077_v21 = vcvt.s32.f32 %v3405_v43  ;;  %v3370_v8 = vunpack.c.2.s8 %v2921_v58  ;;  %v2928_v48 = vld [vmem:[%s5907_s12 + $0x860] sm:$0xff] }
 0x2dc   : > { %v4536_v12 = vpack.c.bf16 %v4061_v49, %v4060_v0  ;;  %v4026_v32 = vcvt.s32.f32 %v3354_v3  ;;  %v4027_v57 = vcvt.s32.f32 %v3355_v31  ;;  %v3371_v13 = vunpack.c.3.s8 %v2921_v58 }
 0x2dd   : > { %5081 = vmatpush.bf16.msra.mxu1 %v4528_v7  ;;  %v4544_v24 = vpack.c.bf16 %v4077_v21, %v4076_v17  ;;  %v4042_v25 = vcvt.s32.f32 %v3370_v8  ;;  %v3386_v62 = vunpack.c.2.s8 %v2925_v5  ;;  %v3387_v1 = vunpack.c.3.s8 %v2925_v5  ;;  %v6522_v17 = vpop.f32.mrf.mxu1 }
 0x2de   : > { %5094 = vmatpush.bf16.msra.mxu2 %v4536_v12  ;;  %v4519_v63 = vpack.c.bf16 %v4027_v57, %v4026_v32  ;;  %v4043_v20 = vcvt.s32.f32 %v3371_v13  ;;  %v3402_v29 = vunpack.c.2.s8 %v2929_v34  ;;  %v3403_v15 = vunpack.c.3.s8 %v2929_v34 }
 0x2df   : > { %5107 = vmatpush.bf16.msra.mxu3 %v4544_v24  ;;  %v4058_v6 = vcvt.s32.f32 %v3386_v62  ;;  %v4059_v33 = vcvt.s32.f32 %v3387_v1  ;;  %v4815_v47 = vadd.f32 %v6468_v18, %v6499_v61  ;;  %v3352_v35 = vunpack.c.0.s8 %v2917_v53 }
 0x2e0   : > { %5069 = vmatpush.bf16.msra.mxu0 %v4519_v63  ;;  %v4527_v2 = vpack.c.bf16 %v4043_v20, %v4042_v25  ;;  %v4074_v54 = vcvt.s32.f32 %v3402_v29  ;;  %v4075_v9 = vcvt.s32.f32 %v3403_v15  ;;  %v3353_v10 = vunpack.c.1.s8 %v2917_v53  ;;  %v4868_v63 = vpop.f32.mrf.mxu0 }
 0x2e1   : > { %v4535_v37 = vpack.c.bf16 %v4059_v33, %v4058_v6  ;;  %v4828_v41 = vadd.f32 %v6470_v38, %v4815_v47  ;;  %v4024_v42 = vcvt.s32.f32 %v3352_v35  ;;  %v3368_v4 = vunpack.c.0.s8 %v2921_v58  ;;  %v2935_v33 = vld [vmem:[%s5907_s12 + $0x898] sm:$0xff]  ;;  %v2938_v63 = vld [vmem:[%s5907_s12 + $0x8b0] sm:$0xff] }
 0x2e2   : > { %5082 = vmatpush.bf16.msra.mxu1 %v4527_v2  ;;  %v4543_v60 = vpack.c.bf16 %v4075_v9, %v4074_v54  ;;  %v4025_v51 = vcvt.s32.f32 %v3353_v10  ;;  %v3369_v22 = vunpack.c.1.s8 %v2921_v58  ;;  %v3384_v50 = vunpack.c.0.s8 %v2925_v5  ;;  %v6526_v9 = vld [vmem:[%s5907_s12 + $0x8b8] sm:$0xff] }
 0x2e3   : > { %5095 = vmatpush.bf16.msra.mxu2 %v4535_v37  ;;  %v4040_v18 = vcvt.s32.f32 %v3368_v4  ;;  %v3385_v61 = vunpack.c.1.s8 %v2925_v5  ;;  %v3400_v16 = vunpack.c.0.s8 %v2929_v34  ;;  %v3401_v27 = vunpack.c.1.s8 %v2929_v34  ;;  %v6529_v4 = vld [vmem:[%s5907_s12 + $0x8d8] sm:$0xff] }
 0x2e4   : > { %5108 = vmatpush.bf16.msra.mxu3 %v4543_v60  ;;  %v4518_v38 = vpack.c.bf16 %v4025_v51, %v4024_v42  ;;  %v4041_v46 = vcvt.s32.f32 %v3369_v22  ;;  %v4056_v28 = vcvt.s32.f32 %v3384_v50  ;;  %v4841_v44 = vadd.f32 %v6482_v19, %v4828_v41  ;;  %v6531_v60 = vpop.f32.mrf.mxu2  ;;  %v6533_v51 = vpop.f32.mrf.mxu3 }
 0x2e5   : > { %v4057_v52 = vcvt.s32.f32 %v3385_v61  ;;  %v4072_v53 = vcvt.s32.f32 %v3400_v16  ;;  %v4073_v55 = vcvt.s32.f32 %v3401_v27  ;;  %v3350_v56 = vunpack.c.2.s8 %v2916_v23 }
 0x2e6   : > { %5070 = vmatpush.bf16.msra.mxu0 %v4518_v38  ;;  %v4526_v40 = vpack.c.bf16 %v4041_v46, %v4040_v18  ;;  %v6519_v58 = vadd.f32 %v6484_v30, %v4841_v44  ;;  %v3351_v36 = vunpack.c.3.s8 %v2916_v23  ;;  %v3366_v59 = vunpack.c.2.s8 %v2920_v45  ;;  %v2947_v38 = vld [vmem:[%s5907_s12 + $0x8f8] sm:$0xff]  ;;  %v4881_v46 = vpop.f32.mrf.mxu1 }
 0x2e7   : > { %v4534_v43 = vpack.c.bf16 %v4057_v52, %v4056_v28  ;;  %v4542_v0 = vpack.c.bf16 %v4073_v55, %v4072_v53  ;;  %v4022_v49 = vcvt.s32.f32 %v3350_v56  ;;  %v3367_v3 = vunpack.c.3.s8 %v2920_v45 }
 0x2e8   : > { %5083 = vmatpush.bf16.msra.mxu1 %v4526_v40  ;;  %v4023_v31 = vcvt.s32.f32 %v3351_v36  ;;  %v4038_v19 = vcvt.s32.f32 %v3366_v59  ;;  %v3382_v5 = vunpack.c.2.s8 %v2924_v14  ;;  %v3383_v7 = vunpack.c.3.s8 %v2924_v14 }
 0x2e9   : > { %5096 = vmatpush.bf16.msra.mxu2 %v4534_v43  ;;  %5109 = vmatpush.bf16.msra.mxu3 %v4542_v0  ;;  %v4039_v21 = vcvt.s32.f32 %v3367_v3  ;;  %v3398_v8 = vunpack.c.2.s8 %v2928_v48  ;;  %v3399_v30 = vunpack.c.3.s8 %v2928_v48  ;;  %v3348_v34 = vunpack.c.0.s8 %v2916_v23  ;;  %v4715_v0 = vld [vmem:[#allocation1] sm:$0xff] }
 0x2ea   : > { %v4517_v12 = vpack.c.bf16 %v4023_v31, %v4022_v49  ;;  %v4054_v32 = vcvt.s32.f32 %v3382_v5  ;;  %v4055_v57 = vcvt.s32.f32 %v3383_v7  ;;  %v3349_v13 = vunpack.c.1.s8 %v2916_v23  ;;  %v4716_v31 = vld [vmem:[#allocation1 + $0x9] sm:$0xff] }
 0x2eb   : > { %v4525_v24 = vpack.c.bf16 %v4039_v21, %v4038_v19  ;;  %v4070_v25 = vcvt.s32.f32 %v3398_v8  ;;  %v4071_v62 = vcvt.s32.f32 %v3399_v30  ;;  %v4020_v1 = vcvt.s32.f32 %v3348_v34 }
 0x2ec   : > { %5071 = vmatpush.bf16.msra.mxu0 %v4517_v12  ;;  %v4533_v20 = vpack.c.bf16 %v4055_v57, %v4054_v32  ;;  %v4021_v29 = vcvt.s32.f32 %v3349_v13  ;;  %v3364_v15 = vunpack.c.0.s8 %v2920_v45  ;;  %v3365_v6 = vunpack.c.1.s8 %v2920_v45  ;;  %v2934_v57 = vld [vmem:[%s5907_s12 + $0x890] sm:$0xff]  ;;  %v4894_v13 = vpop.f32.mrf.mxu2 }
 0x2ed   : > { %5084 = vmatpush.bf16.msra.mxu1 %v4525_v24  ;;  %v4541_v47 = vpack.c.bf16 %v4071_v62, %v4070_v25  ;;  %v3380_v35 = vunpack.c.0.s8 %v2924_v14  ;;  %v3381_v2 = vunpack.c.1.s8 %v2924_v14  ;;  %v3396_v54 = vunpack.c.0.s8 %v2928_v48  ;;  %v4907_v24 = vpop.f32.mrf.mxu3 }
 0x2ee   : > { %5097 = vmatpush.bf16.msra.mxu2 %v4533_v20  ;;  %v4516_v10 = vpack.c.bf16 %v4021_v29, %v4020_v1  ;;  %v4036_v37 = vcvt.s32.f32 %v3364_v15  ;;  %v4037_v41 = vcvt.s32.f32 %v3365_v6  ;;  %v3397_v42 = vunpack.c.1.s8 %v2928_v48 }
 0x2ef   : > { %5110 = vmatpush.bf16.msra.mxu3 %v4541_v47  ;;  %v4052_v22 = vcvt.s32.f32 %v3380_v35  ;;  %v4053_v50 = vcvt.s32.f32 %v3381_v2  ;;  %v4068_v23 = vcvt.s32.f32 %v3396_v54  ;;  %v3426_v18 = vunpack.c.2.s8 %v2935_v33  ;;  %v2942_v54 = vld [vmem:[%s5907_s12 + $0x8d0] sm:$0xff] }
 0x2f0   : > { %5072 = vmatpush.bf16.msra.mxu0 %v4516_v10  ;;  %v4524_v61 = vpack.c.bf16 %v4037_v41, %v4036_v37  ;;  %v4069_v16 = vcvt.s32.f32 %v3397_v42  ;;  %v3427_v27 = vunpack.c.3.s8 %v2935_v33  ;;  %v3442_v45 = vunpack.c.2.s8 %v6526_v9  ;;  %v2946_v42 = vld [vmem:[%s5907_s12 + $0x8f0] sm:$0xff] }
 0x2f1   : > { %v4532_v28 = vpack.c.bf16 %v4053_v50, %v4052_v22  ;;  %v4098_v44 = vcvt.s32.f32 %v3426_v18  ;;  %v3443_v52 = vunpack.c.3.s8 %v6526_v9  ;;  %v3458_v53 = vunpack.c.2.s8 %v6529_v4 }
 0x2f2   : > { %5085 = vmatpush.bf16.msra.mxu1 %v4524_v61  ;;  %v4540_v55 = vpack.c.bf16 %v4069_v16, %v4068_v23  ;;  %v4099_v56 = vcvt.s32.f32 %v3427_v27  ;;  %v4114_v14 = vcvt.s32.f32 %v3442_v45  ;;  %v3459_v40 = vunpack.c.3.s8 %v6529_v4 }
 0x2f3   : > { %5098 = vmatpush.bf16.msra.mxu2 %v4532_v28  ;;  %v4115_v36 = vcvt.s32.f32 %v3443_v52  ;;  %v4130_v59 = vcvt.s32.f32 %v3458_v53  ;;  %v3474_v48 = vunpack.c.2.s8 %v2947_v38  ;;  %v3475_v43 = vunpack.c.3.s8 %v2947_v38  ;;  %5073 = vmatmul.bf16.vlgmr.msra.gmra.mxu0 %v6503_v11 }
 0x2f4   : > { %5111 = vmatpush.bf16.msra.mxu3 %v4540_v55  ;;  %v4555_v49 = vpack.c.bf16 %v4099_v56, %v4098_v44  ;;  %v4131_v3 = vcvt.s32.f32 %v3459_v40  ;;  %v3424_v19 = vunpack.c.0.s8 %v2935_v33  ;;  %v3425_v5 = vunpack.c.1.s8 %v2935_v33 }
 0x2f5   : > { %v4563_v7 = vpack.c.bf16 %v4115_v36, %v4114_v14  ;;  %v4146_v21 = vcvt.s32.f32 %v3474_v48  ;;  %v4147_v8 = vcvt.s32.f32 %v3475_v43  ;;  %5086 = vmatmul.bf16.vlgmr.msra.gmra.mxu1 %v6495_v39  ;;  %v3440_v30 = vunpack.c.0.s8 %v6526_v9 }
 0x2f6   : > { %5117 = vmatpush.bf16.msrb.mxu0 %v4555_v49  ;;  %v4571_v34 = vpack.c.bf16 %v4131_v3, %v4130_v59  ;;  %5099 = vmatmul.bf16.vlgmr.msra.gmra.mxu2 %v4715_v0  ;;  %v4096_v11 = vcvt.s32.f32 %v3424_v19  ;;  %v4097_v12 = vcvt.s32.f32 %v3425_v5  ;;  %v3441_v32 = vunpack.c.1.s8 %v6526_v9  ;;  %v2933_v5 = vld [vmem:[%s5907_s12 + $0x888] sm:$0xff] }
 0x2f7   : > { %5130 = vmatpush.bf16.msrb.mxu1 %v4563_v7  ;;  %v4579_v25 = vpack.c.bf16 %v4147_v8, %v4146_v21  ;;  %5112 = vmatmul.bf16.vlgmr.msra.gmra.mxu3 %v4716_v31  ;;  %v4112_v62 = vcvt.s32.f32 %v3440_v30  ;;  %v3456_v39 = vunpack.c.0.s8 %v6529_v4  ;;  %v3457_v1 = vunpack.c.1.s8 %v6529_v4  ;;  %v2937_v8 = vld [vmem:[%s5907_s12 + $0x8a8] sm:$0xff] }
 0x2f8   : > { %5143 = vmatpush.bf16.msrb.mxu2 %v4571_v34  ;;  %v4554_v20 = vpack.c.bf16 %v4097_v12, %v4096_v11  ;;  %v4113_v29 = vcvt.s32.f32 %v3441_v32  ;;  %v3472_v15 = vunpack.c.0.s8 %v2947_v38  ;;  %v3473_v6 = vunpack.c.1.s8 %v2947_v38  ;;  %v2941_v32 = vld [vmem:[%s5907_s12 + $0x8c8] sm:$0xff] }
 0x2f9   : > { %5156 = vmatpush.bf16.msrb.mxu3 %v4579_v25  ;;  %v4128_v33 = vcvt.s32.f32 %v3456_v39  ;;  %v4129_v47 = vcvt.s32.f32 %v3457_v1  ;;  %v3422_v35 = vunpack.c.2.s8 %v2934_v57  ;;  %v3423_v2 = vunpack.c.3.s8 %v2934_v57 }
 0x2fa   : > { %5118 = vmatpush.bf16.msrb.mxu0 %v4554_v20  ;;  %v4562_v9 = vpack.c.bf16 %v4113_v29, %v4112_v62  ;;  %v4144_v10 = vcvt.s32.f32 %v3472_v15  ;;  %v4145_v37 = vcvt.s32.f32 %v3473_v6  ;;  %v3438_v41 = vunpack.c.2.s8 %v2938_v63  ;;  %v2945_v62 = vld [vmem:[%s5907_s12 + $0x8e8] sm:$0xff] }
 0x2fb   : > { %v4570_v4 = vpack.c.bf16 %v4129_v47, %v4128_v33  ;;  %v4094_v22 = vcvt.s32.f32 %v3422_v35  ;;  %v4095_v50 = vcvt.s32.f32 %v3423_v2  ;;  %v3439_v23 = vunpack.c.3.s8 %v2938_v63 }
 0x2fc   : > { %5131 = vmatpush.bf16.msrb.mxu1 %v4562_v9  ;;  %v4578_v18 = vpack.c.bf16 %v4145_v37, %v4144_v10  ;;  %v4110_v61 = vcvt.s32.f32 %v3438_v41  ;;  %v3454_v16 = vunpack.c.2.s8 %v2942_v54  ;;  %v3455_v27 = vunpack.c.3.s8 %v2942_v54 }
 0x2fd   : > { %5144 = vmatpush.bf16.msrb.mxu2 %v4570_v4  ;;  %v4553_v45 = vpack.c.bf16 %v4095_v50, %v4094_v22  ;;  %v4111_v38 = vcvt.s32.f32 %v3439_v23  ;;  %v3470_v46 = vunpack.c.2.s8 %v2946_v42  ;;  %v3471_v28 = vunpack.c.3.s8 %v2946_v42 }
 0x2fe   : > { %5157 = vmatpush.bf16.msrb.mxu3 %v4578_v18  ;;  %v4126_v44 = vcvt.s32.f32 %v3454_v16  ;;  %v4127_v52 = vcvt.s32.f32 %v3455_v27  ;;  %v4867_v53 = vadd.f32 %v6514_v26, %v6519_v58  ;;  %v3420_v55 = vunpack.c.0.s8 %v2934_v57 }
 0x2ff   : > { %5119 = vmatpush.bf16.msrb.mxu0 %v4553_v45  ;;  %v4561_v56 = vpack.c.bf16 %v4111_v38, %v4110_v61  ;;  %v4142_v14 = vcvt.s32.f32 %v3470_v46  ;;  %v4143_v40 = vcvt.s32.f32 %v3471_v28  ;;  %v3421_v36 = vunpack.c.1.s8 %v2934_v57  ;;  %v2932_v46 = vld [vmem:[%s5907_s12 + $0x880] sm:$0xff] }
 0x300   : > { %v4569_v59 = vpack.c.bf16 %v4127_v52, %v4126_v44  ;;  %v4092_v48 = vcvt.s32.f32 %v3420_v55  ;;  %v3436_v43 = vunpack.c.0.s8 %v2938_v63  ;;  %v3437_v0 = vunpack.c.1.s8 %v2938_v63  ;;  %v6563_v55 = vpop.f32.mrf.mxu0 }
 0x301   : > { %5132 = vmatpush.bf16.msrb.mxu1 %v4561_v56  ;;  %v4577_v49 = vpack.c.bf16 %v4143_v40, %v4142_v14  ;;  %v4093_v3 = vcvt.s32.f32 %v3421_v36  ;;  %v3452_v31 = vunpack.c.0.s8 %v2942_v54  ;;  %v3453_v19 = vunpack.c.1.s8 %v2942_v54  ;;  %v2940_v36 = vld [vmem:[%s5907_s12 + $0x8c0] sm:$0xff] }
 0x302   : > { %5145 = vmatpush.bf16.msrb.mxu2 %v4569_v59  ;;  %v4108_v26 = vcvt.s32.f32 %v3436_v43  ;;  %v4109_v58 = vcvt.s32.f32 %v3437_v0  ;;  %v3468_v7 = vunpack.c.0.s8 %v2946_v42  ;;  %v3469_v21 = vunpack.c.1.s8 %v2946_v42 }
 0x303   : > { %5158 = vmatpush.bf16.msrb.mxu3 %v4577_v49  ;;  %v4552_v30 = vpack.c.bf16 %v4093_v3, %v4092_v48  ;;  %v4124_v34 = vcvt.s32.f32 %v3452_v31  ;;  %v4125_v11 = vcvt.s32.f32 %v3453_v19  ;;  %v4880_v12 = vadd.f32 %v6522_v17, %v4867_v53  ;;  %v2936_v53 = vld [vmem:[%s5907_s12 + $0x8a0] sm:$0xff] }
 0x304   : > { %v4560_v57 = vpack.c.bf16 %v4109_v58, %v4108_v26  ;;  %v4140_v13 = vcvt.s32.f32 %v3468_v7  ;;  %v4141_v24 = vcvt.s32.f32 %v3469_v21  ;;  %v3418_v25 = vunpack.c.2.s8 %v2933_v5 }
 0x305   : > { %5120 = vmatpush.bf16.msrb.mxu0 %v4552_v30  ;;  %v4568_v39 = vpack.c.bf16 %v4125_v11, %v4124_v34  ;;  %v3419_v1 = vunpack.c.3.s8 %v2933_v5  ;;  %v3434_v63 = vunpack.c.2.s8 %v2937_v8  ;;  %v3435_v20 = vunpack.c.3.s8 %v2937_v8 }
 0x306   : > { %5133 = vmatpush.bf16.msrb.mxu1 %v4560_v57  ;;  %v4576_v29 = vpack.c.bf16 %v4141_v24, %v4140_v13  ;;  %v4090_v15 = vcvt.s32.f32 %v3418_v25  ;;  %v3450_v6 = vunpack.c.2.s8 %v2941_v32  ;;  %v3451_v33 = vunpack.c.3.s8 %v2941_v32 }
 0x307   : > { %5146 = vmatpush.bf16.msrb.mxu2 %v4568_v39  ;;  %v4091_v47 = vcvt.s32.f32 %v3419_v1  ;;  %v4106_v35 = vcvt.s32.f32 %v3434_v63  ;;  %v4107_v17 = vcvt.s32.f32 %v3435_v20  ;;  %v3466_v2 = vunpack.c.2.s8 %v2945_v62 }
 0x308   : > { %5159 = vmatpush.bf16.msrb.mxu3 %v4576_v29  ;;  %v4122_v54 = vcvt.s32.f32 %v3450_v6  ;;  %v4123_v9 = vcvt.s32.f32 %v3451_v33  ;;  %v3467_v10 = vunpack.c.3.s8 %v2945_v62  ;;  %v4893_v37 = vadd.f32 %v6531_v60, %v4880_v12  ;;  %v6567_v12 = vpop.f32.mrf.mxu1  ;;  %v4920_v6 = vpop.f32.mrf.mxu0 }
 0x309   : > { %v4551_v41 = vpack.c.bf16 %v4091_v47, %v4090_v15  ;;  %v4559_v42 = vpack.c.bf16 %v4107_v17, %v4106_v35  ;;  %v4138_v4 = vcvt.s32.f32 %v3466_v2  ;;  %v3416_v22 = vunpack.c.0.s8 %v2933_v5  ;;  %v2951_v2 = vld [vmem:[%s5907_s12 + $0x918] sm:$0xff] }
 0x30a   : > { %v4567_v50 = vpack.c.bf16 %v4123_v9, %v4122_v54  ;;  %v4139_v23 = vcvt.s32.f32 %v3467_v10  ;;  %v6559_v18 = vadd.f32 %v6533_v51, %v4893_v37  ;;  %v3417_v61 = vunpack.c.1.s8 %v2933_v5  ;;  %v2944_v5 = vld [vmem:[%s5907_s12 + $0x8e0] sm:$0xff] }
 0x30b   : > { %5121 = vmatpush.bf16.msrb.mxu0 %v4551_v41  ;;  %5134 = vmatpush.bf16.msrb.mxu1 %v4559_v42  ;;  %v4088_v16 = vcvt.s32.f32 %v3416_v22  ;;  %v3432_v27 = vunpack.c.0.s8 %v2937_v8  ;;  %v3433_v45 = vunpack.c.1.s8 %v2937_v8  ;;  %v3448_v38 = vunpack.c.0.s8 %v2941_v32  ;;  %v6571_v41 = vld [vmem:[%s5907_s12 + $0x938] sm:$0xff] }
 0x30c   : > { %5147 = vmatpush.bf16.msrb.mxu2 %v4567_v50  ;;  %v4575_v60 = vpack.c.bf16 %v4139_v23, %v4138_v4  ;;  %v4089_v28 = vcvt.s32.f32 %v3417_v61  ;;  %v3449_v44 = vunpack.c.1.s8 %v2941_v32  ;;  %v3464_v52 = vunpack.c.0.s8 %v2945_v62  ;;  %v6573_v23 = vpop.f32.mrf.mxu2  ;;  %v6575_v61 = vpop.f32.mrf.mxu3 }
 0x30d   : > { %v4104_v51 = vcvt.s32.f32 %v3432_v27  ;;  %v4105_v56 = vcvt.s32.f32 %v3433_v45  ;;  %v4120_v14 = vcvt.s32.f32 %v3448_v38  ;;  %v3465_v40 = vunpack.c.1.s8 %v2945_v62 }
 0x30e   : > { %5160 = vmatpush.bf16.msrb.mxu3 %v4575_v60  ;;  %v4550_v59 = vpack.c.bf16 %v4089_v28, %v4088_v16  ;;  %v4121_v48 = vcvt.s32.f32 %v3449_v44  ;;  %v4136_v43 = vcvt.s32.f32 %v3464_v52  ;;  %v3414_v0 = vunpack.c.2.s8 %v2932_v46 }
 0x30f   : > { %v4558_v49 = vpack.c.bf16 %v4105_v56, %v4104_v51  ;;  %v4137_v3 = vcvt.s32.f32 %v3465_v40  ;;  %v3415_v31 = vunpack.c.3.s8 %v2932_v46  ;;  %v3430_v19 = vunpack.c.2.s8 %v2936_v53  ;;  %v4717_v51 = vld [vmem:[#allocation1 + $0x12] sm:$0xff] }
 0x310   : > { %5122 = vmatpush.bf16.msrb.mxu0 %v4550_v59  ;;  %v4566_v26 = vpack.c.bf16 %v4121_v48, %v4120_v14  ;;  %v4086_v58 = vcvt.s32.f32 %v3414_v0  ;;  %v3431_v7 = vunpack.c.3.s8 %v2936_v53  ;;  %v3446_v21 = vunpack.c.2.s8 %v2940_v36  ;;  %v4933_v56 = vpop.f32.mrf.mxu1 }
 0x311   : > { %5135 = vmatpush.bf16.msrb.mxu1 %v4558_v49  ;;  %v4574_v8 = vpack.c.bf16 %v4137_v3, %v4136_v43  ;;  %v4087_v30 = vcvt.s32.f32 %v3415_v31  ;;  %v4102_v34 = vcvt.s32.f32 %v3430_v19  ;;  %v3447_v11 = vunpack.c.3.s8 %v2940_v36  ;;  %v4718_v3 = vld [vmem:[#allocation1 + $0x1b] sm:$0xff] }
 0x312   : > { %5148 = vmatpush.bf16.msrb.mxu2 %v4566_v26  ;;  %v4103_v32 = vcvt.s32.f32 %v3431_v7  ;;  %v4118_v57 = vcvt.s32.f32 %v3446_v21  ;;  %v3462_v13 = vunpack.c.2.s8 %v2944_v5  ;;  %v3463_v24 = vunpack.c.3.s8 %v2944_v5 }
 0x313   : > { %5161 = vmatpush.bf16.msrb.mxu3 %v4574_v8  ;;  %v4549_v25 = vpack.c.bf16 %v4087_v30, %v4086_v58  ;;  %v4119_v62 = vcvt.s32.f32 %v3447_v11  ;;  %v3412_v39 = vunpack.c.0.s8 %v2932_v46  ;;  %v3413_v1 = vunpack.c.1.s8 %v2932_v46  ;;  %v2959_v46 = vld [vmem:[%s5907_s12 + $0x958] sm:$0xff]  ;;  %v4720_v8 = vld [vmem:[#allocation1 + $0x2d] sm:$0xff] }
 0x314   : > { %v4557_v63 = vpack.c.bf16 %v4103_v32, %v4102_v34  ;;  %v4134_v20 = vcvt.s32.f32 %v3462_v13  ;;  %v4135_v29 = vcvt.s32.f32 %v3463_v24  ;;  %v3428_v15 = vunpack.c.0.s8 %v2936_v53  ;;  %v4719_v58 = vld [vmem:[#allocation1 + $0x24] sm:$0xff] }
 0x315   : > { %5123 = vmatpush.bf16.msrb.mxu0 %v4549_v25  ;;  %v4565_v33 = vpack.c.bf16 %v4119_v62, %v4118_v57  ;;  %v4084_v47 = vcvt.s32.f32 %v3412_v39  ;;  %v4085_v35 = vcvt.s32.f32 %v3413_v1  ;;  %v3429_v17 = vunpack.c.1.s8 %v2936_v53  ;;  %v2963_v53 = vld [vmem:[%s5907_s12 + $0x978] sm:$0xff]  ;;  %v2950_v1 = vld [vmem:[%s5907_s12 + $0x910] sm:$0xff] }
 0x316   : > { %5136 = vmatpush.bf16.msrb.mxu1 %v4557_v63  ;;  %v4573_v54 = vpack.c.bf16 %v4135_v29, %v4134_v20  ;;  %v4100_v9 = vcvt.s32.f32 %v3428_v15  ;;  %v3444_v10 = vunpack.c.0.s8 %v2940_v36  ;;  %v3445_v37 = vunpack.c.1.s8 %v2940_v36  ;;  %v4946_v63 = vpop.f32.mrf.mxu2  ;;  %v4959_v20 = vpop.f32.mrf.mxu3 }
 0x317   : > { %5149 = vmatpush.bf16.msrb.mxu2 %v4565_v33  ;;  %v4548_v42 = vpack.c.bf16 %v4085_v35, %v4084_v47  ;;  %v4101_v4 = vcvt.s32.f32 %v3429_v17  ;;  %v3460_v22 = vunpack.c.0.s8 %v2944_v5  ;;  %v3461_v50 = vunpack.c.1.s8 %v2944_v5  ;;  %v2954_v47 = vld [vmem:[%s5907_s12 + $0x930] sm:$0xff]  ;;  %v2957_v20 = vld [vmem:[%s5907_s12 + $0x948] sm:$0xff] }
 0x318   : > { %5162 = vmatpush.bf16.msrb.mxu3 %v4573_v54  ;;  %v4116_v16 = vcvt.s32.f32 %v3444_v10  ;;  %v4117_v27 = vcvt.s32.f32 %v3445_v37  ;;  %v3490_v45 = vunpack.c.2.s8 %v2951_v2  ;;  %v3491_v38 = vunpack.c.3.s8 %v2951_v2 }
 0x319   : > { %5124 = vmatpush.bf16.msrb.mxu0 %v4548_v42  ;;  %v4556_v60 = vpack.c.bf16 %v4101_v4, %v4100_v9  ;;  %v4132_v28 = vcvt.s32.f32 %v3460_v22  ;;  %v4133_v44 = vcvt.s32.f32 %v3461_v50  ;;  %v3506_v52 = vunpack.c.2.s8 %v6571_v41  ;;  %v6585_v9 = vld [vmem:[#allocation1 + $0x3f] sm:$0xff] }
 0x31a   : > { %v4564_v14 = vpack.c.bf16 %v4117_v27, %v4116_v16  ;;  %v4162_v40 = vcvt.s32.f32 %v3490_v45  ;;  %v4163_v36 = vcvt.s32.f32 %v3491_v38  ;;  %v3507_v59 = vunpack.c.3.s8 %v6571_v41  ;;  %v2958_v4 = vld [vmem:[%s5907_s12 + $0x950] sm:$0xff] }
 0x31b   : > { %5137 = vmatpush.bf16.msrb.mxu1 %v4556_v60  ;;  %v4572_v48 = vpack.c.bf16 %v4133_v44, %v4132_v28  ;;  %v4178_v43 = vcvt.s32.f32 %v3506_v52  ;;  %v3522_v0 = vunpack.c.2.s8 %v2959_v46  ;;  %v3523_v49 = vunpack.c.3.s8 %v2959_v46  ;;  %v2962_v45 = vld [vmem:[%s5907_s12 + $0x970] sm:$0xff]  ;;  %v4681_v52 = vld [vmem:[%s5925_s26 + $0x4a] sm:$0xff] }
 0x31c   : > { %5150 = vmatpush.bf16.msrb.mxu2 %v4564_v14  ;;  %v4587_v31 = vpack.c.bf16 %v4163_v36, %v4162_v40  ;;  %v4179_v19 = vcvt.s32.f32 %v3507_v59  ;;  %v3538_v5 = vunpack.c.2.s8 %v2963_v53  ;;  %v3539_v26 = vunpack.c.3.s8 %v2963_v53  ;;  %5125 = vmatmul.bf16.vlgmr.msrb.gmra.mxu0 %v4717_v51  ;;  %v6589_v44 = vld [vmem:[#allocation1 + $0x36] sm:$0xff] }
 0x31d   : > { %5163 = vmatpush.bf16.msrb.mxu3 %v4572_v48  ;;  %v4194_v7 = vcvt.s32.f32 %v3522_v0  ;;  %v4195_v21 = vcvt.s32.f32 %v3523_v49  ;;  %v3488_v30 = vunpack.c.0.s8 %v2951_v2  ;;  %v3489_v34 = vunpack.c.1.s8 %v2951_v2  ;;  %4724 = vst [vmem:[#allocation1] ss:$9 sm:$0xff] %v4681_v52 }
 0x31e   : > { %5169 = vmatpush.bf16.msra.mxu0 %v4587_v31  ;;  %v4595_v11 = vpack.c.bf16 %v4179_v19, %v4178_v43  ;;  %v4210_v32 = vcvt.s32.f32 %v3538_v5  ;;  %v4211_v57 = vcvt.s32.f32 %v3539_v26  ;;  %5138 = vmatmul.bf16.vlgmr.msrb.gmra.mxu1 %v4718_v3  ;;  %v3504_v13 = vunpack.c.0.s8 %v6571_v41 }
 0x31f   : > { %v4603_v24 = vpack.c.bf16 %v4195_v21, %v4194_v7  ;;  %5151 = vmatmul.bf16.vlgmr.msrb.gmra.mxu2 %v4719_v58  ;;  %v4160_v25 = vcvt.s32.f32 %v3488_v30  ;;  %v4161_v62 = vcvt.s32.f32 %v3489_v34  ;;  %v3505_v39 = vunpack.c.1.s8 %v6571_v41 }
 0x320   : > { %5182 = vmatpush.bf16.msra.mxu1 %v4595_v11  ;;  %v4611_v29 = vpack.c.bf16 %v4211_v57, %v4210_v32  ;;  %5164 = vmatmul.bf16.vlgmr.msrb.gmra.mxu3 %v4720_v8  ;;  %v4176_v15 = vcvt.s32.f32 %v3504_v13  ;;  %v3520_v6 = vunpack.c.0.s8 %v2959_v46  ;;  %v3521_v33 = vunpack.c.1.s8 %v2959_v46  ;;  %v2949_v57 = vld [vmem:[%s5907_s12 + $0x908] sm:$0xff] }
 0x321   : > { %5195 = vmatpush.bf16.msra.mxu2 %v4603_v24  ;;  %v4586_v35 = vpack.c.bf16 %v4161_v62, %v4160_v25  ;;  %v4177_v17 = vcvt.s32.f32 %v3505_v39  ;;  %v3536_v2 = vunpack.c.0.s8 %v2963_v53  ;;  %v3537_v54 = vunpack.c.1.s8 %v2963_v53  ;;  %v2953_v25 = vld [vmem:[%s5907_s12 + $0x928] sm:$0xff] }
 0x322   : > { %5208 = vmatpush.bf16.msra.mxu3 %v4611_v29  ;;  %v4192_v10 = vcvt.s32.f32 %v3520_v6  ;;  %v4193_v37 = vcvt.s32.f32 %v3521_v33  ;;  %v3486_v41 = vunpack.c.2.s8 %v2950_v1  ;;  %v3487_v42 = vunpack.c.3.s8 %v2950_v1 }
 0x323   : > { %5170 = vmatpush.bf16.msra.mxu0 %v4586_v35  ;;  %v4594_v22 = vpack.c.bf16 %v4177_v17, %v4176_v15  ;;  %v4208_v50 = vcvt.s32.f32 %v3536_v2  ;;  %v4209_v16 = vcvt.s32.f32 %v3537_v54  ;;  %v3502_v27 = vunpack.c.2.s8 %v2954_v47 }
 0x324   : > { %v4602_v38 = vpack.c.bf16 %v4193_v37, %v4192_v10  ;;  %v4158_v46 = vcvt.s32.f32 %v3486_v41  ;;  %v4159_v60 = vcvt.s32.f32 %v3487_v42  ;;  %v3503_v28 = vunpack.c.3.s8 %v2954_v47 }
 0x325   : > { %5183 = vmatpush.bf16.msra.mxu1 %v4594_v22  ;;  %v4610_v53 = vpack.c.bf16 %v4209_v16, %v4208_v50  ;;  %v4174_v51 = vcvt.s32.f32 %v3502_v27  ;;  %v3518_v56 = vunpack.c.2.s8 %v2958_v4  ;;  %v3519_v14 = vunpack.c.3.s8 %v2958_v4 }
 0x326   : > { %5196 = vmatpush.bf16.msra.mxu2 %v4602_v38  ;;  %v4585_v40 = vpack.c.bf16 %v4159_v60, %v4158_v46  ;;  %v4175_v36 = vcvt.s32.f32 %v3503_v28  ;;  %v3534_v59 = vunpack.c.2.s8 %v2962_v45  ;;  %v3535_v48 = vunpack.c.3.s8 %v2962_v45 }
 0x327   : > { %5209 = vmatpush.bf16.msra.mxu3 %v4610_v53  ;;  %v4190_v43 = vcvt.s32.f32 %v3518_v56  ;;  %v4191_v0 = vcvt.s32.f32 %v3519_v14  ;;  %v4919_v49 = vadd.f32 %v6563_v55, %v6559_v18  ;;  %v3484_v3 = vunpack.c.0.s8 %v2950_v1 }
 0x328   : > { %5171 = vmatpush.bf16.msra.mxu0 %v4585_v40  ;;  %v4593_v31 = vpack.c.bf16 %v4175_v36, %v4174_v51  ;;  %v4206_v19 = vcvt.s32.f32 %v3534_v59  ;;  %v4207_v5 = vcvt.s32.f32 %v3535_v48  ;;  %v3485_v26 = vunpack.c.1.s8 %v2950_v1 }
 0x329   : > { %v4601_v58 = vpack.c.bf16 %v4191_v0, %v4190_v43  ;;  %v4156_v7 = vcvt.s32.f32 %v3484_v3  ;;  %v3500_v21 = vunpack.c.0.s8 %v2954_v47  ;;  %v3501_v8 = vunpack.c.1.s8 %v2954_v47  ;;  %v2961_v47 = vld [vmem:[%s5907_s12 + $0x968] sm:$0xff]  ;;  %v2948_v43 = vld [vmem:[%s5907_s12 + $0x900] sm:$0xff] }
 0x32a   : > { %5184 = vmatpush.bf16.msra.mxu1 %v4593_v31  ;;  %v4609_v30 = vpack.c.bf16 %v4207_v5, %v4206_v19  ;;  %v4157_v34 = vcvt.s32.f32 %v3485_v26  ;;  %v3516_v11 = vunpack.c.0.s8 %v2958_v4  ;;  %v3517_v32 = vunpack.c.1.s8 %v2958_v4  ;;  %v2952_v31 = vld [vmem:[%s5907_s12 + $0x920] sm:$0xff]  ;;  %v6605_v19 = vpop.f32.mrf.mxu0 }
 0x32b   : > { %5197 = vmatpush.bf16.msra.mxu2 %v4601_v58  ;;  %v4172_v18 = vcvt.s32.f32 %v3500_v21  ;;  %v4173_v55 = vcvt.s32.f32 %v3501_v8  ;;  %v3532_v13 = vunpack.c.0.s8 %v2962_v45  ;;  %v3533_v24 = vunpack.c.1.s8 %v2962_v45 }
 0x32c   : > { %5210 = vmatpush.bf16.msra.mxu3 %v4609_v30  ;;  %v4584_v62 = vpack.c.bf16 %v4157_v34, %v4156_v7  ;;  %v4188_v39 = vcvt.s32.f32 %v3516_v11  ;;  %v4189_v1 = vcvt.s32.f32 %v3517_v32  ;;  %v4932_v63 = vadd.f32 %v6567_v12, %v4919_v49  ;;  %v2956_v7 = vld [vmem:[%s5907_s12 + $0x940] sm:$0xff] }
 0x32d   : > { %v4592_v29 = vpack.c.bf16 %v4173_v55, %v4172_v18  ;;  %v4204_v15 = vcvt.s32.f32 %v3532_v13  ;;  %v4205_v6 = vcvt.s32.f32 %v3533_v24  ;;  %v3482_v33 = vunpack.c.2.s8 %v2949_v57  ;;  %v2960_v55 = vld [vmem:[%s5907_s12 + $0x960] sm:$0xff] }
 0x32e   : > { %5172 = vmatpush.bf16.msra.mxu0 %v4584_v62  ;;  %v4600_v35 = vpack.c.bf16 %v4189_v1, %v4188_v39  ;;  %v3483_v17 = vunpack.c.3.s8 %v2949_v57  ;;  %v3498_v2 = vunpack.c.2.s8 %v2953_v25  ;;  %v3499_v54 = vunpack.c.3.s8 %v2953_v25 }
 0x32f   : > { %5185 = vmatpush.bf16.msra.mxu1 %v4592_v29  ;;  %v4608_v10 = vpack.c.bf16 %v4205_v6, %v4204_v15  ;;  %v4154_v37 = vcvt.s32.f32 %v3482_v33  ;;  %v3514_v41 = vunpack.c.2.s8 %v2957_v20  ;;  %v3515_v42 = vunpack.c.3.s8 %v2957_v20  ;;  %v6609_v29 = vpop.f32.mrf.mxu1 }
 0x330   : > { %5198 = vmatpush.bf16.msra.mxu2 %v4600_v35  ;;  %v4155_v4 = vcvt.s32.f32 %v3483_v17  ;;  %v4170_v22 = vcvt.s32.f32 %v3498_v2  ;;  %v4171_v12 = vcvt.s32.f32 %v3499_v54  ;;  %v3530_v50 = vunpack.c.2.s8 %v2961_v47 }
 0x331   : > { %5211 = vmatpush.bf16.msra.mxu3 %v4608_v10  ;;  %v4186_v16 = vcvt.s32.f32 %v3514_v41  ;;  %v4187_v27 = vcvt.s32.f32 %v3515_v42  ;;  %v3531_v45 = vunpack.c.3.s8 %v2961_v47  ;;  %v4945_v38 = vadd.f32 %v6573_v23, %v4932_v63 }
 0x332   : > { %v4583_v46 = vpack.c.bf16 %v4155_v4, %v4154_v37  ;;  %v4591_v60 = vpack.c.bf16 %v4171_v12, %v4170_v22  ;;  %v4202_v28 = vcvt.s32.f32 %v3530_v50  ;;  %v3480_v52 = vunpack.c.0.s8 %v2949_v57  ;;  %v4972_v4 = vpop.f32.mrf.mxu0 }
 0x333   : > { %v4599_v53 = vpack.c.bf16 %v4187_v27, %v4186_v16  ;;  %v4203_v51 = vcvt.s32.f32 %v3531_v45  ;;  %v6601_v56 = vadd.f32 %v6575_v61, %v4945_v38  ;;  %v3481_v14 = vunpack.c.1.s8 %v2949_v57  ;;  %v2967_v27 = vld [vmem:[%s5907_s12 + $0x998] sm:$0xff] }
 0x334   : > { %5173 = vmatpush.bf16.msra.mxu0 %v4583_v46  ;;  %5186 = vmatpush.bf16.msra.mxu1 %v4591_v60  ;;  %v4152_v40 = vcvt.s32.f32 %v3480_v52  ;;  %v3496_v36 = vunpack.c.0.s8 %v2953_v25  ;;  %v3497_v59 = vunpack.c.1.s8 %v2953_v25  ;;  %v3512_v48 = vunpack.c.0.s8 %v2957_v20 }
 0x335   : > { %5199 = vmatpush.bf16.msra.mxu2 %v4599_v53  ;;  %v4607_v23 = vpack.c.bf16 %v4203_v51, %v4202_v28  ;;  %v4153_v0 = vcvt.s32.f32 %v3481_v14  ;;  %v3513_v49 = vunpack.c.1.s8 %v2957_v20  ;;  %v3528_v3 = vunpack.c.0.s8 %v2961_v47  ;;  %v6613_v28 = vld [vmem:[%s5907_s12 + $0x9b8] sm:$0xff] }
 0x336   : > { %v4168_v61 = vcvt.s32.f32 %v3496_v36  ;;  %v4169_v5 = vcvt.s32.f32 %v3497_v59  ;;  %v4184_v26 = vcvt.s32.f32 %v3512_v48  ;;  %v3529_v58 = vunpack.c.1.s8 %v2961_v47  ;;  %v6617_v36 = vpop.f32.mrf.mxu3 }
 0x337   : > { %5212 = vmatpush.bf16.msra.mxu3 %v4607_v23  ;;  %v4582_v21 = vpack.c.bf16 %v4153_v0, %v4152_v40  ;;  %v4185_v8 = vcvt.s32.f32 %v3513_v49  ;;  %v4200_v30 = vcvt.s32.f32 %v3528_v3  ;;  %v3478_v34 = vunpack.c.2.s8 %v2948_v43  ;;  %v6615_v40 = vpop.f32.mrf.mxu2  ;;  %v2975_v0 = vld [vmem:[%s5907_s12 + $0x9d8] sm:$0xff] }
 0x338   : > { %v4590_v11 = vpack.c.bf16 %v4169_v5, %v4168_v61  ;;  %v4201_v32 = vcvt.s32.f32 %v3529_v58  ;;  %v3479_v57 = vunpack.c.3.s8 %v2948_v43  ;;  %v3494_v18 = vunpack.c.2.s8 %v2952_v31  ;;  %v2979_v5 = vld [vmem:[%s5907_s12 + $0x9f8] sm:$0xff] }
 0x339   : > { %5174 = vmatpush.bf16.msra.mxu0 %v4582_v21  ;;  %v4598_v13 = vpack.c.bf16 %v4185_v8, %v4184_v26  ;;  %v4150_v24 = vcvt.s32.f32 %v3478_v34  ;;  %v3495_v25 = vunpack.c.3.s8 %v2952_v31  ;;  %v3510_v62 = vunpack.c.2.s8 %v2956_v7  ;;  %v4985_v26 = vpop.f32.mrf.mxu1 }
 0x33a   : > { %5187 = vmatpush.bf16.msra.mxu1 %v4590_v11  ;;  %v4606_v39 = vpack.c.bf16 %v4201_v32, %v4200_v30  ;;  %v4151_v1 = vcvt.s32.f32 %v3479_v57  ;;  %v4166_v63 = vcvt.s32.f32 %v3494_v18  ;;  %v3511_v20 = vunpack.c.3.s8 %v2956_v7 }
 0x33b   : > { %5200 = vmatpush.bf16.msra.mxu2 %v4598_v13  ;;  %v4167_v15 = vcvt.s32.f32 %v3495_v25  ;;  %v4182_v6 = vcvt.s32.f32 %v3510_v62  ;;  %v3526_v33 = vunpack.c.2.s8 %v2960_v55  ;;  %v3527_v47 = vunpack.c.3.s8 %v2960_v55 }
 0x33c   : > { %5213 = vmatpush.bf16.msra.mxu3 %v4606_v39  ;;  %v4581_v35 = vpack.c.bf16 %v4151_v1, %v4150_v24  ;;  %v4183_v17 = vcvt.s32.f32 %v3511_v20  ;;  %v3476_v2 = vunpack.c.0.s8 %v2948_v43  ;;  %v3477_v54 = vunpack.c.1.s8 %v2948_v43  ;;  %v4725_v24 = vld [vmem:[#allocation1] sm:$0xff]  ;;  %v4726_v39 = vld [vmem:[#allocation1 + $0x9] sm:$0xff] }
 0x33d   : > { %v4589_v10 = vpack.c.bf16 %v4167_v15, %v4166_v63  ;;  %v4198_v37 = vcvt.s32.f32 %v3526_v33  ;;  %v4199_v41 = vcvt.s32.f32 %v3527_v47  ;;  %v3492_v42 = vunpack.c.0.s8 %v2952_v31 }
 0x33e   : > { %5175 = vmatpush.bf16.msra.mxu0 %v4581_v35  ;;  %v4597_v22 = vpack.c.bf16 %v4183_v17, %v4182_v6  ;;  %v4148_v12 = vcvt.s32.f32 %v3476_v2  ;;  %v4149_v50 = vcvt.s32.f32 %v3477_v54  ;;  %v3493_v16 = vunpack.c.1.s8 %v2952_v31  ;;  %v2966_v2 = vld [vmem:[%s5907_s12 + $0x990] sm:$0xff] }
 0x33f   : > { %5188 = vmatpush.bf16.msra.mxu1 %v4589_v10  ;;  %v4605_v45 = vpack.c.bf16 %v4199_v41, %v4198_v37  ;;  %v4164_v38 = vcvt.s32.f32 %v3492_v42  ;;  %v3508_v46 = vunpack.c.0.s8 %v2956_v7  ;;  %v3509_v60 = vunpack.c.1.s8 %v2956_v7  ;;  %v4998_v54 = vpop.f32.mrf.mxu2  ;;  %v5011_v10 = vpop.f32.mrf.mxu3 }
 0x340   : > { %5201 = vmatpush.bf16.msra.mxu2 %v4597_v22  ;;  %v4580_v52 = vpack.c.bf16 %v4149_v50, %v4148_v12  ;;  %v4165_v53 = vcvt.s32.f32 %v3493_v16  ;;  %v3524_v51 = vunpack.c.0.s8 %v2960_v55  ;;  %v3525_v14 = vunpack.c.1.s8 %v2960_v55 }
 0x341   : > { %5214 = vmatpush.bf16.msra.mxu3 %v4605_v45  ;;  %v4180_v59 = vcvt.s32.f32 %v3508_v46  ;;  %v4181_v48 = vcvt.s32.f32 %v3509_v60  ;;  %v3554_v43 = vunpack.c.2.s8 %v2967_v27  ;;  %v3555_v23 = vunpack.c.3.s8 %v2967_v27  ;;  %v2974_v60 = vld [vmem:[%s5907_s12 + $0x9d0] sm:$0xff] }
 0x342   : > { %5176 = vmatpush.bf16.msra.mxu0 %v4580_v52  ;;  %v4588_v49 = vpack.c.bf16 %v4165_v53, %v4164_v38  ;;  %v4196_v3 = vcvt.s32.f32 %v3524_v51  ;;  %v4197_v31 = vcvt.s32.f32 %v3525_v14  ;;  %v3570_v61 = vunpack.c.2.s8 %v6613_v28  ;;  %v2978_v14 = vld [vmem:[%s5907_s12 + $0x9f0] sm:$0xff] }
 0x343   : > { %v4596_v58 = vpack.c.bf16 %v4181_v48, %v4180_v59  ;;  %v4226_v7 = vcvt.s32.f32 %v3554_v43  ;;  %v4227_v21 = vcvt.s32.f32 %v3555_v23  ;;  %v3571_v8 = vunpack.c.3.s8 %v6613_v28 }
 0x344   : > { %5189 = vmatpush.bf16.msra.mxu1 %v4588_v49  ;;  %v4604_v30 = vpack.c.bf16 %v4197_v31, %v4196_v3  ;;  %v4242_v34 = vcvt.s32.f32 %v3570_v61  ;;  %v3586_v11 = vunpack.c.2.s8 %v2975_v0  ;;  %v3587_v32 = vunpack.c.3.s8 %v2975_v0 }
 0x345   : > { %5202 = vmatpush.bf16.msra.mxu2 %v4596_v58  ;;  %v4619_v57 = vpack.c.bf16 %v4227_v21, %v4226_v7  ;;  %v4243_v18 = vcvt.s32.f32 %v3571_v8  ;;  %v3602_v55 = vunpack.c.2.s8 %v2979_v5  ;;  %v3603_v13 = vunpack.c.3.s8 %v2979_v5  ;;  %5177 = vmatmul.bf16.vlgmr.msra.gmra.mxu0 %v6589_v44 }
 0x346   : > { %5215 = vmatpush.bf16.msra.mxu3 %v4604_v30  ;;  %v4258_v25 = vcvt.s32.f32 %v3586_v11  ;;  %v4259_v62 = vcvt.s32.f32 %v3587_v32  ;;  %v3552_v1 = vunpack.c.0.s8 %v2967_v27  ;;  %v3553_v63 = vunpack.c.1.s8 %v2967_v27 }
 0x347   : > { %5221 = vmatpush.bf16.msrb.mxu0 %v4619_v57  ;;  %v4627_v20 = vpack.c.bf16 %v4243_v18, %v4242_v34  ;;  %v4274_v15 = vcvt.s32.f32 %v3602_v55  ;;  %v4275_v6 = vcvt.s32.f32 %v3603_v13  ;;  %5190 = vmatmul.bf16.vlgmr.msra.gmra.mxu1 %v6585_v9  ;;  %v3568_v33 = vunpack.c.0.s8 %v6613_v28  ;;  %v2970_v9 = vld [vmem:[%s5907_s12 + $0x9b0] sm:$0xff] }
 0x348   : > { %v4635_v47 = vpack.c.bf16 %v4259_v62, %v4258_v25  ;;  %5203 = vmatmul.bf16.vlgmr.msra.gmra.mxu2 %v4725_v24  ;;  %v4224_v44 = vcvt.s32.f32 %v3552_v1  ;;  %v4225_v35 = vcvt.s32.f32 %v3553_v63  ;;  %v3569_v17 = vunpack.c.1.s8 %v6613_v28  ;;  %v2965_v63 = vld [vmem:[%s5907_s12 + $0x988] sm:$0xff] }
 0x349   : > { %5234 = vmatpush.bf16.msrb.mxu1 %v4627_v20  ;;  %v4643_v37 = vpack.c.bf16 %v4275_v6, %v4274_v15  ;;  %5216 = vmatmul.bf16.vlgmr.msra.gmra.mxu3 %v4726_v39  ;;  %v4240_v41 = vcvt.s32.f32 %v3568_v33  ;;  %v3584_v42 = vunpack.c.0.s8 %v2975_v0  ;;  %v3585_v4 = vunpack.c.1.s8 %v2975_v0  ;;  %v2969_v6 = vld [vmem:[%s5907_s12 + $0x9a8] sm:$0xff] }
 0x34a   : > { %5247 = vmatpush.bf16.msrb.mxu2 %v4635_v47  ;;  %v4618_v22 = vpack.c.bf16 %v4225_v35, %v4224_v44  ;;  %v4241_v12 = vcvt.s32.f32 %v3569_v17  ;;  %v3600_v50 = vunpack.c.0.s8 %v2979_v5  ;;  %v3601_v16 = vunpack.c.1.s8 %v2979_v5  ;;  %v2973_v17 = vld [vmem:[%s5907_s12 + $0x9c8] sm:$0xff] }
 0x34b   : > { %5260 = vmatpush.bf16.msrb.mxu3 %v4643_v37  ;;  %v4256_v27 = vcvt.s32.f32 %v3584_v42  ;;  %v4257_v45 = vcvt.s32.f32 %v3585_v4  ;;  %v3550_v38 = vunpack.c.2.s8 %v2966_v2  ;;  %v3551_v46 = vunpack.c.3.s8 %v2966_v2 }
 0x34c   : > { %5222 = vmatpush.bf16.msrb.mxu0 %v4618_v22  ;;  %v4626_v28 = vpack.c.bf16 %v4241_v12, %v4240_v41  ;;  %v4272_v52 = vcvt.s32.f32 %v3600_v50  ;;  %v4273_v53 = vcvt.s32.f32 %v3601_v16  ;;  %v3566_v51 = vunpack.c.2.s8 %v2970_v9  ;;  %v2977_v41 = vld [vmem:[%s5907_s12 + $0x9e8] sm:$0xff] }
 0x34d   : > { %v4634_v59 = vpack.c.bf16 %v4257_v45, %v4256_v27  ;;  %v4222_v48 = vcvt.s32.f32 %v3550_v38  ;;  %v4223_v43 = vcvt.s32.f32 %v3551_v46  ;;  %v3567_v23 = vunpack.c.3.s8 %v2970_v9 }
 0x34e   : > { %5235 = vmatpush.bf16.msrb.mxu1 %v4626_v28  ;;  %v4642_v0 = vpack.c.bf16 %v4273_v53, %v4272_v52  ;;  %v4238_v49 = vcvt.s32.f32 %v3566_v51  ;;  %v3582_v3 = vunpack.c.2.s8 %v2974_v60  ;;  %v3583_v31 = vunpack.c.3.s8 %v2974_v60 }
 0x34f   : > { %5248 = vmatpush.bf16.msrb.mxu2 %v4634_v59  ;;  %v4617_v61 = vpack.c.bf16 %v4223_v43, %v4222_v48  ;;  %v4239_v5 = vcvt.s32.f32 %v3567_v23  ;;  %v3598_v26 = vunpack.c.2.s8 %v2978_v14  ;;  %v3599_v58 = vunpack.c.3.s8 %v2978_v14 }
 0x350   : > { %5261 = vmatpush.bf16.msrb.mxu3 %v4642_v0  ;;  %v4254_v7 = vcvt.s32.f32 %v3582_v3  ;;  %v4255_v21 = vcvt.s32.f32 %v3583_v31  ;;  %v4971_v8 = vadd.f32 %v6605_v19, %v6601_v56  ;;  %v3548_v30 = vunpack.c.0.s8 %v2966_v2 }
 0x351   : > { %5223 = vmatpush.bf16.msrb.mxu0 %v4617_v61  ;;  %v4625_v34 = vpack.c.bf16 %v4239_v5, %v4238_v49  ;;  %v4270_v11 = vcvt.s32.f32 %v3598_v26  ;;  %v4271_v32 = vcvt.s32.f32 %v3599_v58  ;;  %v3549_v57 = vunpack.c.1.s8 %v2966_v2  ;;  %v2964_v26 = vld [vmem:[%s5907_s12 + $0x980] sm:$0xff] }
 0x352   : > { %v4633_v18 = vpack.c.bf16 %v4255_v21, %v4254_v7  ;;  %v4220_v55 = vcvt.s32.f32 %v3548_v30  ;;  %v3564_v13 = vunpack.c.0.s8 %v2970_v9  ;;  %v3565_v24 = vunpack.c.1.s8 %v2970_v9  ;;  %v6644_v30 = vpop.f32.mrf.mxu0 }
 0x353   : > { %5236 = vmatpush.bf16.msrb.mxu1 %v4625_v34  ;;  %v4641_v25 = vpack.c.bf16 %v4271_v32, %v4270_v11  ;;  %v4221_v62 = vcvt.s32.f32 %v3549_v57  ;;  %v3580_v39 = vunpack.c.0.s8 %v2974_v60  ;;  %v3581_v1 = vunpack.c.1.s8 %v2974_v60  ;;  %v2972_v57 = vld [vmem:[%s5907_s12 + $0x9c0] sm:$0xff] }
 0x354   : > { %5249 = vmatpush.bf16.msrb.mxu2 %v4633_v18  ;;  %v4236_v56 = vcvt.s32.f32 %v3564_v13  ;;  %v4237_v19 = vcvt.s32.f32 %v3565_v24  ;;  %v3596_v20 = vunpack.c.0.s8 %v2978_v14  ;;  %v3597_v15 = vunpack.c.1.s8 %v2978_v14 }
 0x355   : > { %5262 = vmatpush.bf16.msrb.mxu3 %v4641_v25  ;;  %v4616_v33 = vpack.c.bf16 %v4221_v62, %v4220_v55  ;;  %v4252_v47 = vcvt.s32.f32 %v3580_v39  ;;  %v4253_v44 = vcvt.s32.f32 %v3581_v1  ;;  %v4984_v35 = vadd.f32 %v6609_v29, %v4971_v8  ;;  %v2968_v8 = vld [vmem:[%s5907_s12 + $0x9a0] sm:$0xff] }
 0x356   : > { %v4624_v2 = vpack.c.bf16 %v4237_v19, %v4236_v56  ;;  %v4268_v54 = vcvt.s32.f32 %v3596_v20  ;;  %v4269_v10 = vcvt.s32.f32 %v3597_v15  ;;  %v3546_v37 = vunpack.c.2.s8 %v2965_v63 }
 0x357   : > { %5224 = vmatpush.bf16.msrb.mxu0 %v4616_v33  ;;  %v4632_v42 = vpack.c.bf16 %v4253_v44, %v4252_v47  ;;  %v3547_v4 = vunpack.c.3.s8 %v2965_v63  ;;  %v3562_v9 = vunpack.c.2.s8 %v2969_v6  ;;  %v3563_v22 = vunpack.c.3.s8 %v2969_v6 }
 0x358   : > { %5237 = vmatpush.bf16.msrb.mxu1 %v4624_v2  ;;  %v4640_v12 = vpack.c.bf16 %v4269_v10, %v4268_v54  ;;  %v4218_v50 = vcvt.s32.f32 %v3546_v37  ;;  %v3578_v16 = vunpack.c.2.s8 %v2973_v17  ;;  %v3579_v27 = vunpack.c.3.s8 %v2973_v17 }
 0x359   : > { %5250 = vmatpush.bf16.msrb.mxu2 %v4632_v42  ;;  %v4219_v45 = vcvt.s32.f32 %v3547_v4  ;;  %v4234_v38 = vcvt.s32.f32 %v3562_v9  ;;  %v4235_v29 = vcvt.s32.f32 %v3563_v22  ;;  %v3594_v46 = vunpack.c.2.s8 %v2977_v41 }
 0x35a   : > { %5263 = vmatpush.bf16.msrb.mxu3 %v4640_v12  ;;  %v4250_v60 = vcvt.s32.f32 %v3578_v16  ;;  %v4251_v28 = vcvt.s32.f32 %v3579_v27  ;;  %v3595_v52 = vunpack.c.3.s8 %v2977_v41  ;;  %v4997_v53 = vadd.f32 %v6615_v40, %v4984_v35  ;;  %v6648_v35 = vpop.f32.mrf.mxu1  ;;  %v5024_v16 = vpop.f32.mrf.mxu0 }
 0x35b   : > { %v4615_v51 = vpack.c.bf16 %v4219_v45, %v4218_v50  ;;  %v4623_v14 = vpack.c.bf16 %v4235_v29, %v4234_v38  ;;  %v4266_v59 = vcvt.s32.f32 %v3594_v46  ;;  %v3544_v48 = vunpack.c.0.s8 %v2965_v63  ;;  %v2983_v46 = vld [vmem:[%s5907_s12 + $0xa18] sm:$0xff] }
 0x35c   : > { %v4631_v43 = vpack.c.bf16 %v4251_v28, %v4250_v60  ;;  %v4267_v23 = vcvt.s32.f32 %v3595_v52  ;;  %v6640_v0 = vadd.f32 %v6617_v36, %v4997_v53  ;;  %v3545_v49 = vunpack.c.1.s8 %v2965_v63  ;;  %v2976_v63 = vld [vmem:[%s5907_s12 + $0x9e0] sm:$0xff] }
 0x35d   : > { %5225 = vmatpush.bf16.msrb.mxu0 %v4615_v51  ;;  %5238 = vmatpush.bf16.msrb.mxu1 %v4623_v14  ;;  %v4216_v3 = vcvt.s32.f32 %v3544_v48  ;;  %v3560_v31 = vunpack.c.0.s8 %v2969_v6  ;;  %v3561_v61 = vunpack.c.1.s8 %v2969_v6  ;;  %v3576_v5 = vunpack.c.0.s8 %v2973_v17  ;;  %v6652_v51 = vld [vmem:[%s5907_s12 + $0xa38] sm:$0xff] }
 0x35e   : > { %5251 = vmatpush.bf16.msrb.mxu2 %v4631_v43  ;;  %v4639_v40 = vpack.c.bf16 %v4267_v23, %v4266_v59  ;;  %v4217_v58 = vcvt.s32.f32 %v3545_v49  ;;  %v3577_v7 = vunpack.c.1.s8 %v2973_v17  ;;  %v3592_v21 = vunpack.c.0.s8 %v2977_v41  ;;  %v6654_v23 = vpop.f32.mrf.mxu2  ;;  %v6656_v49 = vpop.f32.mrf.mxu3 }
 0x35f   : > { %v4232_v36 = vcvt.s32.f32 %v3560_v31  ;;  %v4233_v34 = vcvt.s32.f32 %v3561_v61  ;;  %v4248_v11 = vcvt.s32.f32 %v3576_v5  ;;  %v3593_v32 = vunpack.c.1.s8 %v2977_v41 }
 0x360   : > { %5264 = vmatpush.bf16.msrb.mxu3 %v4639_v40  ;;  %v4614_v18 = vpack.c.bf16 %v4217_v58, %v4216_v3  ;;  %v4249_v55 = vcvt.s32.f32 %v3577_v7  ;;  %v4264_v13 = vcvt.s32.f32 %v3592_v21  ;;  %v3542_v24 = vunpack.c.2.s8 %v2964_v26 }
 0x361   : > { %v4622_v25 = vpack.c.bf16 %v4233_v34, %v4232_v36  ;;  %v4265_v62 = vcvt.s32.f32 %v3593_v32  ;;  %v3543_v39 = vunpack.c.3.s8 %v2964_v26  ;;  %v3558_v1 = vunpack.c.2.s8 %v2968_v8  ;;  %v4727_v36 = vld [vmem:[#allocation1 + $0x12] sm:$0xff] }
 0x362   : > { %5226 = vmatpush.bf16.msrb.mxu0 %v4614_v18  ;;  %v4630_v56 = vpack.c.bf16 %v4249_v55, %v4248_v11  ;;  %v4214_v19 = vcvt.s32.f32 %v3542_v24  ;;  %v3559_v20 = vunpack.c.3.s8 %v2968_v8  ;;  %v3574_v15 = vunpack.c.2.s8 %v2972_v57  ;;  %v5037_v34 = vpop.f32.mrf.mxu1 }
 0x363   : > { %5239 = vmatpush.bf16.msrb.mxu1 %v4622_v25  ;;  %v4638_v6 = vpack.c.bf16 %v4265_v62, %v4264_v13  ;;  %v4215_v33 = vcvt.s32.f32 %v3543_v39  ;;  %v4230_v47 = vcvt.s32.f32 %v3558_v1  ;;  %v3575_v44 = vunpack.c.3.s8 %v2972_v57  ;;  %v4728_v62 = vld [vmem:[#allocation1 + $0x1b] sm:$0xff] }
 0x364   : > { %5252 = vmatpush.bf16.msrb.mxu2 %v4630_v56  ;;  %v4231_v17 = vcvt.s32.f32 %v3559_v20  ;;  %v4246_v2 = vcvt.s32.f32 %v3574_v15  ;;  %v3590_v54 = vunpack.c.2.s8 %v2976_v63  ;;  %v3591_v10 = vunpack.c.3.s8 %v2976_v63 }
 0x365   : > { %5265 = vmatpush.bf16.msrb.mxu3 %v4638_v6  ;;  %v4613_v37 = vpack.c.bf16 %v4215_v33, %v4214_v19  ;;  %v4247_v41 = vcvt.s32.f32 %v3575_v44  ;;  %v3540_v42 = vunpack.c.0.s8 %v2964_v26  ;;  %v3541_v4 = vunpack.c.1.s8 %v2964_v26  ;;  %v6659_v26 = vld [vmem:[%s5907_s12 + $0xa58] sm:$0xff]  ;;  %v4730_v6 = vld [vmem:[#allocation1 + $0x2d] sm:$0xff] }
 0x366   : > { %v4621_v9 = vpack.c.bf16 %v4231_v17, %v4230_v47  ;;  %v4262_v22 = vcvt.s32.f32 %v3590_v54  ;;  %v4263_v12 = vcvt.s32.f32 %v3591_v10  ;;  %v3556_v50 = vunpack.c.0.s8 %v2968_v8  ;;  %v4729_v19 = vld [vmem:[#allocation1 + $0x24] sm:$0xff] }
 0x367   : > { %5227 = vmatpush.bf16.msrb.mxu0 %v4613_v37  ;;  %v4629_v27 = vpack.c.bf16 %v4247_v41, %v4246_v2  ;;  %v4212_v45 = vcvt.s32.f32 %v3540_v42  ;;  %v4213_v38 = vcvt.s32.f32 %v3541_v4  ;;  %v3557_v29 = vunpack.c.1.s8 %v2968_v8  ;;  %v6663_v8 = vld [vmem:[%s5907_s12 + $0xa78] sm:$0xff]  ;;  %v6673_v4 = vld [vmem:[%s5907_s12 + $0xa10] sm:$0xff] }
 0x368   : > { %5240 = vmatpush.bf16.msrb.mxu1 %v4621_v9  ;;  %v4637_v60 = vpack.c.bf16 %v4263_v12, %v4262_v22  ;;  %v4228_v28 = vcvt.s32.f32 %v3556_v50  ;;  %v3572_v52 = vunpack.c.0.s8 %v2972_v57  ;;  %v3573_v53 = vunpack.c.1.s8 %v2972_v57  ;;  %v6676_v9 = vld [vmem:[%s5907_s12 + $0xa30] sm:$0xff]  ;;  %v5050_v22 = vpop.f32.mrf.mxu2  ;;  %v5063_v12 = vpop.f32.mrf.mxu3 }
 0x369   : > { %5253 = vmatpush.bf16.msrb.mxu2 %v4629_v27  ;;  %v4612_v14 = vpack.c.bf16 %v4213_v38, %v4212_v45  ;;  %v4229_v59 = vcvt.s32.f32 %v3557_v29  ;;  %v3588_v48 = vunpack.c.0.s8 %v2976_v63  ;;  %v3589_v43 = vunpack.c.1.s8 %v2976_v63  ;;  %v6680_v38 = vld [vmem:[#allocation1 + $0x36] sm:$0xff]  ;;  %v6682_v29 = vld [vmem:[#allocation1 + $0x3f] sm:$0xff] }
 0x36a   : > { %5266 = vmatpush.bf16.msrb.mxu3 %v4637_v60  ;;  %v4244_v3 = vcvt.s32.f32 %v3572_v52  ;;  %v4245_v31 = vcvt.s32.f32 %v3573_v53  ;;  %v3618_v61 = vunpack.c.2.s8 %v2983_v46  ;;  %v3619_v5 = vunpack.c.3.s8 %v2983_v46 }
 0x36b   : > { %5228 = vmatpush.bf16.msrb.mxu0 %v4612_v14  ;;  %v4620_v40 = vpack.c.bf16 %v4229_v59, %v4228_v28  ;;  %v4260_v58 = vcvt.s32.f32 %v3588_v48  ;;  %v4261_v7 = vcvt.s32.f32 %v3589_v43  ;;  %v3634_v21 = vunpack.c.2.s8 %v6652_v51  ;;  %v2990_v43 = vld [vmem:[%s5907_s12 + $0xa50] sm:$0xff] }
 0x36c   : > { %v4628_v11 = vpack.c.bf16 %v4245_v31, %v4244_v3  ;;  %v4290_v32 = vcvt.s32.f32 %v3618_v61  ;;  %v4291_v57 = vcvt.s32.f32 %v3619_v5  ;;  %v3635_v18 = vunpack.c.3.s8 %v6652_v51 }
 0x36d   : > { %5241 = vmatpush.bf16.msrb.mxu1 %v4620_v40  ;;  %v4636_v55 = vpack.c.bf16 %v4261_v7, %v4260_v58  ;;  %v4306_v13 = vcvt.s32.f32 %v3634_v21  ;;  %v3650_v24 = vunpack.c.2.s8 %v6659_v26  ;;  %v3651_v25 = vunpack.c.3.s8 %v6659_v26 }
 0x36e   : > { %5254 = vmatpush.bf16.msrb.mxu2 %v4628_v11  ;;  %v4651_v39 = vpack.c.bf16 %v4291_v57, %v4290_v32  ;;  %v4307_v1 = vcvt.s32.f32 %v3635_v18  ;;  %v3666_v63 = vunpack.c.2.s8 %v6663_v8  ;;  %v3667_v56 = vunpack.c.3.s8 %v6663_v8  ;;  %5229 = vmatmul.bf16.vlgmr.msrb.gmra.mxu0 %v4727_v36 }
 0x36f   : > { %5267 = vmatpush.bf16.msrb.mxu3 %v4636_v55  ;;  %v4322_v20 = vcvt.s32.f32 %v3650_v24  ;;  %v4323_v15 = vcvt.s32.f32 %v3651_v25  ;;  %v3616_v33 = vunpack.c.0.s8 %v2983_v46  ;;  %v3617_v47 = vunpack.c.1.s8 %v2983_v46  ;;  %v4682_v46 = vld [vmem:[%s5925_s26 + $0x52] sm:$0x3] }
 0x370   : > { %5273 = vmatpush.bf16.msra.mxu0 %v4651_v39  ;;  %v4659_v44 = vpack.c.bf16 %v4307_v1, %v4306_v13  ;;  %v4338_v17 = vcvt.s32.f32 %v3666_v63  ;;  %v4339_v2 = vcvt.s32.f32 %v3667_v56  ;;  %5242 = vmatmul.bf16.vlgmr.msrb.gmra.mxu1 %v4728_v62  ;;  %v3632_v54 = vunpack.c.0.s8 %v6652_v51  ;;  %4734 = vst [vmem:[#allocation1] ss:$9 sm:$0xff] %v4682_v46 }
 0x371   : > { %v4667_v10 = vpack.c.bf16 %v4323_v15, %v4322_v20  ;;  %5255 = vmatmul.bf16.vlgmr.msrb.gmra.mxu2 %v4729_v19  ;;  %v4288_v37 = vcvt.s32.f32 %v3616_v33  ;;  %v4289_v41 = vcvt.s32.f32 %v3617_v47  ;;  %v3633_v42 = vunpack.c.1.s8 %v6652_v51  ;;  %v6699_v33 = vpop.f32.mrf.mxu0 }
 0x372   : > { %5286 = vmatpush.bf16.msra.mxu1 %v4659_v44  ;;  %v4675_v50 = vpack.c.bf16 %v4339_v2, %v4338_v17  ;;  %5268 = vmatmul.bf16.vlgmr.msrb.gmra.mxu3 %v4730_v6  ;;  %v4304_v16 = vcvt.s32.f32 %v3632_v54  ;;  %v3648_v27 = vunpack.c.0.s8 %v6659_v26  ;;  %v3649_v45 = vunpack.c.1.s8 %v6659_v26  ;;  %v2994_v26 = vld [vmem:[%s5907_s12 + $0xa70] sm:$0xff]  ;;  %v6701_v47 = vpop.f32.mrf.mxu1  ;;  %v2981_v2 = vld [vmem:[%s5907_s12 + $0xa08] sm:$0xff] }
 0x373   : > { %5299 = vmatpush.bf16.msra.mxu2 %v4667_v10  ;;  %v4650_v60 = vpack.c.bf16 %v4289_v41, %v4288_v37  ;;  %v4305_v28 = vcvt.s32.f32 %v3633_v42  ;;  %v3664_v52 = vunpack.c.0.s8 %v6663_v8  ;;  %v3665_v53 = vunpack.c.1.s8 %v6663_v8 }
 0x374   : > { %5312 = vmatpush.bf16.msra.mxu3 %v4675_v50  ;;  %v4320_v51 = vcvt.s32.f32 %v3648_v27  ;;  %v4321_v14 = vcvt.s32.f32 %v3649_v45  ;;  %v3614_v59 = vunpack.c.2.s8 %v6673_v4  ;;  %v3615_v48 = vunpack.c.3.s8 %v6673_v4  ;;  %v2989_v27 = vld [vmem:[%s5907_s12 + $0xa48] sm:$0xff] }
 0x375   : > { %5274 = vmatpush.bf16.msra.mxu0 %v4650_v60  ;;  %v4658_v3 = vpack.c.bf16 %v4305_v28, %v4304_v16  ;;  %v4336_v31 = vcvt.s32.f32 %v3664_v52  ;;  %v4337_v61 = vcvt.s32.f32 %v3665_v53  ;;  %v3630_v5 = vunpack.c.2.s8 %v6676_v9  ;;  %v2993_v52 = vld [vmem:[%s5907_s12 + $0xa68] sm:$0xff] }
 0x376   : > { %v4666_v40 = vpack.c.bf16 %v4321_v14, %v4320_v51  ;;  %v4286_v58 = vcvt.s32.f32 %v3614_v59  ;;  %v4287_v7 = vcvt.s32.f32 %v3615_v48  ;;  %v3631_v21 = vunpack.c.3.s8 %v6676_v9 }
 0x377   : > { %5287 = vmatpush.bf16.msra.mxu1 %v4658_v3  ;;  %v4674_v8 = vpack.c.bf16 %v4337_v61, %v4336_v31  ;;  %v4302_v36 = vcvt.s32.f32 %v3630_v5  ;;  %v3646_v34 = vunpack.c.2.s8 %v2990_v43  ;;  %v3647_v11 = vunpack.c.3.s8 %v2990_v43 }
 0x378   : > { %5300 = vmatpush.bf16.msra.mxu2 %v4666_v40  ;;  %v4649_v32 = vpack.c.bf16 %v4287_v7, %v4286_v58  ;;  %v4303_v57 = vcvt.s32.f32 %v3631_v21  ;;  %v3662_v18 = vunpack.c.2.s8 %v2994_v26  ;;  %v3663_v55 = vunpack.c.3.s8 %v2994_v26 }
 0x379   : > { %5313 = vmatpush.bf16.msra.mxu3 %v4674_v8  ;;  %v4318_v13 = vcvt.s32.f32 %v3646_v34  ;;  %v4319_v24 = vcvt.s32.f32 %v3647_v11  ;;  %v5023_v25 = vadd.f32 %v6644_v30, %v6640_v0  ;;  %v3612_v62 = vunpack.c.0.s8 %v6673_v4  ;;  %v6704_v54 = vpop.f32.mrf.mxu2  ;;  %v5076_v8 = vpop.f32.mrf.mxu0 }
 0x37a   : > { %5275 = vmatpush.bf16.msra.mxu0 %v4649_v32  ;;  %v4657_v39 = vpack.c.bf16 %v4303_v57, %v4302_v36  ;;  %v4334_v1 = vcvt.s32.f32 %v3662_v18  ;;  %v4335_v63 = vcvt.s32.f32 %v3663_v55  ;;  %v3613_v56 = vunpack.c.1.s8 %v6673_v4  ;;  %v6706_v10 = vpop.f32.mrf.mxu3  ;;  %v5089_v36 = vpop.f32.mrf.mxu1 }
 0x37b   : > { %v4665_v19 = vpack.c.bf16 %v4319_v24, %v4318_v13  ;;  %v4284_v20 = vcvt.s32.f32 %v3612_v62  ;;  %v3628_v15 = vunpack.c.0.s8 %v6676_v9  ;;  %v3629_v6 = vunpack.c.1.s8 %v6676_v9  ;;  %v2985_v9 = vld [vmem:[%s5907_s12 + $0xa28] sm:$0xff] }
 0x37c   : > { %5288 = vmatpush.bf16.msra.mxu1 %v4657_v39  ;;  %v4673_v0 = vpack.c.bf16 %v4335_v63, %v4334_v1  ;;  %v4285_v30 = vcvt.s32.f32 %v3613_v56  ;;  %v3644_v44 = vunpack.c.0.s8 %v2990_v43  ;;  %v3645_v17 = vunpack.c.1.s8 %v2990_v43  ;;  %v2980_v56 = vld [vmem:[%s5907_s12 + $0xa00] sm:$0xff] }
 0x37d   : > { %5301 = vmatpush.bf16.msra.mxu2 %v4665_v19  ;;  %v4300_v37 = vcvt.s32.f32 %v3628_v15  ;;  %v4301_v41 = vcvt.s32.f32 %v3629_v6  ;;  %v3660_v42 = vunpack.c.0.s8 %v2994_v26  ;;  %v3661_v4 = vunpack.c.1.s8 %v2994_v26 }
 0x37e   : > { %5314 = vmatpush.bf16.msra.mxu3 %v4673_v0  ;;  %v4648_v22 = vpack.c.bf16 %v4285_v30, %v4284_v20  ;;  %v4316_v12 = vcvt.s32.f32 %v3644_v44  ;;  %v4317_v50 = vcvt.s32.f32 %v3645_v17  ;;  %v5036_v16 = vadd.f32 %v6648_v35, %v5023_v25  ;;  %v2984_v0 = vld [vmem:[%s5907_s12 + $0xa20] sm:$0xff] }
 0x37f   : > { %v4656_v45 = vpack.c.bf16 %v4301_v41, %v4300_v37  ;;  %v4332_v46 = vcvt.s32.f32 %v3660_v42  ;;  %v4333_v60 = vcvt.s32.f32 %v3661_v4  ;;  %v3610_v28 = vunpack.c.2.s8 %v2981_v2 }
 0x380   : > { %5276 = vmatpush.bf16.msra.mxu0 %v4648_v22  ;;  %v4664_v53 = vpack.c.bf16 %v4317_v50, %v4316_v12  ;;  %v3611_v51 = vunpack.c.3.s8 %v2981_v2  ;;  %v3626_v14 = vunpack.c.2.s8 %v2985_v9  ;;  %v3627_v59 = vunpack.c.3.s8 %v2985_v9 }
 0x381   : > { %5289 = vmatpush.bf16.msra.mxu1 %v4656_v45  ;;  %v4672_v48 = vpack.c.bf16 %v4333_v60, %v4332_v46  ;;  %v4282_v43 = vcvt.s32.f32 %v3610_v28  ;;  %v3642_v3 = vunpack.c.2.s8 %v2989_v27  ;;  %v3643_v31 = vunpack.c.3.s8 %v2989_v27  ;;  %v5102_v18 = vpop.f32.mrf.mxu2 }
 0x382   : > { %5302 = vmatpush.bf16.msra.mxu2 %v4664_v53  ;;  %v4283_v61 = vcvt.s32.f32 %v3611_v51  ;;  %v4298_v5 = vcvt.s32.f32 %v3626_v14  ;;  %v4299_v35 = vcvt.s32.f32 %v3627_v59  ;;  %v3658_v26 = vunpack.c.2.s8 %v2993_v52  ;;  %v5115_v55 = vpop.f32.mrf.mxu3 }
 0x383   : > { %5315 = vmatpush.bf16.msra.mxu3 %v4672_v48  ;;  %v4314_v40 = vcvt.s32.f32 %v3642_v3  ;;  %v4315_v58 = vcvt.s32.f32 %v3643_v31  ;;  %v3659_v7 = vunpack.c.3.s8 %v2993_v52  ;;  %v5049_v21 = vadd.f32 %v6654_v23, %v5036_v16  ;;  %v2992_v16 = vld [vmem:[%s5907_s12 + $0xa60] sm:$0xff] }
 0x384   : > { %v4647_v34 = vpack.c.bf16 %v4283_v61, %v4282_v43  ;;  %v4655_v11 = vpack.c.bf16 %v4299_v35, %v4298_v5  ;;  %v4330_v32 = vcvt.s32.f32 %v3658_v26  ;;  %v3608_v57 = vunpack.c.0.s8 %v2981_v2 }
 0x385   : > { %v4663_v13 = vpack.c.bf16 %v4315_v58, %v4314_v40  ;;  %v4331_v24 = vcvt.s32.f32 %v3659_v7  ;;  %v6714_v25 = vadd.f32 %v6656_v49, %v5049_v21  ;;  %v3609_v62 = vunpack.c.1.s8 %v2981_v2  ;;  %v2988_v2 = vld [vmem:[%s5907_s12 + $0xa40] sm:$0xff] }
 0x386   : > { %5277 = vmatpush.bf16.msra.mxu0 %v4647_v34  ;;  %5290 = vmatpush.bf16.msra.mxu1 %v4655_v11  ;;  %v4280_v23 = vcvt.s32.f32 %v3608_v57  ;;  %v3624_v39 = vunpack.c.0.s8 %v2985_v9  ;;  %v3625_v1 = vunpack.c.1.s8 %v2985_v9  ;;  %v3640_v63 = vunpack.c.0.s8 %v2989_v27 }
 0x387   : > { %5303 = vmatpush.bf16.msra.mxu2 %v4663_v13  ;;  %v4671_v19 = vpack.c.bf16 %v4331_v24, %v4330_v32  ;;  %v4281_v20 = vcvt.s32.f32 %v3609_v62  ;;  %v3641_v15 = vunpack.c.1.s8 %v2989_v27  ;;  %v3656_v6 = vunpack.c.0.s8 %v2993_v52 }
 0x388   : > { %v4296_v30 = vcvt.s32.f32 %v3624_v39  ;;  %v4297_v44 = vcvt.s32.f32 %v3625_v1  ;;  %v4312_v49 = vcvt.s32.f32 %v3640_v63  ;;  %v3657_v17 = vunpack.c.1.s8 %v2993_v52 }
 0x389   : > { %5316 = vmatpush.bf16.msra.mxu3 %v4671_v19  ;;  %v4646_v37 = vpack.c.bf16 %v4281_v20, %v4280_v23  ;;  %v4313_v41 = vcvt.s32.f32 %v3641_v15  ;;  %v4328_v42 = vcvt.s32.f32 %v3656_v6  ;;  %v3606_v4 = vunpack.c.2.s8 %v2980_v56  ;;  %v4735_v6 = vld [vmem:[#allocation1] sm:$0xff] }
 0x38a   : > { %v4654_v9 = vpack.c.bf16 %v4297_v44, %v4296_v30  ;;  %v4329_v22 = vcvt.s32.f32 %v3657_v17  ;;  %v3607_v12 = vunpack.c.3.s8 %v2980_v56  ;;  %v3622_v50 = vunpack.c.2.s8 %v2984_v0  ;;  %v4736_v30 = vld [vmem:[#allocation1 + $0x9] sm:$0xff] }
 0x38b   : > { %5278 = vmatpush.bf16.msra.mxu0 %v4646_v37  ;;  %v4662_v27 = vpack.c.bf16 %v4313_v41, %v4312_v49  ;;  %v4278_v45 = vcvt.s32.f32 %v3606_v4  ;;  %v3623_v46 = vunpack.c.3.s8 %v2984_v0  ;;  %v3638_v60 = vunpack.c.2.s8 %v2988_v2 }
 0x38c   : > { %5291 = vmatpush.bf16.msra.mxu1 %v4654_v9  ;;  %v4670_v28 = vpack.c.bf16 %v4329_v22, %v4328_v42  ;;  %v4279_v53 = vcvt.s32.f32 %v3607_v12  ;;  %v4294_v52 = vcvt.s32.f32 %v3622_v50  ;;  %v3639_v51 = vunpack.c.3.s8 %v2988_v2 }
 0x38d   : > { %5304 = vmatpush.bf16.msra.mxu2 %v4662_v27  ;;  %v4295_v14 = vcvt.s32.f32 %v3623_v46  ;;  %v4310_v59 = vcvt.s32.f32 %v3638_v60  ;;  %v3654_v48 = vunpack.c.2.s8 %v2992_v16  ;;  %v3655_v43 = vunpack.c.3.s8 %v2992_v16 }
 0x38e   : > { %5317 = vmatpush.bf16.msra.mxu3 %v4670_v28  ;;  %v4645_v3 = vpack.c.bf16 %v4279_v53, %v4278_v45  ;;  %v4311_v31 = vcvt.s32.f32 %v3639_v51  ;;  %v3604_v61 = vunpack.c.0.s8 %v2980_v56  ;;  %v3605_v5 = vunpack.c.1.s8 %v2980_v56 }
 0x38f   : > { %v4653_v35 = vpack.c.bf16 %v4295_v14, %v4294_v52  ;;  %v4326_v26 = vcvt.s32.f32 %v3654_v48  ;;  %v4327_v40 = vcvt.s32.f32 %v3655_v43  ;;  %v3620_v58 = vunpack.c.0.s8 %v2984_v0 }
 0x390   : > { %5279 = vmatpush.bf16.msra.mxu0 %v4645_v3  ;;  %v4661_v7 = vpack.c.bf16 %v4311_v31, %v4310_v59  ;;  %v4276_v21 = vcvt.s32.f32 %v3604_v61  ;;  %v4277_v8 = vcvt.s32.f32 %v3605_v5  ;;  %v3621_v36 = vunpack.c.1.s8 %v2984_v0 }
 0x391   : > { %5292 = vmatpush.bf16.msra.mxu1 %v4653_v35  ;;  %v4669_v34 = vpack.c.bf16 %v4327_v40, %v4326_v26  ;;  %v4292_v11 = vcvt.s32.f32 %v3620_v58  ;;  %v3636_v32 = vunpack.c.0.s8 %v2988_v2  ;;  %v3637_v57 = vunpack.c.1.s8 %v2988_v2 }
 0x392   : > { %5305 = vmatpush.bf16.msra.mxu2 %v4661_v7  ;;  %v4644_v18 = vpack.c.bf16 %v4277_v8, %v4276_v21  ;;  %v4293_v55 = vcvt.s32.f32 %v3621_v36  ;;  %v3652_v13 = vunpack.c.0.s8 %v2992_v16  ;;  %v3653_v24 = vunpack.c.1.s8 %v2992_v16 }
 0x393   : > { %5318 = vmatpush.bf16.msra.mxu3 %v4669_v34  ;;  %v4308_v62 = vcvt.s32.f32 %v3636_v32  ;;  %v4309_v23 = vcvt.s32.f32 %v3637_v57  ;;  %v5075_v39 = vadd.f32 %v6699_v33, %v6714_v25  ;;  %v4676_v57 = vld [vmem:[#allocation2] sm:$0x3] }
 0x394   : > { %5280 = vmatpush.bf16.msra.mxu0 %v4644_v18  ;;  %v4652_v1 = vpack.c.bf16 %v4293_v55, %v4292_v11  ;;  %v4324_v63 = vcvt.s32.f32 %v3652_v13  ;;  %v4325_v56 = vcvt.s32.f32 %v3653_v24 }
 0x395   : > { %v4660_v19 = vpack.c.bf16 %v4309_v23, %v4308_v62  ;;  %v5088_v20 = vadd.f32 %v6701_v47, %v5075_v39 }
 0x396   : > { %5293 = vmatpush.bf16.msra.mxu1 %v4652_v1  ;;  %v4668_v15 = vpack.c.bf16 %v4325_v56, %v4324_v63 }
 0x397   : > { %5306 = vmatpush.bf16.msra.mxu2 %v4660_v19  ;;  %5281 = vmatmul.bf16.vlgmr.msra.gmra.mxu0 %v6680_v38  ;;  %v5101_v0 = vadd.f32 %v6704_v54, %v5088_v20 }
 0x398   : > { %5319 = vmatpush.bf16.msra.mxu3 %v4668_v15 }
 0x399   : > { %5294 = vmatmul.bf16.vlgmr.msra.gmra.mxu1 %v6682_v29  ;;  %v5114_v33 = vadd.f32 %v6706_v10, %v5101_v0  ;;  %v5126_v25 = vpop.f32.mrf.mxu0 }
 0x39a   : > { %5307 = vmatmul.bf16.vlgmr.msra.gmra.mxu2 %v4735_v6 }
 0x39b   : > { %5320 = vmatmul.bf16.vlgmr.msra.gmra.mxu3 %v4736_v30  ;;  %v5127_v44 = vadd.f32 %v5126_v25, %v5114_v33  ;;  %v5139_v49 = vpop.f32.mrf.mxu1 }
 0x39d   : > { %v5140_v47 = vadd.f32 %v5139_v49, %v5127_v44 }
 0x3a1   : > { %v5128_v17 = vpop.f32.mrf.mxu0 }
 0x3a2   : > { %v5152_v2 = vpop.f32.mrf.mxu2 }
 0x3a3   : > { %v5153_v37 = vadd.f32 %v5152_v2, %v5140_v47  ;;  %v5165_v41 = vpop.f32.mrf.mxu3  ;;  %v5141_v38 = vpop.f32.mrf.mxu1 }
 0x3a5   : > { %v5166_v42 = vadd.f32 %v5165_v41, %v5153_v37 }
 0x3aa   : > { %v5154_v4 = vpop.f32.mrf.mxu2 }
 0x3ab   : > { %v5167_v54 = vpop.f32.mrf.mxu3 }
 0x3c2   : > { %v5178_v9 = vpop.f32.mrf.mxu0 }
 0x3c3   : > { %v5179_v22 = vadd.f32 %v5178_v9, %v5166_v42 }
 0x3c4   : > { %v5191_v12 = vpop.f32.mrf.mxu1 }
 0x3c5   : > { %v5192_v29 = vadd.f32 %v5191_v12, %v5179_v22 }
 0x3ca   : > { %v5180_v50 = vpop.f32.mrf.mxu0 }
 0x3cb   : > { %v5204_v10 = vpop.f32.mrf.mxu2 }
 0x3cc   : > { %v5205_v16 = vadd.f32 %v5204_v10, %v5192_v29  ;;  %v5217_v27 = vpop.f32.mrf.mxu3  ;;  %v5193_v45 = vpop.f32.mrf.mxu1 }
 0x3ce   : > { %v5218_v46 = vadd.f32 %v5217_v27, %v5205_v16 }
 0x3d3   : > { %v5206_v60 = vpop.f32.mrf.mxu2 }
 0x3d4   : > { %v5219_v28 = vpop.f32.mrf.mxu3 }
 0x3eb   : > { %v5230_v53 = vpop.f32.mrf.mxu0 }
 0x3ec   : > { %v5231_v31 = vadd.f32 %v5230_v53, %v5218_v46 }
 0x3ed   : > { %v5243_v52 = vpop.f32.mrf.mxu1 }
 0x3ee   : > { %v5244_v61 = vadd.f32 %v5243_v52, %v5231_v31 }
 0x3f3   : > { %v5232_v51 = vpop.f32.mrf.mxu0 }
 0x3f4   : > { %v5256_v14 = vpop.f32.mrf.mxu2 }
 0x3f5   : > { %v5269_v59 = vpop.f32.mrf.mxu3  ;;  %v5245_v48 = vpop.f32.mrf.mxu1  ;;  %v5257_v5 = vadd.f32 %v5256_v14, %v5244_v61 }
 0x3f7   : > { %v5270_v26 = vadd.f32 %v5269_v59, %v5257_v5 }
 0x3fc   : > { %v5258_v43 = vpop.f32.mrf.mxu2 }
 0x3fd   : > { %v5271_v3 = vpop.f32.mrf.mxu3 }
 0x414   : > { %v5282_v35 = vpop.f32.mrf.mxu0 }
 0x415   : > { %v5283_v58 = vadd.f32 %v5282_v35, %v5270_v26 }
 0x416   : > { %v5295_v40 = vpop.f32.mrf.mxu1 }
 0x417   : > { %v5296_v7 = vadd.f32 %v5295_v40, %v5283_v58 }
 0x41c   : > { %v5284_v21 = vpop.f32.mrf.mxu0 }
 0x41d   : > { %v5308_v8 = vpop.f32.mrf.mxu2 }
 0x41e   : > { %v5309_v36 = vadd.f32 %v5308_v8, %v5296_v7  ;;  %v5321_v34 = vpop.f32.mrf.mxu3  ;;  %v5297_v11 = vpop.f32.mrf.mxu1 }
 0x420   : > { %v5322_v32 = vadd.f32 %v5321_v34, %v5309_v36 }
 0x422   : > { %v5325_v18 = vadd.f32 %v5322_v32, %v4676_v57  ;;  %5330 = sbr.rel (%p5494_p1) target bundleno = 1224 (0x4c8), region = 68 }
 0x424   : > { %5326 = vst [vmem:[#allocation2] sm:$0x3] %v5325_v18 }
 0x425   : > { %v5310_v55 = vpop.f32.mrf.mxu2 }
 0x426   : > { %v5323_v13 = vpop.f32.mrf.mxu3 }
 0x427   : > { %v5358_v24 = vld [vmem:[%s6797_s4 + $0x78] sm:$0xff]  ;;  %v5357_v62 = vld [vmem:[%s6797_s4 + $0x70] sm:$0xff]  ;;  %v5356_v23 = vld [vmem:[%s6797_s4 + $0x68] sm:$0xff]  ;;  %vm5383_vm0 = vcmask 74752  }
 0x428   : > { %5363 = vmatpush.msra.mxu0 %v5358_v24  ;;  %v5355_v39 = vld [vmem:[%s6797_s4 + $0x60] sm:$0xff]  ;;  %v5354_v1 = vld [vmem:[%s6797_s4 + $0x58] sm:$0xff]  ;;  %v5353_v63 = vld [vmem:[%s6797_s4 + $0x50] sm:$0xff] }
 0x429   : > { %v5352_v56 = vld [vmem:[%s6797_s4 + $0x48] sm:$0xff]  ;;  %v5351_v19 = vld [vmem:[%s6797_s4 + $0x40] sm:$0xff]  ;;  %v5350_v20 = vld [vmem:[%s6797_s4 + $0x38] sm:$0xff] }
 0x42a   : > { %5364 = vmatpush.msra.mxu0 %v5357_v62  ;;  %v5349_v15 = vld [vmem:[%s6797_s4 + $0x30] sm:$0xff]  ;;  %v5582_v6 = vld [vmem:[#allocation6] ss:$0 sm:$0xff]  ;;  %v5347_v33 = vld [vmem:[%s6797_s4 + $0x20] sm:$0xff] }
 0x42b   : > { %v5331_v0 = vld [vmem:[#allocation2] sm:$0x3]  ;;  %v5583_v44 = vld [vmem:[#allocation8] ss:$0 sm:$0xff]  ;;  %v5346_v49 = vld [vmem:[%s6797_s4 + $0x18] sm:$0xff] }
 0x42c   : > { %5365 = vmatpush.msra.mxu0 %v5356_v23  ;;  %v5348_v30 = vld [vmem:[%s6797_s4 + $0x28] sm:$0xff]  ;;  %v5336_v25 = vmul.f32 %v5582_v6, %v5331_v0  ;;  %v5345_v47 = vld [vmem:[%s6797_s4 + $0x10] sm:$0xff]  ;;  %v5343_v37 = vld [vmem:[%s6797_s4] sm:$0xff] }
 0x42d   : > { %v5344_v2 = vld [vmem:[%s6797_s4 + $0x8] sm:$0xff] }
 0x42e   : > { %5366 = vmatpush.msra.mxu0 %v5355_v39  ;;  %v5341_v17 = vadd.f32 %v5583_v44, %v5336_v25  ;;  %v5584_v38 = vld [vmem:[#allocation9] ss:$0 sm:$0xff] }
 0x430   : > { %5367 = vmatpush.msra.mxu0 %v5354_v1  ;;  %v5342_v41 = vmax.f32 %v5341_v17, 0.0 }
 0x432   : > { %5368 = vmatpush.msra.mxu0 %v5353_v63 }
 0x434   : > { %5369 = vmatpush.msra.mxu0 %v5352_v56 }
 0x436   : > { %5370 = vmatpush.msra.mxu0 %v5351_v19 }
 0x438   : > { %5371 = vmatpush.msra.mxu0 %v5350_v20 }
 0x43a   : > { %5372 = vmatpush.msra.mxu0 %v5349_v15 }
 0x43c   : > { %5373 = vmatpush.msra.mxu0 %v5348_v30 }
 0x43e   : > { %5374 = vmatpush.msra.mxu0 %v5347_v33 }
 0x440   : > { %5375 = vmatpush.msra.mxu0 %v5346_v49 }
 0x442   : > { %5376 = vmatpush.msra.mxu0 %v5345_v47 }
 0x444   : > { %5377 = vmatpush.msra.mxu0 %v5344_v2 }
 0x446   : > { %5378 = vmatpush.msra.mxu0 %v5343_v37 }
 0x447   : > { %5379 = vmatmul.f32.vlgmr.msra.gmra.mxu0 %v5342_v41 }
 0x4c4   : > { %v5380_v42 = vpop.f32.mrf.mxu0 }
 0x4c5   : > { %v5381_v4 = vadd.f32 %v5584_v38, %v5380_v42 }
 0x4c7   : > { %5384 = vst.msk [vmem:[#allocation11] sm:$0x3] %vm5383_vm0, %v5381_v4 }
 0x4c8 PF: > { %p5541_p4 = scmp.eq.s32.totalorder %s5842_s25, 3  ;;  %s5787_s11 = smov [#allocation11]  }
 0x4c9   : > { %s5391_s12 = sshll.u32 %s5787_s11, 4  ;;  %s5393_s13 = sshll.u32 %s6799_s6, 4  ;;  %s5392_s12 = int_to_ptr.vmem [resolvable:$true] %s5391_s12  ;;  %s5394_s13 = int_to_ptr.hbm [resolvable:$true] %s5393_s13 }
 0x4ca   : > { %5517 = dma.vmem_to_hbm [thread:$0]  (%p5541_p4), %s5392_s12, 32, %s5394_s13, [#allocation5]  }
 0x4cb   : > { %5762 = dma.done.wait (%p5541_p4), [#allocation5], 32  }
 0x4cc   : > { %5764 = vsyncadd (%p5541_p4), [#allocation5], 4294967264 }
 0x4cd PF: > { %p19_p5 = scmp.ge.s32.totalorder %s5873_s19, 6   ;;  %s6803_s21 = smov %s5771_s22 }
 0x4ce   : > { %s6804_s22 = smov %s5775_s23  ;;  %s6805_s23 = smov %s5883_s27 }
 0x4cf   : > { %s6806_s24 = smov %s5873_s19  ;;  %21 = sbr.rel (!%p19_p5) target bundleno = 6 (0x6), region = 104 }
 0x4d4   :  { %5407 = vsyncpa [#allocation4], 1 }
 0x4d5   :  { %5409 = vsyncpa [#allocation4 + $0x1], 1 }
 0x4d6   :  { %5410 = vsyncpa [#allocation7], 1 }
 0x4d7   :  { %5411 = vsyncpa [#allocation10], 1 }
 0x4d8   :  { %5412 = vsyncpa [#allocation5], 1 }
 0x4d9   :  { %5414 = vsyncpa [#allocation5 + $0x1], 1 }

</bundles_post_ra>
